<compile_context>
chip_gen: v5e
topology: v5e:2x2
jax: 0.10.0
libtpu: 0.0.40
codegen_flags: <defaults>
</compile_context>

<pallas_src>
import functools

import jax
import jax.numpy as jnp
from jax.experimental import pallas as pl
from jax.experimental.pallas import tpu as pltpu

EPS = 1e-5
NC = 10                        # number of classes
ACT_DTYPE = jnp.bfloat16       # activation / weight storage dtype
VMEM_LIMIT_BYTES = 32 * 1024 * 1024


def _round_up(x, m):
    return (x + m - 1) // m * m


# ---------------------------------------------------------------------------
# in-kernel conv building blocks
# ---------------------------------------------------------------------------
def _conv3x3_from_halo(pad_ref, w_ref, oh, ow):
    """3x3 stride-1 conv.  `pad_ref` holds the input with a 1-px zero halo:
    interior at rows [1:1+oh], cols [8:8+ow] (sublane-aligned store offset).
    Accumulates 9 per-tap MXU matmuls; returns f32 (oh*ow, cout)."""
    m = oh * ow
    cin = pad_ref.shape[-1]
    acc = jnp.zeros((m, w_ref.shape[-1]), jnp.float32)
    for di in range(3):
        for dj in range(3):
            xs = pad_ref[pl.ds(di, oh), pl.ds(7 + dj, ow), :]
            acc = acc + jnp.dot(xs.reshape(m, cin), w_ref[di * 3 + dj],
                                preferred_element_type=jnp.float32)
    return acc


def _conv3x3_s2_from_phases(ph_ref, w_ref, oh, ow):
    """3x3 stride-2 conv from the 2x2 phase split of the padded input.
    ph_ref block: (4, 1, oh+1, ow+1, cin).  Returns f32 (oh*ow, cout)."""
    m = oh * ow
    cin = ph_ref.shape[-1]
    acc = jnp.zeros((m, w_ref.shape[-1]), jnp.float32)
    for di in range(3):
        for dj in range(3):
            p = (di % 2) * 2 + (dj % 2)
            xs = ph_ref[p, 0, pl.ds(di // 2, oh), pl.ds(dj // 2, ow), :]
            acc = acc + jnp.dot(xs.reshape(m, cin), w_ref[di * 3 + dj],
                                preferred_element_type=jnp.float32)
    return acc


def _store_interior(pad_ref, val, oh, ow):
    """Store a (oh*ow, C) activation into the halo buffer interior."""
    pad_ref[pl.ds(1, oh), pl.ds(8, ow), :] = (
        val.astype(pad_ref.dtype).reshape(oh, ow, -1))


# ---------------------------------------------------------------------------
# kernel A: stem (7x7 s2, via pre-built patch rows) + res_block(64)
# ---------------------------------------------------------------------------
def _stem_block1_kernel(cols_ref, w0_ref, s0_ref, b0_ref,
                        w1_ref, s1_ref, b1_ref,
                        w2_ref, s2_ref, b2_ref,
                        o_ref, pad_ref, *, oh, ow):
    # stem: Conv -> ReLU -> BN affine (fastai conv_layer ordering)
    acc0 = jnp.dot(cols_ref[...], w0_ref[...], preferred_element_type=jnp.float32)
    x0 = jnp.maximum(acc0, 0.0) * s0_ref[...] + b0_ref[...]          # (oh*ow, C) f32

    # res_block(64): conv_layer x2, MergeLayer adds the block input
    pad_ref[...] = jnp.zeros_like(pad_ref)
    _store_interior(pad_ref, x0, oh, ow)
    h = _conv3x3_from_halo(pad_ref, w1_ref, oh, ow)
    h = jnp.maximum(h, 0.0) * s1_ref[...] + b1_ref[...]
    _store_interior(pad_ref, h, oh, ow)
    y = _conv3x3_from_halo(pad_ref, w2_ref, oh, ow)
    y = jnp.maximum(y, 0.0) * s2_ref[...] + b2_ref[...] + x0
    o_ref[...] = y.reshape(1, oh, ow, -1).astype(o_ref.dtype)


# ---------------------------------------------------------------------------
# kernel B: l2 (3x3 s2, phase-split input) + res_block(128)
# ---------------------------------------------------------------------------
def _l2_block2_kernel(ph_ref, wd_ref, sd_ref, bd_ref,
                      w1_ref, s1_ref, b1_ref,
                      w2_ref, s2_ref, b2_ref,
                      o_ref, pad_ref, *, oh, ow):
    x = _conv3x3_s2_from_phases(ph_ref, wd_ref, oh, ow)
    x = jnp.maximum(x, 0.0) * sd_ref[...] + bd_ref[...]              # (oh*ow, C) f32

    pad_ref[...] = jnp.zeros_like(pad_ref)
    _store_interior(pad_ref, x, oh, ow)
    h = _conv3x3_from_halo(pad_ref, w1_ref, oh, ow)
    h = jnp.maximum(h, 0.0) * s1_ref[...] + b1_ref[...]
    _store_interior(pad_ref, h, oh, ow)
    y = _conv3x3_from_halo(pad_ref, w2_ref, oh, ow)
    y = jnp.maximum(y, 0.0) * s2_ref[...] + b2_ref[...] + x
    o_ref[...] = y.reshape(1, oh, ow, -1).astype(o_ref.dtype)


# ---------------------------------------------------------------------------
# kernel C: l3 (3x3 s2) + AdaptiveConcatPool2d + BN-folded head linears
# ---------------------------------------------------------------------------
def _l3_head_kernel(ph_ref, w3_ref, s3_ref, b3_ref,
                    w1m_ref, w1a_ref, b1_ref,
                    w2_ref, b2_ref, o_ref, *, oh, ow):
    y = _conv3x3_s2_from_phases(ph_ref, w3_ref, oh, ow)
    y = jnp.maximum(y, 0.0) * s3_ref[...] + b3_ref[...]              # (oh*ow, 256) f32

    # AdaptiveConcatPool2d fused: [max over HW ; mean over HW]
    mx = jnp.max(y, axis=0, keepdims=True)                           # (1, 256)
    av = jnp.sum(y, axis=0, keepdims=True) * (1.0 / (oh * ow))       # (1, 256)

    # head: Dropout is identity in eval; BN1d folded into the linear weights.
    # fc1's weight is split row-wise into the [max ; avg] halves so no lane
    # concatenation is needed inside the kernel.
    h1 = (jnp.dot(mx.astype(ACT_DTYPE), w1m_ref[...],
                  preferred_element_type=jnp.float32)
          + jnp.dot(av.astype(ACT_DTYPE), w1a_ref[...],
                    preferred_element_type=jnp.float32)
          + b1_ref[...])
    h1 = jnp.maximum(h1, 0.0)
    out = jnp.dot(h1.astype(ACT_DTYPE), w2_ref[...],
                  preferred_element_type=jnp.float32) + b2_ref[...]
    o_ref[...] = out.reshape(1, 1, -1).astype(o_ref.dtype)


# ---------------------------------------------------------------------------
# pallas_call wrappers (batch-parallel grid, weights resident across programs)
# ---------------------------------------------------------------------------
def _compiler_params():
    return pltpu.CompilerParams(dimension_semantics=("parallel",),
                                vmem_limit_bytes=VMEM_LIMIT_BYTES)


def _halo_scratch(oh, ow, c):
    # interior lives at rows [1:1+oh], cols [8:8+ow]; everything else is zero
    return pltpu.VMEM((oh + 2, 8 + _round_up(ow + 1, 8), c), ACT_DTYPE)


def stem_block1(cols, p0, p1, p2, n, oh, ow):
    k0, c = p0["w"].shape
    m2 = oh * ow
    assert m2 % 8 == 0
    const2 = lambda i: (0, 0)
    const3 = lambda i: (0, 0, 0)
    return pl.pallas_call(
        functools.partial(_stem_block1_kernel, oh=oh, ow=ow),
        out_shape=jax.ShapeDtypeStruct((n, oh, ow, c), ACT_DTYPE),
        grid=(n,),
        in_specs=[
            pl.BlockSpec((m2, k0), lambda i: (i, 0)),
            pl.BlockSpec((k0, c), const2),
            pl.BlockSpec((1, c), const2),
            pl.BlockSpec((1, c), const2),
            pl.BlockSpec((9, c, c), const3),
            pl.BlockSpec((1, c), const2),
            pl.BlockSpec((1, c), const2),
            pl.BlockSpec((9, c, c), const3),
            pl.BlockSpec((1, c), const2),
            pl.BlockSpec((1, c), const2),
        ],
        out_specs=pl.BlockSpec((1, oh, ow, c), lambda i: (i, 0, 0, 0)),
        scratch_shapes=[_halo_scratch(oh, ow, c)],
        compiler_params=_compiler_params(),
    )(cols, p0["w"], p0["scale"], p0["bias"],
      p1["w"], p1["scale"], p1["bias"],
      p2["w"], p2["scale"], p2["bias"])


def l2_block2(ph, pd, p1, p2, n, oh, ow):
    cin = ph.shape[-1]
    c = pd["w"].shape[-1]
    const2 = lambda i: (0, 0)
    const3 = lambda i: (0, 0, 0)
    return pl.pallas_call(
        functools.partial(_l2_block2_kernel, oh=oh, ow=ow),
        out_shape=jax.ShapeDtypeStruct((n, oh, ow, c), ACT_DTYPE),
        grid=(n,),
        in_specs=[
            pl.BlockSpec((4, 1, oh + 1, ow + 1, cin), lambda i: (0, i, 0, 0, 0)),
            pl.BlockSpec((9, cin, c), const3),
            pl.BlockSpec((1, c), const2),
            pl.BlockSpec((1, c), const2),
            pl.BlockSpec((9, c, c), const3),
            pl.BlockSpec((1, c), const2),
            pl.BlockSpec((1, c), const2),
            pl.BlockSpec((9, c, c), const3),
            pl.BlockSpec((1, c), const2),
            pl.BlockSpec((1, c), const2),
        ],
        out_specs=pl.BlockSpec((1, oh, ow, c), lambda i: (i, 0, 0, 0)),
        scratch_shapes=[_halo_scratch(oh, ow, c)],
        compiler_params=_compiler_params(),
    )(ph, pd["w"], pd["scale"], pd["bias"],
      p1["w"], p1["scale"], p1["bias"],
      p2["w"], p2["scale"], p2["bias"])


def l3_head(ph, p3, pfc1, pfc2, n, oh, ow):
    cin = ph.shape[-1]
    c3 = p3["w"].shape[-1]
    hdim = pfc1["w_max"].shape[-1]
    odim = pfc2["w"].shape[-1]
    const2 = lambda i: (0, 0)
    const3 = lambda i: (0, 0, 0)
    return pl.pallas_call(
        functools.partial(_l3_head_kernel, oh=oh, ow=ow),
        out_shape=jax.ShapeDtypeStruct((n, 1, odim), jnp.float32),
        grid=(n,),
        in_specs=[
            pl.BlockSpec((4, 1, oh + 1, ow + 1, cin), lambda i: (0, i, 0, 0, 0)),
            pl.BlockSpec((9, cin, c3), const3),
            pl.BlockSpec((1, c3), const2),
            pl.BlockSpec((1, c3), const2),
            pl.BlockSpec((c3, hdim), const2),
            pl.BlockSpec((c3, hdim), const2),
            pl.BlockSpec((1, hdim), const2),
            pl.BlockSpec((hdim, odim), const2),
            pl.BlockSpec((1, odim), const2),
        ],
        out_specs=pl.BlockSpec((1, 1, odim), lambda i: (i, 0, 0)),
        compiler_params=_compiler_params(),
    )(ph, p3["w"], p3["scale"], p3["bias"],
      pfc1["w_max"], pfc1["w_avg"], pfc1["bias"],
      pfc2["w"], pfc2["bias"])


# ---------------------------------------------------------------------------
# tiny XLA glue (stem patch rows + the two stride-2 phase splits)
# ---------------------------------------------------------------------------
def _stem_cols(x, ks, stride, pad):
    """im2col patch rows for the 7x7 stem (Cin=3 is too narrow for per-tap
    MXU matmuls).  TODO(synk): build the patch rows inside the kernel."""
    n, h, w, c = x.shape
    xp = jnp.pad(x, ((0, 0), (pad, pad), (pad, pad), (0, 0)))
    oh = (h + 2 * pad - ks) // stride + 1
    ow = (w + 2 * pad - ks) // stride + 1
    cols = [xp[:, i:i + stride * oh:stride, j:j + stride * ow:stride, :]
            for i in range(ks) for j in range(ks)]
    cols = jnp.concatenate(cols, axis=-1).reshape(n * oh * ow, ks * ks * c)
    kp = _round_up(ks * ks * c, 128)
    cols = jnp.pad(cols, ((0, 0), (0, kp - ks * ks * c)))
    return cols.astype(ACT_DTYPE), oh, ow


def _phase_split_s2(x):
    """Pad by 1 and split into the 2x2 phases a 3x3 stride-2 conv needs.
    x: (N,H,W,C) with even H,W -> (4, N, H//2+1, W//2+1, C) bf16."""
    n, h, w, c = x.shape
    assert h % 2 == 0 and w % 2 == 0
    xp = jnp.pad(x, ((0, 0), (1, 1), (1, 1), (0, 0)))
    phases = [xp[:, pi::2, pj::2, :] for pi in range(2) for pj in range(2)]
    return jnp.stack(phases, axis=0).astype(ACT_DTYPE)


# ---------------------------------------------------------------------------
# parameter construction (eval-mode BN stats synthesized; head BN folded)
# ---------------------------------------------------------------------------
def make_conv_params(key, cin, cout, ks, *, cin_pad=None, cout_pad=None, flat=False):
    cin_pad = cin if cin_pad is None else cin_pad
    cout_pad = cout if cout_pad is None else cout_pad
    kw_, kg, kb, km, kv = jax.random.split(key, 5)
    fan_in = cin * ks * ks
    w = jax.random.normal(kw_, (cout, cin, ks, ks), jnp.float32) * (2.0 / fan_in) ** 0.5
    w = jnp.transpose(w, (2, 3, 1, 0))                              # (kh,kw,cin,cout)
    w = jnp.pad(w, ((0, 0), (0, 0), (0, cin_pad - cin), (0, cout_pad - cout)))
    if flat:                                                        # stem layout
        assert cin_pad == cin
        kdim = ks * ks * cin_pad
        kdim_pad = _round_up(kdim, 128)
        w_mat = jnp.pad(w.reshape(kdim, cout_pad), ((0, kdim_pad - kdim), (0, 0)))
    else:                                                           # tap-major layout
        w_mat = w.reshape(ks * ks, cin_pad, cout_pad)

    gamma = 1.0 + 0.1 * jax.random.normal(kg, (cout,), jnp.float32)
    beta = 0.1 * jax.random.normal(kb, (cout,), jnp.float32)
    mean = 0.1 * jax.random.normal(km, (cout,), jnp.float32)
    var = 1.0 + 0.1 * jnp.abs(jax.random.normal(kv, (cout,), jnp.float32))
    s = gamma / jnp.sqrt(var + EPS)
    c = beta - mean * s
    scale = jnp.zeros((1, cout_pad), jnp.float32).at[0, :cout].set(s)
    shift = jnp.zeros((1, cout_pad), jnp.float32).at[0, :cout].set(c)
    return dict(w=w_mat.astype(ACT_DTYPE), scale=scale, bias=shift)


def make_bn_linear_params(key, nin, nout, *, nout_pad=None):
    """BatchNorm1d(nin) (eval) folded into Linear(nin, nout); output lane-padded."""
    nout_pad = nout if nout_pad is None else nout_pad
    kw_, kb, kg, kbe, km, kv = jax.random.split(key, 6)
    W = jax.random.normal(kw_, (nout, nin), jnp.float32) * (2.0 / nin) ** 0.5
    b = 0.01 * jax.random.normal(kb, (nout,), jnp.float32)
    gamma = 1.0 + 0.1 * jax.random.normal(kg, (nin,), jnp.float32)
    beta = 0.1 * jax.random.normal(kbe, (nin,), jnp.float32)
    mean = 0.1 * jax.random.normal(km, (nin,), jnp.float32)
    var = 1.0 + 0.1 * jnp.abs(jax.random.normal(kv, (nin,), jnp.float32))
    s = gamma / jnp.sqrt(var + EPS)
    c = beta - mean * s
    W_io = W.T                                # (nin, nout)
    w_eff = W_io * s[:, None]
    b_eff = c @ W_io + b
    w_eff = jnp.pad(w_eff, ((0, 0), (0, nout_pad - nout)))
    b_eff = jnp.pad(b_eff, (0, nout_pad - nout)).reshape(1, nout_pad)
    return dict(w=w_eff.astype(ACT_DTYPE), bias=b_eff)


def init_params(key, nc):
    ks = jax.random.split(key, 9)
    fc1 = make_bn_linear_params(ks[7], 512, 512)
    return dict(
        # 64-channel stage is carried as 128 zero-padded channels (lane-dense)
        l1=make_conv_params(ks[0], 3, 64, 7, cout_pad=128, flat=True),
        b1c1=make_conv_params(ks[1], 64, 64, 3, cin_pad=128, cout_pad=128),
        b1c2=make_conv_params(ks[2], 64, 64, 3, cin_pad=128, cout_pad=128),
        l2=make_conv_params(ks[3], 64, 128, 3, cin_pad=128),
        b2c1=make_conv_params(ks[4], 128, 128, 3),
        b2c2=make_conv_params(ks[5], 128, 128, 3),
        l3=make_conv_params(ks[6], 128, 256, 3),
        # fc1 weight split into [max-feature ; avg-feature] row halves
        fc1=dict(w_max=fc1["w"][:256], w_avg=fc1["w"][256:], bias=fc1["bias"]),
        fc2=make_bn_linear_params(ks[8], 512, nc, nout_pad=128),
    )


# ---------------------------------------------------------------------------
# forward pass
# ---------------------------------------------------------------------------
def forward(x_nchw, params, nc):
    # accept PyTorch NCHW, run NHWC / bf16 internally
    x = jnp.transpose(x_nchw, (0, 2, 3, 1)).astype(jnp.float32)
    n = x.shape[0]

    # kernel A: l1 (stem) + res_block(64)
    cols, oh1, ow1 = _stem_cols(x, 7, 2, 3)
    x1 = stem_block1(cols, params["l1"], params["b1c1"], params["b1c2"],
                     n, oh1, ow1)                                    # (N,8,8,128)

    # kernel B: l2 + res_block(128)   (XLA phase split only for the s2 conv)
    oh2, ow2 = oh1 // 2, ow1 // 2
    x2 = l2_block2(_phase_split_s2(x1), params["l2"], params["b2c1"],
                   params["b2c2"], n, oh2, ow2)                      # (N,4,4,128)

    # kernel C: l3 + AdaptiveConcatPool2d + head (Dropout identity in eval)
    oh3, ow3 = oh2 // 2, ow2 // 2
    logits = l3_head(_phase_split_s2(x2), params["l3"], params["fc1"],
                     params["fc2"], n, oh3, ow3)                     # (N,1,128)
    # TODO(synk): for large spatial inputs (e.g. 224x224), tile output rows
    # across the grid instead of keeping one whole image per program in VMEM.
    return logits[:, 0, :nc]


if __name__ == "__main__":
    key = jax.random.PRNGKey(0)
    k_params, k_x = jax.random.split(key)
    params = init_params(k_params, NC)

    # small PyTorch-style NCHW input: batch=2, 3 channels, 16x16 spatial
    x = jax.random.normal(k_x, (2, 3, 16, 16), jnp.float32)

    out = jax.jit(functools.partial(forward, nc=NC))(x, params)
    out = jax.block_until_ready(out)
    assert out.shape == (2, NC), out.shape
    assert bool(jnp.all(jnp.isfinite(out)))
    print("KERNEL_OK")
</pallas_src>

<mosaic_0001>
module attributes {stable_mosaic.version = 11 : i64} {
  func.func @_stem_block1_kernel(%arg0: i32, %arg1: memref<64x256xbf16, #tpu.memory_space<vmem>>, %arg2: memref<256x128xbf16, #tpu.memory_space<vmem>>, %arg3: memref<1x128xf32, #tpu.memory_space<vmem>>, %arg4: memref<1x128xf32, #tpu.memory_space<vmem>>, %arg5: memref<9x128x128xbf16, #tpu.memory_space<vmem>>, %arg6: memref<1x128xf32, #tpu.memory_space<vmem>>, %arg7: memref<1x128xf32, #tpu.memory_space<vmem>>, %arg8: memref<9x128x128xbf16, #tpu.memory_space<vmem>>, %arg9: memref<1x128xf32, #tpu.memory_space<vmem>>, %arg10: memref<1x128xf32, #tpu.memory_space<vmem>>, %arg11: memref<1x8x8x128xbf16, #tpu.memory_space<vmem>>, %arg12: memref<10x24x128xbf16, #tpu.memory_space<vmem>>) attributes {dimension_semantics = [#tpu.dimension_semantics<parallel>], iteration_bounds = array<i64: 2>, scalar_prefetch = 0 : i64, scratch_operands = 1 : i64, tpu.core_type = #tpu.core_type<tc>, window_params = [{transform_indices = @transform_0, window_bounds = array<i64: 64, 256>}, {pipeline_mode = #tpu.pipeline_mode<synchronous>, transform_indices = @transform_1, window_bounds = array<i64: 256, 128>}, {pipeline_mode = #tpu.pipeline_mode<synchronous>, transform_indices = @transform_2, window_bounds = array<i64: 1, 128>}, {pipeline_mode = #tpu.pipeline_mode<synchronous>, transform_indices = @transform_3, window_bounds = array<i64: 1, 128>}, {pipeline_mode = #tpu.pipeline_mode<synchronous>, transform_indices = @transform_4, window_bounds = array<i64: 9, 128, 128>}, {pipeline_mode = #tpu.pipeline_mode<synchronous>, transform_indices = @transform_5, window_bounds = array<i64: 1, 128>}, {pipeline_mode = #tpu.pipeline_mode<synchronous>, transform_indices = @transform_6, window_bounds = array<i64: 1, 128>}, {pipeline_mode = #tpu.pipeline_mode<synchronous>, transform_indices = @transform_7, window_bounds = array<i64: 9, 128, 128>}, {pipeline_mode = #tpu.pipeline_mode<synchronous>, transform_indices = @transform_8, window_bounds = array<i64: 1, 128>}, {pipeline_mode = #tpu.pipeline_mode<synchronous>, transform_indices = @transform_9, window_bounds = array<i64: 1, 128>}, {transform_indices = @transform_10, window_bounds = array<i64: 1, 8, 8, 128>}]} {
    %c0 = arith.constant 0 : index
    %c0_0 = arith.constant 0 : index
    %0 = vector.load %arg1[%c0, %c0_0] : memref<64x256xbf16, #tpu.memory_space<vmem>>, vector<64x256xbf16>
    %c0_1 = arith.constant 0 : index
    %c0_2 = arith.constant 0 : index
    %1 = vector.load %arg2[%c0_1, %c0_2] : memref<256x128xbf16, #tpu.memory_space<vmem>>, vector<256x128xbf16>
    %cst = arith.constant dense<0.000000e+00> : vector<64x128xf32>
    %2 = tpu.matmul %0, %1, %cst {dimension_numbers = #tpu.dot_dimension_numbers<[1], [0], [0], [1], [0, 0, 1, 1], [], []>} : vector<64x256xbf16>, vector<256x128xbf16>, vector<64x128xf32> -> vector<64x128xf32>
    %cst_3 = arith.constant 0.000000e+00 : f32
    %3 = vector.broadcast %cst_3 : f32 to vector<64x128xf32>
    %4 = arith.maximumf %2, %3 : vector<64x128xf32>
    %c0_4 = arith.constant 0 : index
    %c0_5 = arith.constant 0 : index
    %5 = vector.load %arg3[%c0_4, %c0_5] : memref<1x128xf32, #tpu.memory_space<vmem>>, vector<1x128xf32>
    %6 = vector.broadcast %5 : vector<1x128xf32> to vector<64x128xf32>
    %7 = arith.mulf %4, %6 : vector<64x128xf32>
    %c0_6 = arith.constant 0 : index
    %c0_7 = arith.constant 0 : index
    %8 = vector.load %arg4[%c0_6, %c0_7] : memref<1x128xf32, #tpu.memory_space<vmem>>, vector<1x128xf32>
    %9 = vector.broadcast %8 : vector<1x128xf32> to vector<64x128xf32>
    %10 = arith.addf %7, %9 : vector<64x128xf32>
    %cst_8 = arith.constant 0.000000e+00 : bf16
    %11 = vector.broadcast %cst_8 : bf16 to vector<10x24x128xbf16>
    %c0_9 = arith.constant 0 : index
    %c0_10 = arith.constant 0 : index
    %c0_11 = arith.constant 0 : index
    %12 = vector.load %arg12[%c0_9, %c0_10, %c0_11] : memref<10x24x128xbf16, #tpu.memory_space<vmem>>, vector<10x24x128xbf16>
    tpu.vector_store %arg12[%c0_9, %c0_10, %c0_11], %11 {strides = array<i32>} : memref<10x24x128xbf16, #tpu.memory_space<vmem>>, vector<10x24x128xbf16>,
    %13 = arith.truncf %10 : vector<64x128xf32> to vector<64x128xbf16>
    %14 = vector.shape_cast %13 : vector<64x128xbf16> to vector<8x8x128xbf16>
    %c1 = arith.constant 1 : index
    %c8 = arith.constant 8 : index
    %c0_12 = arith.constant 0 : index
    %15 = vector.load %arg12[%c1, %c8, %c0_12] : memref<10x24x128xbf16, #tpu.memory_space<vmem>>, vector<8x8x128xbf16>
    tpu.vector_store %arg12[%c1, %c8, %c0_12], %14 {strides = array<i32>} : memref<10x24x128xbf16, #tpu.memory_space<vmem>>, vector<8x8x128xbf16>,
    %cst_13 = arith.constant 0.000000e+00 : f32
    %16 = vector.broadcast %cst_13 : f32 to vector<64x128xf32>
    %c0_14 = arith.constant 0 : index
    %c7 = arith.constant 7 : index
    %c0_15 = arith.constant 0 : index
    %17 = vector.load %arg12[%c0_14, %c7, %c0_15] : memref<10x24x128xbf16, #tpu.memory_space<vmem>>, vector<8x8x128xbf16>
    %18 = vector.shape_cast %17 : vector<8x8x128xbf16> to vector<64x128xbf16>
    %c0_16 = arith.constant 0 : index
    %c0_17 = arith.constant 0 : index
    %c0_18 = arith.constant 0 : index
    %19 = vector.load %arg5[%c0_16, %c0_17, %c0_18] : memref<9x128x128xbf16, #tpu.memory_space<vmem>>, vector<1x128x128xbf16>
    %20 = vector.shape_cast %19 : vector<1x128x128xbf16> to vector<128x128xbf16>
    %cst_19 = arith.constant dense<0.000000e+00> : vector<64x128xf32>
    %21 = tpu.matmul %18, %20, %cst_19 {dimension_numbers = #tpu.dot_dimension_numbers<[1], [0], [0], [1], [0, 0, 1, 1], [], []>} : vector<64x128xbf16>, vector<128x128xbf16>, vector<64x128xf32> -> vector<64x128xf32>
    %22 = arith.addf %16, %21 : vector<64x128xf32>
    %c0_20 = arith.constant 0 : index
    %c8_21 = arith.constant 8 : index
    %c0_22 = arith.constant 0 : index
    %23 = vector.load %arg12[%c0_20, %c8_21, %c0_22] : memref<10x24x128xbf16, #tpu.memory_space<vmem>>, vector<8x8x128xbf16>
    %24 = vector.shape_cast %23 : vector<8x8x128xbf16> to vector<64x128xbf16>
    %c1_23 = arith.constant 1 : index
    %c0_24 = arith.constant 0 : index
    %c0_25 = arith.constant 0 : index
    %25 = vector.load %arg5[%c1_23, %c0_24, %c0_25] : memref<9x128x128xbf16, #tpu.memory_space<vmem>>, vector<1x128x128xbf16>
    %26 = vector.shape_cast %25 : vector<1x128x128xbf16> to vector<128x128xbf16>
    %cst_26 = arith.constant dense<0.000000e+00> : vector<64x128xf32>
    %27 = tpu.matmul %24, %26, %cst_26 {dimension_numbers = #tpu.dot_dimension_numbers<[1], [0], [0], [1], [0, 0, 1, 1], [], []>} : vector<64x128xbf16>, vector<128x128xbf16>, vector<64x128xf32> -> vector<64x128xf32>
    %28 = arith.addf %22, %27 : vector<64x128xf32>
    %c0_27 = arith.constant 0 : index
    %c9 = arith.constant 9 : index
    %c0_28 = arith.constant 0 : index
    %29 = vector.load %arg12[%c0_27, %c9, %c0_28] : memref<10x24x128xbf16, #tpu.memory_space<vmem>>, vector<8x8x128xbf16>
    %30 = vector.shape_cast %29 : vector<8x8x128xbf16> to vector<64x128xbf16>
    %c2 = arith.constant 2 : index
    %c0_29 = arith.constant 0 : index
    %c0_30 = arith.constant 0 : index
    %31 = vector.load %arg5[%c2, %c0_29, %c0_30] : memref<9x128x128xbf16, #tpu.memory_space<vmem>>, vector<1x128x128xbf16>
    %32 = vector.shape_cast %31 : vector<1x128x128xbf16> to vector<128x128xbf16>
    %cst_31 = arith.constant dense<0.000000e+00> : vector<64x128xf32>
    %33 = tpu.matmul %30, %32, %cst_31 {dimension_numbers = #tpu.dot_dimension_numbers<[1], [0], [0], [1], [0, 0, 1, 1], [], []>} : vector<64x128xbf16>, vector<128x128xbf16>, vector<64x128xf32> -> vector<64x128xf32>
    %34 = arith.addf %28, %33 : vector<64x128xf32>
    %c1_32 = arith.constant 1 : index
    %c7_33 = arith.constant 7 : index
    %c0_34 = arith.constant 0 : index
    %35 = vector.load %arg12[%c1_32, %c7_33, %c0_34] : memref<10x24x128xbf16, #tpu.memory_space<vmem>>, vector<8x8x128xbf16>
    %36 = vector.shape_cast %35 : vector<8x8x128xbf16> to vector<64x128xbf16>
    %c3 = arith.constant 3 : index
    %c0_35 = arith.constant 0 : index
    %c0_36 = arith.constant 0 : index
    %37 = vector.load %arg5[%c3, %c0_35, %c0_36] : memref<9x128x128xbf16, #tpu.memory_space<vmem>>, vector<1x128x128xbf16>
    %38 = vector.shape_cast %37 : vector<1x128x128xbf16> to vector<128x128xbf16>
    %cst_37 = arith.constant dense<0.000000e+00> : vector<64x128xf32>
    %39 = tpu.matmul %36, %38, %cst_37 {dimension_numbers = #tpu.dot_dimension_numbers<[1], [0], [0], [1], [0, 0, 1, 1], [], []>} : vector<64x128xbf16>, vector<128x128xbf16>, vector<64x128xf32> -> vector<64x128xf32>
    %40 = arith.addf %34, %39 : vector<64x128xf32>
    %c1_38 = arith.constant 1 : index
    %c8_39 = arith.constant 8 : index
    %c0_40 = arith.constant 0 : index
    %41 = vector.load %arg12[%c1_38, %c8_39, %c0_40] : memref<10x24x128xbf16, #tpu.memory_space<vmem>>, vector<8x8x128xbf16>
    %42 = vector.shape_cast %41 : vector<8x8x128xbf16> to vector<64x128xbf16>
    %c4 = arith.constant 4 : index
    %c0_41 = arith.constant 0 : index
    %c0_42 = arith.constant 0 : index
    %43 = vector.load %arg5[%c4, %c0_41, %c0_42] : memref<9x128x128xbf16, #tpu.memory_space<vmem>>, vector<1x128x128xbf16>
    %44 = vector.shape_cast %43 : vector<1x128x128xbf16> to vector<128x128xbf16>
    %cst_43 = arith.constant dense<0.000000e+00> : vector<64x128xf32>
    %45 = tpu.matmul %42, %44, %cst_43 {dimension_numbers = #tpu.dot_dimension_numbers<[1], [0], [0], [1], [0, 0, 1, 1], [], []>} : vector<64x128xbf16>, vector<128x128xbf16>, vector<64x128xf32> -> vector<64x128xf32>
    %46 = arith.addf %40, %45 : vector<64x128xf32>
    %c1_44 = arith.constant 1 : index
    %c9_45 = arith.constant 9 : index
    %c0_46 = arith.constant 0 : index
    %47 = vector.load %arg12[%c1_44, %c9_45, %c0_46] : memref<10x24x128xbf16, #tpu.memory_space<vmem>>, vector<8x8x128xbf16>
    %48 = vector.shape_cast %47 : vector<8x8x128xbf16> to vector<64x128xbf16>
    %c5 = arith.constant 5 : index
    %c0_47 = arith.constant 0 : index
    %c0_48 = arith.constant 0 : index
    %49 = vector.load %arg5[%c5, %c0_47, %c0_48] : memref<9x128x128xbf16, #tpu.memory_space<vmem>>, vector<1x128x128xbf16>
    %50 = vector.shape_cast %49 : vector<1x128x128xbf16> to vector<128x128xbf16>
    %cst_49 = arith.constant dense<0.000000e+00> : vector<64x128xf32>
    %51 = tpu.matmul %48, %50, %cst_49 {dimension_numbers = #tpu.dot_dimension_numbers<[1], [0], [0], [1], [0, 0, 1, 1], [], []>} : vector<64x128xbf16>, vector<128x128xbf16>, vector<64x128xf32> -> vector<64x128xf32>
    %52 = arith.addf %46, %51 : vector<64x128xf32>
    %c2_50 = arith.constant 2 : index
    %c7_51 = arith.constant 7 : index
    %c0_52 = arith.constant 0 : index
    %53 = vector.load %arg12[%c2_50, %c7_51, %c0_52] : memref<10x24x128xbf16, #tpu.memory_space<vmem>>, vector<8x8x128xbf16>
    %54 = vector.shape_cast %53 : vector<8x8x128xbf16> to vector<64x128xbf16>
    %c6 = arith.constant 6 : index
    %c0_53 = arith.constant 0 : index
    %c0_54 = arith.constant 0 : index
    %55 = vector.load %arg5[%c6, %c0_53, %c0_54] : memref<9x128x128xbf16, #tpu.memory_space<vmem>>, vector<1x128x128xbf16>
    %56 = vector.shape_cast %55 : vector<1x128x128xbf16> to vector<128x128xbf16>
    %cst_55 = arith.constant dense<0.000000e+00> : vector<64x128xf32>
    %57 = tpu.matmul %54, %56, %cst_55 {dimension_numbers = #tpu.dot_dimension_numbers<[1], [0], [0], [1], [0, 0, 1, 1], [], []>} : vector<64x128xbf16>, vector<128x128xbf16>, vector<64x128xf32> -> vector<64x128xf32>
    %58 = arith.addf %52, %57 : vector<64x128xf32>
    %c2_56 = arith.constant 2 : index
    %c8_57 = arith.constant 8 : index
    %c0_58 = arith.constant 0 : index
    %59 = vector.load %arg12[%c2_56, %c8_57, %c0_58] : memref<10x24x128xbf16, #tpu.memory_space<vmem>>, vector<8x8x128xbf16>
    %60 = vector.shape_cast %59 : vector<8x8x128xbf16> to vector<64x128xbf16>
    %c7_59 = arith.constant 7 : index
    %c0_60 = arith.constant 0 : index
    %c0_61 = arith.constant 0 : index
    %61 = vector.load %arg5[%c7_59, %c0_60, %c0_61] : memref<9x128x128xbf16, #tpu.memory_space<vmem>>, vector<1x128x128xbf16>
    %62 = vector.shape_cast %61 : vector<1x128x128xbf16> to vector<128x128xbf16>
    %cst_62 = arith.constant dense<0.000000e+00> : vector<64x128xf32>
    %63 = tpu.matmul %60, %62, %cst_62 {dimension_numbers = #tpu.dot_dimension_numbers<[1], [0], [0], [1], [0, 0, 1, 1], [], []>} : vector<64x128xbf16>, vector<128x128xbf16>, vector<64x128xf32> -> vector<64x128xf32>
    %64 = arith.addf %58, %63 : vector<64x128xf32>
    %c2_63 = arith.constant 2 : index
    %c9_64 = arith.constant 9 : index
    %c0_65 = arith.constant 0 : index
    %65 = vector.load %arg12[%c2_63, %c9_64, %c0_65] : memref<10x24x128xbf16, #tpu.memory_space<vmem>>, vector<8x8x128xbf16>
    %66 = vector.shape_cast %65 : vector<8x8x128xbf16> to vector<64x128xbf16>
    %c8_66 = arith.constant 8 : index
    %c0_67 = arith.constant 0 : index
    %c0_68 = arith.constant 0 : index
    %67 = vector.load %arg5[%c8_66, %c0_67, %c0_68] : memref<9x128x128xbf16, #tpu.memory_space<vmem>>, vector<1x128x128xbf16>
    %68 = vector.shape_cast %67 : vector<1x128x128xbf16> to vector<128x128xbf16>
    %cst_69 = arith.constant dense<0.000000e+00> : vector<64x128xf32>
    %69 = tpu.matmul %66, %68, %cst_69 {dimension_numbers = #tpu.dot_dimension_numbers<[1], [0], [0], [1], [0, 0, 1, 1], [], []>} : vector<64x128xbf16>, vector<128x128xbf16>, vector<64x128xf32> -> vector<64x128xf32>
    %70 = arith.addf %64, %69 : vector<64x128xf32>
    %cst_70 = arith.constant 0.000000e+00 : f32
    %71 = vector.broadcast %cst_70 : f32 to vector<64x128xf32>
    %72 = arith.maximumf %70, %71 : vector<64x128xf32>
    %c0_71 = arith.constant 0 : index
    %c0_72 = arith.constant 0 : index
    %73 = vector.load %arg6[%c0_71, %c0_72] : memref<1x128xf32, #tpu.memory_space<vmem>>, vector<1x128xf32>
    %74 = vector.broadcast %73 : vector<1x128xf32> to vector<64x128xf32>
    %75 = arith.mulf %72, %74 : vector<64x128xf32>
    %c0_73 = arith.constant 0 : index
    %c0_74 = arith.constant 0 : index
    %76 = vector.load %arg7[%c0_73, %c0_74] : memref<1x128xf32, #tpu.memory_space<vmem>>, vector<1x128xf32>
    %77 = vector.broadcast %76 : vector<1x128xf32> to vector<64x128xf32>
    %78 = arith.addf %75, %77 : vector<64x128xf32>
    %79 = arith.truncf %78 : vector<64x128xf32> to vector<64x128xbf16>
    %80 = vector.shape_cast %79 : vector<64x128xbf16> to vector<8x8x128xbf16>
    %c1_75 = arith.constant 1 : index
    %c8_76 = arith.constant 8 : index
    %c0_77 = arith.constant 0 : index
    %81 = vector.load %arg12[%c1_75, %c8_76, %c0_77] : memref<10x24x128xbf16, #tpu.memory_space<vmem>>, vector<8x8x128xbf16>
    tpu.vector_store %arg12[%c1_75, %c8_76, %c0_77], %80 {strides = array<i32>} : memref<10x24x128xbf16, #tpu.memory_space<vmem>>, vector<8x8x128xbf16>,
    %cst_78 = arith.constant 0.000000e+00 : f32
    %82 = vector.broadcast %cst_78 : f32 to vector<64x128xf32>
    %c0_79 = arith.constant 0 : index
    %c7_80 = arith.constant 7 : index
    %c0_81 = arith.constant 0 : index
    %83 = vector.load %arg12[%c0_79, %c7_80, %c0_81] : memref<10x24x128xbf16, #tpu.memory_space<vmem>>, vector<8x8x128xbf16>
    %84 = vector.shape_cast %83 : vector<8x8x128xbf16> to vector<64x128xbf16>
    %c0_82 = arith.constant 0 : index
    %c0_83 = arith.constant 0 : index
    %c0_84 = arith.constant 0 : index
    %85 = vector.load %arg8[%c0_82, %c0_83, %c0_84] : memref<9x128x128xbf16, #tpu.memory_space<vmem>>, vector<1x128x128xbf16>
    %86 = vector.shape_cast %85 : vector<1x128x128xbf16> to vector<128x128xbf16>
    %cst_85 = arith.constant dense<0.000000e+00> : vector<64x128xf32>
    %87 = tpu.matmul %84, %86, %cst_85 {dimension_numbers = #tpu.dot_dimension_numbers<[1], [0], [0], [1], [0, 0, 1, 1], [], []>} : vector<64x128xbf16>, vector<128x128xbf16>, vector<64x128xf32> -> vector<64x128xf32>
    %88 = arith.addf %82, %87 : vector<64x128xf32>
    %c0_86 = arith.constant 0 : index
    %c8_87 = arith.constant 8 : index
    %c0_88 = arith.constant 0 : index
    %89 = vector.load %arg12[%c0_86, %c8_87, %c0_88] : memref<10x24x128xbf16, #tpu.memory_space<vmem>>, vector<8x8x128xbf16>
    %90 = vector.shape_cast %89 : vector<8x8x128xbf16> to vector<64x128xbf16>
    %c1_89 = arith.constant 1 : index
    %c0_90 = arith.constant 0 : index
    %c0_91 = arith.constant 0 : index
    %91 = vector.load %arg8[%c1_89, %c0_90, %c0_91] : memref<9x128x128xbf16, #tpu.memory_space<vmem>>, vector<1x128x128xbf16>
    %92 = vector.shape_cast %91 : vector<1x128x128xbf16> to vector<128x128xbf16>
    %cst_92 = arith.constant dense<0.000000e+00> : vector<64x128xf32>
    %93 = tpu.matmul %90, %92, %cst_92 {dimension_numbers = #tpu.dot_dimension_numbers<[1], [0], [0], [1], [0, 0, 1, 1], [], []>} : vector<64x128xbf16>, vector<128x128xbf16>, vector<64x128xf32> -> vector<64x128xf32>
    %94 = arith.addf %88, %93 : vector<64x128xf32>
    %c0_93 = arith.constant 0 : index
    %c9_94 = arith.constant 9 : index
    %c0_95 = arith.constant 0 : index
    %95 = vector.load %arg12[%c0_93, %c9_94, %c0_95] : memref<10x24x128xbf16, #tpu.memory_space<vmem>>, vector<8x8x128xbf16>
    %96 = vector.shape_cast %95 : vector<8x8x128xbf16> to vector<64x128xbf16>
    %c2_96 = arith.constant 2 : index
    %c0_97 = arith.constant 0 : index
    %c0_98 = arith.constant 0 : index
    %97 = vector.load %arg8[%c2_96, %c0_97, %c0_98] : memref<9x128x128xbf16, #tpu.memory_space<vmem>>, vector<1x128x128xbf16>
    %98 = vector.shape_cast %97 : vector<1x128x128xbf16> to vector<128x128xbf16>
    %cst_99 = arith.constant dense<0.000000e+00> : vector<64x128xf32>
    %99 = tpu.matmul %96, %98, %cst_99 {dimension_numbers = #tpu.dot_dimension_numbers<[1], [0], [0], [1], [0, 0, 1, 1], [], []>} : vector<64x128xbf16>, vector<128x128xbf16>, vector<64x128xf32> -> vector<64x128xf32>
    %100 = arith.addf %94, %99 : vector<64x128xf32>
    %c1_100 = arith.constant 1 : index
    %c7_101 = arith.constant 7 : index
    %c0_102 = arith.constant 0 : index
    %101 = vector.load %arg12[%c1_100, %c7_101, %c0_102] : memref<10x24x128xbf16, #tpu.memory_space<vmem>>, vector<8x8x128xbf16>
    %102 = vector.shape_cast %101 : vector<8x8x128xbf16> to vector<64x128xbf16>
    %c3_103 = arith.constant 3 : index
    %c0_104 = arith.constant 0 : index
    %c0_105 = arith.constant 0 : index
    %103 = vector.load %arg8[%c3_103, %c0_104, %c0_105] : memref<9x128x128xbf16, #tpu.memory_space<vmem>>, vector<1x128x128xbf16>
    %104 = vector.shape_cast %103 : vector<1x128x128xbf16> to vector<128x128xbf16>
    %cst_106 = arith.constant dense<0.000000e+00> : vector<64x128xf32>
    %105 = tpu.matmul %102, %104, %cst_106 {dimension_numbers = #tpu.dot_dimension_numbers<[1], [0], [0], [1], [0, 0, 1, 1], [], []>} : vector<64x128xbf16>, vector<128x128xbf16>, vector<64x128xf32> -> vector<64x128xf32>
    %106 = arith.addf %100, %105 : vector<64x128xf32>
    %c1_107 = arith.constant 1 : index
    %c8_108 = arith.constant 8 : index
    %c0_109 = arith.constant 0 : index
    %107 = vector.load %arg12[%c1_107, %c8_108, %c0_109] : memref<10x24x128xbf16, #tpu.memory_space<vmem>>, vector<8x8x128xbf16>
    %108 = vector.shape_cast %107 : vector<8x8x128xbf16> to vector<64x128xbf16>
    %c4_110 = arith.constant 4 : index
    %c0_111 = arith.constant 0 : index
    %c0_112 = arith.constant 0 : index
    %109 = vector.load %arg8[%c4_110, %c0_111, %c0_112] : memref<9x128x128xbf16, #tpu.memory_space<vmem>>, vector<1x128x128xbf16>
    %110 = vector.shape_cast %109 : vector<1x128x128xbf16> to vector<128x128xbf16>
    %cst_113 = arith.constant dense<0.000000e+00> : vector<64x128xf32>
    %111 = tpu.matmul %108, %110, %cst_113 {dimension_numbers = #tpu.dot_dimension_numbers<[1], [0], [0], [1], [0, 0, 1, 1], [], []>} : vector<64x128xbf16>, vector<128x128xbf16>, vector<64x128xf32> -> vector<64x128xf32>
    %112 = arith.addf %106, %111 : vector<64x128xf32>
    %c1_114 = arith.constant 1 : index
    %c9_115 = arith.constant 9 : index
    %c0_116 = arith.constant 0 : index
    %113 = vector.load %arg12[%c1_114, %c9_115, %c0_116] : memref<10x24x128xbf16, #tpu.memory_space<vmem>>, vector<8x8x128xbf16>
    %114 = vector.shape_cast %113 : vector<8x8x128xbf16> to vector<64x128xbf16>
    %c5_117 = arith.constant 5 : index
    %c0_118 = arith.constant 0 : index
    %c0_119 = arith.constant 0 : index
    %115 = vector.load %arg8[%c5_117, %c0_118, %c0_119] : memref<9x128x128xbf16, #tpu.memory_space<vmem>>, vector<1x128x128xbf16>
    %116 = vector.shape_cast %115 : vector<1x128x128xbf16> to vector<128x128xbf16>
    %cst_120 = arith.constant dense<0.000000e+00> : vector<64x128xf32>
    %117 = tpu.matmul %114, %116, %cst_120 {dimension_numbers = #tpu.dot_dimension_numbers<[1], [0], [0], [1], [0, 0, 1, 1], [], []>} : vector<64x128xbf16>, vector<128x128xbf16>, vector<64x128xf32> -> vector<64x128xf32>
    %118 = arith.addf %112, %117 : vector<64x128xf32>
    %c2_121 = arith.constant 2 : index
    %c7_122 = arith.constant 7 : index
    %c0_123 = arith.constant 0 : index
    %119 = vector.load %arg12[%c2_121, %c7_122, %c0_123] : memref<10x24x128xbf16, #tpu.memory_space<vmem>>, vector<8x8x128xbf16>
    %120 = vector.shape_cast %119 : vector<8x8x128xbf16> to vector<64x128xbf16>
    %c6_124 = arith.constant 6 : index
    %c0_125 = arith.constant 0 : index
    %c0_126 = arith.constant 0 : index
    %121 = vector.load %arg8[%c6_124, %c0_125, %c0_126] : memref<9x128x128xbf16, #tpu.memory_space<vmem>>, vector<1x128x128xbf16>
    %122 = vector.shape_cast %121 : vector<1x128x128xbf16> to vector<128x128xbf16>
    %cst_127 = arith.constant dense<0.000000e+00> : vector<64x128xf32>
    %123 = tpu.matmul %120, %122, %cst_127 {dimension_numbers = #tpu.dot_dimension_numbers<[1], [0], [0], [1], [0, 0, 1, 1], [], []>} : vector<64x128xbf16>, vector<128x128xbf16>, vector<64x128xf32> -> vector<64x128xf32>
    %124 = arith.addf %118, %123 : vector<64x128xf32>
    %c2_128 = arith.constant 2 : index
    %c8_129 = arith.constant 8 : index
    %c0_130 = arith.constant 0 : index
    %125 = vector.load %arg12[%c2_128, %c8_129, %c0_130] : memref<10x24x128xbf16, #tpu.memory_space<vmem>>, vector<8x8x128xbf16>
    %126 = vector.shape_cast %125 : vector<8x8x128xbf16> to vector<64x128xbf16>
    %c7_131 = arith.constant 7 : index
    %c0_132 = arith.constant 0 : index
    %c0_133 = arith.constant 0 : index
    %127 = vector.load %arg8[%c7_131, %c0_132, %c0_133] : memref<9x128x128xbf16, #tpu.memory_space<vmem>>, vector<1x128x128xbf16>
    %128 = vector.shape_cast %127 : vector<1x128x128xbf16> to vector<128x128xbf16>
    %cst_134 = arith.constant dense<0.000000e+00> : vector<64x128xf32>
    %129 = tpu.matmul %126, %128, %cst_134 {dimension_numbers = #tpu.dot_dimension_numbers<[1], [0], [0], [1], [0, 0, 1, 1], [], []>} : vector<64x128xbf16>, vector<128x128xbf16>, vector<64x128xf32> -> vector<64x128xf32>
    %130 = arith.addf %124, %129 : vector<64x128xf32>
    %c2_135 = arith.constant 2 : index
    %c9_136 = arith.constant 9 : index
    %c0_137 = arith.constant 0 : index
    %131 = vector.load %arg12[%c2_135, %c9_136, %c0_137] : memref<10x24x128xbf16, #tpu.memory_space<vmem>>, vector<8x8x128xbf16>
    %132 = vector.shape_cast %131 : vector<8x8x128xbf16> to vector<64x128xbf16>
    %c8_138 = arith.constant 8 : index
    %c0_139 = arith.constant 0 : index
    %c0_140 = arith.constant 0 : index
    %133 = vector.load %arg8[%c8_138, %c0_139, %c0_140] : memref<9x128x128xbf16, #tpu.memory_space<vmem>>, vector<1x128x128xbf16>
    %134 = vector.shape_cast %133 : vector<1x128x128xbf16> to vector<128x128xbf16>
    %cst_141 = arith.constant dense<0.000000e+00> : vector<64x128xf32>
    %135 = tpu.matmul %132, %134, %cst_141 {dimension_numbers = #tpu.dot_dimension_numbers<[1], [0], [0], [1], [0, 0, 1, 1], [], []>} : vector<64x128xbf16>, vector<128x128xbf16>, vector<64x128xf32> -> vector<64x128xf32>
    %136 = arith.addf %130, %135 : vector<64x128xf32>
    %cst_142 = arith.constant 0.000000e+00 : f32
    %137 = vector.broadcast %cst_142 : f32 to vector<64x128xf32>
    %138 = arith.maximumf %136, %137 : vector<64x128xf32>
    %c0_143 = arith.constant 0 : index
    %c0_144 = arith.constant 0 : index
    %139 = vector.load %arg9[%c0_143, %c0_144] : memref<1x128xf32, #tpu.memory_space<vmem>>, vector<1x128xf32>
    %140 = vector.broadcast %139 : vector<1x128xf32> to vector<64x128xf32>
    %141 = arith.mulf %138, %140 : vector<64x128xf32>
    %c0_145 = arith.constant 0 : index
    %c0_146 = arith.constant 0 : index
    %142 = vector.load %arg10[%c0_145, %c0_146] : memref<1x128xf32, #tpu.memory_space<vmem>>, vector<1x128xf32>
    %143 = vector.broadcast %142 : vector<1x128xf32> to vector<64x128xf32>
    %144 = arith.addf %141, %143 : vector<64x128xf32>
    %145 = arith.addf %144, %10 : vector<64x128xf32>
    %146 = vector.shape_cast %145 : vector<64x128xf32> to vector<1x8x8x128xf32>
    %147 = arith.truncf %146 : vector<1x8x8x128xf32> to vector<1x8x8x128xbf16>
    %c0_147 = arith.constant 0 : index
    %c0_148 = arith.constant 0 : index
    %c0_149 = arith.constant 0 : index
    %c0_150 = arith.constant 0 : index
    %148 = vector.load %arg11[%c0_147, %c0_148, %c0_149, %c0_150] : memref<1x8x8x128xbf16, #tpu.memory_space<vmem>>, vector<1x8x8x128xbf16>
    tpu.vector_store %arg11[%c0_147, %c0_148, %c0_149, %c0_150], %147 {strides = array<i32>} : memref<1x8x8x128xbf16, #tpu.memory_space<vmem>>, vector<1x8x8x128xbf16>,
    return
  }
  func.func @transform_0(%arg0: i32) -> (i32, i32) {
    %c0_i32 = arith.constant 0 : i32
    %c0_i32_0 = arith.constant 0 : i32
    return %arg0, %c0_i32 : i32, i32
  }
  func.func @transform_1(%arg0: i32) -> (i32, i32) {
    %c0_i32 = arith.constant 0 : i32
    %c0_i32_0 = arith.constant 0 : i32
    %c0_i32_1 = arith.constant 0 : i32
    return %c0_i32, %c0_i32_0 : i32, i32
  }
  func.func @transform_2(%arg0: i32) -> (i32, i32) {
    %c0_i32 = arith.constant 0 : i32
    %c0_i32_0 = arith.constant 0 : i32
    %c0_i32_1 = arith.constant 0 : i32
    return %c0_i32, %c0_i32_0 : i32, i32
  }
  func.func @transform_3(%arg0: i32) -> (i32, i32) {
    %c0_i32 = arith.constant 0 : i32
    %c0_i32_0 = arith.constant 0 : i32
    %c0_i32_1 = arith.constant 0 : i32
    return %c0_i32, %c0_i32_0 : i32, i32
  }
  func.func @transform_4(%arg0: i32) -> (i32, i32, i32) {
    %c0_i32 = arith.constant 0 : i32
    %c0_i32_0 = arith.constant 0 : i32
    %c0_i32_1 = arith.constant 0 : i32
    %c0_i32_2 = arith.constant 0 : i32
    return %c0_i32, %c0_i32_0, %c0_i32_1 : i32, i32, i32
  }
  func.func @transform_5(%arg0: i32) -> (i32, i32) {
    %c0_i32 = arith.constant 0 : i32
    %c0_i32_0 = arith.constant 0 : i32
    %c0_i32_1 = arith.constant 0 : i32
    return %c0_i32, %c0_i32_0 : i32, i32
  }
  func.func @transform_6(%arg0: i32) -> (i32, i32) {
    %c0_i32 = arith.constant 0 : i32
    %c0_i32_0 = arith.constant 0 : i32
    %c0_i32_1 = arith.constant 0 : i32
    return %c0_i32, %c0_i32_0 : i32, i32
  }
  func.func @transform_7(%arg0: i32) -> (i32, i32, i32) {
    %c0_i32 = arith.constant 0 : i32
    %c0_i32_0 = arith.constant 0 : i32
    %c0_i32_1 = arith.constant 0 : i32
    %c0_i32_2 = arith.constant 0 : i32
    return %c0_i32, %c0_i32_0, %c0_i32_1 : i32, i32, i32
  }
  func.func @transform_8(%arg0: i32) -> (i32, i32) {
    %c0_i32 = arith.constant 0 : i32
    %c0_i32_0 = arith.constant 0 : i32
    %c0_i32_1 = arith.constant 0 : i32
    return %c0_i32, %c0_i32_0 : i32, i32
  }
  func.func @transform_9(%arg0: i32) -> (i32, i32) {
    %c0_i32 = arith.constant 0 : i32
    %c0_i32_0 = arith.constant 0 : i32
    %c0_i32_1 = arith.constant 0 : i32
    return %c0_i32, %c0_i32_0 : i32, i32
  }
  func.func @transform_10(%arg0: i32) -> (i32, i32, i32, i32) {
    %c0_i32 = arith.constant 0 : i32
    %c0_i32_0 = arith.constant 0 : i32
    %c0_i32_1 = arith.constant 0 : i32
    %c0_i32_2 = arith.constant 0 : i32
    return %arg0, %c0_i32, %c0_i32_0, %c0_i32_1 : i32, i32, i32, i32
  }
}

module attributes {stable_mosaic.version = 11 : i64} {
  func.func @_l2_block2_kernel(%arg0: i32, %arg1: memref<4x1x5x5x128xbf16, #tpu.memory_space<vmem>>, %arg2: memref<9x128x128xbf16, #tpu.memory_space<vmem>>, %arg3: memref<1x128xf32, #tpu.memory_space<vmem>>, %arg4: memref<1x128xf32, #tpu.memory_space<vmem>>, %arg5: memref<9x128x128xbf16, #tpu.memory_space<vmem>>, %arg6: memref<1x128xf32, #tpu.memory_space<vmem>>, %arg7: memref<1x128xf32, #tpu.memory_space<vmem>>, %arg8: memref<9x128x128xbf16, #tpu.memory_space<vmem>>, %arg9: memref<1x128xf32, #tpu.memory_space<vmem>>, %arg10: memref<1x128xf32, #tpu.memory_space<vmem>>, %arg11: memref<1x4x4x128xbf16, #tpu.memory_space<vmem>>, %arg12: memref<6x16x128xbf16, #tpu.memory_space<vmem>>) attributes {dimension_semantics = [#tpu.dimension_semantics<parallel>], iteration_bounds = array<i64: 2>, scalar_prefetch = 0 : i64, scratch_operands = 1 : i64, tpu.core_type = #tpu.core_type<tc>, window_params = [{transform_indices = @transform_0, window_bounds = array<i64: 4, 1, 5, 5, 128>}, {pipeline_mode = #tpu.pipeline_mode<synchronous>, transform_indices = @transform_1, window_bounds = array<i64: 9, 128, 128>}, {pipeline_mode = #tpu.pipeline_mode<synchronous>, transform_indices = @transform_2, window_bounds = array<i64: 1, 128>}, {pipeline_mode = #tpu.pipeline_mode<synchronous>, transform_indices = @transform_3, window_bounds = array<i64: 1, 128>}, {pipeline_mode = #tpu.pipeline_mode<synchronous>, transform_indices = @transform_4, window_bounds = array<i64: 9, 128, 128>}, {pipeline_mode = #tpu.pipeline_mode<synchronous>, transform_indices = @transform_5, window_bounds = array<i64: 1, 128>}, {pipeline_mode = #tpu.pipeline_mode<synchronous>, transform_indices = @transform_6, window_bounds = array<i64: 1, 128>}, {pipeline_mode = #tpu.pipeline_mode<synchronous>, transform_indices = @transform_7, window_bounds = array<i64: 9, 128, 128>}, {pipeline_mode = #tpu.pipeline_mode<synchronous>, transform_indices = @transform_8, window_bounds = array<i64: 1, 128>}, {pipeline_mode = #tpu.pipeline_mode<synchronous>, transform_indices = @transform_9, window_bounds = array<i64: 1, 128>}, {transform_indices = @transform_10, window_bounds = array<i64: 1, 4, 4, 128>}]} {
    %cst = arith.constant 0.000000e+00 : f32
    %0 = vector.broadcast %cst : f32 to vector<16x128xf32>
    %c0 = arith.constant 0 : index
    %c0_0 = arith.constant 0 : index
    %c0_1 = arith.constant 0 : index
    %c0_2 = arith.constant 0 : index
    %c0_3 = arith.constant 0 : index
    %1 = vector.load %arg1[%c0, %c0_0, %c0_1, %c0_2, %c0_3] : memref<4x1x5x5x128xbf16, #tpu.memory_space<vmem>>, vector<1x1x4x4x128xbf16>
    %2 = vector.shape_cast %1 : vector<1x1x4x4x128xbf16> to vector<4x4x128xbf16>
    %3 = vector.shape_cast %2 : vector<4x4x128xbf16> to vector<16x128xbf16>
    %c0_4 = arith.constant 0 : index
    %c0_5 = arith.constant 0 : index
    %c0_6 = arith.constant 0 : index
    %4 = vector.load %arg2[%c0_4, %c0_5, %c0_6] : memref<9x128x128xbf16, #tpu.memory_space<vmem>>, vector<1x128x128xbf16>
    %5 = vector.shape_cast %4 : vector<1x128x128xbf16> to vector<128x128xbf16>
    %cst_7 = arith.constant dense<0.000000e+00> : vector<16x128xf32>
    %6 = tpu.matmul %3, %5, %cst_7 {dimension_numbers = #tpu.dot_dimension_numbers<[1], [0], [0], [1], [0, 0, 1, 1], [], []>} : vector<16x128xbf16>, vector<128x128xbf16>, vector<16x128xf32> -> vector<16x128xf32>
    %7 = arith.addf %0, %6 : vector<16x128xf32>
    %c1 = arith.constant 1 : index
    %c0_8 = arith.constant 0 : index
    %c0_9 = arith.constant 0 : index
    %c0_10 = arith.constant 0 : index
    %c0_11 = arith.constant 0 : index
    %8 = vector.load %arg1[%c1, %c0_8, %c0_9, %c0_10, %c0_11] : memref<4x1x5x5x128xbf16, #tpu.memory_space<vmem>>, vector<1x1x4x4x128xbf16>
    %9 = vector.shape_cast %8 : vector<1x1x4x4x128xbf16> to vector<4x4x128xbf16>
    %10 = vector.shape_cast %9 : vector<4x4x128xbf16> to vector<16x128xbf16>
    %c1_12 = arith.constant 1 : index
    %c0_13 = arith.constant 0 : index
    %c0_14 = arith.constant 0 : index
    %11 = vector.load %arg2[%c1_12, %c0_13, %c0_14] : memref<9x128x128xbf16, #tpu.memory_space<vmem>>, vector<1x128x128xbf16>
    %12 = vector.shape_cast %11 : vector<1x128x128xbf16> to vector<128x128xbf16>
    %cst_15 = arith.constant dense<0.000000e+00> : vector<16x128xf32>
    %13 = tpu.matmul %10, %12, %cst_15 {dimension_numbers = #tpu.dot_dimension_numbers<[1], [0], [0], [1], [0, 0, 1, 1], [], []>} : vector<16x128xbf16>, vector<128x128xbf16>, vector<16x128xf32> -> vector<16x128xf32>
    %14 = arith.addf %7, %13 : vector<16x128xf32>
    %c0_16 = arith.constant 0 : index
    %c0_17 = arith.constant 0 : index
    %c0_18 = arith.constant 0 : index
    %c1_19 = arith.constant 1 : index
    %c0_20 = arith.constant 0 : index
    %15 = vector.load %arg1[%c0_16, %c0_17, %c0_18, %c1_19, %c0_20] : memref<4x1x5x5x128xbf16, #tpu.memory_space<vmem>>, vector<1x1x4x4x128xbf16>
    %16 = vector.shape_cast %15 : vector<1x1x4x4x128xbf16> to vector<4x4x128xbf16>
    %17 = vector.shape_cast %16 : vector<4x4x128xbf16> to vector<16x128xbf16>
    %c2 = arith.constant 2 : index
    %c0_21 = arith.constant 0 : index
    %c0_22 = arith.constant 0 : index
    %18 = vector.load %arg2[%c2, %c0_21, %c0_22] : memref<9x128x128xbf16, #tpu.memory_space<vmem>>, vector<1x128x128xbf16>
    %19 = vector.shape_cast %18 : vector<1x128x128xbf16> to vector<128x128xbf16>
    %cst_23 = arith.constant dense<0.000000e+00> : vector<16x128xf32>
    %20 = tpu.matmul %17, %19, %cst_23 {dimension_numbers = #tpu.dot_dimension_numbers<[1], [0], [0], [1], [0, 0, 1, 1], [], []>} : vector<16x128xbf16>, vector<128x128xbf16>, vector<16x128xf32> -> vector<16x128xf32>
    %21 = arith.addf %14, %20 : vector<16x128xf32>
    %c2_24 = arith.constant 2 : index
    %c0_25 = arith.constant 0 : index
    %c0_26 = arith.constant 0 : index
    %c0_27 = arith.constant 0 : index
    %c0_28 = arith.constant 0 : index
    %22 = vector.load %arg1[%c2_24, %c0_25, %c0_26, %c0_27, %c0_28] : memref<4x1x5x5x128xbf16, #tpu.memory_space<vmem>>, vector<1x1x4x4x128xbf16>
    %23 = vector.shape_cast %22 : vector<1x1x4x4x128xbf16> to vector<4x4x128xbf16>
    %24 = vector.shape_cast %23 : vector<4x4x128xbf16> to vector<16x128xbf16>
    %c3 = arith.constant 3 : index
    %c0_29 = arith.constant 0 : index
    %c0_30 = arith.constant 0 : index
    %25 = vector.load %arg2[%c3, %c0_29, %c0_30] : memref<9x128x128xbf16, #tpu.memory_space<vmem>>, vector<1x128x128xbf16>
    %26 = vector.shape_cast %25 : vector<1x128x128xbf16> to vector<128x128xbf16>
    %cst_31 = arith.constant dense<0.000000e+00> : vector<16x128xf32>
    %27 = tpu.matmul %24, %26, %cst_31 {dimension_numbers = #tpu.dot_dimension_numbers<[1], [0], [0], [1], [0, 0, 1, 1], [], []>} : vector<16x128xbf16>, vector<128x128xbf16>, vector<16x128xf32> -> vector<16x128xf32>
    %28 = arith.addf %21, %27 : vector<16x128xf32>
    %c3_32 = arith.constant 3 : index
    %c0_33 = arith.constant 0 : index
    %c0_34 = arith.constant 0 : index
    %c0_35 = arith.constant 0 : index
    %c0_36 = arith.constant 0 : index
    %29 = vector.load %arg1[%c3_32, %c0_33, %c0_34, %c0_35, %c0_36] : memref<4x1x5x5x128xbf16, #tpu.memory_space<vmem>>, vector<1x1x4x4x128xbf16>
    %30 = vector.shape_cast %29 : vector<1x1x4x4x128xbf16> to vector<4x4x128xbf16>
    %31 = vector.shape_cast %30 : vector<4x4x128xbf16> to vector<16x128xbf16>
    %c4 = arith.constant 4 : index
    %c0_37 = arith.constant 0 : index
    %c0_38 = arith.constant 0 : index
    %32 = vector.load %arg2[%c4, %c0_37, %c0_38] : memref<9x128x128xbf16, #tpu.memory_space<vmem>>, vector<1x128x128xbf16>
    %33 = vector.shape_cast %32 : vector<1x128x128xbf16> to vector<128x128xbf16>
    %cst_39 = arith.constant dense<0.000000e+00> : vector<16x128xf32>
    %34 = tpu.matmul %31, %33, %cst_39 {dimension_numbers = #tpu.dot_dimension_numbers<[1], [0], [0], [1], [0, 0, 1, 1], [], []>} : vector<16x128xbf16>, vector<128x128xbf16>, vector<16x128xf32> -> vector<16x128xf32>
    %35 = arith.addf %28, %34 : vector<16x128xf32>
    %c2_40 = arith.constant 2 : index
    %c0_41 = arith.constant 0 : index
    %c0_42 = arith.constant 0 : index
    %c1_43 = arith.constant 1 : index
    %c0_44 = arith.constant 0 : index
    %36 = vector.load %arg1[%c2_40, %c0_41, %c0_42, %c1_43, %c0_44] : memref<4x1x5x5x128xbf16, #tpu.memory_space<vmem>>, vector<1x1x4x4x128xbf16>
    %37 = vector.shape_cast %36 : vector<1x1x4x4x128xbf16> to vector<4x4x128xbf16>
    %38 = vector.shape_cast %37 : vector<4x4x128xbf16> to vector<16x128xbf16>
    %c5 = arith.constant 5 : index
    %c0_45 = arith.constant 0 : index
    %c0_46 = arith.constant 0 : index
    %39 = vector.load %arg2[%c5, %c0_45, %c0_46] : memref<9x128x128xbf16, #tpu.memory_space<vmem>>, vector<1x128x128xbf16>
    %40 = vector.shape_cast %39 : vector<1x128x128xbf16> to vector<128x128xbf16>
    %cst_47 = arith.constant dense<0.000000e+00> : vector<16x128xf32>
    %41 = tpu.matmul %38, %40, %cst_47 {dimension_numbers = #tpu.dot_dimension_numbers<[1], [0], [0], [1], [0, 0, 1, 1], [], []>} : vector<16x128xbf16>, vector<128x128xbf16>, vector<16x128xf32> -> vector<16x128xf32>
    %42 = arith.addf %35, %41 : vector<16x128xf32>
    %c0_48 = arith.constant 0 : index
    %c0_49 = arith.constant 0 : index
    %c1_50 = arith.constant 1 : index
    %c0_51 = arith.constant 0 : index
    %c0_52 = arith.constant 0 : index
    %43 = vector.load %arg1[%c0_48, %c0_49, %c1_50, %c0_51, %c0_52] : memref<4x1x5x5x128xbf16, #tpu.memory_space<vmem>>, vector<1x1x4x4x128xbf16>
    %44 = vector.shape_cast %43 : vector<1x1x4x4x128xbf16> to vector<4x4x128xbf16>
    %45 = vector.shape_cast %44 : vector<4x4x128xbf16> to vector<16x128xbf16>
    %c6 = arith.constant 6 : index
    %c0_53 = arith.constant 0 : index
    %c0_54 = arith.constant 0 : index
    %46 = vector.load %arg2[%c6, %c0_53, %c0_54] : memref<9x128x128xbf16, #tpu.memory_space<vmem>>, vector<1x128x128xbf16>
    %47 = vector.shape_cast %46 : vector<1x128x128xbf16> to vector<128x128xbf16>
    %cst_55 = arith.constant dense<0.000000e+00> : vector<16x128xf32>
    %48 = tpu.matmul %45, %47, %cst_55 {dimension_numbers = #tpu.dot_dimension_numbers<[1], [0], [0], [1], [0, 0, 1, 1], [], []>} : vector<16x128xbf16>, vector<128x128xbf16>, vector<16x128xf32> -> vector<16x128xf32>
    %49 = arith.addf %42, %48 : vector<16x128xf32>
    %c1_56 = arith.constant 1 : index
    %c0_57 = arith.constant 0 : index
    %c1_58 = arith.constant 1 : index
    %c0_59 = arith.constant 0 : index
    %c0_60 = arith.constant 0 : index
    %50 = vector.load %arg1[%c1_56, %c0_57, %c1_58, %c0_59, %c0_60] : memref<4x1x5x5x128xbf16, #tpu.memory_space<vmem>>, vector<1x1x4x4x128xbf16>
    %51 = vector.shape_cast %50 : vector<1x1x4x4x128xbf16> to vector<4x4x128xbf16>
    %52 = vector.shape_cast %51 : vector<4x4x128xbf16> to vector<16x128xbf16>
    %c7 = arith.constant 7 : index
    %c0_61 = arith.constant 0 : index
    %c0_62 = arith.constant 0 : index
    %53 = vector.load %arg2[%c7, %c0_61, %c0_62] : memref<9x128x128xbf16, #tpu.memory_space<vmem>>, vector<1x128x128xbf16>
    %54 = vector.shape_cast %53 : vector<1x128x128xbf16> to vector<128x128xbf16>
    %cst_63 = arith.constant dense<0.000000e+00> : vector<16x128xf32>
    %55 = tpu.matmul %52, %54, %cst_63 {dimension_numbers = #tpu.dot_dimension_numbers<[1], [0], [0], [1], [0, 0, 1, 1], [], []>} : vector<16x128xbf16>, vector<128x128xbf16>, vector<16x128xf32> -> vector<16x128xf32>
    %56 = arith.addf %49, %55 : vector<16x128xf32>
    %c0_64 = arith.constant 0 : index
    %c0_65 = arith.constant 0 : index
    %c1_66 = arith.constant 1 : index
    %c1_67 = arith.constant 1 : index
    %c0_68 = arith.constant 0 : index
    %57 = vector.load %arg1[%c0_64, %c0_65, %c1_66, %c1_67, %c0_68] : memref<4x1x5x5x128xbf16, #tpu.memory_space<vmem>>, vector<1x1x4x4x128xbf16>
    %58 = vector.shape_cast %57 : vector<1x1x4x4x128xbf16> to vector<4x4x128xbf16>
    %59 = vector.shape_cast %58 : vector<4x4x128xbf16> to vector<16x128xbf16>
    %c8 = arith.constant 8 : index
    %c0_69 = arith.constant 0 : index
    %c0_70 = arith.constant 0 : index
    %60 = vector.load %arg2[%c8, %c0_69, %c0_70] : memref<9x128x128xbf16, #tpu.memory_space<vmem>>, vector<1x128x128xbf16>
    %61 = vector.shape_cast %60 : vector<1x128x128xbf16> to vector<128x128xbf16>
    %cst_71 = arith.constant dense<0.000000e+00> : vector<16x128xf32>
    %62 = tpu.matmul %59, %61, %cst_71 {dimension_numbers = #tpu.dot_dimension_numbers<[1], [0], [0], [1], [0, 0, 1, 1], [], []>} : vector<16x128xbf16>, vector<128x128xbf16>, vector<16x128xf32> -> vector<16x128xf32>
    %63 = arith.addf %56, %62 : vector<16x128xf32>
    %cst_72 = arith.constant 0.000000e+00 : f32
    %64 = vector.broadcast %cst_72 : f32 to vector<16x128xf32>
    %65 = arith.maximumf %63, %64 : vector<16x128xf32>
    %c0_73 = arith.constant 0 : index
    %c0_74 = arith.constant 0 : index
    %66 = vector.load %arg3[%c0_73, %c0_74] : memref<1x128xf32, #tpu.memory_space<vmem>>, vector<1x128xf32>
    %67 = vector.broadcast %66 : vector<1x128xf32> to vector<16x128xf32>
    %68 = arith.mulf %65, %67 : vector<16x128xf32>
    %c0_75 = arith.constant 0 : index
    %c0_76 = arith.constant 0 : index
    %69 = vector.load %arg4[%c0_75, %c0_76] : memref<1x128xf32, #tpu.memory_space<vmem>>, vector<1x128xf32>
    %70 = vector.broadcast %69 : vector<1x128xf32> to vector<16x128xf32>
    %71 = arith.addf %68, %70 : vector<16x128xf32>
    %cst_77 = arith.constant 0.000000e+00 : bf16
    %72 = vector.broadcast %cst_77 : bf16 to vector<6x16x128xbf16>
    %c0_78 = arith.constant 0 : index
    %c0_79 = arith.constant 0 : index
    %c0_80 = arith.constant 0 : index
    %73 = vector.load %arg12[%c0_78, %c0_79, %c0_80] : memref<6x16x128xbf16, #tpu.memory_space<vmem>>, vector<6x16x128xbf16>
    tpu.vector_store %arg12[%c0_78, %c0_79, %c0_80], %72 {strides = array<i32>} : memref<6x16x128xbf16, #tpu.memory_space<vmem>>, vector<6x16x128xbf16>,
    %74 = arith.truncf %71 : vector<16x128xf32> to vector<16x128xbf16>
    %75 = vector.shape_cast %74 : vector<16x128xbf16> to vector<4x4x128xbf16>
    %c1_81 = arith.constant 1 : index
    %c8_82 = arith.constant 8 : index
    %c0_83 = arith.constant 0 : index
    %76 = vector.load %arg12[%c1_81, %c8_82, %c0_83] : memref<6x16x128xbf16, #tpu.memory_space<vmem>>, vector<4x4x128xbf16>
    tpu.vector_store %arg12[%c1_81, %c8_82, %c0_83], %75 {strides = array<i32>} : memref<6x16x128xbf16, #tpu.memory_space<vmem>>, vector<4x4x128xbf16>,
    %cst_84 = arith.constant 0.000000e+00 : f32
    %77 = vector.broadcast %cst_84 : f32 to vector<16x128xf32>
    %c0_85 = arith.constant 0 : index
    %c7_86 = arith.constant 7 : index
    %c0_87 = arith.constant 0 : index
    %78 = vector.load %arg12[%c0_85, %c7_86, %c0_87] : memref<6x16x128xbf16, #tpu.memory_space<vmem>>, vector<4x4x128xbf16>
    %79 = vector.shape_cast %78 : vector<4x4x128xbf16> to vector<16x128xbf16>
    %c0_88 = arith.constant 0 : index
    %c0_89 = arith.constant 0 : index
    %c0_90 = arith.constant 0 : index
    %80 = vector.load %arg5[%c0_88, %c0_89, %c0_90] : memref<9x128x128xbf16, #tpu.memory_space<vmem>>, vector<1x128x128xbf16>
    %81 = vector.shape_cast %80 : vector<1x128x128xbf16> to vector<128x128xbf16>
    %cst_91 = arith.constant dense<0.000000e+00> : vector<16x128xf32>
    %82 = tpu.matmul %79, %81, %cst_91 {dimension_numbers = #tpu.dot_dimension_numbers<[1], [0], [0], [1], [0, 0, 1, 1], [], []>} : vector<16x128xbf16>, vector<128x128xbf16>, vector<16x128xf32> -> vector<16x128xf32>
    %83 = arith.addf %77, %82 : vector<16x128xf32>
    %c0_92 = arith.constant 0 : index
    %c8_93 = arith.constant 8 : index
    %c0_94 = arith.constant 0 : index
    %84 = vector.load %arg12[%c0_92, %c8_93, %c0_94] : memref<6x16x128xbf16, #tpu.memory_space<vmem>>, vector<4x4x128xbf16>
    %85 = vector.shape_cast %84 : vector<4x4x128xbf16> to vector<16x128xbf16>
    %c1_95 = arith.constant 1 : index
    %c0_96 = arith.constant 0 : index
    %c0_97 = arith.constant 0 : index
    %86 = vector.load %arg5[%c1_95, %c0_96, %c0_97] : memref<9x128x128xbf16, #tpu.memory_space<vmem>>, vector<1x128x128xbf16>
    %87 = vector.shape_cast %86 : vector<1x128x128xbf16> to vector<128x128xbf16>
    %cst_98 = arith.constant dense<0.000000e+00> : vector<16x128xf32>
    %88 = tpu.matmul %85, %87, %cst_98 {dimension_numbers = #tpu.dot_dimension_numbers<[1], [0], [0], [1], [0, 0, 1, 1], [], []>} : vector<16x128xbf16>, vector<128x128xbf16>, vector<16x128xf32> -> vector<16x128xf32>
    %89 = arith.addf %83, %88 : vector<16x128xf32>
    %c0_99 = arith.constant 0 : index
    %c9 = arith.constant 9 : index
    %c0_100 = arith.constant 0 : index
    %90 = vector.load %arg12[%c0_99, %c9, %c0_100] : memref<6x16x128xbf16, #tpu.memory_space<vmem>>, vector<4x4x128xbf16>
    %91 = vector.shape_cast %90 : vector<4x4x128xbf16> to vector<16x128xbf16>
    %c2_101 = arith.constant 2 : index
    %c0_102 = arith.constant 0 : index
    %c0_103 = arith.constant 0 : index
    %92 = vector.load %arg5[%c2_101, %c0_102, %c0_103] : memref<9x128x128xbf16, #tpu.memory_space<vmem>>, vector<1x128x128xbf16>
    %93 = vector.shape_cast %92 : vector<1x128x128xbf16> to vector<128x128xbf16>
    %cst_104 = arith.constant dense<0.000000e+00> : vector<16x128xf32>
    %94 = tpu.matmul %91, %93, %cst_104 {dimension_numbers = #tpu.dot_dimension_numbers<[1], [0], [0], [1], [0, 0, 1, 1], [], []>} : vector<16x128xbf16>, vector<128x128xbf16>, vector<16x128xf32> -> vector<16x128xf32>
    %95 = arith.addf %89, %94 : vector<16x128xf32>
    %c1_105 = arith.constant 1 : index
    %c7_106 = arith.constant 7 : index
    %c0_107 = arith.constant 0 : index
    %96 = vector.load %arg12[%c1_105, %c7_106, %c0_107] : memref<6x16x128xbf16, #tpu.memory_space<vmem>>, vector<4x4x128xbf16>
    %97 = vector.shape_cast %96 : vector<4x4x128xbf16> to vector<16x128xbf16>
    %c3_108 = arith.constant 3 : index
    %c0_109 = arith.constant 0 : index
    %c0_110 = arith.constant 0 : index
    %98 = vector.load %arg5[%c3_108, %c0_109, %c0_110] : memref<9x128x128xbf16, #tpu.memory_space<vmem>>, vector<1x128x128xbf16>
    %99 = vector.shape_cast %98 : vector<1x128x128xbf16> to vector<128x128xbf16>
    %cst_111 = arith.constant dense<0.000000e+00> : vector<16x128xf32>
    %100 = tpu.matmul %97, %99, %cst_111 {dimension_numbers = #tpu.dot_dimension_numbers<[1], [0], [0], [1], [0, 0, 1, 1], [], []>} : vector<16x128xbf16>, vector<128x128xbf16>, vector<16x128xf32> -> vector<16x128xf32>
    %101 = arith.addf %95, %100 : vector<16x128xf32>
    %c1_112 = arith.constant 1 : index
    %c8_113 = arith.constant 8 : index
    %c0_114 = arith.constant 0 : index
    %102 = vector.load %arg12[%c1_112, %c8_113, %c0_114] : memref<6x16x128xbf16, #tpu.memory_space<vmem>>, vector<4x4x128xbf16>
    %103 = vector.shape_cast %102 : vector<4x4x128xbf16> to vector<16x128xbf16>
    %c4_115 = arith.constant 4 : index
    %c0_116 = arith.constant 0 : index
    %c0_117 = arith.constant 0 : index
    %104 = vector.load %arg5[%c4_115, %c0_116, %c0_117] : memref<9x128x128xbf16, #tpu.memory_space<vmem>>, vector<1x128x128xbf16>
    %105 = vector.shape_cast %104 : vector<1x128x128xbf16> to vector<128x128xbf16>
    %cst_118 = arith.constant dense<0.000000e+00> : vector<16x128xf32>
    %106 = tpu.matmul %103, %105, %cst_118 {dimension_numbers = #tpu.dot_dimension_numbers<[1], [0], [0], [1], [0, 0, 1, 1], [], []>} : vector<16x128xbf16>, vector<128x128xbf16>, vector<16x128xf32> -> vector<16x128xf32>
    %107 = arith.addf %101, %106 : vector<16x128xf32>
    %c1_119 = arith.constant 1 : index
    %c9_120 = arith.constant 9 : index
    %c0_121 = arith.constant 0 : index
    %108 = vector.load %arg12[%c1_119, %c9_120, %c0_121] : memref<6x16x128xbf16, #tpu.memory_space<vmem>>, vector<4x4x128xbf16>
    %109 = vector.shape_cast %108 : vector<4x4x128xbf16> to vector<16x128xbf16>
    %c5_122 = arith.constant 5 : index
    %c0_123 = arith.constant 0 : index
    %c0_124 = arith.constant 0 : index
    %110 = vector.load %arg5[%c5_122, %c0_123, %c0_124] : memref<9x128x128xbf16, #tpu.memory_space<vmem>>, vector<1x128x128xbf16>
    %111 = vector.shape_cast %110 : vector<1x128x128xbf16> to vector<128x128xbf16>
    %cst_125 = arith.constant dense<0.000000e+00> : vector<16x128xf32>
    %112 = tpu.matmul %109, %111, %cst_125 {dimension_numbers = #tpu.dot_dimension_numbers<[1], [0], [0], [1], [0, 0, 1, 1], [], []>} : vector<16x128xbf16>, vector<128x128xbf16>, vector<16x128xf32> -> vector<16x128xf32>
    %113 = arith.addf %107, %112 : vector<16x128xf32>
    %c2_126 = arith.constant 2 : index
    %c7_127 = arith.constant 7 : index
    %c0_128 = arith.constant 0 : index
    %114 = vector.load %arg12[%c2_126, %c7_127, %c0_128] : memref<6x16x128xbf16, #tpu.memory_space<vmem>>, vector<4x4x128xbf16>
    %115 = vector.shape_cast %114 : vector<4x4x128xbf16> to vector<16x128xbf16>
    %c6_129 = arith.constant 6 : index
    %c0_130 = arith.constant 0 : index
    %c0_131 = arith.constant 0 : index
    %116 = vector.load %arg5[%c6_129, %c0_130, %c0_131] : memref<9x128x128xbf16, #tpu.memory_space<vmem>>, vector<1x128x128xbf16>
    %117 = vector.shape_cast %116 : vector<1x128x128xbf16> to vector<128x128xbf16>
    %cst_132 = arith.constant dense<0.000000e+00> : vector<16x128xf32>
    %118 = tpu.matmul %115, %117, %cst_132 {dimension_numbers = #tpu.dot_dimension_numbers<[1], [0], [0], [1], [0, 0, 1, 1], [], []>} : vector<16x128xbf16>, vector<128x128xbf16>, vector<16x128xf32> -> vector<16x128xf32>
    %119 = arith.addf %113, %118 : vector<16x128xf32>
    %c2_133 = arith.constant 2 : index
    %c8_134 = arith.constant 8 : index
    %c0_135 = arith.constant 0 : index
    %120 = vector.load %arg12[%c2_133, %c8_134, %c0_135] : memref<6x16x128xbf16, #tpu.memory_space<vmem>>, vector<4x4x128xbf16>
    %121 = vector.shape_cast %120 : vector<4x4x128xbf16> to vector<16x128xbf16>
    %c7_136 = arith.constant 7 : index
    %c0_137 = arith.constant 0 : index
    %c0_138 = arith.constant 0 : index
    %122 = vector.load %arg5[%c7_136, %c0_137, %c0_138] : memref<9x128x128xbf16, #tpu.memory_space<vmem>>, vector<1x128x128xbf16>
    %123 = vector.shape_cast %122 : vector<1x128x128xbf16> to vector<128x128xbf16>
    %cst_139 = arith.constant dense<0.000000e+00> : vector<16x128xf32>
    %124 = tpu.matmul %121, %123, %cst_139 {dimension_numbers = #tpu.dot_dimension_numbers<[1], [0], [0], [1], [0, 0, 1, 1], [], []>} : vector<16x128xbf16>, vector<128x128xbf16>, vector<16x128xf32> -> vector<16x128xf32>
    %125 = arith.addf %119, %124 : vector<16x128xf32>
    %c2_140 = arith.constant 2 : index
    %c9_141 = arith.constant 9 : index
    %c0_142 = arith.constant 0 : index
    %126 = vector.load %arg12[%c2_140, %c9_141, %c0_142] : memref<6x16x128xbf16, #tpu.memory_space<vmem>>, vector<4x4x128xbf16>
    %127 = vector.shape_cast %126 : vector<4x4x128xbf16> to vector<16x128xbf16>
    %c8_143 = arith.constant 8 : index
    %c0_144 = arith.constant 0 : index
    %c0_145 = arith.constant 0 : index
    %128 = vector.load %arg5[%c8_143, %c0_144, %c0_145] : memref<9x128x128xbf16, #tpu.memory_space<vmem>>, vector<1x128x128xbf16>
    %129 = vector.shape_cast %128 : vector<1x128x128xbf16> to vector<128x128xbf16>
    %cst_146 = arith.constant dense<0.000000e+00> : vector<16x128xf32>
    %130 = tpu.matmul %127, %129, %cst_146 {dimension_numbers = #tpu.dot_dimension_numbers<[1], [0], [0], [1], [0, 0, 1, 1], [], []>} : vector<16x128xbf16>, vector<128x128xbf16>, vector<16x128xf32> -> vector<16x128xf32>
    %131 = arith.addf %125, %130 : vector<16x128xf32>
    %cst_147 = arith.constant 0.000000e+00 : f32
    %132 = vector.broadcast %cst_147 : f32 to vector<16x128xf32>
    %133 = arith.maximumf %131, %132 : vector<16x128xf32>
    %c0_148 = arith.constant 0 : index
    %c0_149 = arith.constant 0 : index
    %134 = vector.load %arg6[%c0_148, %c0_149] : memref<1x128xf32, #tpu.memory_space<vmem>>, vector<1x128xf32>
    %135 = vector.broadcast %134 : vector<1x128xf32> to vector<16x128xf32>
    %136 = arith.mulf %133, %135 : vector<16x128xf32>
    %c0_150 = arith.constant 0 : index
    %c0_151 = arith.constant 0 : index
    %137 = vector.load %arg7[%c0_150, %c0_151] : memref<1x128xf32, #tpu.memory_space<vmem>>, vector<1x128xf32>
    %138 = vector.broadcast %137 : vector<1x128xf32> to vector<16x128xf32>
    %139 = arith.addf %136, %138 : vector<16x128xf32>
    %140 = arith.truncf %139 : vector<16x128xf32> to vector<16x128xbf16>
    %141 = vector.shape_cast %140 : vector<16x128xbf16> to vector<4x4x128xbf16>
    %c1_152 = arith.constant 1 : index
    %c8_153 = arith.constant 8 : index
    %c0_154 = arith.constant 0 : index
    %142 = vector.load %arg12[%c1_152, %c8_153, %c0_154] : memref<6x16x128xbf16, #tpu.memory_space<vmem>>, vector<4x4x128xbf16>
    tpu.vector_store %arg12[%c1_152, %c8_153, %c0_154], %141 {strides = array<i32>} : memref<6x16x128xbf16, #tpu.memory_space<vmem>>, vector<4x4x128xbf16>,
    %cst_155 = arith.constant 0.000000e+00 : f32
    %143 = vector.broadcast %cst_155 : f32 to vector<16x128xf32>
    %c0_156 = arith.constant 0 : index
    %c7_157 = arith.constant 7 : index
    %c0_158 = arith.constant 0 : index
    %144 = vector.load %arg12[%c0_156, %c7_157, %c0_158] : memref<6x16x128xbf16, #tpu.memory_space<vmem>>, vector<4x4x128xbf16>
    %145 = vector.shape_cast %144 : vector<4x4x128xbf16> to vector<16x128xbf16>
    %c0_159 = arith.constant 0 : index
    %c0_160 = arith.constant 0 : index
    %c0_161 = arith.constant 0 : index
    %146 = vector.load %arg8[%c0_159, %c0_160, %c0_161] : memref<9x128x128xbf16, #tpu.memory_space<vmem>>, vector<1x128x128xbf16>
    %147 = vector.shape_cast %146 : vector<1x128x128xbf16> to vector<128x128xbf16>
    %cst_162 = arith.constant dense<0.000000e+00> : vector<16x128xf32>
    %148 = tpu.matmul %145, %147, %cst_162 {dimension_numbers = #tpu.dot_dimension_numbers<[1], [0], [0], [1], [0, 0, 1, 1], [], []>} : vector<16x128xbf16>, vector<128x128xbf16>, vector<16x128xf32> -> vector<16x128xf32>
    %149 = arith.addf %143, %148 : vector<16x128xf32>
    %c0_163 = arith.constant 0 : index
    %c8_164 = arith.constant 8 : index
    %c0_165 = arith.constant 0 : index
    %150 = vector.load %arg12[%c0_163, %c8_164, %c0_165] : memref<6x16x128xbf16, #tpu.memory_space<vmem>>, vector<4x4x128xbf16>
    %151 = vector.shape_cast %150 : vector<4x4x128xbf16> to vector<16x128xbf16>
    %c1_166 = arith.constant 1 : index
    %c0_167 = arith.constant 0 : index
    %c0_168 = arith.constant 0 : index
    %152 = vector.load %arg8[%c1_166, %c0_167, %c0_168] : memref<9x128x128xbf16, #tpu.memory_space<vmem>>, vector<1x128x128xbf16>
    %153 = vector.shape_cast %152 : vector<1x128x128xbf16> to vector<128x128xbf16>
    %cst_169 = arith.constant dense<0.000000e+00> : vector<16x128xf32>
    %154 = tpu.matmul %151, %153, %cst_169 {dimension_numbers = #tpu.dot_dimension_numbers<[1], [0], [0], [1], [0, 0, 1, 1], [], []>} : vector<16x128xbf16>, vector<128x128xbf16>, vector<16x128xf32> -> vector<16x128xf32>
    %155 = arith.addf %149, %154 : vector<16x128xf32>
    %c0_170 = arith.constant 0 : index
    %c9_171 = arith.constant 9 : index
    %c0_172 = arith.constant 0 : index
    %156 = vector.load %arg12[%c0_170, %c9_171, %c0_172] : memref<6x16x128xbf16, #tpu.memory_space<vmem>>, vector<4x4x128xbf16>
    %157 = vector.shape_cast %156 : vector<4x4x128xbf16> to vector<16x128xbf16>
    %c2_173 = arith.constant 2 : index
    %c0_174 = arith.constant 0 : index
    %c0_175 = arith.constant 0 : index
    %158 = vector.load %arg8[%c2_173, %c0_174, %c0_175] : memref<9x128x128xbf16, #tpu.memory_space<vmem>>, vector<1x128x128xbf16>
    %159 = vector.shape_cast %158 : vector<1x128x128xbf16> to vector<128x128xbf16>
    %cst_176 = arith.constant dense<0.000000e+00> : vector<16x128xf32>
    %160 = tpu.matmul %157, %159, %cst_176 {dimension_numbers = #tpu.dot_dimension_numbers<[1], [0], [0], [1], [0, 0, 1, 1], [], []>} : vector<16x128xbf16>, vector<128x128xbf16>, vector<16x128xf32> -> vector<16x128xf32>
    %161 = arith.addf %155, %160 : vector<16x128xf32>
    %c1_177 = arith.constant 1 : index
    %c7_178 = arith.constant 7 : index
    %c0_179 = arith.constant 0 : index
    %162 = vector.load %arg12[%c1_177, %c7_178, %c0_179] : memref<6x16x128xbf16, #tpu.memory_space<vmem>>, vector<4x4x128xbf16>
    %163 = vector.shape_cast %162 : vector<4x4x128xbf16> to vector<16x128xbf16>
    %c3_180 = arith.constant 3 : index
    %c0_181 = arith.constant 0 : index
    %c0_182 = arith.constant 0 : index
    %164 = vector.load %arg8[%c3_180, %c0_181, %c0_182] : memref<9x128x128xbf16, #tpu.memory_space<vmem>>, vector<1x128x128xbf16>
    %165 = vector.shape_cast %164 : vector<1x128x128xbf16> to vector<128x128xbf16>
    %cst_183 = arith.constant dense<0.000000e+00> : vector<16x128xf32>
    %166 = tpu.matmul %163, %165, %cst_183 {dimension_numbers = #tpu.dot_dimension_numbers<[1], [0], [0], [1], [0, 0, 1, 1], [], []>} : vector<16x128xbf16>, vector<128x128xbf16>, vector<16x128xf32> -> vector<16x128xf32>
    %167 = arith.addf %161, %166 : vector<16x128xf32>
    %c1_184 = arith.constant 1 : index
    %c8_185 = arith.constant 8 : index
    %c0_186 = arith.constant 0 : index
    %168 = vector.load %arg12[%c1_184, %c8_185, %c0_186] : memref<6x16x128xbf16, #tpu.memory_space<vmem>>, vector<4x4x128xbf16>
    %169 = vector.shape_cast %168 : vector<4x4x128xbf16> to vector<16x128xbf16>
    %c4_187 = arith.constant 4 : index
    %c0_188 = arith.constant 0 : index
    %c0_189 = arith.constant 0 : index
    %170 = vector.load %arg8[%c4_187, %c0_188, %c0_189] : memref<9x128x128xbf16, #tpu.memory_space<vmem>>, vector<1x128x128xbf16>
    %171 = vector.shape_cast %170 : vector<1x128x128xbf16> to vector<128x128xbf16>
    %cst_190 = arith.constant dense<0.000000e+00> : vector<16x128xf32>
    %172 = tpu.matmul %169, %171, %cst_190 {dimension_numbers = #tpu.dot_dimension_numbers<[1], [0], [0], [1], [0, 0, 1, 1], [], []>} : vector<16x128xbf16>, vector<128x128xbf16>, vector<16x128xf32> -> vector<16x128xf32>
    %173 = arith.addf %167, %172 : vector<16x128xf32>
    %c1_191 = arith.constant 1 : index
    %c9_192 = arith.constant 9 : index
    %c0_193 = arith.constant 0 : index
    %174 = vector.load %arg12[%c1_191, %c9_192, %c0_193] : memref<6x16x128xbf16, #tpu.memory_space<vmem>>, vector<4x4x128xbf16>
    %175 = vector.shape_cast %174 : vector<4x4x128xbf16> to vector<16x128xbf16>
    %c5_194 = arith.constant 5 : index
    %c0_195 = arith.constant 0 : index
    %c0_196 = arith.constant 0 : index
    %176 = vector.load %arg8[%c5_194, %c0_195, %c0_196] : memref<9x128x128xbf16, #tpu.memory_space<vmem>>, vector<1x128x128xbf16>
    %177 = vector.shape_cast %176 : vector<1x128x128xbf16> to vector<128x128xbf16>
    %cst_197 = arith.constant dense<0.000000e+00> : vector<16x128xf32>
    %178 = tpu.matmul %175, %177, %cst_197 {dimension_numbers = #tpu.dot_dimension_numbers<[1], [0], [0], [1], [0, 0, 1, 1], [], []>} : vector<16x128xbf16>, vector<128x128xbf16>, vector<16x128xf32> -> vector<16x128xf32>
    %179 = arith.addf %173, %178 : vector<16x128xf32>
    %c2_198 = arith.constant 2 : index
    %c7_199 = arith.constant 7 : index
    %c0_200 = arith.constant 0 : index
    %180 = vector.load %arg12[%c2_198, %c7_199, %c0_200] : memref<6x16x128xbf16, #tpu.memory_space<vmem>>, vector<4x4x128xbf16>
    %181 = vector.shape_cast %180 : vector<4x4x128xbf16> to vector<16x128xbf16>
    %c6_201 = arith.constant 6 : index
    %c0_202 = arith.constant 0 : index
    %c0_203 = arith.constant 0 : index
    %182 = vector.load %arg8[%c6_201, %c0_202, %c0_203] : memref<9x128x128xbf16, #tpu.memory_space<vmem>>, vector<1x128x128xbf16>
    %183 = vector.shape_cast %182 : vector<1x128x128xbf16> to vector<128x128xbf16>
    %cst_204 = arith.constant dense<0.000000e+00> : vector<16x128xf32>
    %184 = tpu.matmul %181, %183, %cst_204 {dimension_numbers = #tpu.dot_dimension_numbers<[1], [0], [0], [1], [0, 0, 1, 1], [], []>} : vector<16x128xbf16>, vector<128x128xbf16>, vector<16x128xf32> -> vector<16x128xf32>
    %185 = arith.addf %179, %184 : vector<16x128xf32>
    %c2_205 = arith.constant 2 : index
    %c8_206 = arith.constant 8 : index
    %c0_207 = arith.constant 0 : index
    %186 = vector.load %arg12[%c2_205, %c8_206, %c0_207] : memref<6x16x128xbf16, #tpu.memory_space<vmem>>, vector<4x4x128xbf16>
    %187 = vector.shape_cast %186 : vector<4x4x128xbf16> to vector<16x128xbf16>
    %c7_208 = arith.constant 7 : index
    %c0_209 = arith.constant 0 : index
    %c0_210 = arith.constant 0 : index
    %188 = vector.load %arg8[%c7_208, %c0_209, %c0_210] : memref<9x128x128xbf16, #tpu.memory_space<vmem>>, vector<1x128x128xbf16>
    %189 = vector.shape_cast %188 : vector<1x128x128xbf16> to vector<128x128xbf16>
    %cst_211 = arith.constant dense<0.000000e+00> : vector<16x128xf32>
    %190 = tpu.matmul %187, %189, %cst_211 {dimension_numbers = #tpu.dot_dimension_numbers<[1], [0], [0], [1], [0, 0, 1, 1], [], []>} : vector<16x128xbf16>, vector<128x128xbf16>, vector<16x128xf32> -> vector<16x128xf32>
    %191 = arith.addf %185, %190 : vector<16x128xf32>
    %c2_212 = arith.constant 2 : index
    %c9_213 = arith.constant 9 : index
    %c0_214 = arith.constant 0 : index
    %192 = vector.load %arg12[%c2_212, %c9_213, %c0_214] : memref<6x16x128xbf16, #tpu.memory_space<vmem>>, vector<4x4x128xbf16>
    %193 = vector.shape_cast %192 : vector<4x4x128xbf16> to vector<16x128xbf16>
    %c8_215 = arith.constant 8 : index
    %c0_216 = arith.constant 0 : index
    %c0_217 = arith.constant 0 : index
    %194 = vector.load %arg8[%c8_215, %c0_216, %c0_217] : memref<9x128x128xbf16, #tpu.memory_space<vmem>>, vector<1x128x128xbf16>
    %195 = vector.shape_cast %194 : vector<1x128x128xbf16> to vector<128x128xbf16>
    %cst_218 = arith.constant dense<0.000000e+00> : vector<16x128xf32>
    %196 = tpu.matmul %193, %195, %cst_218 {dimension_numbers = #tpu.dot_dimension_numbers<[1], [0], [0], [1], [0, 0, 1, 1], [], []>} : vector<16x128xbf16>, vector<128x128xbf16>, vector<16x128xf32> -> vector<16x128xf32>
    %197 = arith.addf %191, %196 : vector<16x128xf32>
    %cst_219 = arith.constant 0.000000e+00 : f32
    %198 = vector.broadcast %cst_219 : f32 to vector<16x128xf32>
    %199 = arith.maximumf %197, %198 : vector<16x128xf32>
    %c0_220 = arith.constant 0 : index
    %c0_221 = arith.constant 0 : index
    %200 = vector.load %arg9[%c0_220, %c0_221] : memref<1x128xf32, #tpu.memory_space<vmem>>, vector<1x128xf32>
    %201 = vector.broadcast %200 : vector<1x128xf32> to vector<16x128xf32>
    %202 = arith.mulf %199, %201 : vector<16x128xf32>
    %c0_222 = arith.constant 0 : index
    %c0_223 = arith.constant 0 : index
    %203 = vector.load %arg10[%c0_222, %c0_223] : memref<1x128xf32, #tpu.memory_space<vmem>>, vector<1x128xf32>
    %204 = vector.broadcast %203 : vector<1x128xf32> to vector<16x128xf32>
    %205 = arith.addf %202, %204 : vector<16x128xf32>
    %206 = arith.addf %205, %71 : vector<16x128xf32>
    %207 = vector.shape_cast %206 : vector<16x128xf32> to vector<1x4x4x128xf32>
    %208 = arith.truncf %207 : vector<1x4x4x128xf32> to vector<1x4x4x128xbf16>
    %c0_224 = arith.constant 0 : index
    %c0_225 = arith.constant 0 : index
    %c0_226 = arith.constant 0 : index
    %c0_227 = arith.constant 0 : index
    %209 = vector.load %arg11[%c0_224, %c0_225, %c0_226, %c0_227] : memref<1x4x4x128xbf16, #tpu.memory_space<vmem>>, vector<1x4x4x128xbf16>
    tpu.vector_store %arg11[%c0_224, %c0_225, %c0_226, %c0_227], %208 {strides = array<i32>} : memref<1x4x4x128xbf16, #tpu.memory_space<vmem>>, vector<1x4x4x128xbf16>,
    return
  }
  func.func @transform_0(%arg0: i32) -> (i32, i32, i32, i32, i32) {
    %c0_i32 = arith.constant 0 : i32
    %c0_i32_0 = arith.constant 0 : i32
    %c0_i32_1 = arith.constant 0 : i32
    %c0_i32_2 = arith.constant 0 : i32
    %c0_i32_3 = arith.constant 0 : i32
    return %c0_i32, %arg0, %c0_i32_0, %c0_i32_1, %c0_i32_2 : i32, i32, i32, i32, i32
  }
  func.func @transform_1(%arg0: i32) -> (i32, i32, i32) {
    %c0_i32 = arith.constant 0 : i32
    %c0_i32_0 = arith.constant 0 : i32
    %c0_i32_1 = arith.constant 0 : i32
    %c0_i32_2 = arith.constant 0 : i32
    return %c0_i32, %c0_i32_0, %c0_i32_1 : i32, i32, i32
  }
  func.func @transform_2(%arg0: i32) -> (i32, i32) {
    %c0_i32 = arith.constant 0 : i32
    %c0_i32_0 = arith.constant 0 : i32
    %c0_i32_1 = arith.constant 0 : i32
    return %c0_i32, %c0_i32_0 : i32, i32
  }
  func.func @transform_3(%arg0: i32) -> (i32, i32) {
    %c0_i32 = arith.constant 0 : i32
    %c0_i32_0 = arith.constant 0 : i32
    %c0_i32_1 = arith.constant 0 : i32
    return %c0_i32, %c0_i32_0 : i32, i32
  }
  func.func @transform_4(%arg0: i32) -> (i32, i32, i32) {
    %c0_i32 = arith.constant 0 : i32
    %c0_i32_0 = arith.constant 0 : i32
    %c0_i32_1 = arith.constant 0 : i32
    %c0_i32_2 = arith.constant 0 : i32
    return %c0_i32, %c0_i32_0, %c0_i32_1 : i32, i32, i32
  }
  func.func @transform_5(%arg0: i32) -> (i32, i32) {
    %c0_i32 = arith.constant 0 : i32
    %c0_i32_0 = arith.constant 0 : i32
    %c0_i32_1 = arith.constant 0 : i32
    return %c0_i32, %c0_i32_0 : i32, i32
  }
  func.func @transform_6(%arg0: i32) -> (i32, i32) {
    %c0_i32 = arith.constant 0 : i32
    %c0_i32_0 = arith.constant 0 : i32
    %c0_i32_1 = arith.constant 0 : i32
    return %c0_i32, %c0_i32_0 : i32, i32
  }
  func.func @transform_7(%arg0: i32) -> (i32, i32, i32) {
    %c0_i32 = arith.constant 0 : i32
    %c0_i32_0 = arith.constant 0 : i32
    %c0_i32_1 = arith.constant 0 : i32
    %c0_i32_2 = arith.constant 0 : i32
    return %c0_i32, %c0_i32_0, %c0_i32_1 : i32, i32, i32
  }
  func.func @transform_8(%arg0: i32) -> (i32, i32) {
    %c0_i32 = arith.constant 0 : i32
    %c0_i32_0 = arith.constant 0 : i32
    %c0_i32_1 = arith.constant 0 : i32
    return %c0_i32, %c0_i32_0 : i32, i32
  }
  func.func @transform_9(%arg0: i32) -> (i32, i32) {
    %c0_i32 = arith.constant 0 : i32
    %c0_i32_0 = arith.constant 0 : i32
    %c0_i32_1 = arith.constant 0 : i32
    return %c0_i32, %c0_i32_0 : i32, i32
  }
  func.func @transform_10(%arg0: i32) -> (i32, i32, i32, i32) {
    %c0_i32 = arith.constant 0 : i32
    %c0_i32_0 = arith.constant 0 : i32
    %c0_i32_1 = arith.constant 0 : i32
    %c0_i32_2 = arith.constant 0 : i32
    return %arg0, %c0_i32, %c0_i32_0, %c0_i32_1 : i32, i32, i32, i32
  }
}

module attributes {stable_mosaic.version = 11 : i64} {
  func.func @_l3_head_kernel(%arg0: i32, %arg1: memref<4x1x3x3x128xbf16, #tpu.memory_space<vmem>>, %arg2: memref<9x128x256xbf16, #tpu.memory_space<vmem>>, %arg3: memref<1x256xf32, #tpu.memory_space<vmem>>, %arg4: memref<1x256xf32, #tpu.memory_space<vmem>>, %arg5: memref<256x512xbf16, #tpu.memory_space<vmem>>, %arg6: memref<256x512xbf16, #tpu.memory_space<vmem>>, %arg7: memref<1x512xf32, #tpu.memory_space<vmem>>, %arg8: memref<512x128xbf16, #tpu.memory_space<vmem>>, %arg9: memref<1x128xf32, #tpu.memory_space<vmem>>, %arg10: memref<1x1x128xf32, #tpu.memory_space<vmem>>) attributes {dimension_semantics = [#tpu.dimension_semantics<parallel>], iteration_bounds = array<i64: 2>, scalar_prefetch = 0 : i64, scratch_operands = 0 : i64, tpu.core_type = #tpu.core_type<tc>, window_params = [{transform_indices = @transform_0, window_bounds = array<i64: 4, 1, 3, 3, 128>}, {pipeline_mode = #tpu.pipeline_mode<synchronous>, transform_indices = @transform_1, window_bounds = array<i64: 9, 128, 256>}, {pipeline_mode = #tpu.pipeline_mode<synchronous>, transform_indices = @transform_2, window_bounds = array<i64: 1, 256>}, {pipeline_mode = #tpu.pipeline_mode<synchronous>, transform_indices = @transform_3, window_bounds = array<i64: 1, 256>}, {pipeline_mode = #tpu.pipeline_mode<synchronous>, transform_indices = @transform_4, window_bounds = array<i64: 256, 512>}, {pipeline_mode = #tpu.pipeline_mode<synchronous>, transform_indices = @transform_5, window_bounds = array<i64: 256, 512>}, {pipeline_mode = #tpu.pipeline_mode<synchronous>, transform_indices = @transform_6, window_bounds = array<i64: 1, 512>}, {pipeline_mode = #tpu.pipeline_mode<synchronous>, transform_indices = @transform_7, window_bounds = array<i64: 512, 128>}, {pipeline_mode = #tpu.pipeline_mode<synchronous>, transform_indices = @transform_8, window_bounds = array<i64: 1, 128>}, {transform_indices = @transform_9, window_bounds = array<i64: 1, 1, 128>}]} {
    %cst = arith.constant 0.000000e+00 : f32
    %0 = vector.broadcast %cst : f32 to vector<4x256xf32>
    %c0 = arith.constant 0 : index
    %c0_0 = arith.constant 0 : index
    %c0_1 = arith.constant 0 : index
    %c0_2 = arith.constant 0 : index
    %c0_3 = arith.constant 0 : index
    %1 = vector.load %arg1[%c0, %c0_0, %c0_1, %c0_2, %c0_3] : memref<4x1x3x3x128xbf16, #tpu.memory_space<vmem>>, vector<1x1x2x2x128xbf16>
    %2 = vector.shape_cast %1 : vector<1x1x2x2x128xbf16> to vector<2x2x128xbf16>
    %3 = vector.shape_cast %2 : vector<2x2x128xbf16> to vector<4x128xbf16>
    %c0_4 = arith.constant 0 : index
    %c0_5 = arith.constant 0 : index
    %c0_6 = arith.constant 0 : index
    %4 = vector.load %arg2[%c0_4, %c0_5, %c0_6] : memref<9x128x256xbf16, #tpu.memory_space<vmem>>, vector<1x128x256xbf16>
    %5 = vector.shape_cast %4 : vector<1x128x256xbf16> to vector<128x256xbf16>
    %cst_7 = arith.constant dense<0.000000e+00> : vector<4x256xf32>
    %6 = tpu.matmul %3, %5, %cst_7 {dimension_numbers = #tpu.dot_dimension_numbers<[1], [0], [0], [1], [0, 0, 1, 1], [], []>} : vector<4x128xbf16>, vector<128x256xbf16>, vector<4x256xf32> -> vector<4x256xf32>
    %7 = arith.addf %0, %6 : vector<4x256xf32>
    %c1 = arith.constant 1 : index
    %c0_8 = arith.constant 0 : index
    %c0_9 = arith.constant 0 : index
    %c0_10 = arith.constant 0 : index
    %c0_11 = arith.constant 0 : index
    %8 = vector.load %arg1[%c1, %c0_8, %c0_9, %c0_10, %c0_11] : memref<4x1x3x3x128xbf16, #tpu.memory_space<vmem>>, vector<1x1x2x2x128xbf16>
    %9 = vector.shape_cast %8 : vector<1x1x2x2x128xbf16> to vector<2x2x128xbf16>
    %10 = vector.shape_cast %9 : vector<2x2x128xbf16> to vector<4x128xbf16>
    %c1_12 = arith.constant 1 : index
    %c0_13 = arith.constant 0 : index
    %c0_14 = arith.constant 0 : index
    %11 = vector.load %arg2[%c1_12, %c0_13, %c0_14] : memref<9x128x256xbf16, #tpu.memory_space<vmem>>, vector<1x128x256xbf16>
    %12 = vector.shape_cast %11 : vector<1x128x256xbf16> to vector<128x256xbf16>
    %cst_15 = arith.constant dense<0.000000e+00> : vector<4x256xf32>
    %13 = tpu.matmul %10, %12, %cst_15 {dimension_numbers = #tpu.dot_dimension_numbers<[1], [0], [0], [1], [0, 0, 1, 1], [], []>} : vector<4x128xbf16>, vector<128x256xbf16>, vector<4x256xf32> -> vector<4x256xf32>
    %14 = arith.addf %7, %13 : vector<4x256xf32>
    %c0_16 = arith.constant 0 : index
    %c0_17 = arith.constant 0 : index
    %c0_18 = arith.constant 0 : index
    %c1_19 = arith.constant 1 : index
    %c0_20 = arith.constant 0 : index
    %15 = vector.load %arg1[%c0_16, %c0_17, %c0_18, %c1_19, %c0_20] : memref<4x1x3x3x128xbf16, #tpu.memory_space<vmem>>, vector<1x1x2x2x128xbf16>
    %16 = vector.shape_cast %15 : vector<1x1x2x2x128xbf16> to vector<2x2x128xbf16>
    %17 = vector.shape_cast %16 : vector<2x2x128xbf16> to vector<4x128xbf16>
    %c2 = arith.constant 2 : index
    %c0_21 = arith.constant 0 : index
    %c0_22 = arith.constant 0 : index
    %18 = vector.load %arg2[%c2, %c0_21, %c0_22] : memref<9x128x256xbf16, #tpu.memory_space<vmem>>, vector<1x128x256xbf16>
    %19 = vector.shape_cast %18 : vector<1x128x256xbf16> to vector<128x256xbf16>
    %cst_23 = arith.constant dense<0.000000e+00> : vector<4x256xf32>
    %20 = tpu.matmul %17, %19, %cst_23 {dimension_numbers = #tpu.dot_dimension_numbers<[1], [0], [0], [1], [0, 0, 1, 1], [], []>} : vector<4x128xbf16>, vector<128x256xbf16>, vector<4x256xf32> -> vector<4x256xf32>
    %21 = arith.addf %14, %20 : vector<4x256xf32>
    %c2_24 = arith.constant 2 : index
    %c0_25 = arith.constant 0 : index
    %c0_26 = arith.constant 0 : index
    %c0_27 = arith.constant 0 : index
    %c0_28 = arith.constant 0 : index
    %22 = vector.load %arg1[%c2_24, %c0_25, %c0_26, %c0_27, %c0_28] : memref<4x1x3x3x128xbf16, #tpu.memory_space<vmem>>, vector<1x1x2x2x128xbf16>
    %23 = vector.shape_cast %22 : vector<1x1x2x2x128xbf16> to vector<2x2x128xbf16>
    %24 = vector.shape_cast %23 : vector<2x2x128xbf16> to vector<4x128xbf16>
    %c3 = arith.constant 3 : index
    %c0_29 = arith.constant 0 : index
    %c0_30 = arith.constant 0 : index
    %25 = vector.load %arg2[%c3, %c0_29, %c0_30] : memref<9x128x256xbf16, #tpu.memory_space<vmem>>, vector<1x128x256xbf16>
    %26 = vector.shape_cast %25 : vector<1x128x256xbf16> to vector<128x256xbf16>
    %cst_31 = arith.constant dense<0.000000e+00> : vector<4x256xf32>
    %27 = tpu.matmul %24, %26, %cst_31 {dimension_numbers = #tpu.dot_dimension_numbers<[1], [0], [0], [1], [0, 0, 1, 1], [], []>} : vector<4x128xbf16>, vector<128x256xbf16>, vector<4x256xf32> -> vector<4x256xf32>
    %28 = arith.addf %21, %27 : vector<4x256xf32>
    %c3_32 = arith.constant 3 : index
    %c0_33 = arith.constant 0 : index
    %c0_34 = arith.constant 0 : index
    %c0_35 = arith.constant 0 : index
    %c0_36 = arith.constant 0 : index
    %29 = vector.load %arg1[%c3_32, %c0_33, %c0_34, %c0_35, %c0_36] : memref<4x1x3x3x128xbf16, #tpu.memory_space<vmem>>, vector<1x1x2x2x128xbf16>
    %30 = vector.shape_cast %29 : vector<1x1x2x2x128xbf16> to vector<2x2x128xbf16>
    %31 = vector.shape_cast %30 : vector<2x2x128xbf16> to vector<4x128xbf16>
    %c4 = arith.constant 4 : index
    %c0_37 = arith.constant 0 : index
    %c0_38 = arith.constant 0 : index
    %32 = vector.load %arg2[%c4, %c0_37, %c0_38] : memref<9x128x256xbf16, #tpu.memory_space<vmem>>, vector<1x128x256xbf16>
    %33 = vector.shape_cast %32 : vector<1x128x256xbf16> to vector<128x256xbf16>
    %cst_39 = arith.constant dense<0.000000e+00> : vector<4x256xf32>
    %34 = tpu.matmul %31, %33, %cst_39 {dimension_numbers = #tpu.dot_dimension_numbers<[1], [0], [0], [1], [0, 0, 1, 1], [], []>} : vector<4x128xbf16>, vector<128x256xbf16>, vector<4x256xf32> -> vector<4x256xf32>
    %35 = arith.addf %28, %34 : vector<4x256xf32>
    %c2_40 = arith.constant 2 : index
    %c0_41 = arith.constant 0 : index
    %c0_42 = arith.constant 0 : index
    %c1_43 = arith.constant 1 : index
    %c0_44 = arith.constant 0 : index
    %36 = vector.load %arg1[%c2_40, %c0_41, %c0_42, %c1_43, %c0_44] : memref<4x1x3x3x128xbf16, #tpu.memory_space<vmem>>, vector<1x1x2x2x128xbf16>
    %37 = vector.shape_cast %36 : vector<1x1x2x2x128xbf16> to vector<2x2x128xbf16>
    %38 = vector.shape_cast %37 : vector<2x2x128xbf16> to vector<4x128xbf16>
    %c5 = arith.constant 5 : index
    %c0_45 = arith.constant 0 : index
    %c0_46 = arith.constant 0 : index
    %39 = vector.load %arg2[%c5, %c0_45, %c0_46] : memref<9x128x256xbf16, #tpu.memory_space<vmem>>, vector<1x128x256xbf16>
    %40 = vector.shape_cast %39 : vector<1x128x256xbf16> to vector<128x256xbf16>
    %cst_47 = arith.constant dense<0.000000e+00> : vector<4x256xf32>
    %41 = tpu.matmul %38, %40, %cst_47 {dimension_numbers = #tpu.dot_dimension_numbers<[1], [0], [0], [1], [0, 0, 1, 1], [], []>} : vector<4x128xbf16>, vector<128x256xbf16>, vector<4x256xf32> -> vector<4x256xf32>
    %42 = arith.addf %35, %41 : vector<4x256xf32>
    %c0_48 = arith.constant 0 : index
    %c0_49 = arith.constant 0 : index
    %c1_50 = arith.constant 1 : index
    %c0_51 = arith.constant 0 : index
    %c0_52 = arith.constant 0 : index
    %43 = vector.load %arg1[%c0_48, %c0_49, %c1_50, %c0_51, %c0_52] : memref<4x1x3x3x128xbf16, #tpu.memory_space<vmem>>, vector<1x1x2x2x128xbf16>
    %44 = vector.shape_cast %43 : vector<1x1x2x2x128xbf16> to vector<2x2x128xbf16>
    %45 = vector.shape_cast %44 : vector<2x2x128xbf16> to vector<4x128xbf16>
    %c6 = arith.constant 6 : index
    %c0_53 = arith.constant 0 : index
    %c0_54 = arith.constant 0 : index
    %46 = vector.load %arg2[%c6, %c0_53, %c0_54] : memref<9x128x256xbf16, #tpu.memory_space<vmem>>, vector<1x128x256xbf16>
    %47 = vector.shape_cast %46 : vector<1x128x256xbf16> to vector<128x256xbf16>
    %cst_55 = arith.constant dense<0.000000e+00> : vector<4x256xf32>
    %48 = tpu.matmul %45, %47, %cst_55 {dimension_numbers = #tpu.dot_dimension_numbers<[1], [0], [0], [1], [0, 0, 1, 1], [], []>} : vector<4x128xbf16>, vector<128x256xbf16>, vector<4x256xf32> -> vector<4x256xf32>
    %49 = arith.addf %42, %48 : vector<4x256xf32>
    %c1_56 = arith.constant 1 : index
    %c0_57 = arith.constant 0 : index
    %c1_58 = arith.constant 1 : index
    %c0_59 = arith.constant 0 : index
    %c0_60 = arith.constant 0 : index
    %50 = vector.load %arg1[%c1_56, %c0_57, %c1_58, %c0_59, %c0_60] : memref<4x1x3x3x128xbf16, #tpu.memory_space<vmem>>, vector<1x1x2x2x128xbf16>
    %51 = vector.shape_cast %50 : vector<1x1x2x2x128xbf16> to vector<2x2x128xbf16>
    %52 = vector.shape_cast %51 : vector<2x2x128xbf16> to vector<4x128xbf16>
    %c7 = arith.constant 7 : index
    %c0_61 = arith.constant 0 : index
    %c0_62 = arith.constant 0 : index
    %53 = vector.load %arg2[%c7, %c0_61, %c0_62] : memref<9x128x256xbf16, #tpu.memory_space<vmem>>, vector<1x128x256xbf16>
    %54 = vector.shape_cast %53 : vector<1x128x256xbf16> to vector<128x256xbf16>
    %cst_63 = arith.constant dense<0.000000e+00> : vector<4x256xf32>
    %55 = tpu.matmul %52, %54, %cst_63 {dimension_numbers = #tpu.dot_dimension_numbers<[1], [0], [0], [1], [0, 0, 1, 1], [], []>} : vector<4x128xbf16>, vector<128x256xbf16>, vector<4x256xf32> -> vector<4x256xf32>
    %56 = arith.addf %49, %55 : vector<4x256xf32>
    %c0_64 = arith.constant 0 : index
    %c0_65 = arith.constant 0 : index
    %c1_66 = arith.constant 1 : index
    %c1_67 = arith.constant 1 : index
    %c0_68 = arith.constant 0 : index
    %57 = vector.load %arg1[%c0_64, %c0_65, %c1_66, %c1_67, %c0_68] : memref<4x1x3x3x128xbf16, #tpu.memory_space<vmem>>, vector<1x1x2x2x128xbf16>
    %58 = vector.shape_cast %57 : vector<1x1x2x2x128xbf16> to vector<2x2x128xbf16>
    %59 = vector.shape_cast %58 : vector<2x2x128xbf16> to vector<4x128xbf16>
    %c8 = arith.constant 8 : index
    %c0_69 = arith.constant 0 : index
    %c0_70 = arith.constant 0 : index
    %60 = vector.load %arg2[%c8, %c0_69, %c0_70] : memref<9x128x256xbf16, #tpu.memory_space<vmem>>, vector<1x128x256xbf16>
    %61 = vector.shape_cast %60 : vector<1x128x256xbf16> to vector<128x256xbf16>
    %cst_71 = arith.constant dense<0.000000e+00> : vector<4x256xf32>
    %62 = tpu.matmul %59, %61, %cst_71 {dimension_numbers = #tpu.dot_dimension_numbers<[1], [0], [0], [1], [0, 0, 1, 1], [], []>} : vector<4x128xbf16>, vector<128x256xbf16>, vector<4x256xf32> -> vector<4x256xf32>
    %63 = arith.addf %56, %62 : vector<4x256xf32>
    %cst_72 = arith.constant 0.000000e+00 : f32
    %64 = vector.broadcast %cst_72 : f32 to vector<4x256xf32>
    %65 = arith.maximumf %63, %64 : vector<4x256xf32>
    %c0_73 = arith.constant 0 : index
    %c0_74 = arith.constant 0 : index
    %66 = vector.load %arg3[%c0_73, %c0_74] : memref<1x256xf32, #tpu.memory_space<vmem>>, vector<1x256xf32>
    %67 = vector.broadcast %66 : vector<1x256xf32> to vector<4x256xf32>
    %68 = arith.mulf %65, %67 : vector<4x256xf32>
    %c0_75 = arith.constant 0 : index
    %c0_76 = arith.constant 0 : index
    %69 = vector.load %arg4[%c0_75, %c0_76] : memref<1x256xf32, #tpu.memory_space<vmem>>, vector<1x256xf32>
    %70 = vector.broadcast %69 : vector<1x256xf32> to vector<4x256xf32>
    %71 = arith.addf %68, %70 : vector<4x256xf32>
    %cst_77 = arith.constant dense<0xFF800000> : vector<256xf32>
    %72 = vector.multi_reduction <maximumf>, %71, %cst_77 [0] : vector<4x256xf32> to vector<256xf32>
    %73 = vector.shape_cast %72 : vector<256xf32> to vector<1x256xf32>
    %cst_78 = arith.constant dense<0.000000e+00> : vector<256xf32>
    %74 = vector.multi_reduction <add>, %71, %cst_78 [0] : vector<4x256xf32> to vector<256xf32>
    %75 = vector.shape_cast %74 : vector<256xf32> to vector<1x256xf32>
    %cst_79 = arith.constant 2.500000e-01 : f32
    %76 = vector.broadcast %cst_79 : f32 to vector<1x256xf32>
    %77 = arith.mulf %75, %76 : vector<1x256xf32>
    %78 = arith.truncf %73 : vector<1x256xf32> to vector<1x256xbf16>
    %c0_80 = arith.constant 0 : index
    %c0_81 = arith.constant 0 : index
    %79 = vector.load %arg5[%c0_80, %c0_81] : memref<256x512xbf16, #tpu.memory_space<vmem>>, vector<256x512xbf16>
    %cst_82 = arith.constant dense<0.000000e+00> : vector<1x512xf32>
    %80 = tpu.matmul %78, %79, %cst_82 {dimension_numbers = #tpu.dot_dimension_numbers<[1], [0], [0], [1], [0, 0, 1, 1], [], []>} : vector<1x256xbf16>, vector<256x512xbf16>, vector<1x512xf32> -> vector<1x512xf32>
    %81 = arith.truncf %77 : vector<1x256xf32> to vector<1x256xbf16>
    %c0_83 = arith.constant 0 : index
    %c0_84 = arith.constant 0 : index
    %82 = vector.load %arg6[%c0_83, %c0_84] : memref<256x512xbf16, #tpu.memory_space<vmem>>, vector<256x512xbf16>
    %cst_85 = arith.constant dense<0.000000e+00> : vector<1x512xf32>
    %83 = tpu.matmul %81, %82, %cst_85 {dimension_numbers = #tpu.dot_dimension_numbers<[1], [0], [0], [1], [0, 0, 1, 1], [], []>} : vector<1x256xbf16>, vector<256x512xbf16>, vector<1x512xf32> -> vector<1x512xf32>
    %84 = arith.addf %80, %83 : vector<1x512xf32>
    %c0_86 = arith.constant 0 : index
    %c0_87 = arith.constant 0 : index
    %85 = vector.load %arg7[%c0_86, %c0_87] : memref<1x512xf32, #tpu.memory_space<vmem>>, vector<1x512xf32>
    %86 = arith.addf %84, %85 : vector<1x512xf32>
    %cst_88 = arith.constant 0.000000e+00 : f32
    %87 = vector.broadcast %cst_88 : f32 to vector<1x512xf32>
    %88 = arith.maximumf %86, %87 : vector<1x512xf32>
    %89 = arith.truncf %88 : vector<1x512xf32> to vector<1x512xbf16>
    %c0_89 = arith.constant 0 : index
    %c0_90 = arith.constant 0 : index
    %90 = vector.load %arg8[%c0_89, %c0_90] : memref<512x128xbf16, #tpu.memory_space<vmem>>, vector<512x128xbf16>
    %cst_91 = arith.constant dense<0.000000e+00> : vector<1x128xf32>
    %91 = tpu.matmul %89, %90, %cst_91 {dimension_numbers = #tpu.dot_dimension_numbers<[1], [0], [0], [1], [0, 0, 1, 1], [], []>} : vector<1x512xbf16>, vector<512x128xbf16>, vector<1x128xf32> -> vector<1x128xf32>
    %c0_92 = arith.constant 0 : index
    %c0_93 = arith.constant 0 : index
    %92 = vector.load %arg9[%c0_92, %c0_93] : memref<1x128xf32, #tpu.memory_space<vmem>>, vector<1x128xf32>
    %93 = arith.addf %91, %92 : vector<1x128xf32>
    %94 = vector.shape_cast %93 : vector<1x128xf32> to vector<1x1x128xf32>
    %c0_94 = arith.constant 0 : index
    %c0_95 = arith.constant 0 : index
    %c0_96 = arith.constant 0 : index
    %95 = vector.load %arg10[%c0_94, %c0_95, %c0_96] : memref<1x1x128xf32, #tpu.memory_space<vmem>>, vector<1x1x128xf32>
    tpu.vector_store %arg10[%c0_94, %c0_95, %c0_96], %94 {strides = array<i32>} : memref<1x1x128xf32, #tpu.memory_space<vmem>>, vector<1x1x128xf32>,
    return
  }
  func.func @transform_0(%arg0: i32) -> (i32, i32, i32, i32, i32) {
    %c0_i32 = arith.constant 0 : i32
    %c0_i32_0 = arith.constant 0 : i32
    %c0_i32_1 = arith.constant 0 : i32
    %c0_i32_2 = arith.constant 0 : i32
    %c0_i32_3 = arith.constant 0 : i32
    return %c0_i32, %arg0, %c0_i32_0, %c0_i32_1, %c0_i32_2 : i32, i32, i32, i32, i32
  }
  func.func @transform_1(%arg0: i32) -> (i32, i32, i32) {
    %c0_i32 = arith.constant 0 : i32
    %c0_i32_0 = arith.constant 0 : i32
    %c0_i32_1 = arith.constant 0 : i32
    %c0_i32_2 = arith.constant 0 : i32
    return %c0_i32, %c0_i32_0, %c0_i32_1 : i32, i32, i32
  }
  func.func @transform_2(%arg0: i32) -> (i32, i32) {
    %c0_i32 = arith.constant 0 : i32
    %c0_i32_0 = arith.constant 0 : i32
    %c0_i32_1 = arith.constant 0 : i32
    return %c0_i32, %c0_i32_0 : i32, i32
  }
  func.func @transform_3(%arg0: i32) -> (i32, i32) {
    %c0_i32 = arith.constant 0 : i32
    %c0_i32_0 = arith.constant 0 : i32
    %c0_i32_1 = arith.constant 0 : i32
    return %c0_i32, %c0_i32_0 : i32, i32
  }
  func.func @transform_4(%arg0: i32) -> (i32, i32) {
    %c0_i32 = arith.constant 0 : i32
    %c0_i32_0 = arith.constant 0 : i32
    %c0_i32_1 = arith.constant 0 : i32
    return %c0_i32, %c0_i32_0 : i32, i32
  }
  func.func @transform_5(%arg0: i32) -> (i32, i32) {
    %c0_i32 = arith.constant 0 : i32
    %c0_i32_0 = arith.constant 0 : i32
    %c0_i32_1 = arith.constant 0 : i32
    return %c0_i32, %c0_i32_0 : i32, i32
  }
  func.func @transform_6(%arg0: i32) -> (i32, i32) {
    %c0_i32 = arith.constant 0 : i32
    %c0_i32_0 = arith.constant 0 : i32
    %c0_i32_1 = arith.constant 0 : i32
    return %c0_i32, %c0_i32_0 : i32, i32
  }
  func.func @transform_7(%arg0: i32) -> (i32, i32) {
    %c0_i32 = arith.constant 0 : i32
    %c0_i32_0 = arith.constant 0 : i32
    %c0_i32_1 = arith.constant 0 : i32
    return %c0_i32, %c0_i32_0 : i32, i32
  }
  func.func @transform_8(%arg0: i32) -> (i32, i32) {
    %c0_i32 = arith.constant 0 : i32
    %c0_i32_0 = arith.constant 0 : i32
    %c0_i32_1 = arith.constant 0 : i32
    return %c0_i32, %c0_i32_0 : i32, i32
  }
  func.func @transform_9(%arg0: i32) -> (i32, i32, i32) {
    %c0_i32 = arith.constant 0 : i32
    %c0_i32_0 = arith.constant 0 : i32
    %c0_i32_1 = arith.constant 0 : i32
    return %arg0, %c0_i32, %c0_i32_0 : i32, i32, i32
  }
}

</mosaic_0001>

<bundles_post_ra>
// kernel: forward.5
= control target key start
LH: loop header
LB: loop body
LE: loop exit
PB: predicated region body
PF: predicated region fallthrough
CT: control target
= control target key end

     0   :  { %14 = vsyncpa [#allocation4], 0  ;;  %s7185_s0 = inlined_call_operand.vmem [shape: bf16[4,2,3,3,128], index: 0, kind: input, shape index: {}]   ;;  %s7186_s1 = inlined_call_operand.vmem [shape: bf16[9,128,256], index: 1, kind: input, shape index: {}]   ;;  %s7187_s2 = inlined_call_operand.vmem [shape: f32[1,256], index: 2, kind: input, shape index: {}]   ;;  %s7188_s3 = inlined_call_operand.vmem [shape: f32[1,256], index: 3, kind: input, shape index: {}]   ;;  %s7189_s4 = inlined_call_operand.vmem [shape: bf16[256,512], index: 4, kind: input, shape index: {}]   ;;  %s7190_s5 = inlined_call_operand.vmem [shape: bf16[256,512], index: 5, kind: input, shape index: {}]   ;;  %s7191_s6 = inlined_call_operand.vmem [shape: f32[1,512], index: 6, kind: input, shape index: {}]   ;;  %s7192_s7 = inlined_call_operand.vmem [shape: bf16[512,128], index: 7, kind: input, shape index: {}]   ;;  %s7193_s8 = inlined_call_operand.vmem [shape: f32[1,128], index: 8, kind: input, shape index: {}]   ;;  %s7194_s9 = inlined_call_operand.hbm [shape: f32[2,1,128], index: 9, kind: output, shape index: {}]  }
   0x1   :  { %16 = vsyncpa [#allocation4 + $0x1], 0  ;;  %s5055_s30 = smov 0   ;;  %s5057_s10 = smov 0  }
   0x2   :  { %s5059_s11 = smov 0   ;;  %s5061_s12 = smov 0  }
   0x3 LB: > { %s7195_s13 = sadd.s32 4294967295, %s5003_s12   ;;  %s3224_s14 = sadd.s32 4294967294, %s5003_s12   ;;  %s5003_s12 = sphi %s5061_s12, %s7204_s12   ;;  %s4999_s11 = sphi %s5059_s11, %s7203_s11   ;;  %s4995_s10 = sphi %s5057_s10, %s7202_s10   ;;  %s4991_s30 = sphi %s5055_s30, %s7201_s30  }
   0x4   : > { %s5078_s15 = sadd.s32 1, %s5003_s12   ;;  %s29_s16 = sadd.s32 1, %s4999_s11 }
   0x5   : > { %s26_s17 = ssub.s32 %s5003_s12, %s5078_s15  ;;  %p36_p0 = scmp.ne.s32.totalorder %s4999_s11, %s4995_s10 }
   0x6   : > { %p27_p1 = scmp.eq.s32.totalorder %s26_s17, 0  ;;  %p37_p2 = scmp.eq.s32.totalorder %s5003_s12, 0 }
   0x7   : > { %p234_p3 = scmp.eq.s32.totalorder %s7195_s13, 1  ;;  %p239_p4 = scmp.ne.s32.totalorder %s4995_s10, %s4991_s30 }
   0x8   : > { %s5091_s18 = scalar_select %p27_p1, %s4999_s11, %s29_s16  }
   0x9   : > { %p38_p5 = por %p37_p2, %p36_p0  ;;  %p5093_p6 = por %p234_p3, %p36_p0 }
   0xa   : > { %p240_p7 = scmp.eq.s32.totalorder %s3224_s14, 1  ;;  %p3226_p9 = scmp.ge.s32.totalorder %s5003_s12, 2 }
   0xc   : > { %p5097_p8 = por %p240_p7, %p239_p4  ;;  %280 = sbr.rel (%p3226_p9) target bundleno = 30 (0x1e), region = 48 }
  0x11   : > { %283 = sbr.rel (!%p38_p5) target bundleno = 30 (0x1e), region = 52  ;;  %s285_s21 = sand.u32 (%p38_p5), 1, %s4999_s11  }
  0x12   : > { %s4900_s22 = smul.u32 (%p38_p5), 6, %s5003_s12 }
  0x13   : > { %s4899_s23 = smul.u32 (%p38_p5), 24, %s285_s21 }
  0x14   : > { %s290_s26 = scalar_lea.vmem (%p38_p5), %s7185_s0, %s4900_s22 }
  0x15   : > { %v307_v0 = vld [vmem:[%s290_s26] sm:$0xf] (%p38_p5)   ;;  %v311_v1 = vld [vmem:[%s290_s26 + $0x4] sm:$0x3] (%p38_p5)  ;;  %s287_s27 = scalar_lea.vmem (%p38_p5), [#allocation2], %s4899_s23 }
  0x16   : > { %308 = vst [vmem:[%s287_s27] sm:$0xf] %v307_v0   ;;  %v313_v2 = vld [vmem:[%s290_s26 + $0xc] sm:$0xf]   ;;  %v317_v3 = vld [vmem:[%s290_s26 + $0x10] sm:$0x3] }
  0x17   : > { %312 = vst [vmem:[%s287_s27 + $0x4] sm:$0x3] %v311_v1  ;;  %v319_v4 = vld [vmem:[%s290_s26 + $0x18] sm:$0xf]   ;;  %v323_v5 = vld [vmem:[%s290_s26 + $0x1c] sm:$0x3] }
  0x18   : > { %314 = vst [vmem:[%s287_s27 + $0x6] sm:$0xf] %v313_v2   ;;  %v325_v6 = vld [vmem:[%s290_s26 + $0x24] sm:$0xf]   ;;  %v329_v7 = vld [vmem:[%s290_s26 + $0x28] sm:$0x3] }
  0x19   : > { %318 = vst [vmem:[%s287_s27 + $0xa] sm:$0x3] %v317_v3 }
  0x1a   : > { %320 = vst [vmem:[%s287_s27 + $0xc] sm:$0xf] %v319_v4  }
  0x1b   : > { %324 = vst [vmem:[%s287_s27 + $0x10] sm:$0x3] %v323_v5 }
  0x1c   : > { %326 = vst [vmem:[%s287_s27 + $0x12] sm:$0xf] %v325_v6  }
  0x1d   : > { %330 = vst [vmem:[%s287_s27 + $0x16] sm:$0x3] %v329_v7 }
  0x1e PF: > { %p3228_p10 = scmp.ge.s32.totalorder %s5003_s12, 1  ;;  %p377_p11 = scmp.lt.s32.totalorder %s5003_s12, 3 }
  0x20   : > { %p378_p12 = pnand %p3228_p10, %p377_p11 }
  0x21   : > { %s5352_s17 = sand.u32 (!%p378_p12), 1, %s4995_s10   ;;  %s7200_s24 = sadd.s32 (!%p378_p12), 4294967295, %s5003_s12  }
  0x22   : > { %381 = sbr.rel (%p378_p12) target bundleno = 693 (0x2b5), region = 93  ;;  %s3159_s29 = scalar_lea.hbm (!%p378_p12), %s7194_s9, %s7200_s24 }
  0x23   : > { %s4901_s25 = smul.u32 (!%p378_p12), 24, %s5352_s17  ;;  %s3163_s16 = sshll.u32 (!%p378_p12), %s3159_s29, 4  ;;  %s3164_s16 = int_to_ptr.hbm [resolvable:$true] %s3163_s16 }
  0x24   : > { %s3151_s21 = scalar_lea.sflag (!%p378_p12), [#allocation4], %s5352_s17  ;;  %s4961_s24 = scalar_lea.hbm (!%p378_p12), %s7194_s9, 2 }
  0x25   : > { %s5379_s28 = scalar_lea.vmem (!%p378_p12), [#allocation2], %s4901_s25  ;;  %s4955_s25 = sshra.s32 (!%p378_p12), %s3164_s16, 4  ;;  %s4956_s25 = int_to_ptr.hbm [resolvable:$true] %s4955_s25 }
  0x26   : > { %s4957_s13 = scalar_lea.hbm (!%p378_p12), %s4956_s25, 1  ;;  %p4962_p2 = scmp.lt.s32.totalorder (!%p378_p12), %s4956_s25, %s7194_s9 }
  0x27   : > { %v3305_v8 = vld [vmem:[%s7186_s1 + $0xf0] sm:$0xf]  ;;  %v4626_v9 = vld [vmem:[%s7186_s1 + $0xf4] sm:$0xf0]  ;;  %v4625_v10 = vld [vmem:[%s7186_s1 + $0xf4] sm:$0xf]  ;;  %p4958_p13 = scmp.ne.s32.totalorder %s4956_s25, %s4957_s13  ;;  %p4963_p3 = scmp.lt.s32.totalorder %s4961_s24, %s4957_s13 }
  0x28   : > { %v3306_v11 = vor.u32 %v4626_v9, %v3305_v8  ;;  %v3307_v12 = vld [vmem:[%s7186_s1 + $0xf8] sm:$0xf0]  ;;  %v3369_v13 = vld [vmem:[%s7186_s1 + $0x70] sm:$0xf]  ;;  %v4610_v14 = vld [vmem:[%s7186_s1 + $0x74] sm:$0xf0] }
  0x29   : > { %v3310_v15 = vor.u32 %v4625_v10, %v3307_v12  ;;  %v3370_v16 = vor.u32 %v4610_v14, %v3369_v13  ;;  %v4609_v17 = vld [vmem:[%s7186_s1 + $0x74] sm:$0xf]  ;;  %v3371_v18 = vld [vmem:[%s7186_s1 + $0x78] sm:$0xf0]  ;;  %v3297_v19 = vld [vmem:[%s7186_s1 + $0xe0] sm:$0xf]  ;;  %p4959_p0 = pnand %p4958_p13, %p5093_p6  ;;  %p4964_p4 = por %p4963_p3, %p4962_p2 }
  0x2a   : > { %543 = vmatpush.bf16.msra.mxu0 %v3306_v11  ;;  %v3374_v20 = vor.u32 %v4609_v17, %v3371_v18  ;;  %v4624_v21 = vld [vmem:[%s7186_s1 + $0xe4] sm:$0xf0]  ;;  %v4623_v22 = vld [vmem:[%s7186_s1 + $0xe4] sm:$0xf]  ;;  %v3299_v23 = vld [vmem:[%s7186_s1 + $0xe8] sm:$0xf0] }
  0x2b   : > { %556 = vmatpush.bf16.msra.mxu1 %v3310_v15  ;;  %656 = vmatpush.bf16.msra.mxu2 %v3370_v16  ;;  %v3298_v24 = vor.u32 %v4624_v21, %v3297_v19  ;;  %v3302_v25 = vor.u32 %v4623_v22, %v3299_v23  ;;  %v3361_v26 = vld [vmem:[%s7186_s1 + $0x60] sm:$0xf]  ;;  %v4608_v27 = vld [vmem:[%s7186_s1 + $0x64] sm:$0xf0]  ;;  %v4607_v28 = vld [vmem:[%s7186_s1 + $0x64] sm:$0xf]  ;;  %p4960_p1 = pneg %p4959_p0 }
  0x2c   : > { %669 = vmatpush.bf16.msra.mxu3 %v3374_v20  ;;  %v3362_v29 = vor.u32 %v4608_v27, %v3361_v26  ;;  %v3363_v30 = vld [vmem:[%s7186_s1 + $0x68] sm:$0xf0]  ;;  %v3289_v31 = vld [vmem:[%s7186_s1 + $0xd0] sm:$0xf]  ;;  %v4622_v32 = vld [vmem:[%s7186_s1 + $0xd4] sm:$0xf0] }
  0x2d   : > { %v3366_v33 = vor.u32 %v4607_v28, %v3363_v30  ;;  %v4621_v34 = vld [vmem:[%s7186_s1 + $0xd4] sm:$0xf]  ;;  %v3291_v35 = vld [vmem:[%s7186_s1 + $0xd8] sm:$0xf0]  ;;  %v3353_v36 = vld [vmem:[%s7186_s1 + $0x50] sm:$0xf]  ;;  %v3290_v37 = vor.u32 %v4622_v32, %v3289_v31  ;;  %p4965_p5 = pnand %p4964_p4, %p4960_p1 }
  0x2e   : > { %544 = vmatpush.bf16.msra.mxu0 %v3298_v24  ;;  %v4606_v38 = vld [vmem:[%s7186_s1 + $0x54] sm:$0xf0]  ;;  %v4605_v39 = vld [vmem:[%s7186_s1 + $0x54] sm:$0xf]  ;;  %v3355_v40 = vld [vmem:[%s7186_s1 + $0x58] sm:$0xf0]  ;;  %v3294_v41 = vor.u32 %v4621_v34, %v3291_v35 }
  0x2f   : > { %557 = vmatpush.bf16.msra.mxu1 %v3302_v25  ;;  %657 = vmatpush.bf16.msra.mxu2 %v3362_v29  ;;  %v3354_v42 = vor.u32 %v4606_v38, %v3353_v36  ;;  %v3281_v43 = vld [vmem:[%s7186_s1 + $0xc0] sm:$0xf]  ;;  %v4620_v44 = vld [vmem:[%s7186_s1 + $0xc4] sm:$0xf0]  ;;  %v4619_v45 = vld [vmem:[%s7186_s1 + $0xc4] sm:$0xf]  ;;  %v3358_v46 = vor.u32 %v4605_v39, %v3355_v40 }
  0x30   : > { %670 = vmatpush.bf16.msra.mxu3 %v3366_v33  ;;  %v3283_v47 = vld [vmem:[%s7186_s1 + $0xc8] sm:$0xf0]  ;;  %v3345_v48 = vld [vmem:[%s7186_s1 + $0x40] sm:$0xf]  ;;  %v4604_v49 = vld [vmem:[%s7186_s1 + $0x44] sm:$0xf0]  ;;  %v3282_v52 = vor.u32 %v4620_v44, %v3281_v43 }
  0x31   : > { %v4603_v50 = vld [vmem:[%s7186_s1 + $0x44] sm:$0xf]  ;;  %v3347_v51 = vld [vmem:[%s7186_s1 + $0x48] sm:$0xf0]  ;;  %v3286_v53 = vor.u32 %v4619_v45, %v3283_v47  ;;  %v3346_v54 = vor.u32 %v4604_v49, %v3345_v48  ;;  %v3273_v55 = vld [vmem:[%s7186_s1 + $0xb0] sm:$0xf] }
  0x32   : > { %545 = vmatpush.bf16.msra.mxu0 %v3290_v37  ;;  %v4618_v56 = vld [vmem:[%s7186_s1 + $0xb4] sm:$0xf0]  ;;  %v4617_v57 = vld [vmem:[%s7186_s1 + $0xb4] sm:$0xf]  ;;  %v3350_v58 = vor.u32 %v4603_v50, %v3347_v51  ;;  %v3275_v59 = vld [vmem:[%s7186_s1 + $0xb8] sm:$0xf0] }
  0x33   : > { %558 = vmatpush.bf16.msra.mxu1 %v3294_v41  ;;  %658 = vmatpush.bf16.msra.mxu2 %v3354_v42  ;;  %v3337_v60 = vld [vmem:[%s7186_s1 + $0x30] sm:$0xf]  ;;  %v4602_v61 = vld [vmem:[%s7186_s1 + $0x34] sm:$0xf0]  ;;  %v4601_v62 = vld [vmem:[%s7186_s1 + $0x34] sm:$0xf]  ;;  %v3274_v0 = vor.u32 %v4618_v56, %v3273_v55  ;;  %v3278_v1 = vor.u32 %v4617_v57, %v3275_v59 }
  0x34   : > { %671 = vmatpush.bf16.msra.mxu3 %v3358_v46  ;;  %v3339_v63 = vld [vmem:[%s7186_s1 + $0x38] sm:$0xf0]  ;;  %v3338_v2 = vor.u32 %v4602_v61, %v3337_v60  ;;  %v3265_v3 = vld [vmem:[%s7186_s1 + $0xa0] sm:$0xf]  ;;  %v4616_v4 = vld [vmem:[%s7186_s1 + $0xa4] sm:$0xf0] }
  0x35   : > { %v4615_v5 = vld [vmem:[%s7186_s1 + $0xa4] sm:$0xf]  ;;  %v3342_v6 = vor.u32 %v4601_v62, %v3339_v63  ;;  %v3267_v7 = vld [vmem:[%s7186_s1 + $0xa8] sm:$0xf0]  ;;  %v3329_v8 = vld [vmem:[%s7186_s1 + $0x20] sm:$0xf]  ;;  %v3266_v12 = vor.u32 %v4616_v4, %v3265_v3 }
  0x36   : > { %546 = vmatpush.bf16.msra.mxu0 %v3282_v52  ;;  %v4600_v9 = vld [vmem:[%s7186_s1 + $0x24] sm:$0xf0]  ;;  %v4599_v10 = vld [vmem:[%s7186_s1 + $0x24] sm:$0xf]  ;;  %v3331_v11 = vld [vmem:[%s7186_s1 + $0x28] sm:$0xf0]  ;;  %v3270_v13 = vor.u32 %v4615_v5, %v3267_v7 }
  0x37   : > { %559 = vmatpush.bf16.msra.mxu1 %v3286_v53  ;;  %659 = vmatpush.bf16.msra.mxu2 %v3346_v54  ;;  %v3330_v14 = vor.u32 %v4600_v9, %v3329_v8  ;;  %v3257_v15 = vld [vmem:[%s7186_s1 + $0x90] sm:$0xf]  ;;  %v4614_v16 = vld [vmem:[%s7186_s1 + $0x94] sm:$0xf0]  ;;  %v4613_v17 = vld [vmem:[%s7186_s1 + $0x94] sm:$0xf]  ;;  %v3334_v18 = vor.u32 %v4599_v10, %v3331_v11 }
  0x38   : > { %672 = vmatpush.bf16.msra.mxu3 %v3350_v58  ;;  %v3259_v19 = vld [vmem:[%s7186_s1 + $0x98] sm:$0xf0]  ;;  %v3321_v20 = vld [vmem:[%s7186_s1 + $0x10] sm:$0xf]  ;;  %v4598_v21 = vld [vmem:[%s7186_s1 + $0x14] sm:$0xf0]  ;;  %v3258_v24 = vor.u32 %v4614_v16, %v3257_v15 }
  0x39   : > { %v4597_v22 = vld [vmem:[%s7186_s1 + $0x14] sm:$0xf]  ;;  %v3323_v23 = vld [vmem:[%s7186_s1 + $0x18] sm:$0xf0]  ;;  %v3249_v25 = vld [vmem:[%s7186_s1 + $0x80] sm:$0xf]  ;;  %v3262_v27 = vor.u32 %v4613_v17, %v3259_v19  ;;  %v3322_v28 = vor.u32 %v4598_v21, %v3321_v20 }
  0x3a   : > { %547 = vmatpush.bf16.msra.mxu0 %v3274_v0  ;;  %v4612_v26 = vld [vmem:[%s7186_s1 + $0x84] sm:$0xf0]  ;;  %v4611_v29 = vld [vmem:[%s7186_s1 + $0x84] sm:$0xf]  ;;  %v3251_v30 = vld [vmem:[%s7186_s1 + $0x88] sm:$0xf0]  ;;  %v3326_v32 = vor.u32 %v4597_v22, %v3323_v23 }
  0x3b   : > { %560 = vmatpush.bf16.msra.mxu1 %v3278_v1  ;;  %660 = vmatpush.bf16.msra.mxu2 %v3338_v2  ;;  %v3313_v31 = vld [vmem:[%s7186_s1] sm:$0xf]  ;;  %v4596_v33 = vld [vmem:[%s7186_s1 + $0x4] sm:$0xf0]  ;;  %v4595_v34 = vld [vmem:[%s7186_s1 + $0x4] sm:$0xf]  ;;  %v3250_v39 = vor.u32 %v4612_v26, %v3249_v25  ;;  %v3254_v43 = vor.u32 %v4611_v29, %v3251_v30 }
  0x3c   : > { %673 = vmatpush.bf16.msra.mxu3 %v3342_v6  ;;  %v3315_v35 = vld [vmem:[%s7186_s1 + $0x8] sm:$0xf0]  ;;  %v3451_v36 = vld [vmem:[%s7186_s1 + $0x170] sm:$0xf]  ;;  %v4642_v37 = vld [vmem:[%s7186_s1 + $0x174] sm:$0xf0]  ;;  %v3314_v44 = vor.u32 %v4596_v33, %v3313_v31 }
  0x3d   : > { %v4641_v38 = vld [vmem:[%s7186_s1 + $0x174] sm:$0xf]  ;;  %v3453_v40 = vld [vmem:[%s7186_s1 + $0x178] sm:$0xf0]  ;;  %v3533_v41 = vld [vmem:[%s7186_s1 + $0x1f0] sm:$0xf]  ;;  %v3318_v47 = vor.u32 %v4595_v34, %v3315_v35  ;;  %v3452_v48 = vor.u32 %v4642_v37, %v3451_v36 }
  0x3e   : > { %548 = vmatpush.bf16.msra.mxu0 %v3266_v12  ;;  %v4658_v42 = vld [vmem:[%s7186_s1 + $0x1f4] sm:$0xf0]  ;;  %v4657_v45 = vld [vmem:[%s7186_s1 + $0x1f4] sm:$0xf]  ;;  %v3535_v46 = vld [vmem:[%s7186_s1 + $0x1f8] sm:$0xf0]  ;;  %v3456_v49 = vor.u32 %v4641_v38, %v3453_v40 }
  0x3f   : > { %561 = vmatpush.bf16.msra.mxu1 %v3270_v13  ;;  %661 = vmatpush.bf16.msra.mxu2 %v3330_v14  ;;  %v3534_v50 = vor.u32 %v4658_v42, %v3533_v41  ;;  %v3443_v51 = vld [vmem:[%s7186_s1 + $0x160] sm:$0xf]  ;;  %v4640_v52 = vld [vmem:[%s7186_s1 + $0x164] sm:$0xf0]  ;;  %v4639_v53 = vld [vmem:[%s7186_s1 + $0x164] sm:$0xf]  ;;  %v3538_v54 = vor.u32 %v4657_v45, %v3535_v46 }
  0x40   : > { %674 = vmatpush.bf16.msra.mxu3 %v3334_v18  ;;  %v3445_v55 = vld [vmem:[%s7186_s1 + $0x168] sm:$0xf0]  ;;  %v3525_v56 = vld [vmem:[%s7186_s1 + $0x1e0] sm:$0xf]  ;;  %v4656_v57 = vld [vmem:[%s7186_s1 + $0x1e4] sm:$0xf0]  ;;  %v3444_v60 = vor.u32 %v4640_v52, %v3443_v51 }
  0x41   : > { %v4655_v58 = vld [vmem:[%s7186_s1 + $0x1e4] sm:$0xf]  ;;  %v3527_v59 = vld [vmem:[%s7186_s1 + $0x1e8] sm:$0xf0]  ;;  %v3435_v61 = vld [vmem:[%s7186_s1 + $0x150] sm:$0xf]  ;;  %v3448_v63 = vor.u32 %v4639_v53, %v3445_v55  ;;  %v3526_v0 = vor.u32 %v4656_v57, %v3525_v56 }
  0x42   : > { %549 = vmatpush.bf16.msra.mxu0 %v3258_v24  ;;  %v4638_v62 = vld [vmem:[%s7186_s1 + $0x154] sm:$0xf0]  ;;  %v4637_v1 = vld [vmem:[%s7186_s1 + $0x154] sm:$0xf]  ;;  %v3437_v2 = vld [vmem:[%s7186_s1 + $0x158] sm:$0xf0]  ;;  %v3530_v4 = vor.u32 %v4655_v58, %v3527_v59 }
  0x43   : > { %562 = vmatpush.bf16.msra.mxu1 %v3262_v27  ;;  %662 = vmatpush.bf16.msra.mxu2 %v3322_v28  ;;  %v3517_v3 = vld [vmem:[%s7186_s1 + $0x1d0] sm:$0xf]  ;;  %v4654_v5 = vld [vmem:[%s7186_s1 + $0x1d4] sm:$0xf0]  ;;  %v4653_v6 = vld [vmem:[%s7186_s1 + $0x1d4] sm:$0xf]  ;;  %v3436_v10 = vor.u32 %v4638_v62, %v3435_v61  ;;  %v3440_v13 = vor.u32 %v4637_v1, %v3437_v2 }
  0x44   : > { %675 = vmatpush.bf16.msra.mxu3 %v3326_v32  ;;  %v3519_v7 = vld [vmem:[%s7186_s1 + $0x1d8] sm:$0xf0]  ;;  %v3229_v8 = vld [vmem:[%s5379_s28 + $0x6] sm:$0x1]  ;;  %v3230_v9 = vld [vmem:[%s5379_s28 + $0x8] sm:$0x1]  ;;  %v3518_v14 = vor.u32 %v4654_v5, %v3517_v3 }
  0x45   : > { %v3427_v11 = vld [vmem:[%s7186_s1 + $0x140] sm:$0xf]  ;;  %v4636_v12 = vld [vmem:[%s7186_s1 + $0x144] sm:$0xf0]  ;;  %457 = vst [vmem:[#allocation1] ss:$9 sm:$0xff] %v3229_v8  ;;  %v3522_v17 = vor.u32 %v4653_v6, %v3519_v7 }
  0x46   : > { %550 = vmatpush.bf16.msra.mxu0 %v3250_v39  ;;  %v4635_v15 = vld [vmem:[%s7186_s1 + $0x144] sm:$0xf]  ;;  %v3429_v16 = vld [vmem:[%s7186_s1 + $0x148] sm:$0xf0]  ;;  %460 = vst [vmem:[#allocation1 + $0x1] ss:$9 sm:$0xff] %v3230_v9  ;;  %v3428_v24 = vor.u32 %v4636_v12, %v3427_v11 }
  0x47   : > { %563 = vmatpush.bf16.msra.mxu1 %v3254_v43  ;;  %663 = vmatpush.bf16.msra.mxu2 %v3314_v44  ;;  %v3509_v18 = vld [vmem:[%s7186_s1 + $0x1c0] sm:$0xf]  ;;  %v4652_v19 = vld [vmem:[%s7186_s1 + $0x1c4] sm:$0xf0]  ;;  %v4651_v20 = vld [vmem:[%s7186_s1 + $0x1c4] sm:$0xf]  ;;  %v3432_v29 = vor.u32 %v4635_v15, %v3429_v16 }
  0x48   : > { %676 = vmatpush.bf16.msra.mxu3 %v3318_v47  ;;  %v3511_v21 = vld [vmem:[%s7186_s1 + $0x1c8] sm:$0xf0]  ;;  %v3419_v22 = vld [vmem:[%s7186_s1 + $0x130] sm:$0xf]  ;;  %v4634_v23 = vld [vmem:[%s7186_s1 + $0x134] sm:$0xf0]  ;;  %v3510_v30 = vor.u32 %v4652_v19, %v3509_v18 }
  0x49   : > { %v4633_v25 = vld [vmem:[%s7186_s1 + $0x134] sm:$0xf]  ;;  %v3421_v26 = vld [vmem:[%s7186_s1 + $0x138] sm:$0xf0]  ;;  %v3501_v27 = vld [vmem:[%s7186_s1 + $0x1b0] sm:$0xf]  ;;  %v3514_v35 = vor.u32 %v4651_v20, %v3511_v21  ;;  %v3420_v47 = vor.u32 %v4634_v23, %v3419_v22 }
  0x4a   : > { %857 = vmatpush.bf16.msrb.mxu0 %v3452_v48  ;;  %v4650_v28 = vld [vmem:[%s7186_s1 + $0x1b4] sm:$0xf0]  ;;  %vm692_vm0 = vcmask 1040384   ;;  %vm696_vm1 = vcmask 1042434   ;;  %v418_v31 = vld [vmem:[%s5379_s28] sm:$0x1] }
  0x4b   : > { %870 = vmatpush.bf16.msrb.mxu1 %v3456_v49  ;;  %992 = vmatpush.bf16.msrb.mxu2 %v3534_v50  ;;  %v419_v32 = vld [vmem:[%s5379_s28 + $0x2] sm:$0x1]  ;;  %v4649_v33 = vld [vmem:[%s7186_s1 + $0x1b4] sm:$0xf]  ;;  %v3503_v34 = vld [vmem:[%s7186_s1 + $0x1b8] sm:$0xf0]  ;;  %v3424_v50 = vor.u32 %v4633_v25, %v3421_v26  ;;  %v3502_v51 = vor.u32 %v4650_v28, %v3501_v27 }
  0x4c   : > { %1005 = vmatpush.bf16.msrb.mxu3 %v3538_v54  ;;  %v5436_v36 = vld [vmem:[%s7186_s1 + $0x120] sm:$0xf]  ;;  %v4632_v37 = vld [vmem:[%s7186_s1 + $0x124] sm:$0xf0]  ;;  %v5444_v38 = vld [vmem:[%s7186_s1 + $0x124] sm:$0xf]  ;;  %v3506_v54 = vor.u32 %v4649_v33, %v3503_v34 }
  0x4d   : > { %v5449_v39 = vld [vmem:[%s7186_s1 + $0x128] sm:$0xf0]  ;;  %v5454_v40 = vld [vmem:[%s7186_s1 + $0x1a0] sm:$0xf]  ;;  %v5459_v41 = vld [vmem:[%s7186_s1 + $0x1a4] sm:$0xf0]  ;;  %v3412_v57 = vor.u32 %v4632_v37, %v5436_v36 }
  0x4e   : > { %858 = vmatpush.bf16.msrb.mxu0 %v3444_v60  ;;  %v5464_v42 = vld [vmem:[%s7186_s1 + $0x1a4] sm:$0xf]  ;;  %v5469_v43 = vld [vmem:[%s7186_s1 + $0x1a8] sm:$0xf0]  ;;  %v5474_v44 = vld [vmem:[%s7186_s1 + $0x110] sm:$0xf]  ;;  %v3416_v58 = vor.u32 %v5444_v38, %v5449_v39  ;;  %v3494_v59 = vor.u32 %v5459_v41, %v5454_v40 }
  0x4f   : > { %871 = vmatpush.bf16.msrb.mxu1 %v3448_v63  ;;  %993 = vmatpush.bf16.msrb.mxu2 %v3526_v0  ;;  %v5479_v45 = vld [vmem:[%s7186_s1 + $0x114] sm:$0xf0]  ;;  %v461_v46 = vld [vmem:[#allocation1] sm:$0xff]  ;;  %v5484_v48 = vld [vmem:[%s7186_s1 + $0x114] sm:$0xf]  ;;  %vm700_vm2 = vcmask 1041408   ;;  %v3498_v60 = vor.u32 %v5464_v42, %v5469_v43 }
  0x50   : > { %1006 = vmatpush.bf16.msrb.mxu3 %v3530_v4  ;;  %v5489_v49 = vld [vmem:[%s7186_s1 + $0x118] sm:$0xf0]  ;;  %570 = vst [vmem:[#allocation1] ss:$9 sm:$0xff] %v418_v31  ;;  %v5494_v52 = vld [vmem:[%s7186_s1 + $0x190] sm:$0xf]  ;;  %551 = vmatmul.bf16.vlgmr.msra.gmra.mxu0 %v461_v46  ;;  %v3404_v62 = vor.u32 %v5479_v45, %v5474_v44 }
  0x51   : > { %v5499_v53 = vld [vmem:[%s7186_s1 + $0x194] sm:$0xf0]  ;;  %573 = vst [vmem:[#allocation1 + $0x1] ss:$9 sm:$0xff] %v419_v32  ;;  %v5504_v55 = vld [vmem:[%s7186_s1 + $0x194] sm:$0xf]  ;;  %564 = vmatmul.bf16.vlgmr.msra.gmra.mxu1 %v461_v46  ;;  %v3408_v63 = vor.u32 %v5484_v48, %v5489_v49 }
  0x52   : > { %859 = vmatpush.bf16.msrb.mxu0 %v3436_v10  ;;  %v5509_v56 = vld [vmem:[%s7186_s1 + $0x198] sm:$0xf0]  ;;  %v5521_v61 = vld [vmem:[%s7186_s1 + $0x100] sm:$0xf]  ;;  %v3486_v0 = vor.u32 %v5499_v53, %v5494_v52  ;;  %vm702_vm3 = vcmask 1041409   ;;  %vm704_vm4 = vcmask 1043459  }
  0x53   : > { %872 = vmatpush.bf16.msrb.mxu1 %v3440_v13  ;;  %994 = vmatpush.bf16.msrb.mxu2 %v3518_v14  ;;  %v682_v1 = vld [vmem:[%s5379_s28] sm:$0x3]  ;;  %v683_v2 = vld [vmem:[%s5379_s28 + $0x2] sm:$0x3]  ;;  %v3490_v3 = vor.u32 %v5504_v55, %v5509_v56  ;;  %v5541_v11 = vld [vmem:[%s7186_s1 + $0x104] sm:$0xf] }
  0x54   : > { %1007 = vmatpush.bf16.msrb.mxu3 %v3522_v17  ;;  %v5536_v4 = vld [vmem:[%s7186_s1 + $0x104] sm:$0xf0]  ;;  %v686_v5 = vrot.slane %v682_v1, 1  ;;  %v687_v6 = vrot.slane %v682_v1, 2  ;;  %v688_v7 = vrot.slane %v682_v1, 3  ;;  %v689_v8 = vrot.slane %v683_v2, 1 }
  0x55   : > { %v690_v9 = vrot.slane %v683_v2, 2  ;;  %v691_v10 = vrot.slane %v683_v2, 3  ;;  %v5546_v12 = vld [vmem:[%s7186_s1 + $0x108] sm:$0xf0]  ;;  %v5551_v13 = vld [vmem:[%s7186_s1 + $0x180] sm:$0xf]  ;;  %v3396_v19 = vor.u32 %v5536_v4, %v5521_v61 }
  0x56   : > { %860 = vmatpush.bf16.msrb.mxu0 %v3428_v24  ;;  %v5556_v14 = vld [vmem:[%s7186_s1 + $0x184] sm:$0xf0]  ;;  %v695_v15 = vsel %vm692_vm0, %v682_v1, %v686_v5  ;;  %v699_v16 = vsel %vm696_vm1, %v687_v6, %v688_v7  ;;  %v703_v17 = vsel %vm702_vm3, %v682_v1, %v686_v5  ;;  %v705_v18 = vsel %vm704_vm4, %v687_v6, %v688_v7  ;;  %v5567_v20 = vld [vmem:[%s7186_s1 + $0x270] sm:$0xf]  ;;  %v5572_v21 = vld [vmem:[%s7186_s1 + $0x274] sm:$0xf0] }
  0x57   : > { %873 = vmatpush.bf16.msrb.mxu1 %v3432_v29  ;;  %995 = vmatpush.bf16.msrb.mxu2 %v3510_v30  ;;  %v5577_v22 = vld [vmem:[%s7186_s1 + $0x274] sm:$0xf]  ;;  %vm706_vm5 = vcmask 1042433   ;;  %v712_v23 = vsel %vm692_vm0, %v683_v2, %v689_v8  ;;  %v715_v24 = vsel %vm696_vm1, %v690_v9, %v691_v10  ;;  %v3617_v26 = vld [vmem:[%s7186_s1 + $0x278] sm:$0xf0]  ;;  %v5585_v27 = vsel %vm700_vm2, %v695_v15, %v699_v16 }
  0x58   : > { %1008 = vmatpush.bf16.msrb.mxu3 %v3514_v35  ;;  %v574_v25 = vld [vmem:[#allocation1] sm:$0xff]  ;;  %v707_v28 = vsel %vm706_vm5, %v703_v17, %v705_v18  ;;  %v717_v29 = vsel %vm702_vm3, %v683_v2, %v689_v8  ;;  %vm722_vm6 = vsmask.f32 256  ;;  %v3479_v31 = vld [vmem:[%s7186_s1 + $0x188] sm:$0xf0]  ;;  %v718_v35 = vsel %vm704_vm4, %v690_v9, %v691_v10 }
  0x59   : > { %664 = vmatmul.bf16.vlgmr.msra.gmra.mxu2 %v574_v25  ;;  %677 = vmatmul.bf16.vlgmr.msra.gmra.mxu3 %v574_v25  ;;  %v4643_v30 = vld [vmem:[%s7186_s1 + $0x184] sm:$0xf]  ;;  %v3699_v32 = vld [vmem:[%s7186_s1 + $0x2f0] sm:$0xf]  ;;  %v4690_v33 = vld [vmem:[%s7186_s1 + $0x2f4] sm:$0xf0]  ;;  %v716_v37 = vsel %vm700_vm2, %v712_v23, %v715_v24  ;;  %v719_v38 = vsel %vm706_vm5, %v717_v29, %v718_v35  ;;  %v3400_v39 = vor.u32 %v5541_v11, %v5546_v12 }
  0x5a   : > { %861 = vmatpush.bf16.msrb.mxu0 %v3420_v47  ;;  %v709_v34 = vrot.slane %v707_v28, 1  ;;  %vm723_vm7 = vsmask.f32 1284  ;;  %vm725_vm8 = vsmask.f32 2312  ;;  %v3478_v40 = vor.u32 %v5556_v14, %v5551_v13 }
  0x5b   : > { %874 = vmatpush.bf16.msrb.mxu1 %v3424_v50  ;;  %996 = vmatpush.bf16.msrb.mxu2 %v3502_v51  ;;  %v4689_v36 = vld [vmem:[%s7186_s1 + $0x2f4] sm:$0xf]  ;;  %vm724_vm9 = vmor %vm722_vm6, %vm723_vm7  ;;  %vm727_vm10 = vsmask.f32 3340  ;;  %vm729_vm11 = vsmask.f32 4368  ;;  %v3616_v43 = vor.u32 %v5572_v21, %v5567_v20  ;;  %v3620_v44 = vor.u32 %v5577_v22, %v3617_v26 }
  0x5c   : > { %1009 = vmatpush.bf16.msrb.mxu3 %v3506_v54  ;;  %v3701_v41 = vld [vmem:[%s7186_s1 + $0x2f8] sm:$0xf0]  ;;  %v721_v42 = vrot.slane %v719_v38, 1  ;;  %vm726_vm12 = vmor %vm724_vm9, %vm725_vm8  ;;  %vm731_vm13 = vsmask.f32 5396  ;;  %v737_v46 = vshrl.u32 %v5585_v27, 16  ;;  %v3482_v51 = vor.u32 %v4643_v30, %v3479_v31 }
  0x5d   : > { %vm728_vm14 = vmor %vm726_vm12, %vm727_vm10  ;;  %vm733_vm15 = vsmask.f32 6424  ;;  %vm735_vm6 = vsmask.f32 7452  ;;  %v3607_v45 = vld [vmem:[%s7186_s1 + $0x260] sm:$0xf]  ;;  %v3700_v52 = vor.u32 %v4690_v33, %v3699_v32 }
  0x5e   : > { %862 = vmatpush.bf16.msrb.mxu0 %v3412_v57  ;;  %vm730_vm7 = vmor %vm728_vm14, %vm729_vm11  ;;  %v742_v47 = vshll.u32 %v709_v34, 16  ;;  %v745_v48 = vshrl.u32 %v716_v37, 16  ;;  %v750_v49 = vshll.u32 %v721_v42, 16  ;;  %v4672_v50 = vld [vmem:[%s7186_s1 + $0x264] sm:$0xf0]  ;;  %v3704_v57 = vor.u32 %v4689_v36, %v3701_v41 }
  0x5f   : > { %875 = vmatpush.bf16.msrb.mxu1 %v3416_v58  ;;  %997 = vmatpush.bf16.msrb.mxu2 %v3494_v59  ;;  %vm732_vm8 = vmor %vm730_vm7, %vm731_vm13  ;;  %v4671_v53 = vld [vmem:[%s7186_s1 + $0x264] sm:$0xf]  ;;  %v3609_v54 = vld [vmem:[%s7186_s1 + $0x268] sm:$0xf0]  ;;  %v3608_v59 = vor.u32 %v4672_v50, %v3607_v45 }
  0x60   : > { %1010 = vmatpush.bf16.msrb.mxu3 %v3498_v60  ;;  %vm734_vm9 = vmor %vm732_vm8, %vm733_vm15  ;;  %v3691_v55 = vld [vmem:[%s7186_s1 + $0x2e0] sm:$0xf]  ;;  %v4688_v56 = vld [vmem:[%s7186_s1 + $0x2e4] sm:$0xf0] }
  0x61   : > { %vm5650_vm10 = vmor %vm734_vm9, %vm735_vm6  ;;  %v4687_v60 = vld [vmem:[%s7186_s1 + $0x2e4] sm:$0xf]  ;;  %v3693_v61 = vld [vmem:[%s7186_s1 + $0x2e8] sm:$0xf0] }
  0x62   : > { %863 = vmatpush.bf16.msrb.mxu0 %v3404_v62  ;;  %v744_v62 = vsel %vm5650_vm10, %v737_v46, %v742_v47  ;;  %v3599_v1 = vld [vmem:[%s7186_s1 + $0x250] sm:$0xf]  ;;  %v4670_v2 = vld [vmem:[%s7186_s1 + $0x254] sm:$0xf0]  ;;  %v4669_v4 = vld [vmem:[%s7186_s1 + $0x254] sm:$0xf]  ;;  %v3696_v6 = vor.u32 %v4687_v60, %v3693_v61 }
  0x63   : > { %876 = vmatpush.bf16.msrb.mxu1 %v3408_v63  ;;  %998 = vmatpush.bf16.msrb.mxu2 %v3486_v0  ;;  %v752_v63 = vsel %vm5650_vm10, %v745_v48, %v750_v49  ;;  %v3612_v0 = vor.u32 %v4671_v53, %v3609_v54  ;;  %771 = vst [vmem:[#allocation1] ss:$9 sm:$0xff] %v744_v62  ;;  %v3601_v5 = vld [vmem:[%s7186_s1 + $0x258] sm:$0xf0]  ;;  %v3683_v7 = vld [vmem:[%s7186_s1 + $0x2d0] sm:$0xf] }
  0x64   : > { %1011 = vmatpush.bf16.msrb.mxu3 %v3490_v3  ;;  %v3692_v3 = vor.u32 %v4688_v56, %v3691_v55  ;;  %774 = vst [vmem:[#allocation1 + $0x1] ss:$9 sm:$0xff] %v752_v63  ;;  %v4686_v8 = vld [vmem:[%s7186_s1 + $0x2d4] sm:$0xf0]  ;;  %v3600_v9 = vor.u32 %v4670_v2, %v3599_v1  ;;  %v3604_v10 = vor.u32 %v4669_v4, %v3601_v5  ;;  %v4685_v11 = vld [vmem:[%s7186_s1 + $0x2d4] sm:$0xf] }
  0x65   : > { %v3685_v12 = vld [vmem:[%s7186_s1 + $0x2d8] sm:$0xf0]  ;;  %v3591_v13 = vld [vmem:[%s7186_s1 + $0x240] sm:$0xf]  ;;  %v3684_v14 = vor.u32 %v4686_v8, %v3683_v7  ;;  %v4668_v15 = vld [vmem:[%s7186_s1 + $0x244] sm:$0xf0] }
  0x66   : > { %864 = vmatpush.bf16.msrb.mxu0 %v3396_v19  ;;  %v4667_v16 = vld [vmem:[%s7186_s1 + $0x244] sm:$0xf]  ;;  %v3593_v17 = vld [vmem:[%s7186_s1 + $0x248] sm:$0xf0]  ;;  %v3675_v18 = vld [vmem:[%s7186_s1 + $0x2c0] sm:$0xf]  ;;  %v3688_v22 = vor.u32 %v4685_v11, %v3685_v12  ;;  %v3592_v24 = vor.u32 %v4668_v15, %v3591_v13 }
  0x67   : > { %877 = vmatpush.bf16.msrb.mxu1 %v3400_v39  ;;  %999 = vmatpush.bf16.msrb.mxu2 %v3478_v40  ;;  %v4684_v19 = vld [vmem:[%s7186_s1 + $0x2c4] sm:$0xf0]  ;;  %v3457_v20 = vld [vmem:[%s5379_s28 + $0xc] sm:$0x1]  ;;  %v3458_v21 = vld [vmem:[%s5379_s28 + $0xe] sm:$0x1]  ;;  %v3596_v25 = vor.u32 %v4667_v16, %v3593_v17 }
  0x68   : > { %1012 = vmatpush.bf16.msrb.mxu3 %v3482_v51  ;;  %v4683_v23 = vld [vmem:[%s7186_s1 + $0x2c4] sm:$0xf]  ;;  %v3677_v26 = vld [vmem:[%s7186_s1 + $0x2c8] sm:$0xf0]  ;;  %v3583_v27 = vld [vmem:[%s7186_s1 + $0x230] sm:$0xf]  ;;  %v3676_v30 = vor.u32 %v4684_v19, %v3675_v18 }
  0x69   : > { %v4666_v28 = vld [vmem:[%s7186_s1 + $0x234] sm:$0xf0]  ;;  %v4665_v31 = vld [vmem:[%s7186_s1 + $0x234] sm:$0xf]  ;;  %v3585_v32 = vld [vmem:[%s7186_s1 + $0x238] sm:$0xf0]  ;;  %v3680_v35 = vor.u32 %v4683_v23, %v3677_v26 }
  0x6a   : > { %1127 = vmatpush.bf16.msra.mxu0 %v3616_v43  ;;  %v3667_v33 = vld [vmem:[%s7186_s1 + $0x2b0] sm:$0xf]  ;;  %v4682_v34 = vld [vmem:[%s7186_s1 + $0x2b4] sm:$0xf0]  ;;  %v4681_v36 = vld [vmem:[%s7186_s1 + $0x2b4] sm:$0xf]  ;;  %v3584_v39 = vor.u32 %v4666_v28, %v3583_v27  ;;  %v3588_v40 = vor.u32 %v4665_v31, %v3585_v32 }
  0x6b   : > { %1140 = vmatpush.bf16.msra.mxu1 %v3620_v44  ;;  %1309 = vmatpush.bf16.msra.mxu2 %v3700_v52  ;;  %v775_v29 = vld [vmem:[#allocation1] sm:$0xff]  ;;  %v3669_v37 = vld [vmem:[%s7186_s1 + $0x2b8] sm:$0xf0]  ;;  %v4664_v41 = vld [vmem:[%s7186_s1 + $0x224] sm:$0xf0]  ;;  %v3668_v44 = vor.u32 %v4682_v34, %v3667_v33 }
  0x6c   : > { %1322 = vmatpush.bf16.msra.mxu3 %v3704_v57  ;;  %865 = vmatmul.bf16.vlgmr.msrb.gmra.mxu0 %v775_v29  ;;  %906 = vst [vmem:[#allocation1] ss:$9 sm:$0xff] %v3457_v20  ;;  %v3575_v38 = vld [vmem:[%s7186_s1 + $0x220] sm:$0xf]  ;;  %v4663_v42 = vld [vmem:[%s7186_s1 + $0x224] sm:$0xf]  ;;  %v3672_v54 = vor.u32 %v4681_v36, %v3669_v37 }
  0x6d   : > { %878 = vmatmul.bf16.vlgmr.msrb.gmra.mxu1 %v775_v29  ;;  %909 = vst [vmem:[#allocation1 + $0x1] ss:$9 sm:$0xff] %v3458_v21  ;;  %v3577_v43 = vld [vmem:[%s7186_s1 + $0x228] sm:$0xf0]  ;;  %v3659_v45 = vld [vmem:[%s7186_s1 + $0x2a0] sm:$0xf]  ;;  %v3576_v57 = vor.u32 %v4664_v41, %v3575_v38 }
  0x6e   : > { %1128 = vmatpush.bf16.msra.mxu0 %v3608_v59  ;;  %v4680_v46 = vld [vmem:[%s7186_s1 + $0x2a4] sm:$0xf0]  ;;  %v5759_v47 = vld [vmem:[%s7186_s1 + $0x2a4] sm:$0xf]  ;;  %v5764_v48 = vld [vmem:[%s7186_s1 + $0x2a8] sm:$0xf0]  ;;  %v3580_v60 = vor.u32 %v4663_v42, %v3577_v43 }
  0x6f   : > { %1141 = vmatpush.bf16.msra.mxu1 %v3612_v0  ;;  %1310 = vmatpush.bf16.msra.mxu2 %v3692_v3  ;;  %v5769_v49 = vld [vmem:[%s7186_s1 + $0x210] sm:$0xf]  ;;  %v5774_v50 = vld [vmem:[%s7186_s1 + $0x214] sm:$0xf0]  ;;  %v5779_v51 = vld [vmem:[%s7186_s1 + $0x214] sm:$0xf]  ;;  %v3660_v61 = vor.u32 %v4680_v46, %v3659_v45  ;;  %v3664_v2 = vor.u32 %v5759_v47, %v5764_v48 }
  0x70   : > { %1323 = vmatpush.bf16.msra.mxu3 %v3696_v6  ;;  %v5784_v52 = vld [vmem:[%s7186_s1 + $0x218] sm:$0xf0]  ;;  %v5789_v53 = vld [vmem:[%s7186_s1 + $0x290] sm:$0xf]  ;;  %v4678_v55 = vld [vmem:[%s7186_s1 + $0x294] sm:$0xf0]  ;;  %v3568_v3 = vor.u32 %v5774_v50, %v5769_v49 }
  0x71   : > { %v5797_v56 = vld [vmem:[%s7186_s1 + $0x294] sm:$0xf]  ;;  %v5802_v59 = vld [vmem:[%s7186_s1 + $0x298] sm:$0xf0]  ;;  %v5807_v62 = vld [vmem:[%s7186_s1 + $0x200] sm:$0xf]  ;;  %v3572_v4 = vor.u32 %v5779_v51, %v5784_v52  ;;  %v3652_v7 = vor.u32 %v4678_v55, %v5789_v53 }
  0x72   : > { %1129 = vmatpush.bf16.msra.mxu0 %v3600_v9  ;;  %v5812_v63 = vld [vmem:[%s7186_s1 + $0x204] sm:$0xf0]  ;;  %v3539_v0 = vld [vmem:[%s5379_s28 + $0x12] sm:$0x1]  ;;  %v3540_v5 = vld [vmem:[%s5379_s28 + $0x14] sm:$0x1]  ;;  %v3656_v8 = vor.u32 %v5797_v56, %v5802_v59 }
  0x73   : > { %1142 = vmatpush.bf16.msra.mxu1 %v3604_v10  ;;  %1311 = vmatpush.bf16.msra.mxu2 %v3684_v14  ;;  %v3621_v6 = vld [vmem:[%s5379_s28 + $0xc] sm:$0x3]  ;;  %v3622_v9 = vld [vmem:[%s5379_s28 + $0xe] sm:$0x3]  ;;  %v3560_v16 = vor.u32 %v5812_v63, %v5807_v62  ;;  %v4659_v17 = vld [vmem:[%s7186_s1 + $0x204] sm:$0xf] }
  0x74   : > { %1324 = vmatpush.bf16.msra.mxu3 %v3688_v22  ;;  %v910_v1 = vld [vmem:[#allocation1] sm:$0xff]  ;;  %v1159_v10 = vrot.slane %v3621_v6, 1  ;;  %v1160_v11 = vrot.slane %v3621_v6, 2  ;;  %v1161_v12 = vrot.slane %v3621_v6, 3  ;;  %v1162_v13 = vrot.slane %v3622_v9, 1 }
  0x75   : > { %1000 = vmatmul.bf16.vlgmr.msrb.gmra.mxu2 %v910_v1  ;;  %1013 = vmatmul.bf16.vlgmr.msrb.gmra.mxu3 %v910_v1  ;;  %1041 = vst [vmem:[#allocation1] ss:$9 sm:$0xff] %v3539_v0  ;;  %v1163_v14 = vrot.slane %v3622_v9, 2  ;;  %v1164_v15 = vrot.slane %v3622_v9, 3  ;;  %v3561_v18 = vld [vmem:[%s7186_s1 + $0x208] sm:$0xf0] }
  0x76   : > { %1130 = vmatpush.bf16.msra.mxu0 %v3592_v24  ;;  %1044 = vst [vmem:[#allocation1 + $0x1] ss:$9 sm:$0xff] %v3540_v5  ;;  %v3643_v19 = vld [vmem:[%s7186_s1 + $0x280] sm:$0xf]  ;;  %v1167_v20 = vsel %vm692_vm0, %v3621_v6, %v1159_v10  ;;  %v1172_v21 = vsel %vm702_vm3, %v3621_v6, %v1159_v10  ;;  %v4676_v22 = vld [vmem:[%s7186_s1 + $0x284] sm:$0xf0]  ;;  %v1173_v26 = vsel %vm704_vm4, %v1160_v11, %v1161_v12 }
  0x77   : > { %1143 = vmatpush.bf16.msra.mxu1 %v3596_v25  ;;  %1312 = vmatpush.bf16.msra.mxu2 %v3676_v30  ;;  %v3781_v23 = vld [vmem:[%s7186_s1 + $0x370] sm:$0xf]  ;;  %v4706_v24 = vld [vmem:[%s7186_s1 + $0x374] sm:$0xf0]  ;;  %v1170_v25 = vsel %vm696_vm1, %v1160_v11, %v1161_v12  ;;  %v1179_v27 = vsel %vm692_vm0, %v3622_v9, %v1162_v13  ;;  %v1182_v28 = vsel %vm696_vm1, %v1163_v14, %v1164_v15  ;;  %v4675_v29 = vld [vmem:[%s7186_s1 + $0x284] sm:$0xf] }
  0x78   : > { %1325 = vmatpush.bf16.msra.mxu3 %v3680_v35  ;;  %v3645_v30 = vld [vmem:[%s7186_s1 + $0x288] sm:$0xf0]  ;;  %v4705_v31 = vld [vmem:[%s7186_s1 + $0x374] sm:$0xf]  ;;  %v3783_v32 = vld [vmem:[%s7186_s1 + $0x378] sm:$0xf0]  ;;  %v1171_v33 = vsel %vm700_vm2, %v1167_v20, %v1170_v25  ;;  %v1174_v34 = vsel %vm706_vm5, %v1172_v21, %v1173_v26  ;;  %v1183_v35 = vsel %vm700_vm2, %v1179_v27, %v1182_v28  ;;  %v1184_v36 = vsel %vm702_vm3, %v3622_v9, %v1162_v13 }
  0x79   : > { %v3564_v37 = vor.u32 %v4659_v17, %v3561_v18  ;;  %v3863_v38 = vld [vmem:[%s7186_s1 + $0x3f0] sm:$0xf]  ;;  %v1185_v41 = vsel %vm704_vm4, %v1163_v14, %v1164_v15  ;;  %v1189_v42 = vshrl.u32 %v1171_v33, 16  ;;  %v3644_v43 = vor.u32 %v4676_v22, %v3643_v19  ;;  %v4721_v45 = vld [vmem:[%s7186_s1 + $0x3f4] sm:$0xf] }
  0x7a   : > { %1131 = vmatpush.bf16.msra.mxu0 %v3584_v39  ;;  %v4722_v39 = vld [vmem:[%s7186_s1 + $0x3f4] sm:$0xf0]  ;;  %v3865_v46 = vld [vmem:[%s7186_s1 + $0x3f8] sm:$0xf0]  ;;  %v1186_v47 = vsel %vm706_vm5, %v1184_v36, %v1185_v41  ;;  %v3773_v48 = vld [vmem:[%s7186_s1 + $0x360] sm:$0xf]  ;;  %v3786_v49 = vor.u32 %v4705_v31, %v3783_v32  ;;  %v3648_v59 = vor.u32 %v4675_v29, %v3645_v30 }
  0x7b   : > { %1144 = vmatpush.bf16.msra.mxu1 %v3588_v40  ;;  %1313 = vmatpush.bf16.msra.mxu2 %v3668_v44  ;;  %v1176_v40 = vrot.slane %v1174_v34, 1  ;;  %v3782_v44 = vor.u32 %v4706_v24, %v3781_v23  ;;  %v1188_v50 = vrot.slane %v1186_v47, 1  ;;  %v1197_v52 = vshrl.u32 %v1183_v35, 16  ;;  %v4704_v53 = vld [vmem:[%s7186_s1 + $0x364] sm:$0xf0] }
  0x7c   : > { %1326 = vmatpush.bf16.msra.mxu3 %v3672_v54  ;;  %v3864_v54 = vor.u32 %v4722_v39, %v3863_v38  ;;  %v4703_v55 = vld [vmem:[%s7186_s1 + $0x364] sm:$0xf]  ;;  %v3775_v56 = vld [vmem:[%s7186_s1 + $0x368] sm:$0xf0]  ;;  %v3855_v62 = vld [vmem:[%s7186_s1 + $0x3e0] sm:$0xf]  ;;  %v3868_v0 = vor.u32 %v4721_v45, %v3865_v46 }
  0x7d   : > { %v1194_v51 = vshll.u32 %v1176_v40, 16  ;;  %v4720_v63 = vld [vmem:[%s7186_s1 + $0x3e4] sm:$0xf0]  ;;  %v4719_v1 = vld [vmem:[%s7186_s1 + $0x3e4] sm:$0xf] }
  0x7e   : > { %1132 = vmatpush.bf16.msra.mxu0 %v3576_v57  ;;  %v1045_v57 = vld [vmem:[#allocation1] sm:$0xff]  ;;  %v3857_v5 = vld [vmem:[%s7186_s1 + $0x3e8] sm:$0xf0]  ;;  %v3765_v6 = vld [vmem:[%s7186_s1 + $0x350] sm:$0xf] }
  0x7f   : > { %1145 = vmatpush.bf16.msra.mxu1 %v3580_v60  ;;  %1314 = vmatpush.bf16.msra.mxu2 %v3660_v61  ;;  %v1196_v60 = vsel %vm5650_vm10, %v1189_v42, %v1194_v51  ;;  %v1202_v61 = vshll.u32 %v1188_v50, 16  ;;  %v4701_v9 = vld [vmem:[%s7186_s1 + $0x354] sm:$0xf]  ;;  %v3767_v10 = vld [vmem:[%s7186_s1 + $0x358] sm:$0xf0]  ;;  %v3860_v11 = vor.u32 %v4719_v1, %v3857_v5 }
  0x80   : > { %1327 = vmatpush.bf16.msra.mxu3 %v3664_v2  ;;  %1223 = vst [vmem:[#allocation1] ss:$9 sm:$0xff] %v1196_v60  ;;  %v3847_v12 = vld [vmem:[%s7186_s1 + $0x3d0] sm:$0xf]  ;;  %v4718_v13 = vld [vmem:[%s7186_s1 + $0x3d4] sm:$0xf0] }
  0x81   : > { %v1204_v2 = vsel %vm5650_vm10, %v1197_v52, %v1202_v61  ;;  %v3705_v14 = vld [vmem:[%s5379_s28 + $0x2] sm:$0x1]  ;;  %v4717_v17 = vld [vmem:[%s7186_s1 + $0x3d4] sm:$0xf]  ;;  %v3849_v18 = vld [vmem:[%s7186_s1 + $0x3d8] sm:$0xf0]  ;;  %v3848_v24 = vor.u32 %v4718_v13, %v3847_v12 }
  0x82   : > { %1133 = vmatpush.bf16.msra.mxu0 %v3568_v3  ;;  %v3774_v3 = vor.u32 %v4704_v53, %v3773_v48  ;;  %1226 = vst [vmem:[#allocation1 + $0x1] ss:$9 sm:$0xff] %v1204_v2  ;;  %v3757_v19 = vld [vmem:[%s7186_s1 + $0x340] sm:$0xf]  ;;  %v3706_v20 = vld [vmem:[%s5379_s28 + $0x4] sm:$0x1]  ;;  %v3852_v28 = vor.u32 %v4717_v17, %v3849_v18 }
  0x83   : > { %1146 = vmatpush.bf16.msra.mxu1 %v3572_v4  ;;  %1315 = vmatpush.bf16.msra.mxu2 %v3652_v7  ;;  %v3778_v4 = vor.u32 %v4703_v55, %v3775_v56  ;;  %v4702_v7 = vld [vmem:[%s7186_s1 + $0x354] sm:$0xf0]  ;;  %v4700_v21 = vld [vmem:[%s7186_s1 + $0x344] sm:$0xf0]  ;;  %v4699_v22 = vld [vmem:[%s7186_s1 + $0x344] sm:$0xf] }
  0x84   : > { %1328 = vmatpush.bf16.msra.mxu3 %v3656_v8  ;;  %v3856_v8 = vor.u32 %v4720_v63, %v3855_v62  ;;  %v3766_v15 = vor.u32 %v4702_v7, %v3765_v6  ;;  %v3759_v23 = vld [vmem:[%s7186_s1 + $0x348] sm:$0xf0]  ;;  %v3839_v25 = vld [vmem:[%s7186_s1 + $0x3c0] sm:$0xf]  ;;  %v4716_v26 = vld [vmem:[%s7186_s1 + $0x3c4] sm:$0xf0]  ;;  %v3758_v33 = vor.u32 %v4700_v21, %v3757_v19 }
  0x85   : > { %v4715_v27 = vld [vmem:[%s7186_s1 + $0x3c4] sm:$0xf]  ;;  %v3841_v29 = vld [vmem:[%s7186_s1 + $0x3c8] sm:$0xf0]  ;;  %v3749_v30 = vld [vmem:[%s7186_s1 + $0x330] sm:$0xf]  ;;  %v3762_v34 = vor.u32 %v4699_v22, %v3759_v23  ;;  %v3840_v41 = vor.u32 %v4716_v26, %v3839_v25 }
  0x86   : > { %1134 = vmatpush.bf16.msra.mxu0 %v3560_v16  ;;  %v3770_v16 = vor.u32 %v4701_v9, %v3767_v10  ;;  %v4698_v31 = vld [vmem:[%s7186_s1 + $0x334] sm:$0xf0]  ;;  %v4697_v35 = vld [vmem:[%s7186_s1 + $0x334] sm:$0xf]  ;;  %v3751_v36 = vld [vmem:[%s7186_s1 + $0x338] sm:$0xf0] }
  0x87   : > { %1147 = vmatpush.bf16.msra.mxu1 %v3564_v37  ;;  %1316 = vmatpush.bf16.msra.mxu2 %v3644_v43  ;;  %v3831_v37 = vld [vmem:[%s7186_s1 + $0x3b0] sm:$0xf]  ;;  %v4714_v38 = vld [vmem:[%s7186_s1 + $0x3b4] sm:$0xf0]  ;;  %v4713_v39 = vld [vmem:[%s7186_s1 + $0x3b4] sm:$0xf]  ;;  %v3750_v48 = vor.u32 %v4698_v31, %v3749_v30 }
  0x88   : > { %1329 = vmatpush.bf16.msra.mxu3 %v3648_v59  ;;  %v3833_v40 = vld [vmem:[%s7186_s1 + $0x3b8] sm:$0xf0]  ;;  %v3741_v42 = vld [vmem:[%s7186_s1 + $0x320] sm:$0xf]  ;;  %v4696_v43 = vld [vmem:[%s7186_s1 + $0x324] sm:$0xf0] }
  0x89   : > { %1135 = vmatmul.bf16.vlgmr.msra.gmra.mxu0 %v1045_v57  ;;  %v1227_v32 = vld [vmem:[#allocation1] sm:$0xff]  ;;  %v3743_v46 = vld [vmem:[%s7186_s1 + $0x328] sm:$0xf0]  ;;  %v4712_v50 = vld [vmem:[%s7186_s1 + $0x3a4] sm:$0xf0]  ;;  %v3836_v55 = vor.u32 %v4713_v39, %v3833_v40  ;;  %v3742_v60 = vor.u32 %v4696_v43, %v3741_v42 }
  0x8a   : > { %1444 = vmatpush.bf16.msrb.mxu0 %v3782_v44  ;;  %1148 = vmatmul.bf16.vlgmr.msra.gmra.mxu1 %v1045_v57  ;;  %1358 = vst [vmem:[#allocation1] ss:$9 sm:$0xff] %v3705_v14  ;;  %v3844_v44 = vor.u32 %v4715_v27, %v3841_v29  ;;  %v4695_v45 = vld [vmem:[%s7186_s1 + $0x324] sm:$0xf]  ;;  %v6000_v47 = vld [vmem:[%s7186_s1 + $0x3a0] sm:$0xf]  ;;  %v3832_v57 = vor.u32 %v4714_v38, %v3831_v37 }
  0x8b   : > { %1457 = vmatpush.bf16.msrb.mxu1 %v3786_v49  ;;  %1579 = vmatpush.bf16.msrb.mxu2 %v3864_v54  ;;  %1361 = vst [vmem:[#allocation1 + $0x1] ss:$9 sm:$0xff] %v3706_v20  ;;  %v3754_v49 = vor.u32 %v4697_v35, %v3751_v36  ;;  %v6008_v51 = vld [vmem:[%s7186_s1 + $0x3a4] sm:$0xf]  ;;  %v6013_v52 = vld [vmem:[%s7186_s1 + $0x3a8] sm:$0xf0]  ;;  %v3746_v61 = vor.u32 %v4695_v45, %v3743_v46 }
  0x8c   : > { %1592 = vmatpush.bf16.msrb.mxu3 %v3868_v0  ;;  %1317 = vmatmul.bf16.vlgmr.msra.gmra.mxu2 %v1227_v32  ;;  %v6018_v53 = vld [vmem:[%s7186_s1 + $0x310] sm:$0xf]  ;;  %v6023_v54 = vld [vmem:[%s7186_s1 + $0x314] sm:$0xf0]  ;;  %v6028_v56 = vld [vmem:[%s7186_s1 + $0x314] sm:$0xf]  ;;  %v3824_v62 = vor.u32 %v4712_v50, %v6000_v47  ;;  %v3828_v63 = vor.u32 %v6008_v51, %v6013_v52 }
  0x8d   : > { %1330 = vmatmul.bf16.vlgmr.msra.gmra.mxu3 %v1227_v32  ;;  %v6033_v59 = vld [vmem:[%s7186_s1 + $0x318] sm:$0xf0]  ;;  %v3787_v0 = vld [vmem:[%s5379_s28 + $0x8] sm:$0x1]  ;;  %v3788_v1 = vld [vmem:[%s5379_s28 + $0xa] sm:$0x1] }
  0x8e   : > { %1445 = vmatpush.bf16.msrb.mxu0 %v3774_v3  ;;  %v3869_v2 = vld [vmem:[%s5379_s28 + $0x2] sm:$0x3]  ;;  %v3734_v3 = vor.u32 %v6023_v54, %v6018_v53  ;;  %v3815_v9 = vld [vmem:[%s7186_s1 + $0x390] sm:$0xf]  ;;  %v4710_v14 = vld [vmem:[%s7186_s1 + $0x394] sm:$0xf0] }
  0x8f   : > { %1458 = vmatpush.bf16.msrb.mxu1 %v3778_v4  ;;  %1580 = vmatpush.bf16.msrb.mxu2 %v3856_v8  ;;  %v3870_v4 = vld [vmem:[%s5379_s28 + $0x4] sm:$0x3]  ;;  %v1611_v5 = vrot.slane %v3869_v2, 1  ;;  %v1612_v6 = vrot.slane %v3869_v2, 2  ;;  %v1613_v7 = vrot.slane %v3869_v2, 3  ;;  %v3738_v8 = vor.u32 %v6028_v56, %v6033_v59  ;;  %s417_s28 = scalar_lea.vmem [#allocation3], %s5352_s17 }
  0x90   : > { %1593 = vmatpush.bf16.msrb.mxu3 %v3860_v11  ;;  %v1614_v11 = vrot.slane %v3870_v4, 1  ;;  %v1615_v12 = vrot.slane %v3870_v4, 2  ;;  %v1616_v13 = vrot.slane %v3870_v4, 3  ;;  %v3817_v19 = vld [vmem:[%s7186_s1 + $0x398] sm:$0xf0]  ;;  %v3816_v36 = vor.u32 %v4710_v14, %v3815_v9  ;;  %s3161_s14 = sshll.u32 %s417_s28, 4  ;;  %s3162_s14 = int_to_ptr.vmem [resolvable:$true] %s3161_s14 }
  0x91   : > { %v1622_v17 = vsel %vm696_vm1, %v1612_v6, %v1613_v7  ;;  %v1624_v18 = vsel %vm702_vm3, %v3869_v2, %v1611_v5  ;;  %v3725_v20 = vld [vmem:[%s7186_s1 + $0x300] sm:$0xf]  ;;  %v1625_v22 = vsel %vm704_vm4, %v1612_v6, %v1613_v7  ;;  %v4691_v25 = vld [vmem:[%s7186_s1 + $0x304] sm:$0xf]  ;;  %v3727_v26 = vld [vmem:[%s7186_s1 + $0x308] sm:$0xf0] }
  0x92   : > { %1446 = vmatpush.bf16.msrb.mxu0 %v3766_v15  ;;  %v6049_v10 = vld [vmem:[#allocation1] sm:$0xff]  ;;  %v4709_v15 = vld [vmem:[%s7186_s1 + $0x394] sm:$0xf]  ;;  %v1631_v23 = vsel %vm692_vm0, %v3870_v4, %v1614_v11  ;;  %v1626_v27 = vsel %vm706_vm5, %v1624_v18, %v1625_v22  ;;  %v1636_v29 = vsel %vm702_vm3, %v3870_v4, %v1614_v11  ;;  %v3947_v31 = vld [vmem:[%s7186_s1 + $0x470] sm:$0xf]  ;;  %v3730_v47 = vor.u32 %v4691_v25, %v3727_v26 }
  0x93   : > { %1459 = vmatpush.bf16.msrb.mxu1 %v3770_v16  ;;  %1581 = vmatpush.bf16.msrb.mxu2 %v3848_v24  ;;  %1493 = vst [vmem:[#allocation1] ss:$9 sm:$0xff] %v3787_v0  ;;  %v1619_v16 = vsel %vm692_vm0, %v3869_v2, %v1611_v5  ;;  %v4692_v24 = vld [vmem:[%s7186_s1 + $0x304] sm:$0xf0]  ;;  %v3807_v30 = vld [vmem:[%s7186_s1 + $0x380] sm:$0xf] }
  0x94   : > { %1594 = vmatpush.bf16.msrb.mxu3 %v3852_v28  ;;  %1496 = vst [vmem:[#allocation1 + $0x1] ss:$9 sm:$0xff] %v3788_v1  ;;  %v1623_v21 = vsel %vm700_vm2, %v1619_v16, %v1622_v17  ;;  %v1634_v28 = vsel %vm696_vm1, %v1615_v12, %v1616_v13  ;;  %v1628_v32 = vrot.slane %v1626_v27, 1  ;;  %v4738_v37 = vld [vmem:[%s7186_s1 + $0x474] sm:$0xf0]  ;;  %v3726_v46 = vor.u32 %v4692_v24, %v3725_v20 }
  0x95   : > { %v1641_v35 = vshrl.u32 %v1623_v21, 16  ;;  %v4737_v38 = vld [vmem:[%s7186_s1 + $0x474] sm:$0xf]  ;;  %v3949_v39 = vld [vmem:[%s7186_s1 + $0x478] sm:$0xf0]  ;;  %v3948_v50 = vor.u32 %v4738_v37, %v3947_v31  ;;  %vm1807_vm0 = vcmask 1043456  }
  0x96   : > { %1447 = vmatpush.bf16.msrb.mxu0 %v3758_v33  ;;  %v1635_v33 = vsel %vm700_vm2, %v1631_v23, %v1634_v28  ;;  %v4708_v42 = vld [vmem:[%s7186_s1 + $0x384] sm:$0xf0]  ;;  %v3952_v51 = vor.u32 %v4737_v38, %v3949_v39  ;;  %v3931_v58 = vld [vmem:[%s7186_s1 + $0x450] sm:$0xf]  ;;  %v4734_v1 = vld [vmem:[%s7186_s1 + $0x454] sm:$0xf0] }
  0x97   : > { %1460 = vmatpush.bf16.msrb.mxu1 %v3762_v34  ;;  %1582 = vmatpush.bf16.msrb.mxu2 %v3840_v41  ;;  %v1637_v34 = vsel %vm704_vm4, %v1615_v12, %v1616_v13  ;;  %v3820_v41 = vor.u32 %v4709_v15, %v3817_v19  ;;  %v1649_v45 = vshrl.u32 %v1635_v33, 16  ;;  %v3808_v54 = vor.u32 %v4708_v42, %v3807_v30  ;;  %v4736_v56 = vld [vmem:[%s7186_s1 + $0x464] sm:$0xf0]  ;;  %v4733_v2 = vld [vmem:[%s7186_s1 + $0x454] sm:$0xf] }
  0x98   : > { %1595 = vmatpush.bf16.msrb.mxu3 %v3844_v44  ;;  %v1638_v40 = vsel %vm706_vm5, %v1636_v29, %v1637_v34  ;;  %v1646_v44 = vshll.u32 %v1628_v32, 16  ;;  %v3932_v4 = vor.u32 %v4734_v1, %v3931_v58  ;;  %v3923_v6 = vld [vmem:[%s7186_s1 + $0x440] sm:$0xf]  ;;  %v4732_v7 = vld [vmem:[%s7186_s1 + $0x444] sm:$0xf0] }
  0x99   : > { %v1640_v43 = vrot.slane %v1638_v40, 1  ;;  %v3925_v9 = vld [vmem:[%s7186_s1 + $0x448] sm:$0xf0]  ;;  %v3915_v12 = vld [vmem:[%s7186_s1 + $0x430] sm:$0xf] }
  0x9a   : > { %1448 = vmatpush.bf16.msrb.mxu0 %v3750_v48  ;;  %v4707_v48 = vld [vmem:[%s7186_s1 + $0x384] sm:$0xf]  ;;  %v1648_v52 = vsel %vm5650_vm10, %v1641_v35, %v1646_v44  ;;  %v4730_v13 = vld [vmem:[%s7186_s1 + $0x434] sm:$0xf0]  ;;  %v4729_v14 = vld [vmem:[%s7186_s1 + $0x434] sm:$0xf] }
  0x9b   : > { %1461 = vmatpush.bf16.msrb.mxu1 %v3754_v49  ;;  %1583 = vmatpush.bf16.msrb.mxu2 %v3832_v57  ;;  %v3809_v49 = vld [vmem:[%s7186_s1 + $0x388] sm:$0xf0]  ;;  %v1654_v53 = vshll.u32 %v1640_v43, 16  ;;  %v1497_v57 = vld [vmem:[#allocation1] sm:$0xff]  ;;  %v3917_v15 = vld [vmem:[%s7186_s1 + $0x438] sm:$0xf0]  ;;  %v3916_v16 = vor.u32 %v4730_v13, %v3915_v12 }
  0x9c   : > { %1596 = vmatpush.bf16.msrb.mxu3 %v3836_v55  ;;  %v3939_v55 = vld [vmem:[%s7186_s1 + $0x460] sm:$0xf]  ;;  %v3812_v59 = vor.u32 %v4707_v48, %v3809_v49  ;;  %1675 = vst [vmem:[#allocation1] ss:$9 sm:$0xff] %v1648_v52  ;;  %v3920_v17 = vor.u32 %v4729_v14, %v3917_v15  ;;  %v4728_v19 = vld [vmem:[%s7186_s1 + $0x424] sm:$0xf0] }
  0x9d   : > { %v3907_v18 = vld [vmem:[%s7186_s1 + $0x420] sm:$0xf]  ;;  %v4727_v20 = vld [vmem:[%s7186_s1 + $0x424] sm:$0xf]  ;;  %v3909_v21 = vld [vmem:[%s7186_s1 + $0x428] sm:$0xf0] }
  0x9e   : > { %1449 = vmatpush.bf16.msrb.mxu0 %v3742_v60  ;;  %v1656_v60 = vsel %vm5650_vm10, %v1649_v45, %v1654_v53  ;;  %v3908_v22 = vor.u32 %v4728_v19, %v3907_v18  ;;  %v3912_v23 = vor.u32 %v4727_v20, %v3909_v21  ;;  %v3899_v24 = vld [vmem:[%s7186_s1 + $0x410] sm:$0xf]  ;;  %v4726_v25 = vld [vmem:[%s7186_s1 + $0x414] sm:$0xf0]  ;;  %v4725_v26 = vld [vmem:[%s7186_s1 + $0x414] sm:$0xf] }
  0x9f   : > { %1462 = vmatpush.bf16.msrb.mxu1 %v3746_v61  ;;  %1584 = vmatpush.bf16.msrb.mxu2 %v3824_v62  ;;  %v4735_v61 = vld [vmem:[%s7186_s1 + $0x464] sm:$0xf]  ;;  %v3941_v62 = vld [vmem:[%s7186_s1 + $0x468] sm:$0xf0]  ;;  %1678 = vst [vmem:[#allocation1 + $0x1] ss:$9 sm:$0xff] %v1656_v60  ;;  %v3900_v28 = vor.u32 %v4726_v25, %v3899_v24 }
  0xa0   : > { %1597 = vmatpush.bf16.msrb.mxu3 %v3828_v63  ;;  %v3940_v63 = vor.u32 %v4736_v56, %v3939_v55  ;;  %v3944_v0 = vor.u32 %v4735_v61, %v3941_v62  ;;  %v3901_v27 = vld [vmem:[%s7186_s1 + $0x418] sm:$0xf0]  ;;  %v3891_v30 = vld [vmem:[%s7186_s1 + $0x400] sm:$0xf]  ;;  %v4724_v31 = vld [vmem:[%s7186_s1 + $0x404] sm:$0xf0] }
  0xa1   : > { %v3904_v29 = vor.u32 %v4725_v26, %v3901_v27  ;;  %v4723_v32 = vld [vmem:[%s7186_s1 + $0x404] sm:$0xf]  ;;  %v3893_v33 = vld [vmem:[%s7186_s1 + $0x408] sm:$0xf0]  ;;  %v3892_v34 = vor.u32 %v4724_v31, %v3891_v30  ;;  %v4833_v52 = vld [vmem:[%s7190_s5 + $0xec] sm:$0xf0] }
  0xa2   : > { %1450 = vmatpush.bf16.msrb.mxu0 %v3734_v3  ;;  %v3933_v3 = vld [vmem:[%s7186_s1 + $0x458] sm:$0xf0]  ;;  %v3896_v35 = vor.u32 %v4723_v32, %v3893_v33  ;;  %v4195_v53 = vld [vmem:[%s7190_s5 + $0x1e0] sm:$0xf]  ;;  %v4831_v55 = vld [vmem:[%s7190_s5 + $0xe4] sm:$0xf] }
  0xa3   : > { %1463 = vmatpush.bf16.msrb.mxu1 %v3738_v8  ;;  %1585 = vmatpush.bf16.msrb.mxu2 %v3816_v36  ;;  %v3936_v5 = vor.u32 %v4733_v2, %v3933_v3  ;;  %v4731_v8 = vld [vmem:[%s7186_s1 + $0x444] sm:$0xf]  ;;  %v4069_v56 = vld [vmem:[%s7190_s5 + $0xf0] sm:$0xf0]  ;;  %v4035_v18 = vld [vmem:[%s7190_s5 + $0xa0] sm:$0xf] }
  0xa4   : > { %1598 = vmatpush.bf16.msrb.mxu3 %v3820_v41  ;;  %v3928_v11 = vor.u32 %v4731_v8, %v3925_v9  ;;  %v4072_v60 = vor.u32 %v4831_v55, %v4069_v56  ;;  %v4863_v61 = vld [vmem:[%s7190_s5 + $0x1e4] sm:$0xf]  ;;  %v4197_v62 = vld [vmem:[%s7190_s5 + $0x1f0] sm:$0xf0]  ;;  %v4861_v9 = vld [vmem:[%s7190_s5 + $0x1cc] sm:$0xf0] }
  0xa5   : > { %v4825_v20 = vld [vmem:[%s7190_s5 + $0xac] sm:$0xf0]  ;;  %v4163_v21 = vld [vmem:[%s7190_s5 + $0x1a0] sm:$0xf]  ;;  %v4823_v25 = vld [vmem:[%s7190_s5 + $0xa4] sm:$0xf] }
  0xa6   : > { %1451 = vmatpush.bf16.msrb.mxu0 %v3726_v46  ;;  %v1679_v36 = vld [vmem:[#allocation1] sm:$0xff]  ;;  %v4037_v26 = vld [vmem:[%s7190_s5 + $0xb0] sm:$0xf0]  ;;  %v4821_v33 = vld [vmem:[%s7190_s5 + $0x8c] sm:$0xf0] }
  0xa7   : > { %1464 = vmatpush.bf16.msrb.mxu1 %v3730_v47  ;;  %1586 = vmatpush.bf16.msrb.mxu2 %v3808_v54  ;;  %v4855_v27 = vld [vmem:[%s7190_s5 + $0x1a4] sm:$0xf]  ;;  %v4019_v32 = vld [vmem:[%s7190_s5 + $0x80] sm:$0xf]  ;;  %v4133_v56 = vld [vmem:[%s7190_s5 + $0x170] sm:$0xf0] }
  0xa8   : > { %1599 = vmatpush.bf16.msrb.mxu3 %v3812_v59 }
  0xa9   : > { %1452 = vmatmul.bf16.vlgmr.msrb.gmra.mxu0 %v6049_v10 }
  0xaa   : > { %1761 = vmatpush.bf16.msra.mxu0 %v3948_v50  ;;  %1465 = vmatmul.bf16.vlgmr.msrb.gmra.mxu1 %v6049_v10  ;;  %v3924_v10 = vor.u32 %v4732_v7, %v3923_v6  ;;  %v4179_v6 = vld [vmem:[%s7190_s5 + $0x1c0] sm:$0xf] }
  0xab   : > { %1774 = vmatpush.bf16.msra.mxu1 %v3952_v51  ;;  %1587 = vmatmul.bf16.vlgmr.msrb.gmra.mxu2 %v1497_v57  ;;  %v4067_v51 = vld [vmem:[%s7190_s5 + $0xe0] sm:$0xf]  ;;  %v4180_v14 = vor.u32 %v4861_v9, %v4179_v6  ;;  %v3989_v6 = vld [vmem:[%s7190_s5 + $0x50] sm:$0xf0] }
  0xac   : > { %1600 = vmatmul.bf16.vlgmr.msrb.gmra.mxu3 %v1497_v57  ;;  %v4068_v54 = vor.u32 %v4833_v52, %v4067_v51  ;;  %v4865_v57 = vld [vmem:[%s7190_s5 + $0x1ec] sm:$0xf0]  ;;  %v4117_v9 = vld [vmem:[%s7190_s5 + $0x150] sm:$0xf0] }
  0xad   : > { %v4196_v59 = vor.u32 %v4865_v57, %v4195_v53  ;;  %v4815_v53 = vld [vmem:[%s7190_s5 + $0x64] sm:$0xf] }
  0xae   : > { %1762 = vmatpush.bf16.msra.mxu0 %v3940_v63  ;;  %2290 = vmatpush.bf16.msra.mxu2 %v4068_v54  ;;  %v4200_v63 = vor.u32 %v4863_v61, %v4197_v62  ;;  %v4005_v54 = vld [vmem:[%s7190_s5 + $0x70] sm:$0xf0]  ;;  %v4847_v57 = vld [vmem:[%s7190_s5 + $0x164] sm:$0xf] }
  0xaf   : > { %1775 = vmatpush.bf16.msra.mxu1 %v3944_v0  ;;  %2303 = vmatpush.bf16.msra.mxu3 %v4196_v59  ;;  %v4008_v55 = vor.u32 %v4815_v53, %v4005_v54  ;;  %v3987_v59 = vld [vmem:[%s7190_s5 + $0x40] sm:$0xf] }
  0xb2   : > { %1763 = vmatpush.bf16.msra.mxu0 %v3932_v4  ;;  %v4051_v4 = vld [vmem:[%s7190_s5 + $0xc0] sm:$0xf] }
  0xb3   : > { %1776 = vmatpush.bf16.msra.mxu1 %v3936_v5  ;;  %v4829_v5 = vld [vmem:[%s7190_s5 + $0xcc] sm:$0xf0]  ;;  %2304 = vmatpush.bf16.msra.mxu3 %v4180_v14  ;;  %v4099_v14 = vld [vmem:[%s7190_s5 + $0x120] sm:$0xf] }
  0xb4   : > { %v4052_v8 = vor.u32 %v4829_v5, %v4051_v4  ;;  %v4811_v4 = vld [vmem:[%s7190_s5 + $0x44] sm:$0xf] }
  0xb6   : > { %1764 = vmatpush.bf16.msra.mxu0 %v3924_v10  ;;  %v4827_v10 = vld [vmem:[%s7190_s5 + $0xc4] sm:$0xf]  ;;  %2291 = vmatpush.bf16.msra.mxu2 %v4052_v8 }
  0xb7   : > { %1777 = vmatpush.bf16.msra.mxu1 %v3928_v11  ;;  %v4053_v11 = vld [vmem:[%s7190_s5 + $0xd0] sm:$0xf0]  ;;  %v4843_v8 = vld [vmem:[%s7190_s5 + $0x144] sm:$0xf] }
  0xb8   : > { %v4056_v15 = vor.u32 %v4827_v10, %v4053_v11  ;;  %v3992_v11 = vor.u32 %v4811_v4, %v3989_v6  ;;  %v4862_v4 = vld [vmem:[%s7190_s5 + $0x1d4] sm:$0xf0]  ;;  %v4061_v6 = vld [vmem:[%s7190_s5 + $0xd8] sm:$0xf0] }
  0xba   : > { %1765 = vmatpush.bf16.msra.mxu0 %v3916_v16  ;;  %v4859_v16 = vld [vmem:[%s7190_s5 + $0x1c4] sm:$0xf] }
  0xbb   : > { %1778 = vmatpush.bf16.msra.mxu1 %v3920_v17  ;;  %v4181_v17 = vld [vmem:[%s7190_s5 + $0x1d0] sm:$0xf0] }
  0xbc   : > { %v4184_v19 = vor.u32 %v4859_v16, %v4181_v17  ;;  %v4841_v16 = vld [vmem:[%s7190_s5 + $0x12c] sm:$0xf0]  ;;  %v4807_v17 = vld [vmem:[%s7190_s5 + $0x24] sm:$0xf] }
  0xbe   : > { %1766 = vmatpush.bf16.msra.mxu0 %v3908_v22  ;;  %v4857_v22 = vld [vmem:[%s7190_s5 + $0x1ac] sm:$0xf0] }
  0xbf   : > { %1779 = vmatpush.bf16.msra.mxu1 %v3912_v23  ;;  %v4036_v23 = vor.u32 %v4825_v20, %v4035_v18  ;;  %v4164_v24 = vor.u32 %v4857_v22, %v4163_v21  ;;  %v3973_v18 = vld [vmem:[%s7190_s5 + $0x30] sm:$0xf0]  ;;  %v3955_v22 = vld [vmem:[%s7190_s5] sm:$0xf] }
  0xc0   : > { %v4101_v20 = vld [vmem:[%s7190_s5 + $0x130] sm:$0xf0] }
  0xc1   : > { %2292 = vmatpush.bf16.msra.mxu2 %v4036_v23  ;;  %2305 = vmatpush.bf16.msra.mxu3 %v4164_v24  ;;  %v4805_v23 = vld [vmem:[%s7190_s5 + $0xc] sm:$0xf0]  ;;  %v4100_v24 = vor.u32 %v4841_v16, %v4099_v14  ;;  %v4826_v14 = vld [vmem:[%s7190_s5 + $0xb4] sm:$0xf0] }
  0xc2   : > { %1767 = vmatpush.bf16.msra.mxu0 %v3900_v28  ;;  %v4040_v28 = vor.u32 %v4823_v25, %v4037_v26  ;;  %v3976_v25 = vor.u32 %v4807_v17, %v3973_v18  ;;  %v4083_v26 = vld [vmem:[%s7190_s5 + $0x100] sm:$0xf]  ;;  %v4858_v17 = vld [vmem:[%s7190_s5 + $0x1b4] sm:$0xf0]  ;;  %v4824_v18 = vld [vmem:[%s7190_s5 + $0xac] sm:$0xf] }
  0xc3   : > { %1780 = vmatpush.bf16.msra.mxu1 %v3904_v29  ;;  %v4165_v29 = vld [vmem:[%s7190_s5 + $0x1b0] sm:$0xf0] }
  0xc4   : > { %v4168_v30 = vor.u32 %v4855_v27, %v4165_v29  ;;  %v4837_v27 = vld [vmem:[%s7190_s5 + $0x10c] sm:$0xf0] }
  0xc6   : > { %1768 = vmatpush.bf16.msra.mxu0 %v3892_v34  ;;  %v4147_v34 = vld [vmem:[%s7190_s5 + $0x180] sm:$0xf] }
  0xc7   : > { %1781 = vmatpush.bf16.msra.mxu1 %v3896_v35 }
  0xc9   : > { %1769 = vmatmul.bf16.vlgmr.msra.gmra.mxu0 %v1679_v36 }
  0xca   : > { %1782 = vmatmul.bf16.vlgmr.msra.gmra.mxu1 %v1679_v36  ;;  %2316 = vmatpush.bf16.msrb.mxu0 %v4072_v60  ;;  %v4020_v36 = vor.u32 %v4821_v33, %v4019_v32  ;;  %v4813_v60 = vld [vmem:[%s7190_s5 + $0x4c] sm:$0xf0]  ;;  %v4085_v32 = vld [vmem:[%s7190_s5 + $0x110] sm:$0xf0] }
  0xcb   : > { %2329 = vmatpush.bf16.msrb.mxu1 %v4200_v63  ;;  %v4136_v63 = vor.u32 %v4847_v57, %v4133_v56  ;;  %v3988_v5 = vor.u32 %v4813_v60, %v3987_v59  ;;  %v4059_v60 = vld [vmem:[%s7190_s5 + $0xc8] sm:$0xf] }
  0xcc   : > { %2293 = vmatpush.bf16.msra.mxu2 %v4020_v36  ;;  %v4834_v36 = vld [vmem:[%s7190_s5 + $0xf4] sm:$0xf0] }
  0xcd   : > { %v552_v37 = vpop.f32.mrf.mxu0 }
  0xce   : > { %v565_v38 = vpop.f32.mrf.mxu1  ;;  %2317 = vmatpush.bf16.msrb.mxu0 %v4056_v15  ;;  %v4120_v15 = vor.u32 %v4843_v8, %v4117_v9 }
  0xcf   : > { %2330 = vmatpush.bf16.msrb.mxu1 %v4184_v19  ;;  %v4839_v19 = vld [vmem:[%s7190_s5 + $0x124] sm:$0xf] }
  0xd0   : > { %v4104_v29 = vor.u32 %v4839_v19, %v4101_v20  ;;  %v4045_v19 = vld [vmem:[%s7190_s5 + $0xb8] sm:$0xf0] }
  0xd2   : > { %2318 = vmatpush.bf16.msrb.mxu0 %v4040_v28  ;;  %v4803_v28 = vld [vmem:[%s7190_s5 + $0x4] sm:$0xf] }
  0xd3   : > { %2331 = vmatpush.bf16.msrb.mxu1 %v4168_v30  ;;  %v3957_v30 = vld [vmem:[%s7190_s5 + $0x10] sm:$0xf0] }
  0xd5   : > { %v554_v39 = vpop.f32.mrf.mxu0 }
  0xd6   : > { %v567_v40 = vpop.f32.mrf.mxu1  ;;  %v4021_v39 = vld [vmem:[%s7190_s5 + $0x90] sm:$0xf0] }
  0xdc   : > { %v665_v41 = vpop.f32.mrf.mxu2  ;;  %v678_v42 = vpop.f32.mrf.mxu3 }
  0xdd   : > { %v666_v43 = vadd.f32 %v665_v41, %v552_v37  ;;  %v679_v44 = vadd.f32 %v678_v42, %v565_v38  ;;  %v4853_v37 = vld [vmem:[%s7190_s5 + $0x18c] sm:$0xf0]  ;;  %v4819_v38 = vld [vmem:[%s7190_s5 + $0x84] sm:$0xf] }
  0xde   : > { %v4148_v40 = vor.u32 %v4853_v37, %v4147_v34  ;;  %v4024_v41 = vor.u32 %v4819_v38, %v4021_v39  ;;  %v4851_v42 = vld [vmem:[%s7190_s5 + $0x184] sm:$0xf]  ;;  %v4203_v37 = vld [vmem:[%s7190_s5 + $0x1e8] sm:$0xf]  ;;  %v3956_v38 = vor.u32 %v4805_v23, %v3955_v22  ;;  %v4866_v39 = vld [vmem:[%s7190_s5 + $0x1f4] sm:$0xf0]  ;;  %v4048_v22 = vor.u32 %v4824_v18, %v4045_v19 }
  0xdf   : > { %v4856_v23 = vld [vmem:[%s7190_s5 + $0x1ac] sm:$0xf] }
  0xe0   : > { %2306 = vmatpush.bf16.msra.mxu3 %v4148_v40  ;;  %2319 = vmatpush.bf16.msrb.mxu0 %v4024_v41  ;;  %v4832_v40 = vld [vmem:[%s7190_s5 + $0xec] sm:$0xf]  ;;  %v4077_v41 = vld [vmem:[%s7190_s5 + $0xf8] sm:$0xf0] }
  0xe1   : > { %v4840_v19 = vld [vmem:[%s7190_s5 + $0x12c] sm:$0xf] }
  0xe4   : > { %v667_v45 = vpop.f32.mrf.mxu2  ;;  %v680_v46 = vpop.f32.mrf.mxu3  ;;  %2320 = vmatpush.bf16.msrb.mxu0 %v4008_v55 }
  0xe5   : > { %v4817_v46 = vld [vmem:[%s7190_s5 + $0x6c] sm:$0xf0] }
  0xe8   : > { %2321 = vmatpush.bf16.msrb.mxu0 %v3992_v11  ;;  %v4189_v11 = vld [vmem:[%s7190_s5 + $0x1d8] sm:$0xf0] }
  0xe9   : > { %v866_v47 = vpop.f32.mrf.mxu0 }
  0xea   : > { %v879_v48 = vpop.f32.mrf.mxu1  ;;  %v6198_v49 = vadd.f32 %v866_v47, %v666_v43  ;;  %v4149_v43 = vld [vmem:[%s7190_s5 + $0x190] sm:$0xf0]  ;;  %v4131_v47 = vld [vmem:[%s7190_s5 + $0x160] sm:$0xf] }
  0xeb   : > { %v6200_v50 = vadd.f32 %v879_v48, %v679_v44  ;;  %v4003_v44 = vld [vmem:[%s7190_s5 + $0x60] sm:$0xf]  ;;  %v4152_v45 = vor.u32 %v4851_v42, %v4149_v43  ;;  %v4849_v48 = vld [vmem:[%s7190_s5 + $0x16c] sm:$0xf0]  ;;  %v4084_v42 = vor.u32 %v4837_v27, %v4083_v26  ;;  %v3960_v43 = vor.u32 %v4803_v28, %v3957_v30  ;;  %v4822_v28 = vld [vmem:[%s7190_s5 + $0x94] sm:$0xf0] }
  0xec   : > { %v4004_v51 = vor.u32 %v4817_v46, %v4003_v44  ;;  %v4132_v52 = vor.u32 %v4849_v48, %v4131_v47  ;;  %2322 = vmatpush.bf16.msrb.mxu0 %v3976_v25  ;;  %v4864_v44 = vld [vmem:[%s7190_s5 + $0x1ec] sm:$0xf]  ;;  %v4204_v48 = vor.u32 %v4866_v39, %v4203_v37  ;;  %v4027_v25 = vld [vmem:[%s7190_s5 + $0x88] sm:$0xf]  ;;  %v4854_v30 = vld [vmem:[%s7190_s5 + $0x194] sm:$0xf0] }
  0xed   : > { %2332 = vmatpush.bf16.msrb.mxu1 %v4152_v45  ;;  %v4205_v45 = vld [vmem:[%s7190_s5 + $0x1f8] sm:$0xf0]  ;;  %v4818_v39 = vld [vmem:[%s7190_s5 + $0x74] sm:$0xf0] }
  0xee   : > { %2294 = vmatpush.bf16.msra.mxu2 %v4004_v51  ;;  %2307 = vmatpush.bf16.msra.mxu3 %v4132_v52  ;;  %v4080_v51 = vor.u32 %v4832_v40, %v4077_v41  ;;  %v4208_v52 = vor.u32 %v4864_v44, %v4205_v45  ;;  %v4157_v37 = vld [vmem:[%s7190_s5 + $0x198] sm:$0xf0]  ;;  %v4816_v44 = vld [vmem:[%s7190_s5 + $0x6c] sm:$0xf] }
  0xf0   : > { %2323 = vmatpush.bf16.msrb.mxu0 %v3960_v43  ;;  %v4850_v43 = vld [vmem:[%s7190_s5 + $0x174] sm:$0xf0] }
  0xf1   : > { %v868_v0 = vpop.f32.mrf.mxu0  ;;  %2333 = vmatpush.bf16.msrb.mxu1 %v4136_v63  ;;  %v4830_v63 = vld [vmem:[%s7190_s5 + $0xd4] sm:$0xf0] }
  0xf2   : > { %v881_v58 = vpop.f32.mrf.mxu1  ;;  %v4115_v0 = vld [vmem:[%s7190_s5 + $0x140] sm:$0xf]  ;;  %2295 = vmatpush.bf16.msra.mxu2 %v3988_v5  ;;  %v4828_v5 = vld [vmem:[%s7190_s5 + $0xcc] sm:$0xf] }
  0xf3   : > { %v4845_v58 = vld [vmem:[%s7190_s5 + $0x14c] sm:$0xf0]  ;;  %v4064_v9 = vor.u32 %v4828_v5, %v4061_v6  ;;  %v1791_v6 = vld [vmem:[%s7187_s2] sm:$0x3] }
  0xf4   : > { %v4116_v10 = vor.u32 %v4845_v58, %v4115_v0  ;;  %2368 = vmatpush.bf16.msra.mxu0 %v4080_v51  ;;  %v4187_v0 = vld [vmem:[%s7190_s5 + $0x1c8] sm:$0xf]  ;;  %v4060_v58 = vor.u32 %v4830_v63, %v4059_v60  ;;  %v4846_v60 = vld [vmem:[%s7190_s5 + $0x154] sm:$0xf0]  ;;  %v4812_v63 = vld [vmem:[%s7190_s5 + $0x4c] sm:$0xf] }
  0xf5   : > { %2334 = vmatpush.bf16.msrb.mxu1 %v4120_v15  ;;  %v4188_v8 = vor.u32 %v4862_v4, %v4187_v0  ;;  %v4171_v15 = vld [vmem:[%s7190_s5 + $0x1a8] sm:$0xf]  ;;  %v3997_v0 = vld [vmem:[%s7190_s5 + $0x58] sm:$0xf0] }
  0xf6   : > { %2308 = vmatpush.bf16.msra.mxu3 %v4116_v10  ;;  %v4860_v10 = vld [vmem:[%s7190_s5 + $0x1cc] sm:$0xf]  ;;  %v4125_v4 = vld [vmem:[%s7190_s5 + $0x158] sm:$0xf0] }
  0xf8   : > { %v6226_v1 = vpop.f32.mrf.mxu2  ;;  %v6228_v2 = vpop.f32.mrf.mxu3  ;;  %2369 = vmatpush.bf16.msra.mxu0 %v4064_v9 }
  0xf9   : > { %2335 = vmatpush.bf16.msrb.mxu1 %v4104_v29  ;;  %v4155_v29 = vld [vmem:[%s7190_s5 + $0x188] sm:$0xf]  ;;  %v1018_v40 = vadd.f32 %v6226_v1, %v6198_v49  ;;  %v1019_v45 = vadd.f32 %v6228_v2, %v6200_v50  ;;  %v4013_v49 = vld [vmem:[%s7190_s5 + $0x78] sm:$0xf0]  ;;  %v4848_v1 = vld [vmem:[%s7190_s5 + $0x16c] sm:$0xf] }
  0xfa   : > { %2309 = vmatpush.bf16.msra.mxu3 %v4100_v24  ;;  %v4173_v24 = vld [vmem:[%s7190_s5 + $0x1b8] sm:$0xf0]  ;;  %v4016_v2 = vor.u32 %v4816_v44, %v4013_v49 }
  0xfb   : > { %v4176_v27 = vor.u32 %v4856_v23, %v4173_v24  ;;  %v1794_v24 = vperm.slane %v1791_v6, 1 }
  0xfc   : > { %2370 = vmatpush.bf16.msra.mxu0 %v4048_v22  ;;  %v1793_v22 = vperm.slane %v1791_v6, 0  ;;  %v4451_v6 = vld [vmem:[%s7189_s4 + $0x1e0] sm:$0xf] }
  0xfe   : > { %2310 = vmatpush.bf16.msra.mxu3 %v4084_v42  ;;  %v4139_v42 = vld [vmem:[%s7190_s5 + $0x168] sm:$0xf] }
  0xff   : > { %v4140_v50 = vor.u32 %v4850_v43, %v4139_v42 }
 0x100   : > { %v1003_v12 = vpop.f32.mrf.mxu2  ;;  %v1016_v13 = vpop.f32.mrf.mxu3 }
 0x101   : > { %v3971_v12 = vld [vmem:[%s7190_s5 + $0x20] sm:$0xf]  ;;  %v4809_v13 = vld [vmem:[%s7190_s5 + $0x2c] sm:$0xf0] }
 0x102   : > { %v3972_v21 = vor.u32 %v4809_v13, %v3971_v12  ;;  %2355 = vmatpush.bf16.msrb.mxu3 %v4204_v48  ;;  %v4192_v12 = vor.u32 %v4860_v10, %v4189_v11  ;;  %v4043_v13 = vld [vmem:[%s7190_s5 + $0xa8] sm:$0xf]  ;;  %v4000_v10 = vor.u32 %v4812_v63, %v3997_v0 }
 0x103   : > { %v4044_v16 = vor.u32 %v4826_v14, %v4043_v13  ;;  %v3979_v11 = vld [vmem:[%s7190_s5 + $0x28] sm:$0xf]  ;;  %v4842_v14 = vld [vmem:[%s7190_s5 + $0x134] sm:$0xf0] }
 0x104   : > { %2296 = vmatpush.bf16.msra.mxu2 %v3972_v21  ;;  %v4172_v21 = vor.u32 %v4858_v17, %v4171_v15  ;;  %v4808_v15 = vld [vmem:[%s7190_s5 + $0x2c] sm:$0xf] }
 0x106   : > { %v6230_v3 = vpop.f32.mrf.mxu0  ;;  %2356 = vmatpush.bf16.msrb.mxu3 %v4188_v8 }
 0x107   : > { %v6241_v7 = vpop.f32.mrf.mxu1 }
 0x108   : > { %2297 = vmatpush.bf16.msra.mxu2 %v3956_v38  ;;  %v4011_v38 = vld [vmem:[%s7190_s5 + $0x68] sm:$0xf]  ;;  %v1154_v51 = vadd.f32 %v6241_v7, %v1019_v45 }
 0x109   : > { %v4012_v48 = vor.u32 %v4818_v39, %v4011_v38  ;;  %v4836_v39 = vld [vmem:[%s7190_s5 + $0x10c] sm:$0xf] }
 0x10a   : > { %2357 = vmatpush.bf16.msrb.mxu3 %v4172_v21 }
 0x10e   : > { %v1138_v31 = vpop.f32.mrf.mxu0 }
 0x10f   : > { %v1151_v35 = vpop.f32.mrf.mxu1  ;;  %v6336_v61 = vpop.f32.mrf.mxu2  ;;  %v4835_v31 = vld [vmem:[%s7190_s5 + $0x104] sm:$0xf] }
 0x110   : > { %v6338_v62 = vpop.f32.mrf.mxu3  ;;  %v4075_v35 = vld [vmem:[%s7190_s5 + $0xe8] sm:$0xf]  ;;  %v4088_v46 = vor.u32 %v4835_v31, %v4085_v32  ;;  %v4028_v31 = vor.u32 %v4822_v28, %v4027_v25  ;;  %v4820_v32 = vld [vmem:[%s7190_s5 + $0x8c] sm:$0xf] }
 0x111   : > { %v4076_v47 = vor.u32 %v4834_v36, %v4075_v35  ;;  %v4156_v35 = vor.u32 %v4854_v30, %v4155_v29  ;;  %v4806_v29 = vld [vmem:[%s7190_s5 + $0x14] sm:$0xf0]  ;;  %v4091_v30 = vld [vmem:[%s7190_s5 + $0x108] sm:$0xf] }
 0x112   : > { %2336 = vmatpush.bf16.msrb.mxu1 %v4088_v46  ;;  %v4141_v46 = vld [vmem:[%s7190_s5 + $0x178] sm:$0xf0] }
 0x113   : > { %2342 = vmatpush.bf16.msrb.mxu2 %v4076_v47  ;;  %v1153_v47 = vadd.f32 %v6230_v3, %v1018_v40  ;;  %2358 = vmatpush.bf16.msrb.mxu3 %v4156_v35  ;;  %v4123_v3 = vld [vmem:[%s7190_s5 + $0x148] sm:$0xf]  ;;  %v4144_v7 = vor.u32 %v4848_v1, %v4141_v46  ;;  %v4804_v35 = vld [vmem:[%s7190_s5 + $0xc] sm:$0xf]  ;;  %v4093_v40 = vld [vmem:[%s7190_s5 + $0x118] sm:$0xf0] }
 0x114   : > { %v4096_v1 = vor.u32 %v4836_v39, %v4093_v40 }
 0x116   : > { %2381 = vmatpush.bf16.msra.mxu1 %v4208_v52  ;;  %v3995_v52 = vld [vmem:[%s7190_s5 + $0x48] sm:$0xf] }
 0x117   : > { %v1320_v33 = vpop.f32.mrf.mxu2  ;;  %2343 = vmatpush.bf16.msrb.mxu2 %v4060_v58  ;;  %v1336_v58 = vadd.f32 %v6338_v62, %v1154_v51  ;;  %2359 = vmatpush.bf16.msrb.mxu3 %v4140_v50  ;;  %v4124_v62 = vor.u32 %v4846_v60, %v4123_v3 }
 0x118   : > { %v1333_v34 = vpop.f32.mrf.mxu3  ;;  %v4029_v33 = vld [vmem:[%s7190_s5 + $0x98] sm:$0xf0] }
 0x119   : > { %v4852_v34 = vld [vmem:[%s7190_s5 + $0x18c] sm:$0xf]  ;;  %v4032_v36 = vor.u32 %v4820_v32, %v4029_v33 }
 0x11a   : > { %2382 = vmatpush.bf16.msra.mxu1 %v4192_v12  ;;  %v4160_v41 = vor.u32 %v4852_v34, %v4157_v37  ;;  %v4107_v12 = vld [vmem:[%s7190_s5 + $0x128] sm:$0xf] }
 0x11b   : > { %2344 = vmatpush.bf16.msrb.mxu2 %v4044_v16  ;;  %2371 = vmatpush.bf16.msra.mxu0 %v4032_v36  ;;  %v3981_v16 = vld [vmem:[%s7190_s5 + $0x38] sm:$0xf0] }
 0x11c   : > { %2360 = vmatpush.bf16.msrb.mxu3 %v4124_v62  ;;  %v3984_v28 = vor.u32 %v4808_v15, %v3981_v16  ;;  %v3965_v36 = vld [vmem:[%s7190_s5 + $0x18] sm:$0xf0]  ;;  %v4767_v62 = vld [vmem:[%s7189_s4 + $0xe4] sm:$0xf]  ;;  %v4307_v16 = vld [vmem:[%s7189_s4 + $0xc0] sm:$0xf] }
 0x11d   : > { %v3968_v45 = vor.u32 %v4804_v35, %v3965_v36  ;;  %v4759_v35 = vld [vmem:[%s7189_s4 + $0xa4] sm:$0xf]  ;;  %v4293_v36 = vld [vmem:[%s7189_s4 + $0xb0] sm:$0xf0] }
 0x11e   : > { %2383 = vmatpush.bf16.msra.mxu1 %v4176_v27  ;;  %v4108_v27 = vor.u32 %v4842_v14, %v4107_v12  ;;  %v4453_v12 = vld [vmem:[%s7189_s4 + $0x1f0] sm:$0xf0] }
 0x11f   : > { %2345 = vmatpush.bf16.msrb.mxu2 %v4028_v31  ;;  %2372 = vmatpush.bf16.msra.mxu0 %v4016_v2  ;;  %v4838_v31 = vld [vmem:[%s7190_s5 + $0x114] sm:$0xf0] }
 0x120   : > { %2361 = vmatpush.bf16.msrb.mxu3 %v4108_v27  ;;  %v4092_v44 = vor.u32 %v4838_v31, %v4091_v30  ;;  %v4761_v30 = vld [vmem:[%s7189_s4 + $0xac] sm:$0xf0] }
 0x122   : > { %2384 = vmatpush.bf16.msra.mxu1 %v4160_v41 }
 0x123   : > { %2346 = vmatpush.bf16.msrb.mxu2 %v4012_v48  ;;  %2373 = vmatpush.bf16.msra.mxu0 %v4000_v10  ;;  %v4325_v10 = vld [vmem:[%s7189_s4 + $0xf0] sm:$0xf0] }
 0x124   : > { %2362 = vmatpush.bf16.msrb.mxu3 %v4092_v44  ;;  %v4757_v44 = vld [vmem:[%s7189_s4 + $0x8c] sm:$0xf0] }
 0x126   : > { %v6430_v53 = vpop.f32.mrf.mxu0  ;;  %2385 = vmatpush.bf16.msra.mxu1 %v4144_v7 }
 0x127   : > { %v6432_v54 = vpop.f32.mrf.mxu1  ;;  %2374 = vmatpush.bf16.msra.mxu0 %v3984_v28 }
 0x128   : > { %v1471_v9 = vadd.f32 %v6432_v54, %v1336_v58 }
 0x12b   : > { %2375 = vmatpush.bf16.msra.mxu0 %v3968_v45  ;;  %v4296_v45 = vor.u32 %v4759_v35, %v4293_v36  ;;  %v4741_v36 = vld [vmem:[%s7189_s4 + $0xc] sm:$0xf0] }
 0x12e   : > { %v6434_v57 = vpop.f32.mrf.mxu2  ;;  %v1455_v55 = vpop.f32.mrf.mxu0 }
 0x12f   : > { %v6436_v56 = vpop.f32.mrf.mxu3  ;;  %v1468_v59 = vpop.f32.mrf.mxu1  ;;  %v4814_v55 = vld [vmem:[%s7190_s5 + $0x54] sm:$0xf0] }
 0x130   : > { %v1335_v59 = vadd.f32 %v6336_v61, %v1153_v47  ;;  %v4844_v61 = vld [vmem:[%s7190_s5 + $0x14c] sm:$0xf]  ;;  %v3996_v8 = vor.u32 %v4814_v55, %v3995_v52  ;;  %v1606_v17 = vadd.f32 %v6436_v56, %v1471_v9  ;;  %v3963_v56 = vld [vmem:[%s7190_s5 + $0x8] sm:$0xf]  ;;  %v4801_v9 = vld [vmem:[%s7189_s4 + $0x1ec] sm:$0xf0] }
 0x131   : > { %v4128_v54 = vor.u32 %v4844_v61, %v4125_v4  ;;  %v3964_v42 = vor.u32 %v4806_v29, %v3963_v56  ;;  %v4323_v4 = vld [vmem:[%s7189_s4 + $0xe0] sm:$0xf]  ;;  %v4452_v15 = vor.u32 %v4801_v9, %v4451_v6  ;;  %v4389_v6 = vld [vmem:[%s7189_s4 + $0x170] sm:$0xf0] }
 0x132   : > { %v1470_v5 = vadd.f32 %v6430_v53, %v1335_v59  ;;  %v4810_v53 = vld [vmem:[%s7190_s5 + $0x34] sm:$0xf0]  ;;  %2347 = vmatpush.bf16.msrb.mxu2 %v3996_v8  ;;  %v4291_v29 = vld [vmem:[%s7189_s4 + $0xa0] sm:$0xf] }
 0x133   : > { %v3980_v25 = vor.u32 %v4810_v53, %v3979_v11  ;;  %2386 = vmatpush.bf16.msra.mxu1 %v4128_v54  ;;  %v4799_v53 = vld [vmem:[%s7189_s4 + $0x1e4] sm:$0xf] }
 0x134   : > { %v1605_v13 = vadd.f32 %v6434_v57, %v1470_v5  ;;  %v1799_v57 = vld [vmem:[%s7188_s3] sm:$0x3]  ;;  %v4769_v5 = vld [vmem:[%s7189_s4 + $0xec] sm:$0xf0] }
 0x135   : > { %v1801_v33 = vperm.slane %v1799_v57, 0  ;;  %v1802_v38 = vperm.slane %v1799_v57, 1  ;;  %v4324_v14 = vor.u32 %v4769_v5, %v4323_v4  ;;  %v4328_v57 = vor.u32 %v4767_v62, %v4325_v10  ;;  %v4261_v4 = vld [vmem:[%s7189_s4 + $0x70] sm:$0xf0]  ;;  %v4783_v5 = vld [vmem:[%s7189_s4 + $0x164] sm:$0xf] }
 0x136   : > { %v1590_v20 = vpop.f32.mrf.mxu2  ;;  %2348 = vmatpush.bf16.msrb.mxu2 %v3980_v25  ;;  %v4437_v25 = vld [vmem:[%s7189_s4 + $0x1d0] sm:$0xf0] }
 0x137   : > { %v1603_v26 = vpop.f32.mrf.mxu3  ;;  %v4109_v20 = vld [vmem:[%s7190_s5 + $0x138] sm:$0xf0] }
 0x138   : > { %v4112_v34 = vor.u32 %v4840_v19, %v4109_v20  ;;  %v4456_v19 = vor.u32 %v4799_v53, %v4453_v12  ;;  %v4435_v20 = vld [vmem:[%s7189_s4 + $0x1c0] sm:$0xf]  ;;  %v4749_v53 = vld [vmem:[%s7189_s4 + $0x4c] sm:$0xf0] }
 0x13a   : > { %2387 = vmatpush.bf16.msra.mxu1 %v4112_v34  ;;  %2349 = vmatpush.bf16.msrb.mxu2 %v3964_v42  ;;  %v4793_v34 = vld [vmem:[%s7189_s4 + $0x1ac] sm:$0xf0] }
 0x13e   : > { %2388 = vmatpush.bf16.msra.mxu1 %v4096_v1  ;;  %v4403_v1 = vld [vmem:[%s7189_s4 + $0x180] sm:$0xf] }
 0x146   : > { %v1770_v18 = vpop.f32.mrf.mxu0 }
 0x147   : > { %v1787_v21 = vadd.f32 %v1770_v18, %v1605_v13  ;;  %v1783_v23 = vpop.f32.mrf.mxu1 }
 0x148   : > { %v1788_v26 = vadd.f32 %v1783_v23, %v1606_v17  ;;  %v4765_v17 = vld [vmem:[%s7189_s4 + $0xcc] sm:$0xf0]  ;;  %v4309_v23 = vld [vmem:[%s7189_s4 + $0xd0] sm:$0xf0] }
 0x149   : > { %v1789_v32 = vmax.f32 %v1787_v21, 0.0  ;;  %v4797_v21 = vld [vmem:[%s7189_s4 + $0x1cc] sm:$0xf0]  ;;  %v4308_v27 = vor.u32 %v4765_v17, %v4307_v16  ;;  %v4747_v16 = vld [vmem:[%s7189_s4 + $0x44] sm:$0xf] }
 0x14a   : > { %v1790_v37 = vmax.f32 %v1788_v26, 0.0  ;;  %v4436_v28 = vor.u32 %v4797_v21, %v4435_v20  ;;  %v4245_v17 = vld [vmem:[%s7189_s4 + $0x50] sm:$0xf0] }
 0x14b   : > { %v1797_v41 = vmul.f32 %v1793_v22, %v1789_v32  ;;  %v4763_v22 = vld [vmem:[%s7189_s4 + $0xc4] sm:$0xf] }
 0x14c   : > { %v1798_v43 = vmul.f32 %v1794_v24, %v1790_v37  ;;  %v4795_v24 = vld [vmem:[%s7189_s4 + $0x1c4] sm:$0xf]  ;;  %v4312_v31 = vor.u32 %v4763_v22, %v4309_v23  ;;  %v4227_v23 = vld [vmem:[%s7189_s4 + $0x20] sm:$0xf] }
 0x14d   : > { %v1805_v49 = vadd.f32 %v1801_v33, %v1797_v41  ;;  %v4440_v32 = vor.u32 %v4795_v24, %v4437_v25  ;;  %v4419_v33 = vld [vmem:[%s7189_s4 + $0x1a0] sm:$0xf]  ;;  %v4791_v37 = vld [vmem:[%s7189_s4 + $0x1a4] sm:$0xf]  ;;  %v4292_v41 = vor.u32 %v4761_v30, %v4291_v29  ;;  %v4745_v24 = vld [vmem:[%s7189_s4 + $0x2c] sm:$0xf0]  ;;  %v4248_v25 = vor.u32 %v4747_v16, %v4245_v17 }
 0x14e   : > { %v1806_v46 = vadd.f32 %v1802_v38, %v1798_v43  ;;  %v1772_v47 = vpop.f32.mrf.mxu0  ;;  %v4421_v38 = vld [vmem:[%s7189_s4 + $0x1b0] sm:$0xf0]  ;;  %v4420_v42 = vor.u32 %v4793_v34, %v4419_v33  ;;  %v4275_v43 = vld [vmem:[%s7189_s4 + $0x80] sm:$0xf]  ;;  %v4775_v29 = vld [vmem:[%s7189_s4 + $0x124] sm:$0xf]  ;;  %v4228_v34 = vor.u32 %v4745_v24, %v4227_v23 }
 0x14f   : > { %v1822_v48 = vsel %vm1807_vm0, %v1805_v49, 0.0  ;;  %v1785_v51 = vpop.f32.mrf.mxu1  ;;  %v1808_v56 = vsel %vm1807_vm0, %v1805_v49, -inf  ;;  %v4424_v49 = vor.u32 %v4791_v37, %v4421_v38  ;;  %v4755_v47 = vld [vmem:[%s7189_s4 + $0x84] sm:$0xf]  ;;  %v4357_v30 = vld [vmem:[%s7189_s4 + $0x130] sm:$0xf0] }
 0x150   : > { %v1823_v50 = vrot.slane %v1822_v48, 4  ;;  %v1829_v2 = vsel %vm1807_vm0, %v1806_v46, 0.0  ;;  %v1815_v26 = vsel %vm1807_vm0, %v1806_v46, -inf  ;;  %v1809_v39 = vrot.slane %v1808_v56, 4  ;;  %v4789_v46 = vld [vmem:[%s7189_s4 + $0x18c] sm:$0xf0] }
 0x151   : > { %v1830_v52 = vrot.slane %v1829_v2, 4  ;;  %v1816_v40 = vrot.slane %v1815_v26, 4  ;;  %v4787_v51 = vld [vmem:[%s7189_s4 + $0x184] sm:$0xf]  ;;  %v4339_v37 = vld [vmem:[%s7189_s4 + $0x100] sm:$0xf] }
 0x152   : > { %v1824_v55 = vadd.f32 %v1823_v50, %v1822_v48  ;;  %v4277_v48 = vld [vmem:[%s7189_s4 + $0x90] sm:$0xf0]  ;;  %v4773_v38 = vld [vmem:[%s7189_s4 + $0x10c] sm:$0xf0] }
 0x153   : > { %v1831_v3 = vadd.f32 %v1830_v52, %v1829_v2  ;;  %v4405_v50 = vld [vmem:[%s7189_s4 + $0x190] sm:$0xf0]  ;;  %v1810_v2 = vmax.f32 %v1808_v56, %v1809_v39  ;;  %v1817_v52 = vmax.f32 %v1815_v26, %v1816_v40  ;;  %v4777_v26 = vld [vmem:[%s7189_s4 + $0x12c] sm:$0xf0]  ;;  %v4360_v40 = vor.u32 %v4775_v29, %v4357_v30  ;;  %v4756_v29 = vld [vmem:[%s7189_s4 + $0x8c] sm:$0xf] }
 0x154   : > { %v1825_v59 = vrot.slane %v1824_v55, 2  ;;  %v4285_v30 = vld [vmem:[%s7189_s4 + $0x98] sm:$0xf0] }
 0x155   : > { %v1832_v7 = vrot.slane %v1831_v3, 2  ;;  %v1818_v9 = vrot.slane %v1817_v52, 2 }
 0x156   : > { %v1826_v60 = vadd.f32 %v1825_v59, %v1824_v55  ;;  %v4276_v55 = vor.u32 %v4757_v44, %v4275_v43  ;;  %v4259_v59 = vld [vmem:[%s7189_s4 + $0x60] sm:$0xf]  ;;  %v4771_v43 = vld [vmem:[%s7189_s4 + $0x104] sm:$0xf]  ;;  %v4341_v44 = vld [vmem:[%s7189_s4 + $0x110] sm:$0xf0] }
 0x157   : > { %v1833_v63 = vadd.f32 %v1832_v7, %v1831_v3  ;;  %v4404_v3 = vor.u32 %v4789_v46, %v4403_v1  ;;  %v4753_v7 = vld [vmem:[%s7189_s4 + $0x6c] sm:$0xf0]  ;;  %v1819_v21 = vmax.f32 %v1817_v52, %v1818_v9  ;;  %v4459_v1 = vld [vmem:[%s7189_s4 + $0x1e8] sm:$0xf]  ;;  %v4802_v46 = vld [vmem:[%s7189_s4 + $0x1f4] sm:$0xf0] }
 0x158   : > { %v1827_v0 = vrot.slane %v1826_v60, 1  ;;  %v4260_v62 = vor.u32 %v4753_v7, %v4259_v59  ;;  %v4461_v52 = vld [vmem:[%s7189_s4 + $0x1f8] sm:$0xf0] }
 0x159   : > { %v1834_v58 = vrot.slane %v1833_v63, 1  ;;  %v1820_v33 = vrot.slane %v1819_v21, 1  ;;  %v4317_v9 = vld [vmem:[%s7189_s4 + $0xd8] sm:$0xf0] }
 0x15a   : > { %v1828_v61 = vadd.f32 %v1827_v0, %v1826_v60  ;;  %v4280_v60 = vor.u32 %v4755_v47, %v4277_v48  ;;  %v4387_v0 = vld [vmem:[%s7189_s4 + $0x160] sm:$0xf]  ;;  %v4768_v47 = vld [vmem:[%s7189_s4 + $0xec] sm:$0xf] }
 0x15b   : > { %v1835_v8 = vadd.f32 %v1834_v58, %v1833_v63  ;;  %v4408_v63 = vor.u32 %v4787_v51, %v4405_v50  ;;  %v4785_v58 = vld [vmem:[%s7189_s4 + $0x16c] sm:$0xf0]  ;;  %v4340_v51 = vor.u32 %v4773_v38, %v4339_v37  ;;  %v4333_v50 = vld [vmem:[%s7189_s4 + $0xf8] sm:$0xf0]  ;;  %v4288_v37 = vor.u32 %v4756_v29, %v4285_v30  ;;  %v4871_v29 = vld [vmem:[%s7192_s7 + $0x20] sm:$0xff] }
 0x15c   : > { %v1836_v11 = vmul.f32 0.25, %v1828_v61  ;;  %v4751_v61 = vld [vmem:[%s7189_s4 + $0x64] sm:$0xf]  ;;  %v4388_v10 = vor.u32 %v4785_v58, %v4387_v0  ;;  %v4315_v0 = vld [vmem:[%s7189_s4 + $0xc8] sm:$0xf] }
 0x15d   : > { %v1837_v13 = vmul.f32 0.25, %v1835_v8  ;;  %v1811_v8 = vrot.slane %v1810_v2, 2  ;;  %v4264_v12 = vor.u32 %v4751_v61, %v4261_v4  ;;  %v4766_v58 = vld [vmem:[%s7189_s4 + $0xd4] sm:$0xf0]  ;;  %v4336_v61 = vor.u32 %v4768_v47, %v4333_v50 }
 0x15e   : > { %v6650_v54 = vpack.c.bf16 %v1836_v11, %v1836_v11  ;;  %v4243_v11 = vld [vmem:[%s7189_s4 + $0x40] sm:$0xf]  ;;  %v4782_v50 = vld [vmem:[%s7189_s4 + $0x154] sm:$0xf0] }
 0x15f   : > { %v6658_v18 = vpack.c.bf16 %v1837_v13, %v1837_v13  ;;  %v4392_v13 = vor.u32 %v4783_v5, %v4389_v6  ;;  %v1812_v20 = vmax.f32 %v1810_v2, %v1811_v8  ;;  %v4800_v2 = vld [vmem:[%s7189_s4 + $0x1ec] sm:$0xf]  ;;  %v4443_v5 = vld [vmem:[%s7189_s4 + $0x1c8] sm:$0xf]  ;;  %v4798_v6 = vld [vmem:[%s7189_s4 + $0x1d4] sm:$0xf0] }
 0x160   : > { %2298 = vmatmul.bf16.vlgmr.msra.gmra.mxu2 %v6650_v54  ;;  %2324 = vmatmul.bf16.vlgmr.msrb.gmra.mxu0 %v6650_v54  ;;  %v4464_v4 = vor.u32 %v4800_v2, %v4461_v52  ;;  %v4764_v8 = vld [vmem:[%s7189_s4 + $0xcc] sm:$0xf]  ;;  %v4253_v52 = vld [vmem:[%s7189_s4 + $0x58] sm:$0xf0] }
 0x161   : > { %2311 = vmatmul.bf16.vlgmr.msra.gmra.mxu3 %v6658_v18  ;;  %2337 = vmatmul.bf16.vlgmr.msrb.gmra.mxu1 %v6658_v18  ;;  %v4320_v16 = vor.u32 %v4764_v8, %v4317_v9  ;;  %v4748_v2 = vld [vmem:[%s7189_s4 + $0x4c] sm:$0xf]  ;;  %v4365_v9 = vld [vmem:[%s7189_s4 + $0x138] sm:$0xf0] }
 0x162   : > { %2714 = vmatpush.bf16.msra.mxu2 %v4324_v14  ;;  %2727 = vmatpush.bf16.msra.mxu3 %v4452_v15  ;;  %v4371_v14 = vld [vmem:[%s7189_s4 + $0x140] sm:$0xf]  ;;  %v4781_v15 = vld [vmem:[%s7189_s4 + $0x14c] sm:$0xf0]  ;;  %v4776_v8 = vld [vmem:[%s7189_s4 + $0x12c] sm:$0xf] }
 0x163   : > { %2740 = vmatpush.bf16.msrb.mxu0 %v4328_v57  ;;  %2753 = vmatpush.bf16.msrb.mxu1 %v4456_v19  ;;  %v4779_v57 = vld [vmem:[%s7189_s4 + $0x144] sm:$0xf]  ;;  %v4373_v19 = vld [vmem:[%s7189_s4 + $0x150] sm:$0xf0]  ;;  %v4372_v22 = vor.u32 %v4781_v15, %v4371_v14  ;;  %v4299_v14 = vld [vmem:[%s7189_s4 + $0xa8] sm:$0xf] }
 0x164   : > { %v4376_v56 = vor.u32 %v4779_v57, %v4373_v19  ;;  %v4762_v15 = vld [vmem:[%s7189_s4 + $0xb4] sm:$0xf0]  ;;  %v4427_v57 = vld [vmem:[%s7189_s4 + $0x1a8] sm:$0xf] }
 0x165   : > { %v4794_v19 = vld [vmem:[%s7189_s4 + $0x1b4] sm:$0xf0]  ;;  %v4300_v23 = vor.u32 %v4762_v15, %v4299_v14  ;;  %v4368_v15 = vor.u32 %v4776_v8, %v4365_v9 }
 0x166   : > { %2715 = vmatpush.bf16.msra.mxu2 %v4308_v27  ;;  %2728 = vmatpush.bf16.msra.mxu3 %v4436_v28  ;;  %v4743_v27 = vld [vmem:[%s7189_s4 + $0x24] sm:$0xf]  ;;  %v4229_v28 = vld [vmem:[%s7189_s4 + $0x30] sm:$0xf0]  ;;  %v4428_v24 = vor.u32 %v4794_v19, %v4427_v57  ;;  %v4740_v57 = vld [vmem:[%s7189_s4 + $0xc] sm:$0xf] }
 0x167   : > { %2741 = vmatpush.bf16.msrb.mxu0 %v4312_v31  ;;  %2754 = vmatpush.bf16.msrb.mxu1 %v4440_v32  ;;  %v4211_v31 = vld [vmem:[%s7189_s4] sm:$0xf]  ;;  %v1813_v32 = vrot.slane %v1812_v20, 1  ;;  %v4232_v39 = vor.u32 %v4743_v27, %v4229_v28  ;;  %v4411_v27 = vld [vmem:[%s7189_s4 + $0x188] sm:$0xf] }
 0x168   : > { %v4212_v48 = vor.u32 %v4741_v36, %v4211_v31  ;;  %v4790_v28 = vld [vmem:[%s7189_s4 + $0x194] sm:$0xf0]  ;;  %v4788_v31 = vld [vmem:[%s7189_s4 + $0x18c] sm:$0xf]  ;;  %v4221_v19 = vld [vmem:[%s7189_s4 + $0x18] sm:$0xf0] }
 0x169   : > { %v1814_v59 = vmax.f32 %v1812_v20, %v1813_v32  ;;  %v4760_v20 = vld [vmem:[%s7189_s4 + $0xac] sm:$0xf]  ;;  %v4413_v32 = vld [vmem:[%s7189_s4 + $0x198] sm:$0xf0]  ;;  %v4754_v36 = vld [vmem:[%s7189_s4 + $0x74] sm:$0xf0] }
 0x16a   : > { %2716 = vmatpush.bf16.msra.mxu2 %v4292_v41  ;;  %2729 = vmatpush.bf16.msra.mxu3 %v4420_v42  ;;  %v4739_v41 = vld [vmem:[%s7189_s4 + $0x4] sm:$0xf]  ;;  %v4213_v42 = vld [vmem:[%s7189_s4 + $0x10] sm:$0xf0]  ;;  %v4416_v38 = vor.u32 %v4788_v31, %v4413_v32 }
 0x16b   : > { %2742 = vmatpush.bf16.msrb.mxu0 %v4296_v45  ;;  %2755 = vmatpush.bf16.msrb.mxu1 %v4424_v49  ;;  %v4331_v45 = vld [vmem:[%s7189_s4 + $0xe8] sm:$0xf]  ;;  %v4770_v49 = vld [vmem:[%s7189_s4 + $0xf4] sm:$0xf0] }
 0x16c   : > { %v4332_v7 = vor.u32 %v4770_v49, %v4331_v45 }
 0x16e   : > { %2717 = vmatpush.bf16.msra.mxu2 %v4276_v55  ;;  %2730 = vmatpush.bf16.msra.mxu3 %v4404_v3  ;;  %v4216_v55 = vor.u32 %v4739_v41, %v4213_v42  ;;  %v4344_v3 = vor.u32 %v4771_v43, %v4341_v44  ;;  %v4752_v41 = vld [vmem:[%s7189_s4 + $0x6c] sm:$0xf]  ;;  %v4269_v42 = vld [vmem:[%s7189_s4 + $0x78] sm:$0xf0] }
 0x16f   : > { %2743 = vmatpush.bf16.msrb.mxu0 %v4280_v60  ;;  %2756 = vmatpush.bf16.msrb.mxu1 %v4408_v63  ;;  %v4460_v60 = vor.u32 %v4802_v46, %v4459_v1  ;;  %v1821_v63 = vmax.f32 %v1819_v21, %v1820_v33  ;;  %v4301_v21 = vld [vmem:[%s7189_s4 + $0xb8] sm:$0xf0]  ;;  %v4784_v43 = vld [vmem:[%s7189_s4 + $0x16c] sm:$0xf]  ;;  %v4251_v1 = vld [vmem:[%s7189_s4 + $0x48] sm:$0xf]  ;;  %v4272_v47 = vor.u32 %v4752_v41, %v4269_v42 }
 0x170   : > { %2350 = vmatmul.bf16.vlgmr.msrb.gmra.mxu2 %v6650_v54  ;;  %2376 = vmatmul.bf16.vlgmr.msra.gmra.mxu0 %v6650_v54  ;;  %v4244_v54 = vor.u32 %v4749_v53, %v4243_v11  ;;  %v6880_v11 = vpack.c.bf16 %v1814_v59, %v1814_v59  ;;  %v4397_v44 = vld [vmem:[%s7189_s4 + $0x178] sm:$0xf0]  ;;  %v4750_v46 = vld [vmem:[%s7189_s4 + $0x54] sm:$0xf0] }
 0x171   : > { %2363 = vmatmul.bf16.vlgmr.msrb.gmra.mxu3 %v6658_v18  ;;  %2389 = vmatmul.bf16.vlgmr.msra.gmra.mxu1 %v6658_v18  ;;  %v4355_v18 = vld [vmem:[%s7189_s4 + $0x120] sm:$0xf]  ;;  %v6882_v53 = vpack.c.bf16 %v1821_v63, %v1821_v63  ;;  %v4252_v59 = vor.u32 %v4750_v46, %v4251_v1  ;;  %v4746_v63 = vld [vmem:[%s7189_s4 + $0x34] sm:$0xf0]  ;;  %v4897_v1 = vld [vmem:[%s7192_s7 + $0xf0] sm:$0xff] }
 0x172   : > { %2718 = vmatpush.bf16.msra.mxu2 %v4260_v62  ;;  %2731 = vmatpush.bf16.msra.mxu3 %v4388_v10  ;;  %v4356_v35 = vor.u32 %v4777_v26, %v4355_v18  ;;  %v4796_v62 = vld [vmem:[%s7189_s4 + $0x1cc] sm:$0xf]  ;;  %v4445_v10 = vld [vmem:[%s7189_s4 + $0x1d8] sm:$0xf0]  ;;  %v4304_v18 = vor.u32 %v4760_v20, %v4301_v21 }
 0x173   : > { %2744 = vmatpush.bf16.msrb.mxu0 %v4264_v12  ;;  %2757 = vmatpush.bf16.msrb.mxu1 %v4392_v13  ;;  %v4316_v12 = vor.u32 %v4766_v58, %v4315_v0  ;;  %v4444_v13 = vor.u32 %v4798_v6, %v4443_v5  ;;  %v4448_v17 = vor.u32 %v4796_v62, %v4445_v10  ;;  %v4744_v5 = vld [vmem:[%s7189_s4 + $0x2c] sm:$0xf]  ;;  %v4237_v6 = vld [vmem:[%s7189_s4 + $0x38] sm:$0xf0] }
 0x174   : > { %v4256_v0 = vor.u32 %v4748_v2, %v4253_v52  ;;  %v4240_v14 = vor.u32 %v4744_v5, %v4237_v6  ;;  %v4772_v20 = vld [vmem:[%s7189_s4 + $0x10c] sm:$0xf]  ;;  %v4349_v21 = vld [vmem:[%s7189_s4 + $0x118] sm:$0xf0] }
 0x175   : > { %v4890_v46 = vld [vmem:[%s7192_s7 + $0xb8] sm:$0xff]  ;;  %v4896_v2 = vld [vmem:[%s7192_s7 + $0xe8] sm:$0xff] }
 0x176   : > { %2719 = vmatpush.bf16.msra.mxu2 %v4244_v54  ;;  %2732 = vmatpush.bf16.msra.mxu3 %v4372_v22  ;;  %v4792_v54 = vld [vmem:[%s7189_s4 + $0x1ac] sm:$0xf]  ;;  %v4429_v22 = vld [vmem:[%s7189_s4 + $0x1b8] sm:$0xf0] }
 0x177   : > { %2745 = vmatpush.bf16.msrb.mxu0 %v4248_v25  ;;  %2758 = vmatpush.bf16.msrb.mxu1 %v4376_v56  ;;  %v4283_v25 = vld [vmem:[%s7189_s4 + $0x88] sm:$0xf]  ;;  %v4758_v56 = vld [vmem:[%s7189_s4 + $0x94] sm:$0xf0]  ;;  %v4432_v26 = vor.u32 %v4792_v54, %v4429_v22 }
 0x178   : > { %v4284_v33 = vor.u32 %v4758_v56, %v4283_v25  ;;  %v4882_v25 = vld [vmem:[%s7192_s7 + $0x78] sm:$0xff]  ;;  %v4881_v56 = vld [vmem:[%s7192_s7 + $0x70] sm:$0xff] }
 0x17a   : > { %2720 = vmatpush.bf16.msra.mxu2 %v4228_v34  ;;  %2733 = vmatpush.bf16.msra.mxu3 %v4356_v35  ;;  %v4412_v34 = vor.u32 %v4790_v28, %v4411_v27  ;;  %v4267_v35 = vld [vmem:[%s7189_s4 + $0x68] sm:$0xf]  ;;  %v4878_v28 = vld [vmem:[%s7192_s7 + $0x58] sm:$0xff] }
 0x17b   : > { %2746 = vmatpush.bf16.msrb.mxu0 %v4232_v39  ;;  %2759 = vmatpush.bf16.msrb.mxu1 %v4360_v40  ;;  %v4395_v39 = vld [vmem:[%s7189_s4 + $0x168] sm:$0xf]  ;;  %v4786_v40 = vld [vmem:[%s7189_s4 + $0x174] sm:$0xf0]  ;;  %v4268_v45 = vor.u32 %v4754_v36, %v4267_v35  ;;  %v4877_v36 = vld [vmem:[%s7192_s7 + $0x50] sm:$0xff] }
 0x17c   : > { %v4396_v49 = vor.u32 %v4786_v40, %v4395_v39  ;;  %v4872_v27 = vld [vmem:[%s7192_s7 + $0x28] sm:$0xff] }
 0x17d   : > { %v4876_v39 = vld [vmem:[%s7192_s7 + $0x48] sm:$0xff] }
 0x17e   : > { %2721 = vmatpush.bf16.msra.mxu2 %v4212_v48  ;;  %2734 = vmatpush.bf16.msra.mxu3 %v4340_v51  ;;  %v4400_v48 = vor.u32 %v4784_v43, %v4397_v44  ;;  %v4379_v51 = vld [vmem:[%s7189_s4 + $0x148] sm:$0xf]  ;;  %v4869_v43 = vld [vmem:[%s7192_s7 + $0x10] sm:$0xff]  ;;  %v4898_v44 = vld [vmem:[%s7192_s7 + $0xf8] sm:$0xff] }
 0x17f   : > { %2747 = vmatpush.bf16.msrb.mxu0 %v4216_v55  ;;  %2760 = vmatpush.bf16.msrb.mxu1 %v4344_v3  ;;  %v4780_v55 = vld [vmem:[%s7189_s4 + $0x14c] sm:$0xf]  ;;  %v4381_v3 = vld [vmem:[%s7189_s4 + $0x158] sm:$0xf0] }
 0x180   : > { %v4384_v58 = vor.u32 %v4780_v55, %v4381_v3  ;;  %v4888_v3 = vld [vmem:[%s7192_s7 + $0xa8] sm:$0xff] }
 0x181   : > { %2722 = vmatmul.bf16.vlgmr.msra.gmra.mxu2 %v6880_v11  ;;  %2735 = vmatmul.bf16.vlgmr.msra.gmra.mxu3 %v6882_v53 }
 0x182   : > { %2766 = vmatpush.bf16.msrb.mxu2 %v4332_v7  ;;  %2779 = vmatpush.bf16.msrb.mxu3 %v4460_v60  ;;  %v4380_v7 = vor.u32 %v4782_v50, %v4379_v51  ;;  %v4235_v60 = vld [vmem:[%s7189_s4 + $0x28] sm:$0xf]  ;;  %v4867_v50 = vld [vmem:[%s7192_s7] sm:$0xff] }
 0x183   : > { %2792 = vmatpush.bf16.msra.mxu0 %v4336_v61  ;;  %2805 = vmatpush.bf16.msra.mxu1 %v4464_v4  ;;  %v4363_v61 = vld [vmem:[%s7189_s4 + $0x128] sm:$0xf]  ;;  %v4778_v4 = vld [vmem:[%s7189_s4 + $0x134] sm:$0xf0]  ;;  %v4236_v62 = vor.u32 %v4746_v63, %v4235_v60 }
 0x184   : > { %2748 = vmatmul.bf16.vlgmr.msrb.gmra.mxu0 %v6880_v11  ;;  %2761 = vmatmul.bf16.vlgmr.msrb.gmra.mxu1 %v6882_v53  ;;  %v4364_v10 = vor.u32 %v4778_v4, %v4363_v61 }
 0x186   : > { %2767 = vmatpush.bf16.msrb.mxu2 %v4316_v12  ;;  %2780 = vmatpush.bf16.msrb.mxu3 %v4444_v13  ;;  %v4219_v12 = vld [vmem:[%s7189_s4 + $0x8] sm:$0xf]  ;;  %v4742_v13 = vld [vmem:[%s7189_s4 + $0x14] sm:$0xf0] }
 0x187   : > { %2793 = vmatpush.bf16.msra.mxu0 %v4320_v16  ;;  %2806 = vmatpush.bf16.msra.mxu1 %v4448_v17  ;;  %v4347_v16 = vld [vmem:[%s7189_s4 + $0x108] sm:$0xf]  ;;  %v4774_v17 = vld [vmem:[%s7189_s4 + $0x114] sm:$0xf0]  ;;  %v4220_v54 = vor.u32 %v4742_v13, %v4219_v12 }
 0x188   : > { %v4348_v22 = vor.u32 %v4774_v17, %v4347_v16  ;;  %v4893_v16 = vld [vmem:[%s7192_s7 + $0xd0] sm:$0xff]  ;;  %v4886_v17 = vld [vmem:[%s7192_s7 + $0x98] sm:$0xff] }
 0x18a   : > { %2768 = vmatpush.bf16.msrb.mxu2 %v4300_v23  ;;  %2781 = vmatpush.bf16.msrb.mxu3 %v4428_v24  ;;  %v4224_v23 = vor.u32 %v4740_v57, %v4221_v19  ;;  %v4352_v24 = vor.u32 %v4772_v20, %v4349_v21 }
 0x18b   : > { %2794 = vmatpush.bf16.msra.mxu0 %v4304_v18  ;;  %2807 = vmatpush.bf16.msra.mxu1 %v4432_v26  ;;  %v4874_v18 = vld [vmem:[%s7192_s7 + $0x38] sm:$0xff]  ;;  %v4879_v26 = vld [vmem:[%s7192_s7 + $0x60] sm:$0xff] }
 0x18e   : > { %2769 = vmatpush.bf16.msrb.mxu2 %v4284_v33  ;;  %2782 = vmatpush.bf16.msrb.mxu3 %v4412_v34 }
 0x18f   : > { %2795 = vmatpush.bf16.msra.mxu0 %v4288_v37  ;;  %2808 = vmatpush.bf16.msra.mxu1 %v4416_v38  ;;  %v4870_v37 = vld [vmem:[%s7192_s7 + $0x18] sm:$0xff] }
 0x192   : > { %2770 = vmatpush.bf16.msrb.mxu2 %v4268_v45  ;;  %2783 = vmatpush.bf16.msrb.mxu3 %v4396_v49  ;;  %v4875_v45 = vld [vmem:[%s7192_s7 + $0x40] sm:$0xff]  ;;  %v4868_v49 = vld [vmem:[%s7192_s7 + $0x8] sm:$0xff] }
 0x193   : > { %2796 = vmatpush.bf16.msra.mxu0 %v4272_v47  ;;  %2809 = vmatpush.bf16.msra.mxu1 %v4400_v48  ;;  %v4889_v47 = vld [vmem:[%s7192_s7 + $0xb0] sm:$0xff] }
 0x196   : > { %2771 = vmatpush.bf16.msrb.mxu2 %v4252_v59  ;;  %2784 = vmatpush.bf16.msrb.mxu3 %v4380_v7  ;;  %v4895_v59 = vld [vmem:[%s7192_s7 + $0xe0] sm:$0xff] }
 0x197   : > { %2797 = vmatpush.bf16.msra.mxu0 %v4256_v0  ;;  %2810 = vmatpush.bf16.msra.mxu1 %v4384_v58  ;;  %v4887_v7 = vld [vmem:[%s7192_s7 + $0xa0] sm:$0xff]  ;;  %v4894_v0 = vld [vmem:[%s7192_s7 + $0xd8] sm:$0xff] }
 0x198   : > { %v2818_v58 = vld [vmem:[%s7191_s6] sm:$0xf] }
 0x199   : > { %v2821_v8 = vperm.slane %v2818_v58, 1 }
 0x19a   : > { %2772 = vmatpush.bf16.msrb.mxu2 %v4236_v62  ;;  %2785 = vmatpush.bf16.msrb.mxu3 %v4364_v10 }
 0x19b   : > { %2798 = vmatpush.bf16.msra.mxu0 %v4240_v14  ;;  %2811 = vmatpush.bf16.msra.mxu1 %v4368_v15  ;;  %v2820_v15 = vperm.slane %v2818_v58, 0 }
 0x19e   : > { %2773 = vmatpush.bf16.msrb.mxu2 %v4220_v54  ;;  %2786 = vmatpush.bf16.msrb.mxu3 %v4348_v22  ;;  %v4892_v54 = vld [vmem:[%s7192_s7 + $0xc8] sm:$0xff] }
 0x19f   : > { %2799 = vmatpush.bf16.msra.mxu0 %v4224_v23  ;;  %2812 = vmatpush.bf16.msra.mxu1 %v4352_v24  ;;  %v4885_v24 = vld [vmem:[%s7192_s7 + $0x90] sm:$0xff] }
 0x1a1   : > { %2774 = vmatmul.bf16.vlgmr.msrb.gmra.mxu2 %v6880_v11  ;;  %2787 = vmatmul.bf16.vlgmr.msrb.gmra.mxu3 %v6882_v53 }
 0x1a2   : > { %2800 = vmatmul.bf16.vlgmr.msra.gmra.mxu0 %v6880_v11  ;;  %2813 = vmatmul.bf16.vlgmr.msra.gmra.mxu1 %v6882_v53  ;;  %v4880_v11 = vld [vmem:[%s7192_s7 + $0x68] sm:$0xff]  ;;  %v4873_v53 = vld [vmem:[%s7192_s7 + $0x30] sm:$0xff] }
 0x1a3   : > { %3110 = vmatpush.bf16.msra.mxu3 %v4882_v25  ;;  %3097 = vmatpush.bf16.msra.mxu2 %v4874_v18 }
 0x1a4   : > { %3136 = vmatpush.bf16.msrb.mxu1 %v4898_v44  ;;  %3123 = vmatpush.bf16.msrb.mxu0 %v4890_v46 }
 0x1a7   : > { %3111 = vmatpush.bf16.msra.mxu3 %v4881_v56  ;;  %3098 = vmatpush.bf16.msra.mxu2 %v4873_v53  ;;  %v4891_v56 = vld [vmem:[%s7192_s7 + $0xc0] sm:$0xff]  ;;  %v4884_v53 = vld [vmem:[%s7192_s7 + $0x88] sm:$0xff] }
 0x1a8   : > { %3137 = vmatpush.bf16.msrb.mxu1 %v4897_v1  ;;  %3124 = vmatpush.bf16.msrb.mxu0 %v4889_v47 }
 0x1ab   : > { %3112 = vmatpush.bf16.msra.mxu3 %v4880_v11  ;;  %3099 = vmatpush.bf16.msra.mxu2 %v4872_v27  ;;  %v4883_v27 = vld [vmem:[%s7192_s7 + $0x80] sm:$0xff] }
 0x1ac   : > { %3138 = vmatpush.bf16.msrb.mxu1 %v4896_v2  ;;  %3125 = vmatpush.bf16.msrb.mxu0 %v4888_v3 }
 0x1af   : > { %3113 = vmatpush.bf16.msra.mxu3 %v4879_v26  ;;  %3100 = vmatpush.bf16.msra.mxu2 %v4871_v29 }
 0x1b0   : > { %3139 = vmatpush.bf16.msrb.mxu1 %v4895_v59  ;;  %3126 = vmatpush.bf16.msrb.mxu0 %v4887_v7 }
 0x1b3   : > { %3114 = vmatpush.bf16.msra.mxu3 %v4878_v28  ;;  %3101 = vmatpush.bf16.msra.mxu2 %v4870_v37 }
 0x1b4   : > { %3140 = vmatpush.bf16.msrb.mxu1 %v4894_v0  ;;  %3127 = vmatpush.bf16.msrb.mxu0 %v4886_v17 }
 0x1b7   : > { %3115 = vmatpush.bf16.msra.mxu3 %v4877_v36  ;;  %3102 = vmatpush.bf16.msra.mxu2 %v4869_v43 }
 0x1b8   : > { %3141 = vmatpush.bf16.msrb.mxu1 %v4893_v16  ;;  %3128 = vmatpush.bf16.msrb.mxu0 %v4885_v24 }
 0x1bb   : > { %3116 = vmatpush.bf16.msra.mxu3 %v4876_v39  ;;  %3103 = vmatpush.bf16.msra.mxu2 %v4868_v49  ;;  %v2822_v39 = vperm.slane %v2818_v58, 2 }
 0x1bc   : > { %3142 = vmatpush.bf16.msrb.mxu1 %v4892_v54  ;;  %3129 = vmatpush.bf16.msrb.mxu0 %v4884_v53 }
 0x1bf   : > { %3117 = vmatpush.bf16.msra.mxu3 %v4875_v45  ;;  %3104 = vmatpush.bf16.msra.mxu2 %v4867_v50 }
 0x1c0   : > { %3143 = vmatpush.bf16.msrb.mxu1 %v4891_v56  ;;  %3130 = vmatpush.bf16.msrb.mxu0 %v4883_v27 }
 0x1dd   : > { %v2325_v30 = vpop.f32.mrf.mxu0 }
 0x1de   : > { %v2338_v31 = vpop.f32.mrf.mxu1 }
 0x1df   : > { %v2339_v61 = vadd.f32 %v2338_v31, %v2325_v30 }
 0x1e3   : > { %v2299_v32 = vpop.f32.mrf.mxu2 }
 0x1e4   : > { %v2312_v33 = vpop.f32.mrf.mxu3 }
 0x1e5   : > { %v2327_v34 = vpop.f32.mrf.mxu0  ;;  %v2313_v62 = vadd.f32 %v2312_v33, %v2299_v32  ;;  %v2823_v32 = vperm.slane %v2818_v58, 3 }
 0x1e6   : > { %v2340_v35 = vpop.f32.mrf.mxu1 }
 0x1eb   : > { %v2301_v38 = vpop.f32.mrf.mxu2 }
 0x1ec   : > { %v2314_v40 = vpop.f32.mrf.mxu3 }
 0x1ed   : > { %v7072_v41 = vpop.f32.mrf.mxu0 }
 0x1ee   : > { %v7074_v42 = vpop.f32.mrf.mxu1 }
 0x1ef   : > { %v2391_v28 = vadd.f32 %v7074_v42, %v7072_v41 }
 0x1f3   : > { %v7097_v48 = vpop.f32.mrf.mxu2 }
 0x1f4   : > { %v7099_v51 = vpop.f32.mrf.mxu3 }
 0x1f5   : > { %v2379_v52 = vpop.f32.mrf.mxu0  ;;  %v2365_v34 = vadd.f32 %v7099_v51, %v7097_v48 }
 0x1f6   : > { %v2392_v55 = vpop.f32.mrf.mxu1  ;;  %v2904_v52 = vld [vmem:[%s7193_s8] sm:$0x1] }
 0x1fb   : > { %v2353_v60 = vpop.f32.mrf.mxu2 }
 0x1fc   : > { %v2366_v63 = vpop.f32.mrf.mxu3 }
 0x201   : > { %v2749_v4 = vpop.f32.mrf.mxu0  ;;  %v2762_v5 = vpop.f32.mrf.mxu1 }
 0x202   : > { %v2750_v6 = vadd.f32 %v2749_v4, %v2339_v61 }
 0x204   : > { %v2763_v9 = vadd.f32 %v2762_v5, %v2750_v6  ;;  %v2723_v12 = vpop.f32.mrf.mxu2  ;;  %v2736_v13 = vpop.f32.mrf.mxu3 }
 0x205   : > { %v2724_v14 = vadd.f32 %v2723_v12, %v2313_v62 }
 0x206   : > { %v2829_v10 = vadd.f32 %v2821_v8, %v2763_v9 }
 0x207   : > { %v2737_v19 = vadd.f32 %v2736_v13, %v2724_v14 }
 0x208   : > { %v2833_v57 = vmax.f32 %v2829_v10, 0.0 }
 0x209   : > { %v2751_v20 = vpop.f32.mrf.mxu0  ;;  %v2764_v21 = vpop.f32.mrf.mxu1  ;;  %v2828_v23 = vadd.f32 %v2820_v15, %v2737_v19 }
 0x20a   : > { %v2837_v22 = vpack.c.bf16 %v2833_v57, %v2833_v57 }
 0x20b   : > { %v2832_v25 = vmax.f32 %v2828_v23, 0.0 }
 0x20c   : > { %3118 = vmatmul.bf16.vlgmr.msra.gmra.mxu3 %v2837_v22  ;;  %v2725_v18 = vpop.f32.mrf.mxu2  ;;  %v2738_v11 = vpop.f32.mrf.mxu3 }
 0x20d   : > { %v2836_v26 = vpack.c.bf16 %v2832_v25, %v2832_v25 }
 0x20f   : > { %3105 = vmatmul.bf16.vlgmr.msra.gmra.mxu2 %v2836_v26 }
 0x21f   : > { %v2801_v29 = vpop.f32.mrf.mxu0  ;;  %v2814_v30 = vpop.f32.mrf.mxu1 }
 0x220   : > { %v2802_v31 = vadd.f32 %v2801_v29, %v2391_v28 }
 0x222   : > { %v2815_v33 = vadd.f32 %v2814_v30, %v2802_v31 }
 0x224   : > { %v2831_v35 = vadd.f32 %v2823_v32, %v2815_v33  ;;  %v2775_v36 = vpop.f32.mrf.mxu2  ;;  %v2788_v37 = vpop.f32.mrf.mxu3 }
 0x225   : > { %v2776_v38 = vadd.f32 %v2775_v36, %v2365_v34 }
 0x226   : > { %v2835_v40 = vmax.f32 %v2831_v35, 0.0 }
 0x227   : > { %v2789_v43 = vadd.f32 %v2788_v37, %v2776_v38  ;;  %v2803_v44 = vpop.f32.mrf.mxu0  ;;  %v2816_v45 = vpop.f32.mrf.mxu1 }
 0x228   : > { %v2839_v49 = vpack.c.bf16 %v2835_v40, %v2835_v40 }
 0x229   : > { %v2830_v41 = vadd.f32 %v2822_v39, %v2789_v43 }
 0x22a   : > { %3144 = vmatmul.bf16.vlgmr.msrb.gmra.mxu1 %v2839_v49 }
 0x22b   : > { %v2834_v42 = vmax.f32 %v2830_v41, 0.0 }
 0x22c   : > { %v2777_v1 = vpop.f32.mrf.mxu2  ;;  %v2790_v46 = vpop.f32.mrf.mxu3 }
 0x22d   : > { %v2838_v47 = vpack.c.bf16 %v2834_v42, %v2834_v42 }
 0x22f   : > { %3131 = vmatmul.bf16.vlgmr.msrb.gmra.mxu0 %v2838_v47 }
 0x28f   : > { %v3119_v48 = vpop.f32.mrf.mxu3 }
 0x292   : > { %v3106_v51 = vpop.f32.mrf.mxu2 }
 0x293   : > { %v3107_v55 = vadd.f32 %v3106_v51, %v2904_v52 }
 0x295   : > { %v3120_v59 = vadd.f32 %v3119_v48, %v3107_v55 }
 0x297   : > { %v3121_v50 = vpop.f32.mrf.mxu3 }
 0x29a   : > { %v3108_v2 = vpop.f32.mrf.mxu2 }
 0x2a7   : > { %v3145_v3 = vpop.f32.mrf.mxu1 }
 0x2ac   : > { %v3132_v7 = vpop.f32.mrf.mxu0 }
 0x2ad   : > { %v3133_v60 = vadd.f32 %v3132_v7, %v3120_v59 }
 0x2af   : > { %v3146_v63 = vadd.f32 %v3145_v3, %v3133_v60  ;;  %v3147_v0 = vpop.f32.mrf.mxu1 }
 0x2b1   : > { %3149 = vst [vmem:[%s417_s28] sm:$0x1] %v3146_v63 }
 0x2b2   : > { %4968 = shalt.err (!%p4965_p5)
}
 0x2b3   : > { %4902 = dma.vmem_to_hbm [thread:$0]  (%p5093_p6), %s3162_s14, 16, %s3164_s16, %s3151_s21  }
 0x2b4   : > { %v3134_v58 = vpop.f32.mrf.mxu0 }
 0x2b5 PF: > { %s3175_s17 = sand.u32 1, %s4991_s30   ;;  %p4905_p7 = pnand %p3226_p9, %p5097_p8 }
 0x2b6   : > { %s3176_s29 = scalar_lea.sflag [#allocation4], %s3175_s17 }
 0x2b7   : > { %p4906_p10 = pneg %p4905_p7 }
 0x2b9   : > { %4986 = dma.done.wait (%p4906_p10), %s3176_s29, 16  }
 0x2ba   : > { %4988 = vsyncadd (%p4906_p10), %s3176_s29, 4294967280  ;;  %p19_p11 = scmp.ge.s32.totalorder %s5078_s15, 4   ;;  %s7201_s30 = smov %s4995_s10 }
 0x2bb   : > { %s7202_s10 = smov %s4999_s11  ;;  %s7203_s11 = smov %s5091_s18 }
 0x2bc   : > { %s7204_s12 = smov %s5078_s15  ;;  %21 = sbr.rel (!%p19_p11) target bundleno = 3 (0x3), region = 159 }
 0x2c1   :  { %3181 = vsyncpa [#allocation4], 1 }
 0x2c2   :  { %3183 = vsyncpa [#allocation4 + $0x1], 1 }

// kernel: forward.3
= control target key start
LH: loop header
LB: loop body
LE: loop exit
PB: predicated region body
PF: predicated region fallthrough
CT: control target
= control target key end

     0   :  { %s5851_s13 = smov 0   ;;  %s7045_s0 = inlined_call_operand.vmem [shape: bf16[128,256], index: 0, kind: input, shape index: {}]   ;;  %s7046_s1 = inlined_call_operand.vmem [shape: bf16[256,128], index: 1, kind: input, shape index: {}]   ;;  %s7047_s2 = inlined_call_operand.vmem [shape: f32[1,128], index: 2, kind: input, shape index: {}]   ;;  %s7048_s3 = inlined_call_operand.vmem [shape: f32[1,128], index: 3, kind: input, shape index: {}]   ;;  %s7049_s4 = inlined_call_operand.vmem [shape: bf16[9,128,128], index: 4, kind: input, shape index: {}]   ;;  %s7050_s5 = inlined_call_operand.vmem [shape: f32[1,128], index: 5, kind: input, shape index: {}]   ;;  %s7051_s6 = inlined_call_operand.vmem [shape: f32[1,128], index: 6, kind: input, shape index: {}]   ;;  %s7052_s7 = inlined_call_operand.vmem [shape: bf16[9,128,128], index: 7, kind: input, shape index: {}]   ;;  %s7053_s8 = inlined_call_operand.vmem [shape: f32[1,128], index: 8, kind: input, shape index: {}]   ;;  %s7054_s9 = inlined_call_operand.vmem [shape: f32[1,128], index: 9, kind: input, shape index: {}]   ;;  %s7055_s10 = inlined_call_operand.vmem [shape: bf16[2,8,8,128], index: 10, kind: output, shape index: {}]  }
   0x1 LB: > { %s5857_s14 = sadd.s32 4294967295, %s5793_s13   ;;  %p4475_p0 = scmp.ge.s32.totalorder %s5793_s13, 1  ;;  %s5793_s13 = sphi %s5851_s13, %s20_s13  }
   0x2   : > { %p314_p1 = scmp.lt.s32.totalorder %s5793_s13, 3 }
   0x4   : > { %p315_p2 = pnand %p4475_p0, %p314_p1 }
   0x6   : > { %318 = sbr.rel (%p315_p2) target bundleno = 799 (0x31f), region = 60 }
   0xb   : > { %v5572_v0 = vld [vmem:[%s7046_s1 + $0x38] sm:$0xff]  ;;  %v5571_v2 = vld [vmem:[%s7046_s1 + $0x30] sm:$0xff]  ;;  %v5570_v4 = vld [vmem:[%s7046_s1 + $0x28] sm:$0xff]  ;;  %s4476_s27 = sshll.u32 %s5857_s14, 3  ;;  %v5795_v52 = vmov 0   ;;  %p360_p4 = scmp.lt.s32.totalorder %s5857_s14, 1 }
   0xc   : > { %v5580_v1 = vld [vmem:[%s7046_s1 + $0x78] sm:$0xff]  ;;  %542 = vmatpush.bf16.msra.mxu0 %v5572_v0  ;;  %v5579_v3 = vld [vmem:[%s7046_s1 + $0x70] sm:$0xff]  ;;  %v5578_v5 = vld [vmem:[%s7046_s1 + $0x68] sm:$0xff]  ;;  %p354_p3 = scmp.lt.s32.totalorder %s4476_s27, 15  ;;  %636 = vst [vmem:[#allocation2 + $0x10] sm:$0xf] %v5795_v52 }
   0xd   : > { %571 = vmatpush.bf16.msra.mxu1 %v5580_v1  ;;  %v5569_v6 = vld [vmem:[%s7046_s1 + $0x20] sm:$0xff]  ;;  %v5568_v8 = vld [vmem:[%s7046_s1 + $0x18] sm:$0xff]  ;;  %v5567_v10 = vld [vmem:[%s7046_s1 + $0x10] sm:$0xff]  ;;  %632 = vst [vmem:[#allocation2] sm:$0xf] %v5795_v52  ;;  %s7069_s14 = smov (!%p360_p4, %s5857_s14), 1 }
   0xe   : > { %v5577_v7 = vld [vmem:[%s7046_s1 + $0x60] sm:$0xff]  ;;  %v5576_v9 = vld [vmem:[%s7046_s1 + $0x58] sm:$0xff]  ;;  %s7067_s27 = smov (!%p354_p3, %s4476_s27), 15  ;;  %v5575_v11 = vld [vmem:[%s7046_s1 + $0x50] sm:$0xff]  ;;  %633 = vst [vmem:[#allocation2 + $0x4] sm:$0xf] %v5795_v52 }
   0xf   : > { %s5555_s22 = sshll.u32 %s7067_s27, 3  ;;  %v5566_v12 = vld [vmem:[%s7046_s1 + $0x8] sm:$0xff]  ;;  %v5565_v14 = vld [vmem:[%s7046_s1] sm:$0xff]  ;;  %v5600_v28 = vld [vmem:[%s7049_s4 + $0x78] sm:$0xff]  ;;  %634 = vst [vmem:[#allocation2 + $0x8] sm:$0xf] %v5795_v52 }
  0x10   : > { %543 = vmatpush.bf16.msra.mxu0 %v5571_v2  ;;  %v5574_v13 = vld [vmem:[%s7046_s1 + $0x48] sm:$0xff]  ;;  %s5907_s30 = scalar_lea.vmem %s7045_s0, %s5555_s22  ;;  %v5573_v15 = vld [vmem:[%s7046_s1 + $0x40] sm:$0xff]  ;;  %v5592_v29 = vld [vmem:[%s7049_s4 + $0x38] sm:$0xff]  ;;  %907 = vmatpush.bf16.msra.mxu2 %v5600_v28  ;;  %635 = vst [vmem:[#allocation2 + $0xc] sm:$0xf] %v5795_v52  ;;  %s5556_s29 = sshll.u32 %s7069_s14, 5 }
  0x11   : > { %572 = vmatpush.bf16.msra.mxu1 %v5579_v3  ;;  %v4483_v16 = vld [vmem:[%s5907_s30] sm:$0xf]  ;;  %v5558_v17 = vld [vmem:[%s5907_s30 + $0x4] sm:$0xf0]  ;;  %v5557_v18 = vld [vmem:[%s5907_s30 + $0x4] sm:$0xf]  ;;  %1000 = vmatpush.bf16.msra.mxu3 %v5592_v29  ;;  %s7006_s12 = scalar_lea.vmem %s7055_s10, %s5556_s29 }
  0x12   : > { %v4485_v19 = vld [vmem:[%s5907_s30 + $0x8] sm:$0xf0]  ;;  %v4484_v20 = vor.u32 %v5558_v17, %v4483_v16  ;;  %v4491_v22 = vld [vmem:[%s5907_s30 + $0x10] sm:$0xf]  ;;  %v5560_v23 = vld [vmem:[%s5907_s30 + $0x14] sm:$0xf0] }
  0x13   : > { %v4488_v21 = vor.u32 %v5557_v18, %v4485_v19  ;;  %v5559_v24 = vld [vmem:[%s5907_s30 + $0x14] sm:$0xf]  ;;  %v4493_v25 = vld [vmem:[%s5907_s30 + $0x18] sm:$0xf0]  ;;  %v4492_v26 = vor.u32 %v5560_v23, %v4491_v22  ;;  %v5598_v31 = vld [vmem:[%s7049_s4 + $0x68] sm:$0xff] }
  0x14   : > { %544 = vmatpush.bf16.msra.mxu0 %v5570_v4  ;;  %v4496_v27 = vor.u32 %v5559_v24, %v4493_v25  ;;  %v5599_v30 = vld [vmem:[%s7049_s4 + $0x70] sm:$0xff]  ;;  %v4499_v32 = vld [vmem:[%s5907_s30 + $0x20] sm:$0xf]  ;;  %v5562_v33 = vld [vmem:[%s5907_s30 + $0x24] sm:$0xf0] }
  0x15   : > { %573 = vmatpush.bf16.msra.mxu1 %v5578_v5  ;;  %908 = vmatpush.bf16.msra.mxu2 %v5599_v30  ;;  %v5561_v34 = vld [vmem:[%s5907_s30 + $0x24] sm:$0xf]  ;;  %v4501_v35 = vld [vmem:[%s5907_s30 + $0x28] sm:$0xf0]  ;;  %v4500_v36 = vor.u32 %v5562_v33, %v4499_v32  ;;  %v4507_v38 = vld [vmem:[%s5907_s30 + $0x30] sm:$0xf] }
  0x16   : > { %v4504_v37 = vor.u32 %v5561_v34, %v4501_v35  ;;  %v5564_v39 = vld [vmem:[%s5907_s30 + $0x34] sm:$0xf0]  ;;  %v5563_v40 = vld [vmem:[%s5907_s30 + $0x34] sm:$0xf]  ;;  %v4509_v41 = vld [vmem:[%s5907_s30 + $0x38] sm:$0xf0] }
  0x17   : > { %v4508_v42 = vor.u32 %v5564_v39, %v4507_v38  ;;  %v4512_v43 = vor.u32 %v5563_v40, %v4509_v41  ;;  %v5608_v44 = vld [vmem:[%s7049_s4 + $0xb8] sm:$0xff]  ;;  %v5597_v45 = vld [vmem:[%s7049_s4 + $0x60] sm:$0xff]  ;;  %v5591_v46 = vld [vmem:[%s7049_s4 + $0x30] sm:$0xff]  ;;  %637 = vst [vmem:[#allocation2 + $0x14] sm:$0xf] %v5795_v52 }
  0x18   : > { %545 = vmatpush.bf16.msra.mxu0 %v5569_v6  ;;  %1001 = vmatpush.bf16.msra.mxu3 %v5591_v46  ;;  %v5607_v47 = vld [vmem:[%s7049_s4 + $0xb0] sm:$0xff]  ;;  %v5596_v48 = vld [vmem:[%s7049_s4 + $0x58] sm:$0xff]  ;;  %v5590_v49 = vld [vmem:[%s7049_s4 + $0x28] sm:$0xff]  ;;  %638 = vst [vmem:[#allocation2 + $0x18] sm:$0xf] %v5795_v52 }
  0x19   : > { %574 = vmatpush.bf16.msra.mxu1 %v5577_v7  ;;  %909 = vmatpush.bf16.msra.mxu2 %v5598_v31  ;;  %v5620_v50 = vld [vmem:[%s7049_s4 + $0xf8] sm:$0xff]  ;;  %v5606_v51 = vld [vmem:[%s7049_s4 + $0xa8] sm:$0xff]  ;;  %v5595_v53 = vld [vmem:[%s7049_s4 + $0x50] sm:$0xff]  ;;  %639 = vst [vmem:[#allocation2 + $0x1c] sm:$0xf] %v5795_v52 }
  0x1a   : > { %v5589_v54 = vld [vmem:[%s7049_s4 + $0x20] sm:$0xff]  ;;  %v5619_v55 = vld [vmem:[%s7049_s4 + $0xf0] sm:$0xff]  ;;  %v5594_v57 = vld [vmem:[%s7049_s4 + $0x48] sm:$0xff]  ;;  %640 = vst [vmem:[#allocation2 + $0x20] sm:$0xf] %v5795_v52 }
  0x1b   : > { %v5605_v56 = vld [vmem:[%s7049_s4 + $0xa0] sm:$0xff]  ;;  %v5588_v58 = vld [vmem:[%s7049_s4 + $0x18] sm:$0xff]  ;;  %v5618_v59 = vld [vmem:[%s7049_s4 + $0xe8] sm:$0xff]  ;;  %641 = vst [vmem:[#allocation2 + $0x24] sm:$0xf] %v5795_v52 }
  0x1c   : > { %546 = vmatpush.bf16.msra.mxu0 %v5568_v8  ;;  %1002 = vmatpush.bf16.msra.mxu3 %v5590_v49  ;;  %v5604_v60 = vld [vmem:[%s7049_s4 + $0x98] sm:$0xff]  ;;  %v5593_v61 = vld [vmem:[%s7049_s4 + $0x40] sm:$0xff]  ;;  %v5587_v62 = vld [vmem:[%s7049_s4 + $0x10] sm:$0xff]  ;;  %642 = vst [vmem:[#allocation2 + $0x28] sm:$0xf] %v5795_v52 }
  0x1d   : > { %575 = vmatpush.bf16.msra.mxu1 %v5576_v9  ;;  %910 = vmatpush.bf16.msra.mxu2 %v5597_v45  ;;  %v5617_v63 = vld [vmem:[%s7049_s4 + $0xe0] sm:$0xff]  ;;  %643 = vst [vmem:[#allocation2 + $0x2c] sm:$0xf] %v5795_v52  ;;  %v5603_v0 = vld [vmem:[%s7049_s4 + $0x90] sm:$0xff]  ;;  %v5586_v1 = vld [vmem:[%s7049_s4 + $0x8] sm:$0xff] }
  0x1e   : > { %644 = vst [vmem:[#allocation2 + $0x30] sm:$0xf] %v5795_v52  ;;  %v5616_v2 = vld [vmem:[%s7049_s4 + $0xd8] sm:$0xff]  ;;  %v5602_v3 = vld [vmem:[%s7049_s4 + $0x88] sm:$0xff]  ;;  %v5585_v4 = vld [vmem:[%s7049_s4] sm:$0xff] }
  0x1f   : > { %645 = vst [vmem:[#allocation2 + $0x34] sm:$0xf] %v5795_v52  ;;  %v5615_v5 = vld [vmem:[%s7049_s4 + $0xd0] sm:$0xff]  ;;  %v5628_v6 = vld [vmem:[%s7049_s4 + $0x138] sm:$0xff]  ;;  %v5601_v7 = vld [vmem:[%s7049_s4 + $0x80] sm:$0xff] }
  0x20   : > { %547 = vmatpush.bf16.msra.mxu0 %v5567_v10  ;;  %1003 = vmatpush.bf16.msra.mxu3 %v5589_v54  ;;  %646 = vst [vmem:[#allocation2 + $0x38] sm:$0xf] %v5795_v52  ;;  %v5614_v8 = vld [vmem:[%s7049_s4 + $0xc8] sm:$0xff]  ;;  %v5613_v16 = vld [vmem:[%s7049_s4 + $0xc0] sm:$0xff]  ;;  %v5627_v18 = vld [vmem:[%s7049_s4 + $0x130] sm:$0xff] }
  0x21   : > { %576 = vmatpush.bf16.msra.mxu1 %v5575_v11  ;;  %911 = vmatpush.bf16.msra.mxu2 %v5596_v48  ;;  %647 = vst [vmem:[#allocation2 + $0x3c] sm:$0xf] %v5795_v52  ;;  %v680_v11 = vld [vmem:[#allocation2 + $0x4] sm:$0xf]  ;;  %v681_v25 = vld [vmem:[#allocation2 + $0xc] sm:$0x8] }
  0x22   : > { %648 = vst [vmem:[#allocation2 + $0x40] sm:$0xf] %v5795_v52  ;;  %v704_v19 = vshrl.u32 %v680_v11, 16  ;;  %v707_v28 = vshll.u32 %v680_v11, 16  ;;  %vm695_vm0 = vsmask.f32 256 }
  0x23   : > { %649 = vst [vmem:[#allocation2 + $0x44] sm:$0xf] %v5795_v52  ;;  %vm696_vm1 = vsmask.f32 4368  ;;  %v1030_v31 = vld [vmem:[#allocation2 + $0x8] sm:$0x1] }
  0x24   : > { %548 = vmatpush.bf16.msra.mxu0 %v5566_v12  ;;  %1004 = vmatpush.bf16.msra.mxu3 %v5588_v58  ;;  %650 = vst [vmem:[#allocation2 + $0x48] sm:$0xf] %v5795_v52  ;;  %v1032_v34 = vld [vmem:[#allocation2 + $0x14] sm:$0x1]  ;;  %v712_v38 = vshrl.u32 %v681_v25, 16  ;;  %vm6084_vm2 = vmor %vm695_vm0, %vm696_vm1  ;;  %v1058_v45 = vshll.u32 %v1030_v31, 16 }
  0x25   : > { %577 = vmatpush.bf16.msra.mxu1 %v5574_v13  ;;  %912 = vmatpush.bf16.msra.mxu2 %v5595_v53  ;;  %651 = vst [vmem:[#allocation2 + $0x4c] sm:$0xf] %v5795_v52  ;;  %v6055_v13 = vld [vmem:[%s7047_s2] ss:$0 sm:$0xff]  ;;  %v1280_v39 = vld [vmem:[#allocation2 + $0x18] sm:$0x8] }
  0x26   : > { %652 = vst [vmem:[#allocation2 + $0x50] sm:$0xf] %v5795_v52  ;;  %v1072_v46 = vshll.u32 %v1032_v34, 16  ;;  %v4603_v54 = vld [vmem:[#allocation2 + $0x4] sm:$0xf]  ;;  %v1060_v58 = vrot.slane %v1058_v45, 5 }
  0x27   : > { %653 = vst [vmem:[#allocation2 + $0x54] sm:$0xf] %v5795_v52  ;;  %vm1045_vm3 = vsmask.f32 3328  ;;  %vm1046_vm4 = vsmask.f32 7440 }
  0x28   : > { %549 = vmatpush.bf16.msra.mxu0 %v5565_v14  ;;  %1005 = vmatpush.bf16.msra.mxu3 %v5587_v62  ;;  %654 = vst [vmem:[#allocation2 + $0x58] sm:$0xf] %v5795_v52  ;;  %v6060_v14 = vld [vmem:[%s7048_s3] ss:$0 sm:$0xff]  ;;  %vm6106_vm5 = vmor %vm1045_vm3, %vm1046_vm4 }
  0x29   : > { %578 = vmatpush.bf16.msra.mxu1 %v5573_v15  ;;  %913 = vmatpush.bf16.msra.mxu2 %v5594_v57  ;;  %655 = vst [vmem:[#allocation2 + $0x5c] sm:$0xf] %v5795_v52  ;;  %v1029_v15 = vld [vmem:[#allocation2 + $0x4] sm:$0xf]  ;;  %v1034_v62 = vld [vmem:[#allocation2 + $0x20] sm:$0x1] }
  0x2a   : > { %656 = vst [vmem:[#allocation2 + $0x60] sm:$0xf] %v5795_v52  ;;  %v1049_v22 = vshrl.u32 %v1029_v15, 16  ;;  %v1052_v23 = vshll.u32 %v1029_v15, 16 }
  0x2b   : > { %550 = vmatmul.bf16.vlgmr.msra.gmra.mxu0 %v4484_v20  ;;  %657 = vst [vmem:[#allocation2 + $0x64] sm:$0xf] %v5795_v52  ;;  %v679_v20 = vld [vmem:[#allocation2] sm:$0x8] }
  0x2c   : > { %579 = vmatmul.bf16.vlgmr.msra.gmra.mxu1 %v4488_v21  ;;  %1241 = vmatpush.bf16.msrb.mxu0 %v5608_v44  ;;  %658 = vst [vmem:[#allocation2 + $0x68] sm:$0xf] %v5795_v52  ;;  %v1051_v35 = vrot.slane %v1049_v22, 4 }
  0x2d   : > { %1479 = vmatpush.bf16.msrb.mxu1 %v5620_v50  ;;  %914 = vmatpush.bf16.msra.mxu2 %v5593_v61  ;;  %659 = vst [vmem:[#allocation2 + $0x6c] sm:$0xf] %v5795_v52  ;;  %v1308_v50 = vshrl.u32 %v1280_v39, 16 }
  0x2e   : > { %1006 = vmatpush.bf16.msra.mxu3 %v5586_v1  ;;  %660 = vst [vmem:[#allocation2 + $0x70] sm:$0xf] %v5795_v52 }
  0x2f   : > { %661 = vst [vmem:[#allocation2 + $0x74] sm:$0xf] %v5795_v52  ;;  %v4578_v52 = vrot.slane %v712_v38, 11 }
  0x30   : > { %1242 = vmatpush.bf16.msrb.mxu0 %v5607_v47 }
  0x31   : > { %1480 = vmatpush.bf16.msrb.mxu1 %v5619_v55  ;;  %1605 = vmatpush.bf16.msrb.mxu2 %v5628_v6 }
  0x32   : > { %1007 = vmatpush.bf16.msra.mxu3 %v5585_v4  ;;  %v1282_v4 = vld [vmem:[#allocation2 + $0x24] sm:$0x8] }
  0x33   : > { %v1321_v22 = vshrl.u32 %v1282_v4, 16 }
  0x34   : > { %1243 = vmatpush.bf16.msrb.mxu0 %v5606_v51  ;;  %v683_v51 = vld [vmem:[#allocation2 + $0x18] sm:$0x8] }
  0x35   : > { %1481 = vmatpush.bf16.msrb.mxu1 %v5618_v59  ;;  %1606 = vmatpush.bf16.msrb.mxu2 %v5627_v18  ;;  %v6094_v59 = vrot.slane %v1072_v46, 5  ;;  %v725_v61 = vshrl.u32 %v683_v51, 16 }
  0x37   : > { %v6116_v31 = vrot.slane %v725_v61, 11 }
  0x38   : > { %1244 = vmatpush.bf16.msrb.mxu0 %v5605_v56 }
  0x39   : > { %1482 = vmatpush.bf16.msrb.mxu1 %v5617_v63 }
  0x3b   : > { %555 = vmatmul.bf16.gmra.mxu0 %v4492_v26  ;;  %v699_v26 = vshrl.u32 %v679_v20, 16 }
  0x3c   : > { %584 = vmatmul.bf16.gmra.mxu1 %v4496_v27  ;;  %1245 = vmatpush.bf16.msrb.mxu0 %v5604_v60  ;;  %v706_v27 = vrot.slane %v704_v19, 7 }
  0x3d   : > { %1483 = vmatpush.bf16.msrb.mxu1 %v5616_v2  ;;  %v4577_v41 = vrot.slane %v699_v26, 11  ;;  %v6100_v2 = vrot.slane %v1308_v50, 11 }
  0x40   : > { %1246 = vmatpush.bf16.msrb.mxu0 %v5603_v0 }
  0x41   : > { %1484 = vmatpush.bf16.msrb.mxu1 %v5615_v5 }
  0x44   : > { %1247 = vmatpush.bf16.msrb.mxu0 %v5602_v3  ;;  %v685_v3 = vld [vmem:[#allocation2 + $0x24] sm:$0x8] }
  0x45   : > { %1485 = vmatpush.bf16.msrb.mxu1 %v5614_v8 }
  0x48   : > { %1248 = vmatpush.bf16.msrb.mxu0 %v5601_v7 }
  0x49   : > { %1486 = vmatpush.bf16.msrb.mxu1 %v5613_v16  ;;  %v5625_v16 = vld [vmem:[%s7049_s4 + $0x120] sm:$0xff] }
  0x4b   : > { %560 = vmatmul.bf16.gmra.mxu0 %v4500_v36  ;;  %v1054_v36 = vrot.slane %v1052_v23, 5 }
  0x4c   : > { %589 = vmatmul.bf16.gmra.mxu1 %v4504_v37  ;;  %v1278_v37 = vld [vmem:[#allocation2 + $0xc] sm:$0x8] }
  0x4d   : > { %v1295_v47 = vshrl.u32 %v1278_v37, 16  ;;  %v1055_v49 = vor.u32 %v1054_v36, %v1051_v35  ;;  %v1284_v36 = vld [vmem:[#allocation2 + $0x30] sm:$0x8] }
  0x4f   : > { %v6096_v60 = vrot.slane %v1295_v47, 11  ;;  %v1056_v1 = vrot.slane %v1055_v49, 4  ;;  %v6129_v47 = vrot.slane %v1321_v22, 11 }
  0x5b   : > { %565 = vmatmul.bf16.gmra.mxu0 %v4508_v42  ;;  %v709_v42 = vor.u32 %v707_v28, %v706_v27  ;;  %v1061_v28 = vsel %vm6106_vm5, %v1056_v1, %v1060_v58 }
  0x5c   : > { %594 = vmatmul.bf16.gmra.mxu1 %v4512_v43  ;;  %v5626_v43 = vld [vmem:[%s7049_s4 + $0x128] sm:$0xff] }
  0x5d   : > { %1607 = vmatpush.bf16.msrb.mxu2 %v5626_v43  ;;  %v710_v55 = vsel %vm6084_vm2, %v4577_v41, %v709_v42 }
  0x5e   : > { %v6102_v7 = vunpack.c.l.b16 %v710_v55  ;;  %v1334_v55 = vshrl.u32 %v1284_v36, 16 }
  0x61   : > { %1608 = vmatpush.bf16.msrb.mxu2 %v5625_v16 }
  0xa8   : > { %v551_v9 = vpop.f32.mrf.mxu0 }
  0xa9   : > { %v580_v10 = vpop.f32.mrf.mxu1 }
  0xaa   : > { %v581_v12 = vadd.f32 %v580_v10, %v551_v9  ;;  %v1036_v9 = vld [vmem:[#allocation2 + $0x2c] sm:$0x1] }
  0xab   : > { %v1100_v35 = vshll.u32 %v1036_v9, 16 }
  0xac   : > { %v600_v17 = vmax.f32 %v581_v12, 0.0 }
  0xad   : > { %v6131_v61 = vrot.slane %v1100_v35, 5 }
  0xae   : > { %v612_v21 = vmul.f32 %v6055_v13, %v600_v17  ;;  %v1086_v17 = vshll.u32 %v1034_v62, 16  ;;  %v5624_v62 = vld [vmem:[%s7049_s4 + $0x118] sm:$0xff] }
  0xaf   : > { %1609 = vmatpush.bf16.msrb.mxu2 %v5624_v62 }
  0xb0   : > { %v6075_v24 = vadd.f32 %v6060_v14, %v612_v21  ;;  %v553_v29 = vpop.f32.mrf.mxu0  ;;  %v738_v21 = vshrl.u32 %v685_v3, 16  ;;  %v6123_v42 = vrot.slane %v1086_v17, 5 }
  0xb1   : > { %v582_v30 = vpop.f32.mrf.mxu1 }
  0xb2   : > { %v662_v32 = vpack.c.bf16 %v6075_v24, %v6075_v24  ;;  %v583_v33 = vadd.f32 %v582_v30, %v553_v29  ;;  %v6121_v41 = vrot.slane %v738_v21, 11 }
  0xb4   : > { %671 = vst [vmem:[#allocation2 + $0x10] sm:$0xf] %v662_v32  ;;  %v601_v40 = vmax.f32 %v583_v33, 0.0 }
  0xb6   : > { %v613_v48 = vmul.f32 %v6055_v13, %v601_v40 }
  0xb8   : > { %v6090_v53 = vadd.f32 %v6060_v14, %v613_v48  ;;  %v556_v56 = vpop.f32.mrf.mxu0  ;;  %v687_v48 = vld [vmem:[#allocation2 + $0x30] sm:$0x8] }
  0xb9   : > { %v585_v57 = vpop.f32.mrf.mxu1  ;;  %v751_v4 = vshrl.u32 %v687_v48, 16 }
  0xba   : > { %v663_v63 = vpack.c.bf16 %v6090_v53, %v6090_v53  ;;  %v586_v0 = vadd.f32 %v585_v57, %v556_v56  ;;  %v1177_v57 = vunpack.c.l.b16 %v1061_v28 }
  0xbb   : > { %v5581_v5 = vld [vmem:[#allocation2 + $0xc] sm:$0xf0] }
  0xbc   : > { %v682_v6 = vld [vmem:[#allocation2 + $0x10] sm:$0xf]  ;;  %672 = vst [vmem:[#allocation2 + $0x1c] sm:$0xf] %v663_v63  ;;  %v602_v10 = vmax.f32 %v586_v0, 0.0  ;;  %v4604_v11 = vor.u32 %v5581_v5, %v4603_v54 }
  0xbd   : > { %v1031_v8 = vld [vmem:[#allocation2 + $0x10] sm:$0xf]  ;;  %v717_v12 = vshrl.u32 %v682_v6, 16  ;;  %v720_v26 = vshll.u32 %v682_v6, 16 }
  0xbe   : > { %v1063_v18 = vshrl.u32 %v1031_v8, 16  ;;  %v1066_v19 = vshll.u32 %v1031_v8, 16  ;;  %v1279_v20 = vld [vmem:[#allocation2 + $0x10] sm:$0xf]  ;;  %v614_v23 = vmul.f32 %v6055_v13, %v602_v10  ;;  %915 = vmatmul.bf16.vlgmr.msra.gmra.mxu2 %v4604_v11 }
  0xbf   : > { %v719_v25 = vrot.slane %v717_v12, 7  ;;  %v1300_v27 = vshrl.u32 %v1279_v20, 16  ;;  %v1303_v40 = vshll.u32 %v1279_v20, 16  ;;  %v6144_v12 = vrot.slane %v1334_v55, 11  ;;  %v6159_v35 = vld [vmem:[#allocation2 + $0x10] sm:$0xf] }
  0xc0   : > { %v1065_v29 = vrot.slane %v1063_v18, 4  ;;  %v1068_v30 = vrot.slane %v1066_v19, 5  ;;  %v6119_v32 = vadd.f32 %v6060_v14, %v614_v23  ;;  %v558_v37 = vpop.f32.mrf.mxu0  ;;  %v5623_v55 = vld [vmem:[%s7049_s4 + $0x110] sm:$0xff] }
  0xc1   : > { %v722_v33 = vor.u32 %v720_v26, %v719_v25  ;;  %v1302_v34 = vrot.slane %v1300_v27, 7  ;;  %v587_v38 = vpop.f32.mrf.mxu1  ;;  %v6149_v26 = vrot.slane %v751_v4, 11  ;;  %1610 = vmatpush.bf16.msrb.mxu2 %v5623_v55 }
  0xc2   : > { %v1069_v39 = vor.u32 %v1068_v30, %v1065_v29  ;;  %v664_v43 = vpack.c.bf16 %v6119_v32, %v6119_v32  ;;  %v588_v45 = vadd.f32 %v587_v38, %v558_v37  ;;  %v689_v30 = vld [vmem:[#allocation2 + $0x3c] sm:$0x8] }
  0xc3   : > { %v723_v46 = vsel %vm6084_vm2, %v4578_v52, %v722_v33  ;;  %v1281_v51 = vld [vmem:[#allocation2 + $0x1c] sm:$0xf]  ;;  %v1305_v54 = vor.u32 %v1303_v40, %v1302_v34 }
  0xc4   : > { %v937_v49 = vunpack.c.l.b16 %v723_v46  ;;  %v1070_v50 = vrot.slane %v1069_v39, 4  ;;  %673 = vst [vmem:[#allocation2 + $0x28] sm:$0xf] %v664_v43  ;;  %v603_v56 = vmax.f32 %v588_v45, 0.0  ;;  %v1313_v58 = vshrl.u32 %v1281_v51, 16  ;;  %v5636_v33 = vld [vmem:[%s7049_s4 + $0x178] sm:$0xff] }
  0xc5   : > { %v1316_v0 = vshll.u32 %v1281_v51, 16  ;;  %v684_v1 = vld [vmem:[#allocation2 + $0x1c] sm:$0xf]  ;;  %v1306_v10 = vsel %vm6084_vm2, %v6096_v60, %v1305_v54  ;;  %1851 = vmatpush.bf16.msrb.mxu3 %v5636_v33 }
  0xc6   : > { %v944_v52 = vpack.c.b16 %v937_v49, %v6102_v7  ;;  %v1075_v63 = vsel %vm6106_vm5, %v1070_v50, %v6094_v59  ;;  %v1033_v3 = vld [vmem:[#allocation2 + $0x1c] sm:$0xf]  ;;  %v615_v5 = vmul.f32 %v6055_v13, %v603_v56  ;;  %v1315_v8 = vrot.slane %v1313_v58, 7  ;;  %v1038_v59 = vld [vmem:[#allocation2 + $0x38] sm:$0x1]  ;;  %v5635_v58 = vld [vmem:[%s7049_s4 + $0x170] sm:$0xff] }
  0xc7   : > { %v1178_v6 = vunpack.c.l.b16 %v1075_v63  ;;  %v730_v9 = vshrl.u32 %v684_v1, 16  ;;  %v1077_v7 = vshrl.u32 %v1033_v3, 16  ;;  %v1080_v11 = vshll.u32 %v1033_v3, 16  ;;  %v4607_v28 = vld [vmem:[#allocation2 + $0x1c] sm:$0xf] }
  0xc8   : > { %1008 = vmatmul.bf16.vlgmr.msra.gmra.mxu3 %v944_v52  ;;  %v6147_v16 = vadd.f32 %v6060_v14, %v615_v5  ;;  %v1318_v18 = vor.u32 %v1316_v0, %v1315_v8  ;;  %v561_v20 = vpop.f32.mrf.mxu0  ;;  %v733_v22 = vshll.u32 %v684_v1, 16  ;;  %v1114_v34 = vshll.u32 %v1038_v59, 16  ;;  %v5622_v5 = vld [vmem:[%s7049_s4 + $0x108] sm:$0xff]  ;;  %v5647_v59 = vld [vmem:[%s7049_s4 + $0x1b0] sm:$0xff] }
  0xc9   : > { %v1185_v17 = vpack.c.b16 %v1178_v6, %v1177_v57  ;;  %v732_v19 = vrot.slane %v730_v9, 7  ;;  %v590_v21 = vpop.f32.mrf.mxu1  ;;  %v1079_v23 = vrot.slane %v1077_v7, 4  ;;  %v1082_v25 = vrot.slane %v1080_v11, 5  ;;  %v5648_v57 = vld [vmem:[%s7049_s4 + $0x1b8] sm:$0xff]  ;;  %v6186_v11 = vld [vmem:[#allocation2 + $0x44] sm:$0x1]  ;;  %1852 = vmatpush.bf16.msrb.mxu3 %v5635_v58  ;;  %1611 = vmatpush.bf16.msrb.mxu2 %v5622_v5 }
  0xca   : > { %v665_v60 = vpack.c.bf16 %v6147_v16, %v6147_v16  ;;  %v591_v27 = vadd.f32 %v590_v21, %v561_v20  ;;  %v1319_v29 = vsel %vm6084_vm2, %v6100_v2, %v1318_v18  ;;  %v1415_v37 = vunpack.c.l.b16 %v1306_v10  ;;  %v5656_v6 = vld [vmem:[%s7049_s4 + $0x1f8] sm:$0xff]  ;;  %2090 = vmatpush.bf16.msra.mxu0 %v5648_v57 }
  0xcb   : > { %1249 = vmatmul.bf16.vlgmr.msrb.gmra.mxu0 %v1185_v17  ;;  %v5582_v36 = vld [vmem:[#allocation2 + $0x24] sm:$0xf0]  ;;  %v1416_v38 = vunpack.c.l.b16 %v1319_v29  ;;  %v735_v40 = vor.u32 %v733_v22, %v732_v19  ;;  %v1083_v45 = vor.u32 %v1082_v25, %v1079_v23  ;;  %v764_v56 = vshrl.u32 %v689_v30, 16  ;;  %2216 = vmatpush.bf16.msra.mxu1 %v5656_v6  ;;  %v5655_v25 = vld [vmem:[%s7049_s4 + $0x1f0] sm:$0xff]  ;;  %v6207_v30 = vld [vmem:[#allocation2 + $0x3c] sm:$0x8] }
  0xcc   : > { %v686_v39 = vld [vmem:[#allocation2 + $0x28] sm:$0xf]  ;;  %674 = vst [vmem:[#allocation2 + $0x34] sm:$0xf] %v665_v60  ;;  %v604_v46 = vmax.f32 %v591_v27, 0.0  ;;  %v4608_v48 = vor.u32 %v5582_v36, %v4607_v28  ;;  %v6174_v4 = vrot.slane %v1114_v34, 5 }
  0xcd   : > { %v1035_v43 = vld [vmem:[#allocation2 + $0x28] sm:$0xf]  ;;  %v743_v49 = vshrl.u32 %v686_v39, 16  ;;  %v1423_v50 = vpack.c.b16 %v1416_v38, %v1415_v37  ;;  %v746_v51 = vshll.u32 %v686_v39, 16  ;;  %v1084_v54 = vrot.slane %v1083_v45, 4  ;;  %v5621_v39 = vld [vmem:[%s7049_s4 + $0x100] sm:$0xff] }
  0xce   : > { %v1283_v2 = vld [vmem:[#allocation2 + $0x28] sm:$0xf]  ;;  %v616_v62 = vmul.f32 %v6055_v13, %v604_v46  ;;  %920 = vmatmul.bf16.gmra.mxu2 %v4608_v48  ;;  %v1091_v63 = vshrl.u32 %v1035_v43, 16  ;;  %v1094_v0 = vshll.u32 %v1035_v43, 16  ;;  %v736_v1 = vsel %vm6084_vm2, %v6116_v31, %v735_v40  ;;  %2091 = vmatpush.bf16.msra.mxu0 %v5647_v59  ;;  %v5633_v46 = vld [vmem:[%s7049_s4 + $0x160] sm:$0xff] }
  0xcf   : > { %v745_v52 = vrot.slane %v743_v49, 7  ;;  %1487 = vmatmul.bf16.vlgmr.msrb.gmra.mxu1 %v1423_v50  ;;  %v1326_v3 = vshrl.u32 %v1283_v2, 16  ;;  %v1659_v8 = vshrl.u32 %v6159_v35, 16  ;;  %v5634_v17 = vld [vmem:[%s7049_s4 + $0x168] sm:$0xff]  ;;  %v1089_v20 = vsel %vm6106_vm5, %v1084_v54, %v6123_v42  ;;  %1612 = vmatpush.bf16.msrb.mxu2 %v5621_v39 }
  0xd0   : > { %v6184_v9 = vadd.f32 %v6060_v14, %v616_v62  ;;  %v1093_v7 = vrot.slane %v1091_v63, 4  ;;  %v1096_v31 = vrot.slane %v1094_v0, 5  ;;  %v563_v18 = vpop.f32.mrf.mxu0  ;;  %v1329_v22 = vshll.u32 %v1283_v2, 16  ;;  %v5646_v42 = vld [vmem:[%s7049_s4 + $0x1a8] sm:$0xff]  ;;  %1853 = vmatpush.bf16.msrb.mxu3 %v5634_v17  ;;  %2217 = vmatpush.bf16.msra.mxu1 %v5655_v25 }
  0xd1   : > { %v748_v10 = vor.u32 %v746_v51, %v745_v52  ;;  %v592_v19 = vpop.f32.mrf.mxu1  ;;  %v1328_v21 = vrot.slane %v1326_v3, 7  ;;  %v6197_v23 = vrot.slane %v764_v56, 11  ;;  %v938_v33 = vunpack.c.l.b16 %v736_v1  ;;  %v6219_v51 = vld [vmem:[#allocation2 + $0x48] sm:$0x8] }
  0xd2   : > { %v666_v60 = vpack.c.bf16 %v6184_v9, %v6184_v9  ;;  %v593_v27 = vadd.f32 %v592_v19, %v563_v18  ;;  %v1097_v29 = vor.u32 %v1096_v31, %v1093_v7  ;;  %v1128_v38 = vshll.u32 %v6186_v11, 16  ;;  %v6226_v1 = vld [vmem:[#allocation2 + $0x48] sm:$0x8]  ;;  %2092 = vmatpush.bf16.msra.mxu0 %v5646_v42  ;;  %v5645_v7 = vld [vmem:[%s7049_s4 + $0x1a0] sm:$0xff]  ;;  %v5632_v31 = vld [vmem:[%s7049_s4 + $0x158] sm:$0xff] }
  0xd3   : > { %v749_v28 = vsel %vm6084_vm2, %v6121_v41, %v748_v10  ;;  %v1285_v36 = vld [vmem:[#allocation2 + $0x34] sm:$0xf]  ;;  %v1331_v43 = vor.u32 %v1329_v22, %v1328_v21  ;;  %v1179_v49 = vunpack.c.l.b16 %v1089_v20  ;;  %v1347_v54 = vshrl.u32 %v6207_v30, 16  ;;  %v5654_v3 = vld [vmem:[%s7049_s4 + $0x1e8] sm:$0xff] }
  0xd4   : > { %v939_v34 = vunpack.c.l.b16 %v749_v28  ;;  %v688_v37 = vld [vmem:[#allocation2 + $0x34] sm:$0xf]  ;;  %675 = vst [vmem:[#allocation2 + $0x40] sm:$0xf] %v666_v60  ;;  %v605_v41 = vmax.f32 %v593_v27, 0.0  ;;  %v1098_v40 = vrot.slane %v1097_v29, 4  ;;  %1854 = vmatpush.bf16.msrb.mxu3 %v5633_v46  ;;  %2218 = vmatpush.bf16.msra.mxu1 %v5654_v3 }
  0xd5   : > { %v1339_v45 = vshrl.u32 %v1285_v36, 16  ;;  %v756_v2 = vshrl.u32 %v688_v37, 16  ;;  %v1037_v50 = vld [vmem:[#allocation2 + $0x34] sm:$0xf]  ;;  %v1342_v58 = vshll.u32 %v1285_v36, 16  ;;  %v1360_v10 = vshrl.u32 %v6219_v51, 16 }
  0xd6   : > { %v945_v48 = vpack.c.b16 %v939_v34, %v938_v33  ;;  %v617_v55 = vmul.f32 %v6055_v13, %v605_v41  ;;  %v1103_v56 = vsel %vm6106_vm5, %v1098_v40, %v6131_v61  ;;  %v1105_v63 = vshrl.u32 %v1037_v50, 16  ;;  %v4611_v25 = vld [vmem:[#allocation2 + $0x34] sm:$0xf]  ;;  %2093 = vmatpush.bf16.msra.mxu0 %v5645_v7  ;;  %v5630_v30 = vld [vmem:[%s7049_s4 + $0x148] sm:$0xff] }
  0xd7   : > { %v1341_v57 = vrot.slane %v1339_v45, 7  ;;  %v1180_v62 = vunpack.c.l.b16 %v1103_v56  ;;  %v758_v52 = vrot.slane %v756_v2, 7  ;;  %v1108_v0 = vshll.u32 %v1037_v50, 16  ;;  %v5631_v2 = vld [vmem:[%s7049_s4 + $0x150] sm:$0xff]  ;;  %v5653_v50 = vld [vmem:[%s7049_s4 + $0x1e0] sm:$0xff] }
  0xd8   : > { %1013 = vmatmul.bf16.gmra.mxu3 %v945_v48  ;;  %v6232_v5 = vadd.f32 %v6060_v14, %v617_v55  ;;  %v1332_v61 = vsel %vm6084_vm2, %v6129_v47, %v1331_v43  ;;  %v566_v59 = vpop.f32.mrf.mxu0  ;;  %v759_v19 = vshll.u32 %v688_v37, 16  ;;  %v1107_v20 = vrot.slane %v1105_v63, 4  ;;  %v6277_v7 = vld [vmem:[#allocation2 + $0x54] sm:$0x8]  ;;  %2219 = vmatpush.bf16.msra.mxu1 %v5653_v50 }
  0xd9   : > { %v1344_v6 = vor.u32 %v1342_v58, %v1341_v57  ;;  %v595_v17 = vpop.f32.mrf.mxu1  ;;  %v1186_v18 = vpack.c.b16 %v1180_v62, %v1179_v49  ;;  %v1110_v21 = vrot.slane %v1108_v0, 5  ;;  %v777_v27 = vshrl.u32 %v6226_v1, 16  ;;  %1855 = vmatpush.bf16.msrb.mxu3 %v5632_v31  ;;  %v5664_v58 = vld [vmem:[%s7049_s4 + $0x238] sm:$0xff]  ;;  %v5643_v11 = vld [vmem:[%s7049_s4 + $0x190] sm:$0xff] }
  0xda   : > { %v667_v47 = vpack.c.bf16 %v6232_v5, %v6232_v5  ;;  %v596_v22 = vadd.f32 %v595_v17, %v566_v59  ;;  %v1417_v29 = vunpack.c.l.b16 %v1332_v61  ;;  %v761_v34 = vor.u32 %v759_v19, %v758_v52  ;;  %2462 = vmatpush.bf16.msra.mxu2 %v5664_v58  ;;  %v5652_v17 = vld [vmem:[%s7049_s4 + $0x1d8] sm:$0xff] }
  0xdb   : > { %v1345_v60 = vsel %vm6084_vm2, %v6144_v12, %v1344_v6  ;;  %1254 = vmatmul.bf16.gmra.mxu0 %v1186_v18  ;;  %v5583_v28 = vld [vmem:[#allocation2 + $0x3c] sm:$0xf0]  ;;  %v1111_v37 = vor.u32 %v1110_v21, %v1107_v20  ;;  %v5644_v12 = vld [vmem:[%s7049_s4 + $0x198] sm:$0xff]  ;;  %v1130_v52 = vrot.slane %v1128_v38, 5  ;;  %v6267_v63 = vrot.slane %v1347_v54, 11 }
  0xdc   : > { %v1418_v42 = vunpack.c.l.b16 %v1345_v60  ;;  %v690_v33 = vld [vmem:[#allocation2 + $0x40] sm:$0xf]  ;;  %676 = vst [vmem:[#allocation2 + $0x4c] sm:$0xf] %v667_v47  ;;  %v606_v39 = vmax.f32 %v596_v22, 0.0  ;;  %v4612_v41 = vor.u32 %v5583_v28, %v4611_v25  ;;  %v6269_v0 = vrot.slane %v1360_v10, 11  ;;  %2094 = vmatpush.bf16.msra.mxu0 %v5644_v12  ;;  %2220 = vmatpush.bf16.msra.mxu1 %v5652_v17 }
  0xdd   : > { %v1039_v36 = vld [vmem:[#allocation2 + $0x40] sm:$0xf]  ;;  %v769_v40 = vshrl.u32 %v690_v33, 16  ;;  %v772_v43 = vshll.u32 %v690_v33, 16  ;;  %v1112_v46 = vrot.slane %v1111_v37, 4  ;;  %v762_v3 = vsel %vm6084_vm2, %v6149_v26, %v761_v34  ;;  %1856 = vmatpush.bf16.msrb.mxu3 %v5631_v2  ;;  %v5651_v12 = vld [vmem:[%s7049_s4 + $0x1d0] sm:$0xff] }
  0xde   : > { %v1424_v45 = vpack.c.b16 %v1418_v42, %v1417_v29  ;;  %v1119_v48 = vshrl.u32 %v1039_v36, 16  ;;  %v1287_v49 = vld [vmem:[#allocation2 + $0x40] sm:$0xf]  ;;  %v618_v51 = vmul.f32 %v6055_v13, %v606_v39  ;;  %925 = vmatmul.bf16.gmra.mxu2 %v4612_v41  ;;  %v1122_v56 = vshll.u32 %v1039_v36, 16  ;;  %v1042_v28 = vld [vmem:[#allocation2 + $0x50] sm:$0x1] }
  0xdf   : > { %v771_v55 = vrot.slane %v769_v40, 7  ;;  %v1352_v57 = vshrl.u32 %v1287_v49, 16  ;;  %v1117_v26 = vsel %vm6106_vm5, %v1112_v46, %v6174_v4  ;;  %v1355_v31 = vshll.u32 %v1287_v49, 16  ;;  %v5663_v4 = vld [vmem:[%s7049_s4 + $0x230] sm:$0xff]  ;;  %v5642_v29 = vld [vmem:[%s7049_s4 + $0x188] sm:$0xff]  ;;  %v5629_v36 = vld [vmem:[%s7049_s4 + $0x140] sm:$0xff] }
  0xe0   : > { %1492 = vmatmul.bf16.gmra.mxu1 %v1424_v45  ;;  %v1121_v62 = vrot.slane %v1119_v48, 4  ;;  %v6272_v1 = vadd.f32 %v6060_v14, %v618_v51  ;;  %v1124_v6 = vrot.slane %v1122_v56, 5  ;;  %v568_v38 = vpop.f32.mrf.mxu0  ;;  %v6288_v59 = vrot.slane %v777_v27, 11  ;;  %2095 = vmatpush.bf16.msra.mxu0 %v5643_v11  ;;  %v1044_v51 = vld [vmem:[#allocation2 + $0x5c] sm:$0x1] }
  0xe1   : > { %v774_v61 = vor.u32 %v772_v43, %v771_v55  ;;  %v597_v54 = vpop.f32.mrf.mxu1  ;;  %v1354_v10 = vrot.slane %v1352_v57, 7  ;;  %v940_v47 = vunpack.c.l.b16 %v762_v3  ;;  %v790_v27 = vshrl.u32 %v6277_v7, 16  ;;  %1857 = vmatpush.bf16.msrb.mxu3 %v5630_v30  ;;  %2463 = vmatpush.bf16.msra.mxu2 %v5663_v4 }
  0xe2   : > { %7062 = vst [vmem:[#allocation3_spill] sm:$0xff] %v6272_v1  ;;  %v668_v18 = vpack.c.bf16 %v6272_v1, %v6272_v1  ;;  %v598_v19 = vadd.f32 %v597_v54, %v568_v38  ;;  %v1125_v21 = vor.u32 %v1124_v6, %v1121_v62  ;;  %v1181_v39 = vunpack.c.l.b16 %v1117_v26  ;;  %2221 = vmatpush.bf16.msra.mxu1 %v5651_v12  ;;  %v1290_v26 = vld [vmem:[#allocation2 + $0x54] sm:$0x8] }
  0xe3   : > { %v775_v20 = vsel %vm6084_vm2, %v6197_v23, %v774_v61  ;;  %v1289_v25 = vld [vmem:[#allocation2 + $0x4c] sm:$0xf]  ;;  %v1357_v23 = vor.u32 %v1355_v31, %v1354_v10  ;;  %v4584_v38 = vrot.slane %v790_v27, 11  ;;  %v1156_v54 = vshll.u32 %v1044_v51, 16 }
  0xe4   : > { %v941_v22 = vunpack.c.l.b16 %v775_v20  ;;  %v692_v60 = vld [vmem:[#allocation2 + $0x4c] sm:$0xf]  ;;  %677 = vst [vmem:[#allocation2 + $0x58] sm:$0xf] %v668_v18  ;;  %v607_v42 = vmax.f32 %v598_v19, 0.0  ;;  %v1126_v33 = vrot.slane %v1125_v21, 4  ;;  %2096 = vmatpush.bf16.msra.mxu0 %v5642_v29 }
  0xe5   : > { %v1365_v34 = vshrl.u32 %v1289_v25, 16  ;;  %v1368_v41 = vshll.u32 %v1289_v25, 16  ;;  %v782_v40 = vshrl.u32 %v692_v60, 16  ;;  %v1041_v43 = vld [vmem:[#allocation2 + $0x4c] sm:$0xf]  ;;  %v785_v49 = vshll.u32 %v692_v60, 16  ;;  %1858 = vmatpush.bf16.msrb.mxu3 %v5629_v36 }
  0xe6   : > { %v946_v37 = vpack.c.b16 %v941_v22, %v940_v47  ;;  %v619_v45 = vmul.f32 %v6055_v13, %v607_v42  ;;  %v1131_v46 = vsel %vm6106_vm5, %v1126_v33, %v1130_v52  ;;  %v1133_v55 = vshrl.u32 %v1041_v43, 16  ;;  %v5641_v52 = vld [vmem:[%s7049_s4 + $0x180] sm:$0xff]  ;;  %v4615_v11 = vld [vmem:[#allocation2 + $0x4c] sm:$0xf]  ;;  %v1644_v25 = vld [vmem:[#allocation2 + $0x1c] sm:$0xf] }
  0xe7   : > { %v1367_v48 = vrot.slane %v1365_v34, 7  ;;  %v1182_v2 = vunpack.c.l.b16 %v1131_v46  ;;  %v784_v50 = vrot.slane %v782_v40, 7  ;;  %v1136_v56 = vshll.u32 %v1041_v43, 16  ;;  %v1292_v29 = vld [vmem:[#allocation2 + $0x60] sm:$0x8] }
  0xe8   : > { %1018 = vmatmul.bf16.gmra.mxu3 %v946_v37  ;;  %v6315_v57 = vadd.f32 %v6060_v14, %v619_v45  ;;  %v1358_v58 = vsel %vm6084_vm2, %v6267_v63, %v1357_v23  ;;  %v1142_v13 = vshll.u32 %v1042_v28, 16  ;;  %v1135_v6 = vrot.slane %v1133_v55, 4  ;;  %v5650_v14 = vld [vmem:[%s7049_s4 + $0x1c8] sm:$0xff]  ;;  %2097 = vmatpush.bf16.msra.mxu0 %v5641_v52  ;;  %v5649_v42 = vld [vmem:[%s7049_s4 + $0x1c0] sm:$0xff] }
  0xe9   : > { %v1370_v62 = vor.u32 %v1368_v41, %v1367_v48  ;;  %v1187_v3 = vpack.c.b16 %v1182_v2, %v1181_v39  ;;  %v787_v61 = vor.u32 %v785_v49, %v784_v50  ;;  %v1138_v7 = vrot.slane %v1136_v56, 5  ;;  %2222 = vmatpush.bf16.msra.mxu1 %v5650_v14  ;;  %v5662_v37 = vld [vmem:[%s7049_s4 + $0x228] sm:$0xff]  ;;  %v5661_v48 = vld [vmem:[%s7049_s4 + $0x220] sm:$0xff] }
  0xea   : > { %7063 = vst [vmem:[#allocation4_spill] sm:$0xff] %v6315_v57  ;;  %v669_v63 = vpack.c.bf16 %v6315_v57, %v6315_v57  ;;  %v1419_v31 = vunpack.c.l.b16 %v1358_v58  ;;  %v1144_v47 = vrot.slane %v1142_v13, 5  ;;  %v1158_v41 = vrot.slane %v1156_v54, 5  ;;  %2464 = vmatpush.bf16.msra.mxu2 %v5662_v37  ;;  %v1643_v54 = vld [vmem:[#allocation2 + $0x14] sm:$0x1] }
  0xeb   : > { %v1371_v30 = vsel %vm6084_vm2, %v6269_v0, %v1370_v62  ;;  %1259 = vmatmul.bf16.gmra.mxu0 %v1187_v3  ;;  %v5584_v10 = vld [vmem:[#allocation2 + $0x54] sm:$0xf0]  ;;  %v1139_v20 = vor.u32 %v1138_v7, %v1135_v6  ;;  %v788_v0 = vsel %vm6084_vm2, %v6288_v59, %v787_v61  ;;  %v1373_v40 = vshrl.u32 %v1290_v26, 16  ;;  %v1645_v62 = vld [vmem:[#allocation2 + $0x20] sm:$0x1] }
  0xec   : > { %v1420_v17 = vunpack.c.l.b16 %v1371_v30  ;;  %v694_v18 = vld [vmem:[#allocation2 + $0x58] sm:$0xf]  ;;  %678 = vst [vmem:[#allocation2 + $0x64] sm:$0xf] %v669_v63  ;;  %v4616_v21 = vor.u32 %v5584_v10, %v4615_v11  ;;  %v1386_v45 = vshrl.u32 %v1292_v29, 16  ;;  %v1662_v46 = vshll.u32 %v6159_v35, 16 }
  0xed   : > { %v1043_v19 = vld [vmem:[#allocation2 + $0x58] sm:$0xf]  ;;  %v795_v4 = vshrl.u32 %v694_v18, 16  ;;  %v798_v23 = vshll.u32 %v694_v18, 16  ;;  %v1140_v34 = vrot.slane %v1139_v20, 4  ;;  %v942_v49 = vunpack.c.l.b16 %v788_v0  ;;  %2223 = vmatpush.bf16.msra.mxu1 %v5649_v42 }
  0xee   : > { %v1291_v22 = vld [vmem:[#allocation2 + $0x58] sm:$0xf]  ;;  %v1425_v60 = vpack.c.b16 %v1420_v17, %v1419_v31  ;;  %v1147_v27 = vshrl.u32 %v1043_v19, 16  ;;  %v1150_v28 = vshll.u32 %v1043_v19, 16  ;;  %930 = vmatmul.bf16.gmra.mxu2 %v4616_v21  ;;  %v1673_v50 = vshrl.u32 %v1644_v25, 16 }
  0xef   : > { %v797_v33 = vrot.slane %v795_v4, 7  ;;  %v1378_v36 = vshrl.u32 %v1291_v22, 16  ;;  %v1676_v51 = vshll.u32 %v1644_v25, 16  ;;  %v1145_v56 = vsel %vm6106_vm5, %v1140_v34, %v1144_v47  ;;  %2465 = vmatpush.bf16.msra.mxu2 %v5661_v48  ;;  %v1890_v17 = vld [vmem:[#allocation2 + $0x1c] sm:$0xf] }
  0xf0   : > { %1497 = vmatmul.bf16.gmra.mxu1 %v1425_v60  ;;  %v1149_v39 = vrot.slane %v1147_v27, 4  ;;  %v1152_v59 = vrot.slane %v1150_v28, 5  ;;  %v1381_v58 = vshll.u32 %v1291_v22, 16  ;;  %v1661_v13 = vrot.slane %v1659_v8, 4  ;;  %v5609_v18 = vld [vmem:[#allocation2 + $0x18] sm:$0xf0] }
  0xf1   : > { %v800_v43 = vor.u32 %v798_v23, %v797_v33  ;;  %v1380_v12 = vrot.slane %v1378_v36, 7  ;;  %v1664_v6 = vrot.slane %v1662_v46, 5  ;;  %v1675_v7 = vrot.slane %v1673_v50, 4  ;;  %v1891_v22 = vld [vmem:[#allocation2 + $0x24] sm:$0x8] }
  0xf2   : > { %v1153_v2 = vor.u32 %v1152_v59, %v1149_v39  ;;  %v4735_v14 = vrot.slane %v1373_v40, 11  ;;  %v4736_v11 = vrot.slane %v1386_v45, 11  ;;  %v1678_v10 = vrot.slane %v1676_v51, 5  ;;  %v1892_v25 = vld [vmem:[#allocation2 + $0x28] sm:$0xf] }
  0xf3   : > { %v801_v55 = vsel %vm6084_vm2, %v4584_v38, %v800_v43  ;;  %v1293_v61 = vld [vmem:[#allocation2 + $0x64] sm:$0xf]  ;;  %v1383_v63 = vor.u32 %v1381_v58, %v1380_v12  ;;  %v1682_v31 = vshll.u32 %v1645_v62, 16  ;;  %v1183_v35 = vunpack.c.l.b16 %v1145_v56  ;;  %v4803_v0 = vld [vmem:[#allocation2 + $0x10] sm:$0xf] }
  0xf4   : > { %v943_v52 = vunpack.c.l.b16 %v801_v55  ;;  %v1154_v3 = vrot.slane %v1153_v2, 4  ;;  %v1391_v30 = vshrl.u32 %v1293_v61, 16  ;;  %v1394_v20 = vshll.u32 %v1293_v61, 16  ;;  %v1889_v23 = vld [vmem:[#allocation2 + $0x18] sm:$0x8] }
  0xf5   : > { %v1665_v21 = vor.u32 %v1664_v6, %v1661_v13  ;;  %v1668_v4 = vshll.u32 %v1643_v54, 16  ;;  %v1679_v47 = vor.u32 %v1678_v10, %v1675_v7  ;;  %v1384_v27 = vsel %vm6084_vm2, %v4735_v14, %v1383_v63  ;;  %v1648_v12 = vld [vmem:[#allocation2 + $0x34] sm:$0xf]  ;;  %v1646_v51 = vld [vmem:[#allocation2 + $0x28] sm:$0xf]  ;;  %v5660_v13 = vld [vmem:[%s7049_s4 + $0x218] sm:$0xff] }
  0xf6   : > { %v947_v38 = vpack.c.b16 %v943_v52, %v942_v49  ;;  %v1159_v26 = vsel %vm6106_vm5, %v1154_v3, %v1158_v41  ;;  %v1393_v19 = vrot.slane %v1391_v30, 7  ;;  %v1911_v29 = vshrl.u32 %v1890_v17, 16  ;;  %2466 = vmatpush.bf16.msra.mxu2 %v5660_v13  ;;  %v5659_v63 = vld [vmem:[%s7049_s4 + $0x210] sm:$0xff]  ;;  %v1649_v10 = vld [vmem:[#allocation2 + $0x38] sm:$0x1] }
  0xf7   : > { %v1184_v8 = vunpack.c.l.b16 %v1159_v26  ;;  %v4804_v42 = vor.u32 %v5609_v18, %v4803_v0  ;;  %v1684_v33 = vrot.slane %v1682_v31, 5  ;;  %v1680_v36 = vrot.slane %v1679_v47, 4  ;;  %v1896_v31 = vld [vmem:[#allocation2 + $0x40] sm:$0xf]  ;;  %v1895_v0 = vld [vmem:[#allocation2 + $0x3c] sm:$0x8] }
  0xf8   : > { %1023 = vmatmul.bf16.gmra.mxu3 %v947_v38  ;;  %v1396_v28 = vor.u32 %v1394_v20, %v1393_v19  ;;  %v1919_v37 = vshrl.u32 %v1891_v22, 16  ;;  %v1924_v39 = vshrl.u32 %v1892_v25, 16  ;;  %v1421_v59 = vunpack.c.l.b16 %v1384_v27  ;;  %v5610_v27 = vld [vmem:[#allocation2 + $0x30] sm:$0xf0] }
  0xf9   : > { %v1188_v60 = vpack.c.b16 %v1184_v8, %v1183_v35  ;;  %v1666_v40 = vrot.slane %v1665_v21, 4  ;;  %v1670_v43 = vrot.slane %v1668_v4, 5  ;;  %v1906_v45 = vshrl.u32 %v1889_v23, 16  ;;  %v1647_v35 = vld [vmem:[#allocation2 + $0x2c] sm:$0x1] }
  0xfa   : > { %v1397_v34 = vsel %vm6084_vm2, %v4736_v11, %v1396_v28  ;;  %v1913_v46 = vrot.slane %v1911_v29, 7  ;;  %v1926_v48 = vrot.slane %v1924_v39, 7  ;;  %v1927_v49 = vshll.u32 %v1892_v25, 16  ;;  %2467 = vmatpush.bf16.msra.mxu2 %v5659_v63  ;;  %v1894_v21 = vld [vmem:[#allocation2 + $0x34] sm:$0xf]  ;;  %v5657_v63 = vld [vmem:[%s7049_s4 + $0x200] sm:$0xff] }
  0xfb   : > { %1264 = vmatmul.bf16.gmra.mxu0 %v1188_v60  ;;  %v1422_v41 = vunpack.c.l.b16 %v1397_v34  ;;  %v1914_v50 = vshll.u32 %v1890_v17, 16  ;;  %v1685_v55 = vsel %vm6106_vm5, %v1680_v36, %v1684_v33  ;;  %v4898_v56 = vrot.slane %v1919_v37, 11  ;;  %v4807_v33 = vld [vmem:[#allocation2 + $0x28] sm:$0xf]  ;;  %v1893_v34 = vld [vmem:[#allocation2 + $0x30] sm:$0x8] }
  0xfc   : > { %v1929_v58 = vor.u32 %v1927_v49, %v1926_v48  ;;  %v1701_v62 = vshrl.u32 %v1648_v12, 16  ;;  %v1671_v52 = vsel %vm6106_vm5, %v1666_v40, %v1670_v43  ;;  %v1704_v3 = vshll.u32 %v1648_v12, 16  ;;  %v5637_v23 = vld [vmem:[#allocation2 + $0x24] sm:$0xf0]  ;;  %v4971_v43 = vld [vmem:[#allocation2 + $0x1c] sm:$0xf] }
  0xfd   : > { %v1426_v2 = vpack.c.b16 %v1422_v41, %v1421_v59  ;;  %v4897_v61 = vrot.slane %v1906_v45, 11  ;;  %v1916_v6 = vor.u32 %v1914_v50, %v1913_v46  ;;  %v1687_v7 = vshrl.u32 %v1646_v51, 16  ;;  %v1652_v41 = vld [vmem:[#allocation2 + $0x4c] sm:$0xf] }
  0xfe   : > { %1613 = vmatmul.bf16.vlgmr.msrb.gmra.mxu2 %v4804_v42  ;;  %v1690_v14 = vshll.u32 %v1646_v51, 16  ;;  %v1788_v11 = vunpack.c.l.b16 %v1685_v55  ;;  %v1930_v30 = vsel %vm6084_vm2, %v4898_v56, %v1929_v58  ;;  %v1703_v54 = vrot.slane %v1701_v62, 4 }
  0xff   : > { %v1706_v38 = vrot.slane %v1704_v3, 5  ;;  %v1787_v26 = vunpack.c.l.b16 %v1671_v52  ;;  %v1917_v17 = vsel %vm6084_vm2, %v4897_v61, %v1916_v6  ;;  %v1689_v8 = vrot.slane %v1687_v7, 4  ;;  %v5658_v52 = vld [vmem:[%s7049_s4 + $0x208] sm:$0xff] }
 0x100   : > { %1502 = vmatmul.bf16.gmra.mxu1 %v1426_v2  ;;  %v1692_v18 = vrot.slane %v1690_v14, 5  ;;  %v2027_v20 = vunpack.c.l.b16 %v1930_v30  ;;  %v1710_v47 = vshll.u32 %v1649_v10, 16  ;;  %v1950_v22 = vshrl.u32 %v1896_v31, 16  ;;  %v1650_v2 = vld [vmem:[#allocation2 + $0x40] sm:$0xf]  ;;  %2468 = vmatpush.bf16.msra.mxu2 %v5658_v52 }
 0x101   : > { %v1795_v19 = vpack.c.b16 %v1788_v11, %v1787_v26  ;;  %v1707_v4 = vor.u32 %v1706_v38, %v1703_v54  ;;  %v2026_v25 = vunpack.c.l.b16 %v1917_v17  ;;  %v1696_v60 = vshll.u32 %v1647_v35, 16  ;;  %v1653_v30 = vld [vmem:[#allocation2 + $0x50] sm:$0x1]  ;;  %v1900_v10 = vld [vmem:[#allocation2 + $0x58] sm:$0xf] }
 0x102   : > { %v1693_v28 = vor.u32 %v1692_v18, %v1689_v8  ;;  %v1937_v29 = vshrl.u32 %v1894_v21, 16  ;;  %v1712_v37 = vrot.slane %v1710_v47, 5  ;;  %v1945_v39 = vshrl.u32 %v1895_v0, 16  ;;  %v1651_v18 = vld [vmem:[#allocation2 + $0x44] sm:$0x1] }
 0x103   : > { %v2034_v42 = vpack.c.b16 %v2027_v20, %v2026_v25  ;;  %v1708_v36 = vrot.slane %v1707_v4, 4  ;;  %v1952_v59 = vrot.slane %v1950_v22, 7  ;;  %v4808_v40 = vor.u32 %v5610_v27, %v4807_v33  ;;  %v1898_v20 = vld [vmem:[#allocation2 + $0x4c] sm:$0xf]  ;;  %v1899_v22 = vld [vmem:[#allocation2 + $0x54] sm:$0x8] }
 0x104   : > { %v1698_v12 = vrot.slane %v1696_v60, 5  ;;  %v1694_v45 = vrot.slane %v1693_v28, 4  ;;  %v1932_v46 = vshrl.u32 %v1893_v34, 16  ;;  %v1939_v48 = vrot.slane %v1937_v29, 7  ;;  %2469 = vmatpush.bf16.msra.mxu2 %v5657_v63  ;;  %v1897_v28 = vld [vmem:[#allocation2 + $0x48] sm:$0x8] }
 0x105   : > { %v1953_v49 = vshll.u32 %v1896_v31, 16  ;;  %v4972_v50 = vor.u32 %v5637_v23, %v4971_v43  ;;  %v1729_v51 = vshrl.u32 %v1652_v41, 16  ;;  %v1732_v55 = vshll.u32 %v1652_v41, 16  ;;  %v5611_v34 = vld [vmem:[#allocation2 + $0x48] sm:$0xf0] }
 0x106   : > { %v1713_v56 = vsel %vm6106_vm5, %v1708_v36, %v1712_v37  ;;  %v1940_v58 = vshll.u32 %v1894_v21, 16  ;;  %v4900_v62 = vrot.slane %v1945_v39, 11  ;;  %v1715_v3 = vshrl.u32 %v1650_v2, 16  ;;  %v4811_v43 = vld [vmem:[#allocation2 + $0x40] sm:$0xf] }
 0x107   : > { %v1955_v13 = vor.u32 %v1953_v49, %v1952_v59  ;;  %v1718_v61 = vshll.u32 %v1650_v2, 16  ;;  %v1699_v6 = vsel %vm6106_vm5, %v1694_v45, %v1698_v12  ;;  %v4899_v7 = vrot.slane %v1932_v46, 11  ;;  %v4975_v59 = vld [vmem:[#allocation2 + $0x34] sm:$0xf] }
 0x108   : > { %1859 = vmatmul.bf16.vlgmr.msrb.gmra.mxu3 %v1795_v19  ;;  %v1942_v14 = vor.u32 %v1940_v58, %v1939_v48  ;;  %v1790_v11 = vunpack.c.l.b16 %v1713_v56  ;;  %v1731_v54 = vrot.slane %v1729_v51, 4  ;;  %v1734_v38 = vrot.slane %v1732_v55, 5  ;;  %v1654_v55 = vld [vmem:[#allocation2 + $0x58] sm:$0xf] }
 0x109   : > { %v1956_v26 = vsel %vm6084_vm2, %v4900_v62, %v1955_v13  ;;  %v1789_v31 = vunpack.c.l.b16 %v1699_v6  ;;  %v1717_v17 = vrot.slane %v1715_v3, 4  ;;  %v1720_v35 = vrot.slane %v1718_v61, 5 }
 0x10a   : > { %v1943_v8 = vsel %vm6084_vm2, %v4899_v7, %v1942_v14  ;;  %v1738_v19 = vshll.u32 %v1653_v30, 16  ;;  %v2029_v4 = vunpack.c.l.b16 %v1956_v26  ;;  %v1735_v47 = vor.u32 %v1734_v38, %v1731_v54  ;;  %v1902_v26 = vld [vmem:[#allocation2 + $0x64] sm:$0xf] }
 0x10b   : > { %2098 = vmatmul.bf16.vlgmr.msra.gmra.mxu0 %v2034_v42  ;;  %v1796_v21 = vpack.c.b16 %v1790_v11, %v1789_v31  ;;  %v1976_v25 = vshrl.u32 %v1900_v10, 16  ;;  %v2028_v60 = vunpack.c.l.b16 %v1943_v8  ;;  %v1721_v0 = vor.u32 %v1720_v35, %v1717_v17  ;;  %v5638_v42 = vld [vmem:[#allocation2 + $0x3c] sm:$0xf0]  ;;  %v1657_v11 = vld [vmem:[#allocation2 + $0x68] sm:$0x1] }
 0x10c   : > { %v1724_v27 = vshll.u32 %v1651_v18, 16  ;;  %v1963_v29 = vshrl.u32 %v1898_v20, 16  ;;  %v1971_v33 = vshrl.u32 %v1899_v22, 16  ;;  %v1736_v36 = vrot.slane %v1735_v47, 4  ;;  %v1655_v17 = vld [vmem:[#allocation2 + $0x5c] sm:$0x1] }
 0x10d   : > { %v2035_v23 = vpack.c.b16 %v2029_v4, %v2028_v60  ;;  %v1740_v37 = vrot.slane %v1738_v19, 5  ;;  %v1978_v39 = vrot.slane %v1976_v25, 7  ;;  %v1958_v41 = vshrl.u32 %v1897_v28, 16  ;;  %v1904_v18 = vld [vmem:[#allocation2 + $0x70] sm:$0xf] }
 0x10e   : > { %1618 = vmatmul.bf16.gmra.mxu2 %v4808_v40  ;;  %v1656_v40 = vld [vmem:[#allocation2 + $0x64] sm:$0xf]  ;;  %v1722_v12 = vrot.slane %v1721_v0, 4  ;;  %v1726_v45 = vrot.slane %v1724_v27, 5  ;;  %v1965_v46 = vrot.slane %v1963_v29, 7  ;;  %v1979_v48 = vshll.u32 %v1900_v10, 16 }
 0x10f   : > { %v4812_v49 = vor.u32 %v5611_v34, %v4811_v43  ;;  %v4976_v2 = vor.u32 %v5638_v42, %v4975_v59  ;;  %v4902_v51 = vrot.slane %v1971_v33, 11  ;;  %v1741_v56 = vsel %vm6106_vm5, %v1736_v36, %v1740_v37  ;;  %v2255_v10 = vld [vmem:[#allocation2 + $0x28] sm:$0xf]  ;;  %v2253_v4 = vld [vmem:[#allocation2 + $0x1c] sm:$0xf] }
 0x110   : > { %2224 = vmatmul.bf16.vlgmr.msra.gmra.mxu1 %v4972_v50  ;;  %v1966_v50 = vshll.u32 %v1898_v20, 16  ;;  %v1981_v58 = vor.u32 %v1979_v48, %v1978_v39  ;;  %v1757_v62 = vshrl.u32 %v1656_v40, 16  ;;  %v1760_v13 = vshll.u32 %v1656_v40, 16  ;;  %v1901_v22 = vld [vmem:[#allocation2 + $0x60] sm:$0x8] }
 0x111   : > { %v4901_v52 = vrot.slane %v1958_v41, 11  ;;  %v1727_v3 = vsel %vm6106_vm5, %v1722_v12, %v1726_v45  ;;  %v1743_v6 = vshrl.u32 %v1654_v55, 16  ;;  %v1746_v7 = vshll.u32 %v1654_v55, 16  ;;  %v1903_v33 = vld [vmem:[#allocation2 + $0x6c] sm:$0x8] }
 0x112   : > { %v1968_v61 = vor.u32 %v1966_v50, %v1965_v46  ;;  %v1792_v14 = vunpack.c.l.b16 %v1741_v56  ;;  %v1982_v63 = vsel %vm6084_vm2, %v4902_v51, %v1981_v58  ;;  %v1759_v30 = vrot.slane %v1757_v62, 4  ;;  %v5639_v37 = vld [vmem:[#allocation2 + $0x54] sm:$0xf0]  ;;  %v2256_v41 = vld [vmem:[#allocation2 + $0x2c] sm:$0x1] }
 0x113   : > { %v1762_v54 = vrot.slane %v1760_v13, 5  ;;  %v1791_v38 = vunpack.c.l.b16 %v1727_v3  ;;  %v1745_v35 = vrot.slane %v1743_v6, 4  ;;  %v1748_v8 = vrot.slane %v1746_v7, 5  ;;  %v5612_v40 = vld [vmem:[#allocation2 + $0x60] sm:$0xf0] }
 0x114   : > { %v1969_v31 = vsel %vm6084_vm2, %v4901_v52, %v1968_v61  ;;  %v2031_v20 = vunpack.c.l.b16 %v1982_v63  ;;  %v1989_v25 = vshrl.u32 %v1902_v26, 16  ;;  %v2284_v60 = vshrl.u32 %v2255_v10, 16  ;;  %v4979_v48 = vld [vmem:[#allocation2 + $0x4c] sm:$0xf]  ;;  %v4815_v55 = vld [vmem:[#allocation2 + $0x58] sm:$0xf] }
 0x115   : > { %v1797_v19 = vpack.c.b16 %v1792_v14, %v1791_v38  ;;  %v1763_v47 = vor.u32 %v1762_v54, %v1759_v30  ;;  %v2287_v0 = vshll.u32 %v2255_v10, 16  ;;  %v2030_v27 = vunpack.c.l.b16 %v1969_v31  ;;  %v2254_v6 = vld [vmem:[#allocation2 + $0x20] sm:$0x1] }
 0x116   : > { %v1752_v28 = vshll.u32 %v1655_v17, 16  ;;  %v2002_v29 = vshrl.u32 %v1904_v18, 16  ;;  %v1749_v42 = vor.u32 %v1748_v8, %v1745_v35  ;;  %v2273_v34 = vshll.u32 %v2253_v4, 16 }
 0x117   : > { %v2036_v36 = vpack.c.b16 %v2031_v20, %v2030_v27  ;;  %v1984_v59 = vshrl.u32 %v1901_v22, 16  ;;  %v1764_v43 = vrot.slane %v1763_v47, 4  ;;  %v1991_v12 = vrot.slane %v1989_v25, 7  ;;  %v2259_v20 = vld [vmem:[#allocation2 + $0x40] sm:$0xf] }
 0x118   : > { %1864 = vmatmul.bf16.gmra.mxu3 %v1796_v21  ;;  %v1766_v21 = vshll.u32 %v1657_v11, 16  ;;  %v2286_v45 = vrot.slane %v2284_v60, 4  ;;  %v2289_v46 = vrot.slane %v2287_v0, 5  ;;  %v2004_v50 = vrot.slane %v2002_v29, 7  ;;  %v2257_v25 = vld [vmem:[#allocation2 + $0x34] sm:$0xf] }
 0x119   : > { %v2005_v51 = vshll.u32 %v1904_v18, 16  ;;  %v1750_v56 = vrot.slane %v1749_v42, 4  ;;  %v1992_v58 = vshll.u32 %v1902_v26, 16  ;;  %v2275_v13 = vrot.slane %v2273_v34, 5 }
 0x11a   : > { %v1768_v39 = vrot.slane %v1766_v21, 5  ;;  %v4816_v52 = vor.u32 %v5612_v40, %v4815_v55  ;;  %v4980_v3 = vor.u32 %v5639_v37, %v4979_v48  ;;  %v4903_v61 = vrot.slane %v1984_v59, 11  ;;  %v4983_v59 = vld [vmem:[#allocation2 + $0x64] sm:$0xf] }
 0x11b   : > { %2103 = vmatmul.bf16.gmra.mxu0 %v2035_v23  ;;  %v2270_v23 = vshrl.u32 %v2253_v4, 16  ;;  %v1994_v14 = vor.u32 %v1992_v58, %v1991_v12  ;;  %v2290_v63 = vor.u32 %v2289_v46, %v2286_v45  ;;  %v2293_v11 = vshll.u32 %v2256_v41, 16  ;;  %v5640_v41 = vld [vmem:[#allocation2 + $0x6c] sm:$0xf0]  ;;  %v2260_v40 = vld [vmem:[#allocation2 + $0x44] sm:$0x1] }
 0x11c   : > { %v1769_v7 = vsel %vm6106_vm5, %v1764_v43, %v1768_v39  ;;  %v2007_v54 = vor.u32 %v2005_v51, %v2004_v50  ;;  %v2279_v10 = vshll.u32 %v2254_v6, 16  ;;  %v2312_v27 = vshrl.u32 %v2259_v20, 16  ;;  %v2258_v46 = vld [vmem:[#allocation2 + $0x38] sm:$0x1] }
 0x11d   : > { %v2272_v62 = vrot.slane %v2270_v23, 4  ;;  %v1794_v31 = vunpack.c.l.b16 %v1769_v7  ;;  %v1995_v17 = vsel %vm6084_vm2, %v4903_v61, %v1994_v14  ;;  %v2291_v35 = vrot.slane %v2290_v63, 4 }
 0x11e   : > { %1623 = vmatmul.bf16.gmra.mxu2 %v4812_v49  ;;  %v1754_v49 = vrot.slane %v1752_v28, 5  ;;  %v2295_v8 = vrot.slane %v2293_v11, 5  ;;  %v2281_v4 = vrot.slane %v2279_v10, 5  ;;  %v2032_v22 = vunpack.c.l.b16 %v1995_v17 }
 0x11f   : > { %v2276_v26 = vor.u32 %v2275_v13, %v2272_v62  ;;  %v2315_v28 = vshll.u32 %v2259_v20, 16  ;;  %v2298_v42 = vshrl.u32 %v2257_v25, 16  ;;  %v4984_v48 = vor.u32 %v5640_v41, %v4983_v59  ;;  %v2263_v62 = vld [vmem:[#allocation2 + $0x58] sm:$0xf]  ;;  %v2262_v20 = vld [vmem:[#allocation2 + $0x50] sm:$0x1] }
 0x120   : > { %2229 = vmatmul.bf16.gmra.mxu1 %v4976_v2  ;;  %v1997_v2 = vshrl.u32 %v1903_v33, 16  ;;  %v1755_v38 = vsel %vm6106_vm5, %v1750_v56, %v1754_v49  ;;  %v2296_v0 = vsel %vm6106_vm5, %v2291_v35, %v2295_v8  ;;  %v2301_v33 = vshll.u32 %v2257_v25, 16  ;;  %v2264_v35 = vld [vmem:[#allocation2 + $0x5c] sm:$0x1] }
 0x121   : > { %v1793_v18 = vunpack.c.l.b16 %v1755_v38  ;;  %v2277_v21 = vrot.slane %v2276_v26, 4  ;;  %v2399_v23 = vunpack.c.l.b16 %v2296_v0  ;;  %v2317_v37 = vrot.slane %v2315_v28, 5 }
 0x122   : > { %v4904_v30 = vrot.slane %v1997_v2, 11  ;;  %v2300_v43 = vrot.slane %v2298_v42, 4  ;;  %v2303_v12 = vrot.slane %v2301_v33, 5  ;;  %v2321_v2 = vshll.u32 %v2260_v40, 16  ;;  %v2267_v33 = vld [vmem:[#allocation2 + $0x70] sm:$0xf] }
 0x123   : > { %v1798_v47 = vpack.c.b16 %v1794_v31, %v1793_v18  ;;  %v2282_v29 = vsel %vm6106_vm5, %v2277_v21, %v2281_v4  ;;  %v2307_v51 = vshll.u32 %v2258_v46, 16  ;;  %v2340_v6 = vshrl.u32 %v2263_v62, 16 }
 0x124   : > { %v2398_v39 = vunpack.c.l.b16 %v2282_v29  ;;  %v2304_v50 = vor.u32 %v2303_v12, %v2300_v43  ;;  %v2323_v58 = vrot.slane %v2321_v2, 5  ;;  %v2343_v7 = vshll.u32 %v2263_v62, 16  ;;  %v2265_v29 = vld [vmem:[#allocation2 + $0x64] sm:$0xf]  ;;  %v2268_v62 = vld [vmem:[#allocation2 + $0x74] sm:$0x1] }
 0x125   : > { %v2342_v26 = vrot.slane %v2340_v6, 4  ;;  %v2349_v4 = vshll.u32 %v2264_v35, 16  ;;  %v2335_v25 = vshll.u32 %v2262_v20, 16  ;;  %v2368_v59 = vshrl.u32 %v2267_v33, 16 }
 0x126   : > { %v2406_v45 = vpack.c.b16 %v2399_v23, %v2398_v39  ;;  %v2305_v13 = vrot.slane %v2304_v50, 4  ;;  %v2345_v10 = vrot.slane %v2343_v7, 5  ;;  %v2357_v39 = vshll.u32 %v2265_v29, 16 }
 0x127   : > { %v2351_v28 = vrot.slane %v2349_v4, 5  ;;  %v2371_v41 = vshll.u32 %v2267_v33, 16  ;;  %v2377_v6 = vshll.u32 %v2268_v62, 16 }
 0x128   : > { %1869 = vmatmul.bf16.gmra.mxu3 %v1797_v19  ;;  %v2008_v19 = vsel %vm6084_vm2, %v4904_v30, %v2007_v54  ;;  %v2346_v21 = vor.u32 %v2345_v10, %v2342_v26 }
 0x129   : > { %v2033_v60 = vunpack.c.l.b16 %v2008_v19  ;;  %v2373_v2 = vrot.slane %v2371_v41, 5 }
 0x12b   : > { %2108 = vmatmul.bf16.gmra.mxu0 %v2036_v36  ;;  %v2037_v34 = vpack.c.b16 %v2033_v60, %v2032_v22  ;;  %v2314_v36 = vrot.slane %v2312_v27, 4  ;;  %v2347_v27 = vrot.slane %v2346_v21, 4 }
 0x12d   : > { %v2318_v49 = vor.u32 %v2317_v37, %v2314_v36  ;;  %v2354_v36 = vshrl.u32 %v2265_v29, 16  ;;  %v2352_v37 = vsel %vm6106_vm5, %v2347_v27, %v2351_v28 }
 0x12e   : > { %1628 = vmatmul.bf16.gmra.mxu2 %v4816_v52  ;;  %v2309_v52 = vrot.slane %v2307_v51, 5  ;;  %v2403_v43 = vunpack.c.l.b16 %v2352_v37  ;;  %v5683_v37 = vld [vmem:[%s7052_s7 + $0x70] sm:$0xff] }
 0x12f   : > { %v2319_v56 = vrot.slane %v2318_v49, 4  ;;  %v2356_v46 = vrot.slane %v2354_v36, 4  ;;  %v2370_v49 = vrot.slane %v2368_v59, 4 }
 0x130   : > { %2234 = vmatmul.bf16.gmra.mxu1 %v4980_v3  ;;  %v2261_v3 = vld [vmem:[#allocation2 + $0x4c] sm:$0xf]  ;;  %v2310_v63 = vsel %vm6106_vm5, %v2305_v13, %v2309_v52 }
 0x131   : > { %v2324_v61 = vsel %vm6106_vm5, %v2319_v56, %v2323_v58  ;;  %v2326_v11 = vshrl.u32 %v2261_v3, 16  ;;  %v2329_v30 = vshll.u32 %v2261_v3, 16  ;;  %v2400_v17 = vunpack.c.l.b16 %v2310_v63  ;;  %v2266_v58 = vld [vmem:[#allocation2 + $0x68] sm:$0x1] }
 0x132   : > { %v2401_v54 = vunpack.c.l.b16 %v2324_v61  ;;  %v2363_v3 = vshll.u32 %v2266_v58, 16  ;;  %v2374_v61 = vor.u32 %v2373_v2, %v2370_v49 }
 0x133   : > { %v2328_v8 = vrot.slane %v2326_v11, 4  ;;  %v2331_v18 = vrot.slane %v2329_v30, 5 }
 0x134   : > { %v2407_v19 = vpack.c.b16 %v2401_v54, %v2400_v17  ;;  %v2365_v11 = vrot.slane %v2363_v3, 5  ;;  %v2375_v30 = vrot.slane %v2374_v61, 4  ;;  %v2379_v54 = vrot.slane %v2377_v6, 5 }
 0x135   : > { %v2332_v22 = vor.u32 %v2331_v18, %v2328_v8 }
 0x136   : > { %v2380_v8 = vsel %vm6106_vm5, %v2375_v30, %v2379_v54  ;;  %v5676_v30 = vld [vmem:[%s7052_s7 + $0x38] sm:$0xff] }
 0x137   : > { %v2333_v23 = vrot.slane %v2332_v22, 4  ;;  %2865 = vmatpush.bf16.msrb.mxu0 %v5676_v30 }
 0x138   : > { %1874 = vmatmul.bf16.gmra.mxu3 %v1798_v47 }
 0x13b   : > { %2113 = vmatmul.bf16.gmra.mxu0 %v2037_v34  ;;  %v2337_v34 = vrot.slane %v2335_v25, 5 }
 0x13d   : > { %v2338_v40 = vsel %vm6106_vm5, %v2333_v23, %v2337_v34  ;;  %v5684_v23 = vld [vmem:[%s7052_s7 + $0x78] sm:$0xff] }
 0x13e   : > { %2470 = vmatmul.bf16.vlgmr.msra.gmra.mxu2 %v2406_v45  ;;  %v2402_v56 = vunpack.c.l.b16 %v2338_v40  ;;  %2772 = vmatpush.bf16.msra.mxu3 %v5684_v23  ;;  %v5692_v23 = vld [vmem:[%s7052_s7 + $0xb8] sm:$0xff] }
 0x13f   : > { %3103 = vmatpush.bf16.msrb.mxu1 %v5692_v23 }
 0x140   : > { %2239 = vmatmul.bf16.gmra.mxu1 %v4984_v48  ;;  %v2359_v48 = vrot.slane %v2357_v39, 5  ;;  %v2408_v13 = vpack.c.b16 %v2403_v43, %v2402_v56  ;;  %v5682_v43 = vld [vmem:[%s7052_s7 + $0x68] sm:$0xff]  ;;  %v5681_v56 = vld [vmem:[%s7052_s7 + $0x60] sm:$0xff] }
 0x141   : > { %v6404_v55 = vpop.f32.mrf.mxu2 }
 0x142   : > { %v2360_v52 = vor.u32 %v2359_v48, %v2356_v46  ;;  %2773 = vmatpush.bf16.msra.mxu3 %v5683_v37  ;;  %v5675_v37 = vld [vmem:[%s7052_s7 + $0x30] sm:$0xff] }
 0x143   : > { %2866 = vmatpush.bf16.msrb.mxu0 %v5675_v37 }
 0x144   : > { %v2361_v63 = vrot.slane %v2360_v52, 4  ;;  %v5680_v52 = vld [vmem:[%s7052_s7 + $0x58] sm:$0xff] }
 0x146   : > { %v2366_v35 = vsel %vm6106_vm5, %v2361_v63, %v2365_v11  ;;  %2774 = vmatpush.bf16.msra.mxu3 %v5682_v43  ;;  %v5679_v11 = vld [vmem:[%s7052_s7 + $0x50] sm:$0xff]  ;;  %v5678_v43 = vld [vmem:[%s7052_s7 + $0x48] sm:$0xff] }
 0x147   : > { %v2404_v18 = vunpack.c.l.b16 %v2366_v35 }
 0x148   : > { %v6408_v14 = vpop.f32.mrf.mxu0 }
 0x149   : > { %v6412_v38 = vpop.f32.mrf.mxu2 }
 0x14a   : > { %2775 = vmatpush.bf16.msra.mxu3 %v5681_v56  ;;  %v5704_v56 = vld [vmem:[%s7052_s7 + $0xf8] sm:$0xff] }
 0x14b   : > { %v6414_v31 = vpop.f32.mrf.mxu3  ;;  %3341 = vmatpush.bf16.msrb.mxu2 %v5704_v56  ;;  %v5672_v56 = vld [vmem:[%s7052_s7 + $0x18] sm:$0xff] }
 0x14c   : > { %v6416_v47 = vpop.f32.mrf.mxu1 }
 0x14e   : > { %2475 = vmatmul.bf16.gmra.mxu2 %v2407_v19  ;;  %v2405_v19 = vunpack.c.l.b16 %v2380_v8  ;;  %2776 = vmatpush.bf16.msra.mxu3 %v5680_v52 }
 0x150   : > { %v6418_v60 = vpop.f32.mrf.mxu0  ;;  %v2409_v4 = vpack.c.b16 %v2405_v19, %v2404_v18 }
 0x151   : > { %v6420_v0 = vpop.f32.mrf.mxu2 }
 0x152   : > { %2777 = vmatpush.bf16.msra.mxu3 %v5679_v11 }
 0x153   : > { %v6422_v42 = vpop.f32.mrf.mxu3 }
 0x154   : > { %v6428_v12 = vpop.f32.mrf.mxu1  ;;  %v1012_v23 = vadd.f32 %v6422_v42, %v6412_v38  ;;  %v5677_v38 = vld [vmem:[%s7052_s7 + $0x40] sm:$0xff] }
 0x155   : > { %v5689_v42 = vld [vmem:[%s7052_s7 + $0xa0] sm:$0xff] }
 0x156   : > { %2778 = vmatpush.bf16.msra.mxu3 %v5678_v43  ;;  %v5690_v43 = vld [vmem:[%s7052_s7 + $0xa8] sm:$0xff] }
 0x158   : > { %v6432_v50 = vpop.f32.mrf.mxu0 }
 0x159   : > { %v6430_v45 = vpop.f32.mrf.mxu2 }
 0x15a   : > { %2779 = vmatpush.bf16.msra.mxu3 %v5677_v38  ;;  %v5671_v38 = vld [vmem:[%s7052_s7 + $0x10] sm:$0xff] }
 0x15b   : > { %v6434_v51 = vpop.f32.mrf.mxu3 }
 0x15d   : > { %v6440_v10 = vpop.f32.mrf.mxu1 }
 0x15e   : > { %2480 = vmatmul.bf16.gmra.mxu2 %v2408_v13 }
 0x160   : > { %v6442_v17 = vpop.f32.mrf.mxu0 }
 0x161   : > { %v6436_v7 = vpop.f32.mrf.mxu2 }
 0x163   : > { %v6438_v26 = vpop.f32.mrf.mxu3 }
 0x165   : > { %v6452_v22 = vpop.f32.mrf.mxu1 }
 0x168   : > { %v6454_v25 = vpop.f32.mrf.mxu0 }
 0x169   : > { %v6448_v20 = vpop.f32.mrf.mxu2 }
 0x16b   : > { %v6450_v21 = vpop.f32.mrf.mxu3 }
 0x16d   : > { %v6460_v29 = vpop.f32.mrf.mxu1 }
 0x16e   : > { %2485 = vmatmul.bf16.gmra.mxu2 %v2409_v4  ;;  %v1010_v4 = vadd.f32 %v6414_v31, %v6404_v55  ;;  %v5691_v55 = vld [vmem:[%s7052_s7 + $0xb0] sm:$0xff]  ;;  %v5674_v31 = vld [vmem:[%s7052_s7 + $0x28] sm:$0xff] }
 0x16f   : > { %3104 = vmatpush.bf16.msrb.mxu1 %v5691_v55  ;;  %2867 = vmatpush.bf16.msrb.mxu0 %v5674_v31  ;;  %v1271_v55 = vadd.f32 %v6418_v60, %v1012_v23  ;;  %v5702_v31 = vld [vmem:[%s7052_s7 + $0xe8] sm:$0xff]  ;;  %v1017_v60 = vadd.f32 %v6438_v26, %v6430_v45  ;;  %v1020_v23 = vadd.f32 %v6450_v21, %v6436_v7  ;;  %v5687_v21 = vld [vmem:[%s7052_s7 + $0x90] sm:$0xff] }
 0x170   : > { %v6462_v33 = vpop.f32.mrf.mxu0  ;;  %v1270_v11 = vadd.f32 %v6408_v14, %v1010_v4  ;;  %v5673_v14 = vld [vmem:[%s7052_s7 + $0x20] sm:$0xff]  ;;  %v5703_v4 = vld [vmem:[%s7052_s7 + $0xf0] sm:$0xff] }
 0x171   : > { %v6456_v27 = vpop.f32.mrf.mxu2  ;;  %3342 = vmatpush.bf16.msrb.mxu2 %v5703_v4 }
 0x172   : > { %v1508_v37 = vadd.f32 %v6416_v47, %v1270_v11 }
 0x173   : > { %v6458_v28 = vpop.f32.mrf.mxu3  ;;  %3105 = vmatpush.bf16.msrb.mxu1 %v5690_v43  ;;  %2868 = vmatpush.bf16.msrb.mxu0 %v5673_v14  ;;  %v1509_v43 = vadd.f32 %v6428_v12, %v1271_v55  ;;  %v1015_v14 = vadd.f32 %v6434_v51, %v6420_v0  ;;  %v5701_v0 = vld [vmem:[%s7052_s7 + $0xe0] sm:$0xff]  ;;  %v5712_v51 = vld [vmem:[%s7052_s7 + $0x138] sm:$0xff] }
 0x174   : > { %v1022_v12 = vadd.f32 %v6458_v28, %v6448_v20  ;;  %v5670_v20 = vld [vmem:[%s7052_s7 + $0x8] sm:$0xff]  ;;  %3467 = vmatpush.bf16.msrb.mxu3 %v5712_v51 }
 0x175   : > { %v6474_v59 = vpop.f32.mrf.mxu1  ;;  %3343 = vmatpush.bf16.msrb.mxu2 %v5702_v31  ;;  %v1272_v28 = vadd.f32 %v6432_v50, %v1015_v14  ;;  %v5686_v14 = vld [vmem:[%s7052_s7 + $0x88] sm:$0xff] }
 0x176   : > { %v1275_v55 = vadd.f32 %v6462_v33, %v1022_v12  ;;  %v6634_v33 = vld [vmem:[%s7051_s6] ss:$0 sm:$0xff] }
 0x177   : > { %3106 = vmatpush.bf16.msrb.mxu1 %v5689_v42  ;;  %2869 = vmatpush.bf16.msrb.mxu0 %v5672_v56  ;;  %v1274_v42 = vadd.f32 %v6454_v25, %v1020_v23 }
 0x178   : > { %v6476_v41 = vpop.f32.mrf.mxu0 }
 0x179   : > { %v6467_v34 = vpop.f32.mrf.mxu2  ;;  %3344 = vmatpush.bf16.msrb.mxu2 %v5701_v0 }
 0x17b   : > { %v6469_v36 = vpop.f32.mrf.mxu3  ;;  %2870 = vmatpush.bf16.msrb.mxu0 %v5671_v38 }
 0x17c   : > { %v1025_v31 = vadd.f32 %v6469_v36, %v6456_v27  ;;  %v1512_v36 = vadd.f32 %v6460_v29, %v1274_v42 }
 0x17d   : > { %v6485_v48 = vpop.f32.mrf.mxu1 }
 0x17e   : > { %v1276_v23 = vadd.f32 %v6476_v41, %v1025_v31 }
 0x17f   : > { %2871 = vmatpush.bf16.msrb.mxu0 %v5670_v20 }
 0x180   : > { %v6487_v49 = vpop.f32.mrf.mxu0  ;;  %v1514_v31 = vadd.f32 %v6485_v48, %v1276_v23  ;;  %v2897_v23 = vld [vmem:[#allocation2 + $0x14] sm:$0x1] }
 0x181   : > { %v1614_v39 = vpop.f32.mrf.mxu2 }
 0x182   : > { %v1634_v47 = vadd.f32 %v1614_v39, %v1508_v37 }
 0x183   : > { %v6478_v40 = vpop.f32.mrf.mxu3 }
 0x185   : > { %v6494_v62 = vpop.f32.mrf.mxu1 }
 0x188   : > { %v2099_v13 = vpop.f32.mrf.mxu0 }
 0x189   : > { %v6483_v46 = vpop.f32.mrf.mxu2 }
 0x18a   : > { %v1635_v45 = vadd.f32 %v6483_v46, %v1509_v43  ;;  %v6627_v43 = vld [vmem:[%s7050_s5] ss:$0 sm:$0xff] }
 0x18b   : > { %v1860_v2 = vpop.f32.mrf.mxu3 }
 0x18c   : > { %v1880_v11 = vadd.f32 %v1860_v2, %v1634_v47  ;;  %v5688_v2 = vld [vmem:[%s7052_s7 + $0x98] sm:$0xff]  ;;  %v1273_v47 = vadd.f32 %v6442_v17, %v1017_v60  ;;  %v1510_v17 = vadd.f32 %v6440_v10, %v1272_v28  ;;  %v5669_v10 = vld [vmem:[%s7052_s7] sm:$0xff]  ;;  %v1513_v60 = vadd.f32 %v6474_v59, %v1275_v55  ;;  %v2549_v55 = vld [vmem:[#allocation2 + $0xc] sm:$0x8] }
 0x18d   : > { %v6503_v6 = vpop.f32.mrf.mxu1  ;;  %3107 = vmatpush.bf16.msrb.mxu1 %v5688_v2  ;;  %v2547_v2 = vld [vmem:[#allocation2] sm:$0x8]  ;;  %2872 = vmatpush.bf16.msrb.mxu0 %v5669_v10 }
 0x18e   : > { %v2119_v4 = vadd.f32 %v2099_v13, %v1880_v11  ;;  %v5700_v13 = vld [vmem:[%s7052_s7 + $0xd8] sm:$0xff]  ;;  %v1511_v27 = vadd.f32 %v6452_v22, %v1273_v47  ;;  %v1027_v22 = vadd.f32 %v6478_v40, %v6467_v34  ;;  %v5685_v59 = vld [vmem:[%s7052_s7 + $0x80] sm:$0xff] }
 0x18f   : > { %3345 = vmatpush.bf16.msrb.mxu2 %v5700_v13  ;;  %v2548_v34 = vld [vmem:[#allocation2 + $0x4] sm:$0xf] }
 0x190   : > { %v6505_v63 = vpop.f32.mrf.mxu0  ;;  %v2245_v56 = vadd.f32 %v6503_v6, %v2119_v4  ;;  %v5711_v4 = vld [vmem:[%s7052_s7 + $0x130] sm:$0xff]  ;;  %v1277_v47 = vadd.f32 %v6487_v49, %v1027_v22  ;;  %v2894_v49 = vld [vmem:[#allocation2 + $0x4] sm:$0xf] }
 0x191   : > { %v6492_v58 = vpop.f32.mrf.mxu2  ;;  %3108 = vmatpush.bf16.msrb.mxu1 %v5687_v21  ;;  %3468 = vmatpush.bf16.msrb.mxu3 %v5711_v4  ;;  %v3140_v4 = vld [vmem:[#allocation2 + $0xc] sm:$0x8] }
 0x192   : > { %v1636_v29 = vadd.f32 %v6492_v58, %v1510_v17  ;;  %v2564_v58 = vshrl.u32 %v2547_v2, 16  ;;  %v1515_v10 = vadd.f32 %v6494_v62, %v1277_v47 }
 0x193   : > { %v6501_v61 = vpop.f32.mrf.mxu3 }
 0x194   : > { %v1881_v46 = vadd.f32 %v6501_v61, %v1635_v45  ;;  %v2569_v45 = vshrl.u32 %v2548_v34, 16 }
 0x195   : > { %v6519_v18 = vpop.f32.mrf.mxu1  ;;  %3109 = vmatpush.bf16.msrb.mxu1 %v5686_v14  ;;  %v2914_v14 = vshll.u32 %v2894_v49, 16 }
 0x196   : > { %v2120_v25 = vadd.f32 %v6505_v63, %v1881_v46  ;;  %v5699_v63 = vld [vmem:[%s7052_s7 + $0xd0] sm:$0xff]  ;;  %v2572_v46 = vshll.u32 %v2548_v34, 16  ;;  %v2571_v13 = vrot.slane %v2569_v45, 7  ;;  %v5091_v34 = vld [vmem:[#allocation2 + $0x4] sm:$0xf] }
 0x197   : > { %3346 = vmatpush.bf16.msrb.mxu2 %v5699_v63 }
 0x198   : > { %v6521_v19 = vpop.f32.mrf.mxu0  ;;  %v2246_v41 = vadd.f32 %v6519_v18, %v2120_v25 }
 0x199   : > { %v6499_v3 = vpop.f32.mrf.mxu2  ;;  %3110 = vmatpush.bf16.msrb.mxu1 %v5685_v59 }
 0x19a   : > { %v1637_v38 = vadd.f32 %v6499_v3, %v1511_v27  ;;  %v5698_v3 = vld [vmem:[%s7052_s7 + $0xc8] sm:$0xff]  ;;  %v2574_v27 = vor.u32 %v2572_v46, %v2571_v13 }
 0x19b   : > { %v6515_v35 = vpop.f32.mrf.mxu3  ;;  %3347 = vmatpush.bf16.msrb.mxu2 %v5698_v3 }
 0x19c   : > { %v1882_v40 = vadd.f32 %v6515_v35, %v1636_v29  ;;  %v2916_v29 = vrot.slane %v2914_v14, 5 }
 0x19d   : > { %v6551_v57 = vpop.f32.mrf.mxu1 }
 0x1a0   : > { %v6553_v1 = vpop.f32.mrf.mxu0 }
 0x1a1   : > { %v6513_v54 = vpop.f32.mrf.mxu2 }
 0x1a2   : > { %v1638_v0 = vadd.f32 %v6513_v54, %v1512_v36  ;;  %v5697_v36 = vld [vmem:[%s7052_s7 + $0xc0] sm:$0xff] }
 0x1a3   : > { %v6537_v52 = vpop.f32.mrf.mxu3  ;;  %3348 = vmatpush.bf16.msrb.mxu2 %v5697_v36 }
 0x1a4   : > { %v1883_v54 = vadd.f32 %v6537_v52, %v1637_v38  ;;  %v2121_v52 = vadd.f32 %v6521_v19, %v1882_v40  ;;  %v2895_v19 = vld [vmem:[#allocation2 + $0x8] sm:$0x1] }
 0x1a5   : > { %v6603_v7 = vpop.f32.mrf.mxu1  ;;  %v2920_v38 = vshll.u32 %v2895_v19, 16 }
 0x1a8   : > { %v6605_v26 = vpop.f32.mrf.mxu0 }
 0x1a9   : > { %v6517_v8 = vpop.f32.mrf.mxu2 }
 0x1aa   : > { %v1639_v18 = vadd.f32 %v6517_v8, %v1513_v60 }
 0x1ab   : > { %v6577_v39 = vpop.f32.mrf.mxu3 }
 0x1ac   : > { %v1884_v51 = vadd.f32 %v6577_v39, %v1638_v0 }
 0x1ad   : > { %v2235_v21 = vpop.f32.mrf.mxu1 }
 0x1ae   : > { %v2123_v17 = vadd.f32 %v6605_v26, %v1884_v51  ;;  %v5710_v26 = vld [vmem:[%s7052_s7 + $0x128] sm:$0xff]  ;;  %v3142_v51 = vld [vmem:[#allocation2 + $0x18] sm:$0x8] }
 0x1af   : > { %3469 = vmatpush.bf16.msrb.mxu3 %v5710_v26  ;;  %v2553_v26 = vld [vmem:[#allocation2 + $0x24] sm:$0x8] }
 0x1b0   : > { %v2111_v20 = vpop.f32.mrf.mxu0 }
 0x1b1   : > { %v6546_v30 = vpop.f32.mrf.mxu2 }
 0x1b2   : > { %v1640_v48 = vadd.f32 %v6546_v30, %v1514_v31  ;;  %v2247_v30 = vadd.f32 %v6551_v57, %v2121_v52  ;;  %v2934_v57 = vshll.u32 %v2897_v23, 16  ;;  %v5709_v31 = vld [vmem:[%s7052_s7 + $0x120] sm:$0xff] }
 0x1b3   : > { %v1872_v11 = vpop.f32.mrf.mxu3  ;;  %3470 = vmatpush.bf16.msrb.mxu3 %v5709_v31 }
 0x1b4   : > { %v1885_v39 = vadd.f32 %v1872_v11, %v1639_v18  ;;  %v2911_v11 = vshrl.u32 %v2894_v49, 16  ;;  %v2551_v49 = vld [vmem:[#allocation2 + $0x18] sm:$0x8] }
 0x1b5   : > { %v2590_v19 = vshrl.u32 %v2551_v49, 16 }
 0x1b6   : > { %v2124_v63 = vadd.f32 %v2111_v20, %v1885_v39  ;;  %v2913_v22 = vrot.slane %v2911_v11, 4  ;;  %v3157_v20 = vshrl.u32 %v3140_v4, 16 }
 0x1b8   : > { %v2917_v40 = vor.u32 %v2916_v29, %v2913_v22  ;;  %v2114_v45 = vpop.f32.mrf.mxu0  ;;  %v5217_v22 = vrot.slane %v3157_v20, 11 }
 0x1b9   : > { %v6579_v37 = vpop.f32.mrf.mxu2 }
 0x1ba   : > { %v6694_v46 = vadd.f32 %v6579_v37, %v1515_v10  ;;  %v2918_v52 = vrot.slane %v2917_v40, 4  ;;  %v3170_v37 = vshrl.u32 %v3142_v51, 16  ;;  %v6705_v40 = vrot.slane %v2590_v19, 11 }
 0x1bb   : > { %v1875_v8 = vpop.f32.mrf.mxu3 }
 0x1bc   : > { %v1886_v60 = vadd.f32 %v1875_v8, %v1640_v48  ;;  %v5218_v29 = vrot.slane %v3170_v37, 11 }
 0x1be   : > { %v2125_v18 = vadd.f32 %v2114_v45, %v1886_v60 }
 0x1c1   : > { %v2471_v50 = vpop.f32.mrf.mxu2 }
 0x1c2   : > { %v2491_v61 = vadd.f32 %v2471_v50, %v2245_v56  ;;  %v5065_v50 = vrot.slane %v2564_v58, 11  ;;  %v2237_v58 = vpop.f32.mrf.mxu1 }
 0x1c4   : > { %v2499_v6 = vmax.f32 %v2491_v61, 0.0  ;;  %v2122_v61 = vadd.f32 %v6553_v1, %v1883_v54  ;;  %v2575_v62 = vsel %vm6084_vm2, %v5065_v50, %v2574_v27 }
 0x1c6   : > { %v2511_v12 = vmul.f32 %v6627_v43, %v2499_v6  ;;  %v2577_v6 = vshrl.u32 %v2549_v55, 16  ;;  %v2248_v0 = vadd.f32 %v6603_v7, %v2122_v61  ;;  %v2922_v55 = vrot.slane %v2920_v38, 5 }
 0x1c8   : > { %v2523_v28 = vadd.f32 %v6634_v33, %v2511_v12  ;;  %v6689_v12 = vadd.f32 %v2235_v21, %v2123_v17  ;;  %v2923_v60 = vsel %vm6106_vm5, %v2918_v52, %v2922_v55 }
 0x1c9   : > { %v2473_v35 = vpop.f32.mrf.mxu2 }
 0x1ca   : > { %v2531_v42 = vpack.c.bf16 %v2523_v28, %v2523_v28  ;;  %v2492_v56 = vadd.f32 %v2473_v35, %v2246_v41  ;;  %v5066_v41 = vrot.slane %v2577_v6, 11  ;;  %v6691_v28 = vadd.f32 %v2237_v58, %v2124_v63  ;;  %v2240_v45 = vpop.f32.mrf.mxu1 }
 0x1cb   : > { %v2801_v35 = vunpack.c.l.b16 %v2575_v62  ;;  %v2936_v6 = vrot.slane %v2934_v57, 5  ;;  %v2603_v58 = vshrl.u32 %v2553_v26, 16  ;;  %v6710_v20 = vadd.f32 %v2240_v45, %v2125_v18  ;;  %v2901_v26 = vld [vmem:[#allocation2 + $0x2c] sm:$0x1] }
 0x1cc   : > { %2539 = vst [vmem:[#allocation2 + $0x10] sm:$0xf] %v2531_v42  ;;  %v2500_v25 = vmax.f32 %v2492_v56, 0.0 }
 0x1cd   : > { %v6718_v49 = vrot.slane %v2603_v58, 11 }
 0x1ce   : > { %v2512_v1 = vmul.f32 %v6627_v43, %v2500_v25 }
 0x1d0   : > { %v2524_v2 = vadd.f32 %v6634_v33, %v2512_v1 }
 0x1d1   : > { %v2476_v59 = vpop.f32.mrf.mxu2 }
 0x1d2   : > { %v2532_v3 = vpack.c.bf16 %v2524_v2, %v2524_v2  ;;  %v2493_v54 = vadd.f32 %v2476_v59, %v2247_v30 }
 0x1d3   : > { %v5665_v7 = vld [vmem:[#allocation2 + $0xc] sm:$0xf0] }
 0x1d4   : > { %v2550_v21 = vld [vmem:[#allocation2 + $0x10] sm:$0xf]  ;;  %2540 = vst [vmem:[#allocation2 + $0x1c] sm:$0xf] %v2532_v3  ;;  %v2501_v47 = vmax.f32 %v2493_v54, 0.0  ;;  %v5092_v42 = vor.u32 %v5665_v7, %v5091_v34  ;;  %v3039_v54 = vunpack.c.l.b16 %v2923_v60 }
 0x1d5   : > { %v2896_v13 = vld [vmem:[#allocation2 + $0x10] sm:$0xf]  ;;  %v2582_v56 = vshrl.u32 %v2550_v21, 16  ;;  %v2585_v25 = vshll.u32 %v2550_v21, 16 }
 0x1d6   : > { %v2925_v39 = vshrl.u32 %v2896_v13, 16  ;;  %v2928_v50 = vshll.u32 %v2896_v13, 16  ;;  %v3141_v61 = vld [vmem:[#allocation2 + $0x10] sm:$0xf]  ;;  %v2513_v17 = vmul.f32 %v6627_v43, %v2501_v47  ;;  %2780 = vmatmul.bf16.vlgmr.msra.gmra.mxu3 %v5092_v42  ;;  %v2899_v42 = vld [vmem:[#allocation2 + $0x20] sm:$0x1] }
 0x1d7   : > { %v2584_v8 = vrot.slane %v2582_v56, 7  ;;  %v3162_v27 = vshrl.u32 %v3141_v61, 16  ;;  %v3165_v1 = vshll.u32 %v3141_v61, 16  ;;  %v1877_v61 = vpop.f32.mrf.mxu3 }
 0x1d8   : > { %v2927_v36 = vrot.slane %v2925_v39, 4  ;;  %v2930_v48 = vrot.slane %v2928_v50, 5  ;;  %v2525_v11 = vadd.f32 %v6634_v33, %v2513_v17  ;;  %v1887_v60 = vadd.f32 %v1877_v61, %v6694_v46  ;;  %v5707_v46 = vld [vmem:[%s7052_s7 + $0x110] sm:$0xff] }
 0x1d9   : > { %v2587_v14 = vor.u32 %v2585_v25, %v2584_v8  ;;  %v3164_v10 = vrot.slane %v3162_v27, 7  ;;  %v2478_v63 = vpop.f32.mrf.mxu2  ;;  %v5731_v61 = vld [vmem:[%s7052_s7 + $0x1b0] sm:$0xff] }
 0x1da   : > { %v2931_v23 = vor.u32 %v2930_v48, %v2927_v36  ;;  %v2533_v4 = vpack.c.bf16 %v2525_v11, %v2525_v11  ;;  %v2494_v30 = vadd.f32 %v2478_v63, %v2248_v0  ;;  %v5708_v0 = vld [vmem:[%s7052_s7 + $0x118] sm:$0xff]  ;;  %v3144_v63 = vld [vmem:[#allocation2 + $0x24] sm:$0x8] }
 0x1db   : > { %v2588_v2 = vsel %vm6084_vm2, %v5066_v41, %v2587_v14  ;;  %v3167_v62 = vor.u32 %v3165_v1, %v3164_v10  ;;  %v3143_v34 = vld [vmem:[#allocation2 + $0x1c] sm:$0xf]  ;;  %3471 = vmatpush.bf16.msrb.mxu3 %v5708_v0 }
 0x1dc   : > { %v2802_v38 = vunpack.c.l.b16 %v2588_v2  ;;  %v2932_v59 = vrot.slane %v2931_v23, 4  ;;  %2541 = vst [vmem:[#allocation2 + $0x28] sm:$0xf] %v2533_v4  ;;  %v2502_v3 = vmax.f32 %v2494_v30, 0.0  ;;  %v3175_v57 = vshrl.u32 %v3143_v34, 16 }
 0x1dd   : > { %v3178_v51 = vshll.u32 %v3143_v34, 16  ;;  %v3168_v21 = vsel %vm6084_vm2, %v5217_v22, %v3167_v62  ;;  %v2552_v13 = vld [vmem:[#allocation2 + $0x1c] sm:$0xf] }
 0x1de   : > { %v2809_v41 = vpack.c.b16 %v2802_v38, %v2801_v35  ;;  %v2937_v7 = vsel %vm6106_vm5, %v2932_v59, %v2936_v6  ;;  %v2898_v47 = vld [vmem:[#allocation2 + $0x1c] sm:$0xf]  ;;  %v2514_v56 = vmul.f32 %v6627_v43, %v2502_v3  ;;  %v3177_v31 = vrot.slane %v3175_v57, 7 }
 0x1df   : > { %v3040_v55 = vunpack.c.l.b16 %v2937_v7  ;;  %v2595_v52 = vshrl.u32 %v2552_v13, 16  ;;  %v2598_v39 = vshll.u32 %v2552_v13, 16  ;;  %v2939_v18 = vshrl.u32 %v2898_v47, 16  ;;  %v5095_v14 = vld [vmem:[#allocation2 + $0x1c] sm:$0xf]  ;;  %3472 = vmatpush.bf16.msrb.mxu3 %v5707_v46 }
 0x1e0   : > { %2873 = vmatmul.bf16.vlgmr.msrb.gmra.mxu0 %v2809_v41  ;;  %v2942_v50 = vshll.u32 %v2898_v47, 16  ;;  %v2948_v35 = vshll.u32 %v2899_v42, 16  ;;  %v2526_v37 = vadd.f32 %v6634_v33, %v2514_v56  ;;  %v3180_v8 = vor.u32 %v3178_v51, %v3177_v31  ;;  %v5720_v57 = vld [vmem:[%s7052_s7 + $0x178] sm:$0xff]  ;;  %v3146_v47 = vld [vmem:[#allocation2 + $0x30] sm:$0x8] }
 0x1e1   : > { %v3047_v17 = vpack.c.b16 %v3040_v55, %v3039_v54  ;;  %v2597_v25 = vrot.slane %v2595_v52, 7  ;;  %v2481_v27 = vpop.f32.mrf.mxu2  ;;  %v2941_v36 = vrot.slane %v2939_v18, 4  ;;  %v3277_v22 = vunpack.c.l.b16 %v3168_v21  ;;  %v5732_v7 = vld [vmem:[%s7052_s7 + $0x1b8] sm:$0xff]  ;;  %v2555_v55 = vld [vmem:[#allocation2 + $0x30] sm:$0x8]  ;;  %3713 = vmatpush.bf16.msra.mxu0 %v5720_v57 }
 0x1e2   : > { %v2944_v48 = vrot.slane %v2942_v50, 5  ;;  %v6720_v6 = vrot.slane %v2948_v35, 5  ;;  %v2534_v19 = vpack.c.bf16 %v2526_v37, %v2526_v37  ;;  %v2495_v11 = vadd.f32 %v2481_v27, %v6689_v12  ;;  %3951 = vmatpush.bf16.msra.mxu1 %v5732_v7  ;;  %v5719_v50 = vld [vmem:[%s7052_s7 + $0x170] sm:$0xff]  ;;  %v5706_v35 = vld [vmem:[%s7052_s7 + $0x108] sm:$0xff]  ;;  %v2903_v46 = vld [vmem:[#allocation2 + $0x38] sm:$0x1] }
 0x1e3   : > { %3111 = vmatmul.bf16.vlgmr.msrb.gmra.mxu1 %v3047_v17  ;;  %v3181_v10 = vsel %vm6084_vm2, %v5218_v29, %v3180_v8  ;;  %v2600_v1 = vor.u32 %v2598_v39, %v2597_v25  ;;  %v5666_v23 = vld [vmem:[#allocation2 + $0x24] sm:$0xf0]  ;;  %v2962_v54 = vshll.u32 %v2901_v26, 16  ;;  %v3183_v42 = vshrl.u32 %v3144_v63, 16  ;;  %3473 = vmatpush.bf16.msrb.mxu3 %v5706_v35  ;;  %v5739_v57 = vld [vmem:[%s7052_s7 + $0x1f0] sm:$0xff] }
 0x1e4   : > { %v3278_v4 = vunpack.c.l.b16 %v3181_v10  ;;  %v2554_v30 = vld [vmem:[#allocation2 + $0x28] sm:$0xf]  ;;  %v2945_v62 = vor.u32 %v2944_v48, %v2941_v36  ;;  %2542 = vst [vmem:[#allocation2 + $0x34] sm:$0xf] %v2534_v19  ;;  %v2503_v38 = vmax.f32 %v2495_v11, 0.0  ;;  %v5096_v59 = vor.u32 %v5666_v23, %v5095_v14  ;;  %v5740_v11 = vld [vmem:[%s7052_s7 + $0x1f8] sm:$0xff]  ;;  %v2116_v14 = vpop.f32.mrf.mxu0 }
 0x1e5   : > { %v2900_v2 = vld [vmem:[#allocation2 + $0x28] sm:$0xf]  ;;  %v2601_v12 = vsel %vm6084_vm2, %v6705_v40, %v2600_v1  ;;  %v2608_v34 = vshrl.u32 %v2554_v30, 16  ;;  %v2611_v45 = vshll.u32 %v2554_v30, 16  ;;  %v2964_v17 = vrot.slane %v2962_v54, 5  ;;  %3714 = vmatpush.bf16.msra.mxu0 %v5719_v50  ;;  %4077 = vmatpush.bf16.msra.mxu2 %v5740_v11 }
 0x1e6   : > { %v3145_v29 = vld [vmem:[#allocation2 + $0x28] sm:$0xf]  ;;  %v3285_v58 = vpack.c.b16 %v3278_v4, %v3277_v22  ;;  %v2946_v3 = vrot.slane %v2945_v62, 4  ;;  %v2515_v51 = vmul.f32 %v6627_v43, %v2503_v38  ;;  %2785 = vmatmul.bf16.gmra.mxu3 %v5096_v59  ;;  %v2953_v41 = vshrl.u32 %v2900_v2, 16  ;;  %v6761_v23 = vld [vmem:[#allocation2 + $0x3c] sm:$0x8]  ;;  %3952 = vmatpush.bf16.msra.mxu1 %v5731_v61  ;;  %v2242_v61 = vpop.f32.mrf.mxu1 }
 0x1e7   : > { %v2610_v0 = vrot.slane %v2608_v34, 7  ;;  %v2956_v40 = vshll.u32 %v2900_v2, 16  ;;  %v2803_v21 = vunpack.c.l.b16 %v2601_v12  ;;  %v3188_v56 = vshrl.u32 %v3145_v29, 16  ;;  %v5730_v62 = vld [vmem:[%s7052_s7 + $0x1a8] sm:$0xff] }
 0x1e8   : > { %3349 = vmatmul.bf16.vlgmr.msrb.gmra.mxu2 %v3285_v58  ;;  %v2951_v13 = vsel %vm6106_vm5, %v2946_v3, %v6720_v6  ;;  %v2527_v31 = vadd.f32 %v6634_v33, %v2515_v51  ;;  %v2955_v39 = vrot.slane %v2953_v41, 4  ;;  %v6752_v8 = vrot.slane %v3183_v42, 11  ;;  %v5705_v51 = vld [vmem:[%s7052_s7 + $0x100] sm:$0xff]  ;;  %v5738_v35 = vld [vmem:[%s7052_s7 + $0x1e8] sm:$0xff] }
 0x1e9   : > { %v2613_v52 = vor.u32 %v2611_v45, %v2610_v0  ;;  %v2958_v18 = vrot.slane %v2956_v40, 5  ;;  %v2483_v37 = vpop.f32.mrf.mxu2  ;;  %v3190_v25 = vrot.slane %v3188_v56, 7  ;;  %v3191_v27 = vshll.u32 %v3145_v29, 16  ;;  %v5717_v56 = vld [vmem:[%s7052_s7 + $0x160] sm:$0xff]  ;;  %4078 = vmatpush.bf16.msra.mxu2 %v5739_v57  ;;  %3474 = vmatpush.bf16.msrb.mxu3 %v5705_v51 }
 0x1ea   : > { %v2535_v36 = vpack.c.bf16 %v2527_v31, %v2527_v31  ;;  %v2496_v48 = vadd.f32 %v2483_v37, %v6691_v28  ;;  %v3196_v63 = vshrl.u32 %v3146_v47, 16  ;;  %v2616_v22 = vshrl.u32 %v2555_v55, 16  ;;  %v5718_v28 = vld [vmem:[%s7052_s7 + $0x168] sm:$0xff]  ;;  %3953 = vmatpush.bf16.msra.mxu1 %v5730_v62  ;;  %v5729_v55 = vld [vmem:[%s7052_s7 + $0x1a0] sm:$0xff] }
 0x1eb   : > { %v2614_v6 = vsel %vm6084_vm2, %v6718_v49, %v2613_v52  ;;  %v2959_v19 = vor.u32 %v2958_v18, %v2955_v39  ;;  %v3147_v1 = vld [vmem:[#allocation2 + $0x34] sm:$0xf]  ;;  %v3193_v26 = vor.u32 %v3191_v27, %v3190_v25  ;;  %v2126_v4 = vadd.f32 %v2116_v14, %v1887_v60  ;;  %3715 = vmatpush.bf16.msra.mxu0 %v5718_v28  ;;  %v2905_v27 = vld [vmem:[#allocation2 + $0x44] sm:$0x1] }
 0x1ec   : > { %v2804_v10 = vunpack.c.l.b16 %v2614_v6  ;;  %2543 = vst [vmem:[#allocation2 + $0x40] sm:$0xf] %v2535_v36  ;;  %v2504_v49 = vmax.f32 %v2496_v48, 0.0  ;;  %v3201_v2 = vshrl.u32 %v3147_v1, 16  ;;  %v3041_v59 = vunpack.c.l.b16 %v2951_v13  ;;  %v2556_v29 = vld [vmem:[#allocation2 + $0x34] sm:$0xf] }
 0x1ed   : > { %v2960_v30 = vrot.slane %v2959_v19, 4  ;;  %v3194_v12 = vsel %vm6084_vm2, %v6752_v8, %v3193_v26  ;;  %v3204_v34 = vshll.u32 %v3147_v1, 16  ;;  %v2902_v58 = vld [vmem:[#allocation2 + $0x34] sm:$0xf]  ;;  %v5220_v3 = vrot.slane %v3196_v63, 11  ;;  %v5716_v6 = vld [vmem:[%s7052_s7 + $0x158] sm:$0xff]  ;;  %4079 = vmatpush.bf16.msra.mxu2 %v5738_v35 }
 0x1ee   : > { %v2810_v38 = vpack.c.b16 %v2804_v10, %v2803_v21  ;;  %v2516_v60 = vmul.f32 %v6627_v43, %v2504_v49  ;;  %v3203_v54 = vrot.slane %v3201_v2, 7  ;;  %v6781_v41 = vrot.slane %v2616_v22, 11  ;;  %v5099_v8 = vld [vmem:[#allocation2 + $0x34] sm:$0xf]  ;;  %v3148_v48 = vld [vmem:[#allocation2 + $0x3c] sm:$0x8]  ;;  %3954 = vmatpush.bf16.msra.mxu1 %v5729_v55 }
 0x1ef   : > { %v2965_v45 = vsel %vm6106_vm5, %v2960_v30, %v2964_v17  ;;  %v2621_v40 = vshrl.u32 %v2556_v29, 16  ;;  %v2624_v7 = vshll.u32 %v2556_v29, 16  ;;  %v2629_v47 = vshrl.u32 %v6761_v23, 16  ;;  %3716 = vmatpush.bf16.msra.mxu0 %v5717_v56  ;;  %v5728_v49 = vld [vmem:[%s7052_s7 + $0x198] sm:$0xff]  ;;  %v3150_v55 = vld [vmem:[#allocation2 + $0x48] sm:$0x8] }
 0x1f0   : > { %2878 = vmatmul.bf16.gmra.mxu0 %v2810_v38  ;;  %v3042_v0 = vunpack.c.l.b16 %v2965_v45  ;;  %v2528_v21 = vadd.f32 %v6634_v33, %v2516_v60  ;;  %v3206_v13 = vor.u32 %v3204_v34, %v3203_v54  ;;  %v2967_v42 = vshrl.u32 %v2902_v58, 16  ;;  %v2559_v35 = vld [vmem:[#allocation2 + $0x48] sm:$0x8] }
 0x1f1   : > { %v2486_v31 = vpop.f32.mrf.mxu2  ;;  %v2623_v39 = vrot.slane %v2621_v40, 7  ;;  %v2970_v18 = vshll.u32 %v2902_v58, 16  ;;  %v2976_v50 = vshll.u32 %v2903_v46, 16  ;;  %v2252_v19 = vadd.f32 %v2242_v61, %v2126_v4  ;;  %v5748_v46 = vld [vmem:[%s7052_s7 + $0x238] sm:$0xff]  ;;  %v5715_v40 = vld [vmem:[%s7052_s7 + $0x150] sm:$0xff] }
 0x1f2   : > { %v3048_v52 = vpack.c.b16 %v3042_v0, %v3041_v59  ;;  %v2536_v37 = vpack.c.bf16 %v2528_v21, %v2528_v21  ;;  %v2497_v17 = vadd.f32 %v2486_v31, %v6710_v20  ;;  %v3207_v25 = vsel %vm6084_vm2, %v5220_v3, %v3206_v13  ;;  %v5737_v59 = vld [vmem:[%s7052_s7 + $0x1e0] sm:$0xff]  ;;  %3955 = vmatpush.bf16.msra.mxu1 %v5728_v49  ;;  %v5736_v31 = vld [vmem:[%s7052_s7 + $0x1d8] sm:$0xff] }
 0x1f3   : > { %v2969_v36 = vrot.slane %v2967_v42, 4  ;;  %v5667_v11 = vld [vmem:[#allocation2 + $0x3c] sm:$0xf0]  ;;  %v3279_v14 = vunpack.c.l.b16 %v3194_v12  ;;  %v3280_v10 = vunpack.c.l.b16 %v3207_v25  ;;  %v2626_v26 = vor.u32 %v2624_v7, %v2623_v39  ;;  %3717 = vmatpush.bf16.msra.mxu0 %v5716_v6  ;;  %v5727_v7 = vld [vmem:[%s7052_s7 + $0x190] sm:$0xff]  ;;  %4080 = vmatpush.bf16.msra.mxu2 %v5737_v59 }
 0x1f4   : > { %3116 = vmatmul.bf16.gmra.mxu1 %v3048_v52  ;;  %v2558_v1 = vld [vmem:[#allocation2 + $0x40] sm:$0xf]  ;;  %2544 = vst [vmem:[#allocation2 + $0x4c] sm:$0xf] %v2536_v37  ;;  %v2505_v20 = vmax.f32 %v2497_v17, 0.0  ;;  %v5100_v23 = vor.u32 %v5667_v11, %v5099_v8  ;;  %v5070_v22 = vrot.slane %v2629_v47, 11  ;;  %4323 = vmatpush.bf16.msra.mxu3 %v5748_v46 }
 0x1f5   : > { %v2904_v63 = vld [vmem:[#allocation2 + $0x40] sm:$0xf]  ;;  %v2634_v28 = vshrl.u32 %v2558_v1, 16  ;;  %v3286_v30 = vpack.c.b16 %v3280_v10, %v3279_v14  ;;  %v2627_v4 = vsel %vm6084_vm2, %v6781_v41, %v2626_v26  ;;  %v2637_v2 = vshll.u32 %v2558_v1, 16  ;;  %v2561_v14 = vld [vmem:[#allocation2 + $0x54] sm:$0x8] }
 0x1f6   : > { %v2972_v62 = vrot.slane %v2970_v18, 5  ;;  %v3149_v38 = vld [vmem:[#allocation2 + $0x40] sm:$0xf]  ;;  %v2517_v12 = vmul.f32 %v6627_v43, %v2505_v20  ;;  %2790 = vmatmul.bf16.gmra.mxu3 %v5100_v23  ;;  %v2978_v29 = vrot.slane %v2976_v50, 5  ;;  %v2981_v58 = vshrl.u32 %v2904_v63, 16  ;;  %3956 = vmatpush.bf16.msra.mxu1 %v5727_v7  ;;  %v5747_v10 = vld [vmem:[%s7052_s7 + $0x230] sm:$0xff] }
 0x1f7   : > { %v2636_v34 = vrot.slane %v2634_v28, 7  ;;  %v2984_v45 = vshll.u32 %v2904_v63, 16  ;;  %v2990_v3 = vshll.u32 %v2905_v27, 16  ;;  %v3209_v54 = vshrl.u32 %v3148_v48, 16  ;;  %v5714_v27 = vld [vmem:[%s7052_s7 + $0x148] sm:$0xff]  ;;  %3718 = vmatpush.bf16.msra.mxu0 %v5715_v40  ;;  %4081 = vmatpush.bf16.msra.mxu2 %v5736_v31 }
 0x1f8   : > { %3354 = vmatmul.bf16.gmra.mxu2 %v3286_v30  ;;  %v2973_v60 = vor.u32 %v2972_v62, %v2969_v36  ;;  %v2529_v57 = vadd.f32 %v6634_v33, %v2517_v12  ;;  %v2983_v0 = vrot.slane %v2981_v58, 4  ;;  %v3214_v41 = vshrl.u32 %v3149_v38, 16  ;;  %v5726_v36 = vld [vmem:[%s7052_s7 + $0x188] sm:$0xff]  ;;  %4324 = vmatpush.bf16.msra.mxu3 %v5747_v10 }
 0x1f9   : > { %v2639_v51 = vor.u32 %v2637_v2, %v2636_v34  ;;  %v2488_v21 = vpop.f32.mrf.mxu2  ;;  %v2805_v13 = vunpack.c.l.b16 %v2627_v4  ;;  %v2986_v42 = vrot.slane %v2984_v45, 5  ;;  %v2992_v56 = vrot.slane %v2990_v3, 5  ;;  %v5713_v45 = vld [vmem:[%s7052_s7 + $0x140] sm:$0xff] }
 0x1fa   : > { %v2974_v47 = vrot.slane %v2973_v60, 4  ;;  %v2537_v52 = vpack.c.bf16 %v2529_v57, %v2529_v57  ;;  %v2498_v39 = vadd.f32 %v2488_v21, %v2252_v19  ;;  %v3216_v50 = vrot.slane %v3214_v41, 7  ;;  %3957 = vmatpush.bf16.msra.mxu1 %v5726_v36  ;;  %v2909_v21 = vld [vmem:[#allocation2 + $0x5c] sm:$0x1]  ;;  %v5733_v36 = vld [vmem:[%s7052_s7 + $0x1c0] sm:$0xff] }
 0x1fb   : > { %v2640_v18 = vsel %vm6084_vm2, %v5070_v22, %v2639_v51  ;;  %v2987_v37 = vor.u32 %v2986_v42, %v2983_v0  ;;  %v3151_v17 = vld [vmem:[#allocation2 + $0x4c] sm:$0xf]  ;;  %v5221_v8 = vrot.slane %v3209_v54, 11  ;;  %v3217_v25 = vshll.u32 %v3149_v38, 16  ;;  %v5735_v22 = vld [vmem:[%s7052_s7 + $0x1d0] sm:$0xff]  ;;  %3719 = vmatpush.bf16.msra.mxu0 %v5714_v27  ;;  %v5725_v51 = vld [vmem:[%s7052_s7 + $0x180] sm:$0xff] }
 0x1fc   : > { %v2806_v61 = vunpack.c.l.b16 %v2640_v18  ;;  %2545 = vst [vmem:[#allocation2 + $0x58] sm:$0xf] %v2537_v52  ;;  %v2506_v48 = vmax.f32 %v2498_v39, 0.0  ;;  %v2979_v6 = vsel %vm6106_vm5, %v2974_v47, %v2978_v29  ;;  %v3222_v19 = vshrl.u32 %v3150_v55, 16  ;;  %v2560_v23 = vld [vmem:[#allocation2 + $0x4c] sm:$0xf]  ;;  %4082 = vmatpush.bf16.msra.mxu2 %v5735_v22 }
 0x1fd   : > { %v3227_v11 = vshrl.u32 %v3151_v17, 16  ;;  %v2988_v26 = vrot.slane %v2987_v37, 4  ;;  %v3219_v63 = vor.u32 %v3217_v25, %v3216_v50  ;;  %v3230_v20 = vshll.u32 %v3151_v17, 16  ;;  %v2906_v2 = vld [vmem:[#allocation2 + $0x4c] sm:$0xf] }
 0x1fe   : > { %v2811_v1 = vpack.c.b16 %v2806_v61, %v2805_v13  ;;  %v2518_v28 = vmul.f32 %v6627_v43, %v2506_v48  ;;  %v5222_v49 = vrot.slane %v3222_v19, 11  ;;  %v2642_v4 = vshrl.u32 %v2559_v35, 16  ;;  %v2907_v43 = vld [vmem:[#allocation2 + $0x50] sm:$0x1]  ;;  %v5103_v40 = vld [vmem:[#allocation2 + $0x4c] sm:$0xf]  ;;  %3958 = vmatpush.bf16.msra.mxu1 %v5725_v51 }
 0x1ff   : > { %v3229_v30 = vrot.slane %v3227_v11, 7  ;;  %v2993_v62 = vsel %vm6106_vm5, %v2988_v26, %v2992_v56  ;;  %v3043_v38 = vunpack.c.l.b16 %v2979_v6  ;;  %v3220_v59 = vsel %vm6084_vm2, %v5221_v8, %v3219_v63  ;;  %v3152_v47 = vld [vmem:[#allocation2 + $0x54] sm:$0x8]  ;;  %3720 = vmatpush.bf16.msra.mxu0 %v5713_v45  ;;  %v3154_v63 = vld [vmem:[#allocation2 + $0x60] sm:$0x8] }
 0x200   : > { %2883 = vmatmul.bf16.gmra.mxu0 %v2811_v1  ;;  %v2647_v12 = vshrl.u32 %v2560_v23, 16  ;;  %v2530_v34 = vadd.f32 %v6634_v33, %v2518_v28  ;;  %v3044_v29 = vunpack.c.l.b16 %v2993_v62  ;;  %v2650_v60 = vshll.u32 %v2560_v23, 16  ;;  %v5734_v33 = vld [vmem:[%s7052_s7 + $0x1c8] sm:$0xff] }
 0x201   : > { %v3232_v58 = vor.u32 %v3230_v20, %v3229_v30  ;;  %v5071_v3 = vrot.slane %v2642_v4, 11  ;;  %v2655_v46 = vshrl.u32 %v2561_v14, 16  ;;  %v2995_v57 = vshrl.u32 %v2906_v2, 16  ;;  %4083 = vmatpush.bf16.msra.mxu2 %v5734_v33  ;;  %v5746_v14 = vld [vmem:[%s7052_s7 + $0x228] sm:$0xff]  ;;  %v3504_v30 = vld [vmem:[#allocation2 + $0x10] sm:$0xf] }
 0x202   : > { %v2649_v54 = vrot.slane %v2647_v12, 7  ;;  %v2538_v0 = vpack.c.bf16 %v2530_v34, %v2530_v34  ;;  %v3049_v41 = vpack.c.b16 %v3044_v29, %v3043_v38  ;;  %v2998_v13 = vshll.u32 %v2906_v2, 16  ;;  %4325 = vmatpush.bf16.msra.mxu3 %v5746_v14  ;;  %v5745_v4 = vld [vmem:[%s7052_s7 + $0x220] sm:$0xff]  ;;  %v3505_v33 = vld [vmem:[#allocation2 + $0x14] sm:$0x1] }
 0x203   : > { %v3233_v7 = vsel %vm6084_vm2, %v5222_v49, %v3232_v58  ;;  %v5668_v42 = vld [vmem:[#allocation2 + $0x54] sm:$0xf0]  ;;  %v3281_v56 = vunpack.c.l.b16 %v3220_v59  ;;  %v2997_v39 = vrot.slane %v2995_v57, 4  ;;  %v5072_v50 = vrot.slane %v2655_v46, 11 }
 0x204   : > { %v3282_v55 = vunpack.c.l.b16 %v3233_v7  ;;  %v2562_v31 = vld [vmem:[#allocation2 + $0x58] sm:$0xf]  ;;  %v2652_v52 = vor.u32 %v2650_v60, %v2649_v54  ;;  %2546 = vst [vmem:[#allocation2 + $0x64] sm:$0xf] %v2538_v0  ;;  %3121 = vmatmul.bf16.gmra.mxu1 %v3049_v41  ;;  %v5104_v18 = vor.u32 %v5668_v42, %v5103_v40  ;;  %v3000_v8 = vrot.slane %v2998_v13, 5 }
 0x205   : > { %v2660_v35 = vshrl.u32 %v2562_v31, 16  ;;  %v2908_v61 = vld [vmem:[#allocation2 + $0x58] sm:$0xf]  ;;  %v2663_v17 = vshll.u32 %v2562_v31, 16  ;;  %v3004_v25 = vshll.u32 %v2907_v43, 16  ;;  %v3018_v26 = vshll.u32 %v2909_v21, 16  ;;  %4084 = vmatpush.bf16.msra.mxu2 %v5733_v36 }
 0x206   : > { %v3287_v37 = vpack.c.b16 %v3282_v55, %v3281_v56  ;;  %v3153_v27 = vld [vmem:[#allocation2 + $0x58] sm:$0xf]  ;;  %2795 = vmatmul.bf16.gmra.mxu3 %v5104_v18  ;;  %v2653_v48 = vsel %vm6084_vm2, %v5071_v3, %v2652_v52  ;;  %v3009_v19 = vshrl.u32 %v2908_v61, 16  ;;  %v3012_v11 = vshll.u32 %v2908_v61, 16  ;;  %v3506_v0 = vld [vmem:[#allocation2 + $0x1c] sm:$0xf] }
 0x207   : > { %v2662_v6 = vrot.slane %v2660_v35, 7  ;;  %v3001_v10 = vor.u32 %v3000_v8, %v2997_v39  ;;  %v3006_v1 = vrot.slane %v3004_v25, 5  ;;  %v3235_v20 = vshrl.u32 %v3152_v47, 16  ;;  %4326 = vmatpush.bf16.msra.mxu3 %v5745_v4  ;;  %v3507_v21 = vld [vmem:[#allocation2 + $0x20] sm:$0x1] }
 0x208   : > { %3359 = vmatmul.bf16.gmra.mxu2 %v3287_v37  ;;  %v3011_v22 = vrot.slane %v3009_v19, 4  ;;  %v3014_v28 = vrot.slane %v3012_v11, 5  ;;  %v3240_v49 = vshrl.u32 %v3153_v27, 16  ;;  %v2807_v2 = vunpack.c.l.b16 %v2653_v48  ;;  %v5693_v42 = vld [vmem:[#allocation2 + $0x18] sm:$0xf0] }
 0x209   : > { %v2665_v23 = vor.u32 %v2663_v17, %v2662_v6  ;;  %v3002_v62 = vrot.slane %v3001_v10, 4  ;;  %v3020_v38 = vrot.slane %v3018_v26, 5  ;;  %v3243_v59 = vshll.u32 %v3153_v27, 16  ;;  %v3751_v35 = vld [vmem:[#allocation2 + $0x1c] sm:$0xf] }
 0x20a   : > { %v3015_v34 = vor.u32 %v3014_v28, %v3011_v22  ;;  %v3242_v29 = vrot.slane %v3240_v49, 7  ;;  %v3248_v58 = vshrl.u32 %v3154_v63, 16  ;;  %v3521_v3 = vshrl.u32 %v3504_v30, 16  ;;  %v3752_v8 = vld [vmem:[#allocation2 + $0x24] sm:$0x8] }
 0x20b   : > { %v2666_v12 = vsel %vm6084_vm2, %v5072_v50, %v2665_v23  ;;  %v3007_v43 = vsel %vm6106_vm5, %v3002_v62, %v3006_v1  ;;  %v3155_v45 = vld [vmem:[#allocation2 + $0x64] sm:$0xf]  ;;  %v3524_v54 = vshll.u32 %v3504_v30, 16  ;;  %v5223_v51 = vrot.slane %v3235_v20, 11  ;;  %v5291_v27 = vld [vmem:[#allocation2 + $0x10] sm:$0xf] }
 0x20c   : > { %v2808_v60 = vunpack.c.l.b16 %v2666_v12  ;;  %v3016_v46 = vrot.slane %v3015_v34, 4  ;;  %v3045_v57 = vunpack.c.l.b16 %v3007_v43  ;;  %v3245_v40 = vor.u32 %v3243_v59, %v3242_v29  ;;  %v3750_v14 = vld [vmem:[#allocation2 + $0x18] sm:$0x8]  ;;  %v3753_v10 = vld [vmem:[#allocation2 + $0x28] sm:$0xf] }
 0x20d   : > { %v3253_v7 = vshrl.u32 %v3155_v45, 16  ;;  %v3523_v13 = vrot.slane %v3521_v3, 4  ;;  %v5224_v56 = vrot.slane %v3248_v58, 11  ;;  %v3256_v55 = vshll.u32 %v3155_v45, 16  ;;  %v3508_v4 = vld [vmem:[#allocation2 + $0x28] sm:$0xf] }
 0x20e   : > { %v2812_v41 = vpack.c.b16 %v2808_v60, %v2807_v2  ;;  %v3021_v47 = vsel %vm6106_vm5, %v3016_v46, %v3020_v38  ;;  %v3526_v31 = vrot.slane %v3524_v54, 5  ;;  %v3530_v18 = vshll.u32 %v3505_v33, 16  ;;  %v3510_v59 = vld [vmem:[#allocation2 + $0x34] sm:$0xf]  ;;  %v5744_v58 = vld [vmem:[%s7052_s7 + $0x218] sm:$0xff] }
 0x20f   : > { %v3046_v52 = vunpack.c.l.b16 %v3021_v47  ;;  %v3255_v39 = vrot.slane %v3253_v7, 7  ;;  %v3535_v50 = vshrl.u32 %v3506_v0, 16  ;;  %v3538_v37 = vshll.u32 %v3506_v0, 16  ;;  %4327 = vmatpush.bf16.msra.mxu3 %v5744_v58  ;;  %v5743_v33 = vld [vmem:[%s7052_s7 + $0x210] sm:$0xff] }
 0x210   : > { %2888 = vmatmul.bf16.gmra.mxu0 %v2812_v41  ;;  %v3527_v61 = vor.u32 %v3526_v31, %v3523_v13  ;;  %v3544_v17 = vshll.u32 %v3507_v21, 16  ;;  %v3246_v36 = vsel %vm6084_vm2, %v5223_v51, %v3245_v40  ;;  %v5292_v19 = vor.u32 %v5693_v42, %v5291_v27 }
 0x211   : > { %v3050_v25 = vpack.c.b16 %v3046_v52, %v3045_v57  ;;  %v3258_v48 = vor.u32 %v3256_v55, %v3255_v39  ;;  %v3537_v6 = vrot.slane %v3535_v50, 4  ;;  %v3540_v11 = vrot.slane %v3538_v37, 5  ;;  %v3757_v39 = vld [vmem:[#allocation2 + $0x40] sm:$0xf] }
 0x212   : > { %v3772_v1 = vshrl.u32 %v3751_v35, 16  ;;  %v3528_v63 = vrot.slane %v3527_v61, 4  ;;  %v3532_v20 = vrot.slane %v3530_v18, 5  ;;  %v3780_v23 = vshrl.u32 %v3752_v8, 16  ;;  %v3755_v8 = vld [vmem:[#allocation2 + $0x34] sm:$0xf] }
 0x213   : > { %v3259_v26 = vsel %vm6084_vm2, %v5224_v56, %v3258_v48  ;;  %v3283_v22 = vunpack.c.l.b16 %v3246_v36  ;;  %v3541_v49 = vor.u32 %v3540_v11, %v3537_v6  ;;  %v3546_v30 = vrot.slane %v3544_v17, 5  ;;  %v3511_v56 = vld [vmem:[#allocation2 + $0x38] sm:$0x1]  ;;  %4328 = vmatpush.bf16.msra.mxu3 %v5743_v33  ;;  %v3756_v6 = vld [vmem:[#allocation2 + $0x3c] sm:$0x8]  ;;  %v5741_v33 = vld [vmem:[%s7052_s7 + $0x200] sm:$0xff] }
 0x214   : > { %3126 = vmatmul.bf16.gmra.mxu1 %v3050_v25  ;;  %v3284_v28 = vunpack.c.l.b16 %v3259_v26  ;;  %v3767_v2 = vshrl.u32 %v3750_v14, 16  ;;  %v3774_v62 = vrot.slane %v3772_v1, 7  ;;  %v3785_v38 = vshrl.u32 %v3753_v10, 16 }
 0x215   : > { %v3542_v34 = vrot.slane %v3541_v49, 4  ;;  %v3775_v29 = vshll.u32 %v3751_v35, 16  ;;  %v3533_v60 = vsel %vm6106_vm5, %v3528_v63, %v3532_v20  ;;  %v5386_v43 = vrot.slane %v3780_v23, 11  ;;  %v3509_v35 = vld [vmem:[#allocation2 + $0x2c] sm:$0x1] }
 0x216   : > { %3475 = vmatmul.bf16.vlgmr.msrb.gmra.mxu3 %v5292_v19  ;;  %v3288_v12 = vpack.c.b16 %v3284_v28, %v3283_v22  ;;  %v3787_v45 = vrot.slane %v3785_v38, 7  ;;  %v3788_v3 = vshll.u32 %v3753_v10, 16  ;;  %v3549_v46 = vshrl.u32 %v3508_v4, 16  ;;  %v5694_v19 = vld [vmem:[#allocation2 + $0x30] sm:$0xf0] }
 0x217   : > { %v3547_v54 = vsel %vm6106_vm5, %v3542_v34, %v3546_v30  ;;  %v3552_v57 = vshll.u32 %v3508_v4, 16  ;;  %v3563_v51 = vshrl.u32 %v3510_v59, 16  ;;  %v5385_v41 = vrot.slane %v3767_v2, 11  ;;  %v5295_v10 = vld [vmem:[#allocation2 + $0x28] sm:$0xf] }
 0x218   : > { %3364 = vmatmul.bf16.gmra.mxu2 %v3288_v12  ;;  %v3650_v0 = vunpack.c.l.b16 %v3547_v54  ;;  %v3777_v40 = vor.u32 %v3775_v29, %v3774_v62  ;;  %v3790_v7 = vor.u32 %v3788_v3, %v3787_v45  ;;  %v3566_v13 = vshll.u32 %v3510_v59, 16  ;;  %v3754_v63 = vld [vmem:[#allocation2 + $0x30] sm:$0x8]  ;;  %v5721_v20 = vld [vmem:[#allocation2 + $0x24] sm:$0xf0] }
 0x219   : > { %v3565_v21 = vrot.slane %v3563_v51, 4  ;;  %v3649_v47 = vunpack.c.l.b16 %v3533_v60  ;;  %v3551_v55 = vrot.slane %v3549_v46, 4  ;;  %v3554_v31 = vrot.slane %v3552_v57, 5  ;;  %v3514_v28 = vld [vmem:[#allocation2 + $0x4c] sm:$0xf] }
 0x21a   : > { %v3791_v42 = vsel %vm6084_vm2, %v5386_v43, %v3790_v7  ;;  %v3568_v52 = vrot.slane %v3566_v13, 5  ;;  %v3778_v50 = vsel %vm6084_vm2, %v5385_v41, %v3777_v40  ;;  %v3572_v17 = vshll.u32 %v3511_v56, 16  ;;  %v5459_v30 = vld [vmem:[#allocation2 + $0x1c] sm:$0xf]  ;;  %v3512_v12 = vld [vmem:[#allocation2 + $0x40] sm:$0xf] }
 0x21b   : > { %v3657_v18 = vpack.c.b16 %v3650_v0, %v3649_v47  ;;  %v3888_v61 = vunpack.c.l.b16 %v3791_v42  ;;  %v3811_v25 = vshrl.u32 %v3757_v39, 16  ;;  %v3887_v27 = vunpack.c.l.b16 %v3778_v50  ;;  %v5742_v43 = vld [vmem:[%s7052_s7 + $0x208] sm:$0xff]  ;;  %v3515_v42 = vld [vmem:[#allocation2 + $0x50] sm:$0x1] }
 0x21c   : > { %v3569_v37 = vor.u32 %v3568_v52, %v3565_v21  ;;  %v3555_v36 = vor.u32 %v3554_v31, %v3551_v55  ;;  %v3558_v48 = vshll.u32 %v3509_v35, 16  ;;  %v3798_v11 = vshrl.u32 %v3755_v8, 16  ;;  %4329 = vmatpush.bf16.msra.mxu3 %v5742_v43  ;;  %v3761_v31 = vld [vmem:[#allocation2 + $0x58] sm:$0xf]  ;;  %v3759_v50 = vld [vmem:[#allocation2 + $0x4c] sm:$0xf] }
 0x21d   : > { %v3895_v14 = vpack.c.b16 %v3888_v61, %v3887_v27  ;;  %v3574_v26 = vrot.slane %v3572_v17, 5  ;;  %v3806_v23 = vshrl.u32 %v3756_v6, 16  ;;  %v3813_v22 = vrot.slane %v3811_v25, 7  ;;  %v5695_v25 = vld [vmem:[#allocation2 + $0x48] sm:$0xf0] }
 0x21e   : > { %v3570_v1 = vrot.slane %v3569_v37, 4  ;;  %v5296_v49 = vor.u32 %v5694_v19, %v5295_v10  ;;  %v3556_v4 = vrot.slane %v3555_v36, 4  ;;  %v3560_v2 = vrot.slane %v3558_v48, 5  ;;  %v3760_v48 = vld [vmem:[#allocation2 + $0x54] sm:$0x8] }
 0x21f   : > { %v3793_v62 = vshrl.u32 %v3754_v63, 16  ;;  %v3800_v38 = vrot.slane %v3798_v11, 7  ;;  %v3814_v59 = vshll.u32 %v3757_v39, 16  ;;  %v5460_v34 = vor.u32 %v5721_v20, %v5459_v30  ;;  %v5299_v19 = vld [vmem:[#allocation2 + $0x40] sm:$0xf] }
 0x220   : > { %3721 = vmatmul.bf16.vlgmr.msra.gmra.mxu0 %v3657_v18  ;;  %v3575_v29 = vsel %vm6106_vm5, %v3570_v1, %v3574_v26  ;;  %v3591_v58 = vshrl.u32 %v3514_v28, 16  ;;  %v3594_v60 = vshll.u32 %v3514_v28, 16  ;;  %v3801_v45 = vshll.u32 %v3755_v8, 16  ;;  %4330 = vmatpush.bf16.msra.mxu3 %v5741_v33  ;;  %v3513_v18 = vld [vmem:[#allocation2 + $0x44] sm:$0x1] }
 0x221   : > { %v5388_v3 = vrot.slane %v3806_v23, 11  ;;  %v3816_v54 = vor.u32 %v3814_v59, %v3813_v22  ;;  %v3561_v46 = vsel %vm6106_vm5, %v3556_v4, %v3560_v2  ;;  %v3577_v57 = vshrl.u32 %v3512_v12, 16  ;;  %v3758_v11 = vld [vmem:[#allocation2 + $0x48] sm:$0x8]  ;;  %v5722_v10 = vld [vmem:[#allocation2 + $0x3c] sm:$0xf0] }
 0x222   : > { %v3580_v51 = vshll.u32 %v3512_v12, 16  ;;  %v3652_v0 = vunpack.c.l.b16 %v3575_v29  ;;  %v5387_v41 = vrot.slane %v3793_v62, 11  ;;  %v3803_v40 = vor.u32 %v3801_v45, %v3800_v38  ;;  %v3516_v63 = vld [vmem:[#allocation2 + $0x58] sm:$0xf]  ;;  %v3518_v28 = vld [vmem:[#allocation2 + $0x64] sm:$0xf] }
 0x223   : > { %v3593_v7 = vrot.slane %v3591_v58, 4  ;;  %v3596_v21 = vrot.slane %v3594_v60, 5  ;;  %v3651_v13 = vunpack.c.l.b16 %v3561_v46  ;;  %v3817_v47 = vsel %vm6084_vm2, %v5388_v3, %v3816_v54  ;;  %v3517_v33 = vld [vmem:[#allocation2 + $0x5c] sm:$0x1] }
 0x224   : > { %3959 = vmatmul.bf16.vlgmr.msra.gmra.mxu1 %v3895_v14  ;;  %v3579_v56 = vrot.slane %v3577_v57, 4  ;;  %v3582_v55 = vrot.slane %v3580_v51, 5  ;;  %v3804_v39 = vsel %vm6084_vm2, %v5387_v41, %v3803_v40  ;;  %v3890_v35 = vunpack.c.l.b16 %v3817_v47  ;;  %v3519_v41 = vld [vmem:[#allocation2 + $0x68] sm:$0x1] }
 0x225   : > { %v3658_v52 = vpack.c.b16 %v3652_v0, %v3651_v13  ;;  %v3597_v61 = vor.u32 %v3596_v21, %v3593_v7  ;;  %v3600_v37 = vshll.u32 %v3515_v42, 16  ;;  %v3837_v17 = vshrl.u32 %v3761_v31, 16  ;;  %v4116_v0 = vld [vmem:[#allocation2 + $0x28] sm:$0xf] }
 0x226   : > { %3480 = vmatmul.bf16.gmra.mxu3 %v5296_v49  ;;  %v3889_v8 = vunpack.c.l.b16 %v3804_v39  ;;  %v3583_v27 = vor.u32 %v3582_v55, %v3579_v56  ;;  %v3586_v36 = vshll.u32 %v3513_v18, 16  ;;  %v3824_v6 = vshrl.u32 %v3759_v50, 16  ;;  %v5463_v49 = vld [vmem:[#allocation2 + $0x34] sm:$0xf]  ;;  %v3763_v56 = vld [vmem:[#allocation2 + $0x64] sm:$0xf] }
 0x227   : > { %v3598_v1 = vrot.slane %v3597_v61, 4  ;;  %v3602_v26 = vrot.slane %v3600_v37, 5  ;;  %v5300_v20 = vor.u32 %v5695_v25, %v5299_v19  ;;  %v3832_v23 = vshrl.u32 %v3760_v48, 16  ;;  %v4114_v39 = vld [vmem:[#allocation2 + $0x1c] sm:$0xf] }
 0x228   : > { %4085 = vmatmul.bf16.vlgmr.msra.gmra.mxu2 %v5460_v34  ;;  %v3896_v14 = vpack.c.b16 %v3890_v35, %v3889_v8  ;;  %v3839_v22 = vrot.slane %v3837_v17, 7  ;;  %v3584_v30 = vrot.slane %v3583_v27, 4  ;;  %v3588_v4 = vrot.slane %v3586_v36, 5  ;;  %v3762_v35 = vld [vmem:[#allocation2 + $0x60] sm:$0x8] }
 0x229   : > { %v3819_v2 = vshrl.u32 %v3758_v11, 16  ;;  %v3826_v62 = vrot.slane %v3824_v6, 7  ;;  %v5464_v38 = vor.u32 %v5722_v10, %v5463_v49  ;;  %v3827_v59 = vshll.u32 %v3759_v50, 16  ;;  %v3764_v27 = vld [vmem:[#allocation2 + $0x6c] sm:$0x8] }
 0x22a   : > { %v3840_v12 = vshll.u32 %v3761_v31, 16  ;;  %v3605_v34 = vshrl.u32 %v3516_v63, 16  ;;  %v3603_v29 = vsel %vm6106_vm5, %v3598_v1, %v3602_v26  ;;  %v3608_v58 = vshll.u32 %v3516_v63, 16  ;;  %v4117_v1 = vld [vmem:[#allocation2 + $0x2c] sm:$0x1] }
 0x22b   : > { %v3619_v60 = vshrl.u32 %v3518_v28, 16  ;;  %v3622_v43 = vshll.u32 %v3518_v28, 16  ;;  %v5390_v45 = vrot.slane %v3832_v23, 11  ;;  %v3589_v54 = vsel %vm6106_vm5, %v3584_v30, %v3588_v4  ;;  %v5696_v26 = vld [vmem:[#allocation2 + $0x60] sm:$0xf0] }
 0x22c   : > { %v3842_v3 = vor.u32 %v3840_v12, %v3839_v22  ;;  %v5389_v46 = vrot.slane %v3819_v2, 11  ;;  %v3829_v57 = vor.u32 %v3827_v59, %v3826_v62  ;;  %v3654_v51 = vunpack.c.l.b16 %v3603_v29  ;;  %v5723_v49 = vld [vmem:[#allocation2 + $0x54] sm:$0xf0] }
 0x22d   : > { %v3607_v40 = vrot.slane %v3605_v34, 4  ;;  %v3610_v7 = vrot.slane %v3608_v58, 5  ;;  %v3621_v21 = vrot.slane %v3619_v60, 4  ;;  %v3624_v13 = vrot.slane %v3622_v43, 5  ;;  %v5303_v62 = vld [vmem:[#allocation2 + $0x58] sm:$0xf] }
 0x22e   : > { %v3653_v47 = vunpack.c.l.b16 %v3589_v54  ;;  %v3843_v42 = vsel %vm6084_vm2, %v5390_v45, %v3842_v3  ;;  %v3830_v55 = vsel %vm6084_vm2, %v5389_v46, %v3829_v57  ;;  %v3614_v31 = vshll.u32 %v3517_v33, 16  ;;  %v5467_v58 = vld [vmem:[#allocation2 + $0x4c] sm:$0xf]  ;;  %v4115_v60 = vld [vmem:[#allocation2 + $0x20] sm:$0x1] }
 0x22f   : > { %v3628_v50 = vshll.u32 %v3519_v41, 16  ;;  %v4145_v61 = vshrl.u32 %v4116_v0, 16  ;;  %v4148_v37 = vshll.u32 %v4116_v0, 16  ;;  %v3892_v17 = vunpack.c.l.b16 %v3843_v42 }
 0x230   : > { %3726 = vmatmul.bf16.gmra.mxu0 %v3658_v52  ;;  %v3765_v52 = vld [vmem:[#allocation2 + $0x70] sm:$0xf]  ;;  %v3659_v18 = vpack.c.b16 %v3654_v51, %v3653_v47  ;;  %v3611_v8 = vor.u32 %v3610_v7, %v3607_v40  ;;  %v3625_v25 = vor.u32 %v3624_v13, %v3621_v21  ;;  %v3850_v36 = vshrl.u32 %v3763_v56, 16 }
 0x231   : > { %v3863_v48 = vshrl.u32 %v3765_v52, 16  ;;  %v4131_v6 = vshrl.u32 %v4114_v39, 16  ;;  %v4134_v19 = vshll.u32 %v4114_v39, 16  ;;  %v3891_v11 = vunpack.c.l.b16 %v3830_v55 }
 0x232   : > { %v3845_v10 = vshrl.u32 %v3762_v35, 16  ;;  %v3630_v63 = vrot.slane %v3628_v50, 5  ;;  %v4147_v23 = vrot.slane %v4145_v61, 4  ;;  %v4150_v22 = vrot.slane %v4148_v37, 5 }
 0x233   : > { %v3897_v28 = vpack.c.b16 %v3892_v17, %v3891_v11  ;;  %v3612_v30 = vrot.slane %v3611_v8, 4  ;;  %v3626_v4 = vrot.slane %v3625_v25, 4  ;;  %v3852_v2 = vrot.slane %v3850_v36, 7 }
 0x234   : > { %3964 = vmatmul.bf16.gmra.mxu1 %v3896_v14  ;;  %v3616_v14 = vrot.slane %v3614_v31, 5  ;;  %v3866_v59 = vshll.u32 %v3765_v52, 16  ;;  %v4133_v12 = vrot.slane %v4131_v6, 4  ;;  %v4136_v34 = vrot.slane %v4134_v19, 5 }
 0x235   : > { %v5304_v29 = vor.u32 %v5696_v26, %v5303_v62  ;;  %v5468_v43 = vor.u32 %v5723_v49, %v5467_v58  ;;  %v3853_v45 = vshll.u32 %v3763_v56, 16  ;;  %v4151_v3 = vor.u32 %v4150_v22, %v4147_v23  ;;  %v4120_v56 = vld [vmem:[#allocation2 + $0x40] sm:$0xf]  ;;  %v4119_v23 = vld [vmem:[#allocation2 + $0x38] sm:$0x1] }
 0x236   : > { %3485 = vmatmul.bf16.gmra.mxu3 %v5300_v20  ;;  %v3858_v20 = vshrl.u32 %v3764_v27, 16  ;;  %v4154_v54 = vshll.u32 %v4117_v1, 16  ;;  %v3617_v46 = vsel %vm6106_vm5, %v3612_v30, %v3616_v14  ;;  %v3631_v57 = vsel %vm6106_vm5, %v3626_v4, %v3630_v63  ;;  %v4121_v14 = vld [vmem:[#allocation2 + $0x44] sm:$0x1]  ;;  %v5724_v1 = vld [vmem:[#allocation2 + $0x6c] sm:$0xf0] }
 0x237   : > { %v5391_v51 = vrot.slane %v3845_v10, 11  ;;  %v3855_v0 = vor.u32 %v3853_v45, %v3852_v2  ;;  %v4137_v40 = vor.u32 %v4136_v34, %v4133_v12  ;;  %v4140_v7 = vshll.u32 %v4115_v60, 16  ;;  %v5471_v10 = vld [vmem:[#allocation2 + $0x64] sm:$0xf]  ;;  %v4122_v58 = vld [vmem:[#allocation2 + $0x4c] sm:$0xf] }
 0x238   : > { %4090 = vmatmul.bf16.gmra.mxu2 %v5464_v38  ;;  %v3865_v38 = vrot.slane %v3863_v48, 7  ;;  %v5392_v33 = vrot.slane %v3858_v20, 11  ;;  %v3656_v21 = vunpack.c.l.b16 %v3631_v57  ;;  %v4152_v13 = vrot.slane %v4151_v3, 4 }
 0x239   : > { %v4156_v47 = vrot.slane %v4154_v54, 5  ;;  %v3655_v42 = vunpack.c.l.b16 %v3617_v46  ;;  %v3856_v55 = vsel %vm6084_vm2, %v5391_v51, %v3855_v0  ;;  %v4138_v52 = vrot.slane %v4137_v40, 4 }
 0x23a   : > { %v3868_v41 = vor.u32 %v3866_v59, %v3865_v38  ;;  %v4142_v39 = vrot.slane %v4140_v7, 5  ;;  %v4173_v61 = vshrl.u32 %v4120_v56, 16  ;;  %v4176_v37 = vshll.u32 %v4120_v56, 16  ;;  %v4124_v59 = vld [vmem:[#allocation2 + $0x58] sm:$0xf] }
 0x23b   : > { %v3660_v50 = vpack.c.b16 %v3656_v21, %v3655_v42  ;;  %v4157_v35 = vsel %vm6106_vm5, %v4152_v13, %v4156_v47  ;;  %v3893_v17 = vunpack.c.l.b16 %v3856_v55  ;;  %v5472_v49 = vor.u32 %v5724_v1, %v5471_v10  ;;  %v4125_v13 = vld [vmem:[#allocation2 + $0x5c] sm:$0x1] }
 0x23c   : > { %v3869_v31 = vsel %vm6084_vm2, %v5392_v33, %v3868_v41  ;;  %v4143_v25 = vsel %vm6106_vm5, %v4138_v52, %v4142_v39  ;;  %v4260_v48 = vunpack.c.l.b16 %v4157_v35  ;;  %v4175_v44 = vrot.slane %v4173_v61, 4 }
 0x23d   : > { %v3894_v8 = vunpack.c.l.b16 %v3869_v31  ;;  %v4178_v6 = vrot.slane %v4176_v37, 5  ;;  %v4259_v11 = vunpack.c.l.b16 %v4143_v25  ;;  %v4168_v4 = vshll.u32 %v4119_v23, 16  ;;  %v4123_v31 = vld [vmem:[#allocation2 + $0x50] sm:$0x1] }
 0x23e   : > { %v4201_v45 = vshrl.u32 %v4124_v59, 16  ;;  %v4204_v3 = vshll.u32 %v4124_v59, 16  ;;  %v4187_v57 = vshrl.u32 %v4122_v58, 16  ;;  %v4190_v51 = vshll.u32 %v4122_v58, 16  ;;  %v4127_v59 = vld [vmem:[#allocation2 + $0x68] sm:$0x1] }
 0x23f   : > { %v3898_v19 = vpack.c.b16 %v3894_v8, %v3893_v17  ;;  %v4267_v20 = vpack.c.b16 %v4260_v48, %v4259_v11  ;;  %v4179_v22 = vor.u32 %v4178_v6, %v4175_v44  ;;  %v4170_v34 = vrot.slane %v4168_v4, 5  ;;  %v4126_v8 = vld [vmem:[#allocation2 + $0x64] sm:$0xf] }
 0x240   : > { %3731 = vmatmul.bf16.gmra.mxu0 %v3659_v18  ;;  %v4118_v18 = vld [vmem:[#allocation2 + $0x34] sm:$0xf]  ;;  %v4203_v40 = vrot.slane %v4201_v45, 4  ;;  %v4206_v7 = vrot.slane %v4204_v3, 5  ;;  %v4189_v47 = vrot.slane %v4187_v57, 4  ;;  %v4192_v42 = vrot.slane %v4190_v51, 5 }
 0x241   : > { %v4159_v27 = vshrl.u32 %v4118_v18, 16  ;;  %v4162_v36 = vshll.u32 %v4118_v18, 16  ;;  %v4180_v62 = vrot.slane %v4179_v22, 4  ;;  %v4210_v39 = vshll.u32 %v4125_v13, 16 }
 0x242   : > { %v4207_v52 = vor.u32 %v4206_v7, %v4203_v40  ;;  %v4196_v35 = vshll.u32 %v4123_v31, 16  ;;  %v4218_v11 = vshll.u32 %v4126_v8, 16 }
 0x243   : > { %v4161_v26 = vrot.slane %v4159_v27, 4  ;;  %v4164_v63 = vrot.slane %v4162_v36, 5  ;;  %v4212_v17 = vrot.slane %v4210_v39, 5  ;;  %v4128_v27 = vld [vmem:[#allocation2 + $0x70] sm:$0xf] }
 0x244   : > { %3969 = vmatmul.bf16.gmra.mxu1 %v3897_v28  ;;  %v4182_v28 = vshll.u32 %v4121_v14, 16  ;;  %v4208_v37 = vrot.slane %v4207_v52, 4  ;;  %v4198_v44 = vrot.slane %v4196_v35, 5  ;;  %v4229_v1 = vshrl.u32 %v4128_v27, 16 }
 0x245   : > { %v4165_v30 = vor.u32 %v4164_v63, %v4161_v26  ;;  %v4232_v26 = vshll.u32 %v4128_v27, 16 }
 0x246   : > { %3490 = vmatmul.bf16.gmra.mxu3 %v5304_v29  ;;  %v4184_v38 = vrot.slane %v4182_v28, 5  ;;  %v4213_v10 = vsel %vm6106_vm5, %v4208_v37, %v4212_v17  ;;  %v4231_v4 = vrot.slane %v4229_v1, 4 }
 0x247   : > { %v4166_v12 = vrot.slane %v4165_v30, 4  ;;  %v4264_v23 = vunpack.c.l.b16 %v4213_v10  ;;  %v4220_v30 = vrot.slane %v4218_v11, 5 }
 0x248   : > { %4095 = vmatmul.bf16.gmra.mxu2 %v5468_v43  ;;  %v4185_v43 = vsel %vm6106_vm5, %v4180_v62, %v4184_v38 }
 0x249   : > { %v4171_v46 = vsel %vm6106_vm5, %v4166_v12, %v4170_v34  ;;  %v4262_v0 = vunpack.c.l.b16 %v4185_v43  ;;  %v4129_v12 = vld [vmem:[#allocation2 + $0x74] sm:$0x1] }
 0x24a   : > { %v4261_v21 = vunpack.c.l.b16 %v4171_v46  ;;  %v4238_v45 = vshll.u32 %v4129_v12, 16 }
 0x24c   : > { %v4268_v55 = vpack.c.b16 %v4262_v0, %v4261_v21 }
 0x250   : > { %3736 = vmatmul.bf16.gmra.mxu0 %v3660_v50  ;;  %v4193_v50 = vor.u32 %v4192_v42, %v4189_v47 }
 0x252   : > { %v4194_v48 = vrot.slane %v4193_v50, 4 }
 0x254   : > { %3974 = vmatmul.bf16.gmra.mxu1 %v3898_v19  ;;  %v4215_v19 = vshrl.u32 %v4126_v8, 16  ;;  %v4199_v63 = vsel %vm6106_vm5, %v4194_v48, %v4198_v44 }
 0x255   : > { %v4263_v38 = vunpack.c.l.b16 %v4199_v63 }
 0x256   : > { %4331 = vmatmul.bf16.vlgmr.msra.gmra.mxu3 %v4267_v20  ;;  %v4217_v22 = vrot.slane %v4215_v19, 4 }
 0x258   : > { %4100 = vmatmul.bf16.gmra.mxu2 %v5472_v49  ;;  %v4221_v58 = vor.u32 %v4220_v30, %v4217_v22 }
 0x259   : > { %v2781_v2 = vpop.f32.mrf.mxu3 }
 0x25a   : > { %v4222_v46 = vrot.slane %v4221_v58, 4 }
 0x25d   : > { %v2874_v29 = vpop.f32.mrf.mxu0 }
 0x25e   : > { %v2875_v60 = vadd.f32 %v2874_v29, %v2781_v2  ;;  %v4234_v2 = vrot.slane %v4232_v26, 5  ;;  %v4269_v29 = vpack.c.b16 %v4264_v23, %v4263_v38 }
 0x260   : > { %v3112_v54 = vpop.f32.mrf.mxu1  ;;  %v4235_v43 = vor.u32 %v4234_v2, %v4231_v4 }
 0x261   : > { %v3132_v33 = vadd.f32 %v3112_v54, %v2875_v60  ;;  %v6929_v41 = vpop.f32.mrf.mxu3  ;;  %v4224_v60 = vshll.u32 %v4127_v59, 16 }
 0x262   : > { %v4236_v51 = vrot.slane %v4235_v43, 4 }
 0x263   : > { %v4226_v57 = vrot.slane %v4224_v60, 5 }
 0x265   : > { %v6931_v56 = vpop.f32.mrf.mxu0  ;;  %v4227_v13 = vsel %vm6106_vm5, %v4222_v46, %v4226_v57 }
 0x266   : > { %4336 = vmatmul.bf16.gmra.mxu3 %v4268_v55  ;;  %v4265_v42 = vunpack.c.l.b16 %v4227_v13  ;;  %v2877_v43 = vadd.f32 %v6931_v56, %v6929_v41 }
 0x268   : > { %v6933_v18 = vpop.f32.mrf.mxu1 }
 0x269   : > { %v2786_v61 = vpop.f32.mrf.mxu3  ;;  %v3133_v57 = vadd.f32 %v6933_v18, %v2877_v43  ;;  %v6986_v18 = vld [vmem:[%s7053_s8] ss:$0 sm:$0xff] }
 0x26b   : > { %v3350_v25 = vpop.f32.mrf.mxu2 }
 0x26c   : > { %v3370_v36 = vadd.f32 %v3350_v25, %v3132_v33  ;;  %v4240_v33 = vrot.slane %v4238_v45, 5 }
 0x26d   : > { %v2879_v6 = vpop.f32.mrf.mxu0 }
 0x26e   : > { %v2880_v14 = vadd.f32 %v2879_v6, %v2786_v61  ;;  %v4241_v47 = vsel %vm6106_vm5, %v4236_v51, %v4240_v33 }
 0x26f   : > { %v4266_v55 = vunpack.c.l.b16 %v4241_v47 }
 0x271   : > { %v3117_v20 = vpop.f32.mrf.mxu1  ;;  %v6939_v49 = vpop.f32.mrf.mxu3  ;;  %v4270_v61 = vpack.c.b16 %v4266_v55, %v4265_v42 }
 0x272   : > { %v3134_v28 = vadd.f32 %v3117_v20, %v2880_v14 }
 0x273   : > { %v6941_v62 = vpop.f32.mrf.mxu2 }
 0x274   : > { %v3371_v33 = vadd.f32 %v6941_v62, %v3133_v57 }
 0x275   : > { %v6943_v34 = vpop.f32.mrf.mxu0 }
 0x276   : > { %4341 = vmatmul.bf16.gmra.mxu3 %v4269_v29  ;;  %v2882_v41 = vadd.f32 %v6943_v34, %v6939_v49  ;;  %v6994_v49 = vld [vmem:[%s7054_s9] ss:$0 sm:$0xff] }
 0x279   : > { %v6945_v3 = vpop.f32.mrf.mxu1  ;;  %v2791_v54 = vpop.f32.mrf.mxu3 }
 0x27b   : > { %v3355_v0 = vpop.f32.mrf.mxu2 }
 0x27c   : > { %v3372_v40 = vadd.f32 %v3355_v0, %v3134_v28 }
 0x27d   : > { %v2884_v7 = vpop.f32.mrf.mxu0 }
 0x27e   : > { %v2885_v21 = vadd.f32 %v2884_v7, %v2791_v54 }
 0x281   : > { %v3122_v31 = vpop.f32.mrf.mxu1  ;;  %v6951_v52 = vpop.f32.mrf.mxu3 }
 0x282   : > { %v3136_v39 = vadd.f32 %v3122_v31, %v2885_v21 }
 0x283   : > { %v6953_v50 = vpop.f32.mrf.mxu2 }
 0x285   : > { %v6955_v35 = vpop.f32.mrf.mxu0 }
 0x286   : > { %4346 = vmatmul.bf16.gmra.mxu3 %v4270_v61 }
 0x289   : > { %v6957_v37 = vpop.f32.mrf.mxu1  ;;  %v2796_v17 = vpop.f32.mrf.mxu3 }
 0x28b   : > { %v3360_v8 = vpop.f32.mrf.mxu2 }
 0x28c   : > { %v3374_v25 = vadd.f32 %v3360_v8, %v3136_v39  ;;  %v3135_v8 = vadd.f32 %v6945_v3, %v2882_v41 }
 0x28d   : > { %v2889_v27 = vpop.f32.mrf.mxu0 }
 0x28e   : > { %v2890_v15 = vadd.f32 %v2889_v27, %v2796_v17 }
 0x291   : > { %v3127_v48 = vpop.f32.mrf.mxu1  ;;  %v6959_v44 = vpop.f32.mrf.mxu3 }
 0x292   : > { %v3138_v6 = vadd.f32 %v3127_v48, %v2890_v15  ;;  %v3373_v48 = vadd.f32 %v6953_v50, %v3135_v8 }
 0x293   : > { %v6961_v19 = vpop.f32.mrf.mxu2 }
 0x295   : > { %v6963_v22 = vpop.f32.mrf.mxu0 }
 0x299   : > { %v3476_v11 = vpop.f32.mrf.mxu3  ;;  %v6967_v4 = vpop.f32.mrf.mxu1 }
 0x29a   : > { %v3496_v14 = vadd.f32 %v3476_v11, %v3370_v36 }
 0x29b   : > { %v3365_v10 = vpop.f32.mrf.mxu2 }
 0x29c   : > { %v3376_v1 = vadd.f32 %v3365_v10, %v3138_v6 }
 0x29d   : > { %v3722_v38 = vpop.f32.mrf.mxu0 }
 0x29e   : > { %v3742_v51 = vadd.f32 %v3722_v38, %v3496_v14 }
 0x2a1   : > { %v3478_v26 = vpop.f32.mrf.mxu3  ;;  %v3960_v12 = vpop.f32.mrf.mxu1 }
 0x2a2   : > { %v3497_v7 = vadd.f32 %v3478_v26, %v3371_v33 }
 0x2a3   : > { %v6969_v2 = vpop.f32.mrf.mxu2 }
 0x2a5   : > { %v3724_v60 = vpop.f32.mrf.mxu0 }
 0x2a6   : > { %v3743_v42 = vadd.f32 %v3724_v60, %v3497_v7  ;;  %v2887_v60 = vadd.f32 %v6955_v35, %v6951_v52 }
 0x2a9   : > { %v3481_v63 = vpop.f32.mrf.mxu3  ;;  %v3962_v45 = vpop.f32.mrf.mxu1 }
 0x2aa   : > { %v3498_v20 = vadd.f32 %v3481_v63, %v3372_v40  ;;  %v3980_v40 = vadd.f32 %v3960_v12, %v3742_v51  ;;  %v3981_v56 = vadd.f32 %v3962_v45, %v3743_v42 }
 0x2ab   : > { %v4086_v36 = vpop.f32.mrf.mxu2 }
 0x2ac   : > { %v4106_v21 = vadd.f32 %v4086_v36, %v3980_v40 }
 0x2ad   : > { %v3727_v0 = vpop.f32.mrf.mxu0 }
 0x2b1   : > { %v3483_v23 = vpop.f32.mrf.mxu3  ;;  %v3965_v13 = vpop.f32.mrf.mxu1 }
 0x2b2   : > { %v3499_v10 = vadd.f32 %v3483_v23, %v3373_v48 }
 0x2b3   : > { %v4088_v54 = vpop.f32.mrf.mxu2 }
 0x2b4   : > { %v4107_v61 = vadd.f32 %v4088_v54, %v3981_v56 }
 0x2b5   : > { %v3729_v62 = vpop.f32.mrf.mxu0 }
 0x2b6   : > { %v3745_v38 = vadd.f32 %v3729_v62, %v3499_v10 }
 0x2b9   : > { %v3486_v28 = vpop.f32.mrf.mxu3  ;;  %v3967_v15 = vpop.f32.mrf.mxu1 }
 0x2ba   : > { %v6965_v30 = vadd.f32 %v3486_v28, %v3374_v25  ;;  %v3744_v25 = vadd.f32 %v3727_v0, %v3498_v20  ;;  %v3983_v43 = vadd.f32 %v3967_v15, %v3745_v38 }
 0x2bb   : > { %v4091_v31 = vpop.f32.mrf.mxu2 }
 0x2bc   : > { %v3982_v14 = vadd.f32 %v3965_v13, %v3744_v25 }
 0x2bd   : > { %v3732_v20 = vpop.f32.mrf.mxu0 }
 0x2be   : > { %v4108_v26 = vadd.f32 %v4091_v31, %v3982_v14  ;;  %v3746_v51 = vadd.f32 %v3732_v20, %v6965_v30 }
 0x2c1   : > { %v6971_v59 = vpop.f32.mrf.mxu3 }
 0x2c3   : > { %v4093_v11 = vpop.f32.mrf.mxu2 }
 0x2c4   : > { %v4109_v57 = vadd.f32 %v4093_v11, %v3983_v43 }
 0x2c5   : > { %v3734_v40 = vpop.f32.mrf.mxu0 }
 0x2c9   : > { %v3491_v29 = vpop.f32.mrf.mxu3 }
 0x2ca   : > { %v6973_v58 = vadd.f32 %v3491_v29, %v3376_v1  ;;  %v3970_v29 = vpop.f32.mrf.mxu1 }
 0x2cb   : > { %v4096_v54 = vpop.f32.mrf.mxu2  ;;  %v3984_v13 = vadd.f32 %v3970_v29, %v3746_v51 }
 0x2d1   : > { %v6977_v46 = vpop.f32.mrf.mxu3 }
 0x2d2   : > { %v3972_v42 = vpop.f32.mrf.mxu1 }
 0x2d3   : > { %v4098_v30 = vpop.f32.mrf.mxu2 }
 0x2d9   : > { %v4332_v47 = vpop.f32.mrf.mxu3 }
 0x2da   : > { %v4352_v55 = vadd.f32 %v4332_v47, %v4106_v21 }
 0x2dc   : > { %v4360_v39 = vmax.f32 %v4352_v55, 0.0  ;;  %v4110_v55 = vadd.f32 %v4096_v54, %v3984_v13 }
 0x2de   : > { %v4372_v27 = vmul.f32 %v6986_v18, %v4360_v39 }
 0x2e0   : > { %v4384_v1 = vadd.f32 %v6994_v49, %v4372_v27  ;;  %v3975_v27 = vpop.f32.mrf.mxu1 }
 0x2e1   : > { %v4334_v17 = vpop.f32.mrf.mxu3 }
 0x2e2   : > { %v4353_v34 = vadd.f32 %v4334_v17, %v4107_v61  ;;  %v4392_v12 = vadd.f32 %v4384_v1, %v6075_v24  ;;  %v3737_v61 = vpop.f32.mrf.mxu0 }
 0x2e3   : > { %v3748_v48 = vadd.f32 %v3737_v61, %v6973_v58 }
 0x2e4   : > { %v4361_v6 = vmax.f32 %v4353_v34, 0.0 }
 0x2e5   : > { %v3986_v10 = vadd.f32 %v3975_v27, %v3748_v48 }
 0x2e6   : > { %v4373_v3 = vmul.f32 %v6986_v18, %v4361_v6 }
 0x2e8   : > { %v4385_v63 = vadd.f32 %v6994_v49, %v4373_v3  ;;  %v3977_v38 = vpop.f32.mrf.mxu1 }
 0x2e9   : > { %v4337_v28 = vpop.f32.mrf.mxu3 }
 0x2ea   : > { %v4393_v50 = vadd.f32 %v4385_v63, %v6090_v53  ;;  %v4354_v36 = vadd.f32 %v4337_v28, %v4108_v26  ;;  %v3137_v53 = vadd.f32 %v6957_v37, %v2887_v60  ;;  %v3739_v3 = vpop.f32.mrf.mxu0 }
 0x2ec   : > { %v5752_v23 = vpack.c.bf16 %v4393_v50, %v4392_v12  ;;  %v4362_v45 = vmax.f32 %v4354_v36, 0.0  ;;  %v3375_v7 = vadd.f32 %v6961_v19, %v3137_v53  ;;  %v7065_v53 = vld [vmem:[#allocation4_spill] sm:$0xff] }
 0x2ee   : > { %5753 = vst [vmem:[%s7006_s12] sm:$0xff] %v5752_v23   ;;  %v4374_v33 = vmul.f32 %v6986_v18, %v4362_v45  ;;  %v3501_v52 = vadd.f32 %v6971_v59, %v3375_v7  ;;  %v2892_v59 = vadd.f32 %v6963_v22, %v6959_v44 }
 0x2f0   : > { %v4386_v35 = vadd.f32 %v6994_v49, %v4374_v33  ;;  %v3747_v41 = vadd.f32 %v3734_v40, %v3501_v52  ;;  %v3139_v15 = vadd.f32 %v6967_v4, %v2892_v59 }
 0x2f1   : > { %v4339_v24 = vpop.f32.mrf.mxu3 }
 0x2f2   : > { %v4355_v0 = vadd.f32 %v4339_v24, %v4109_v57  ;;  %v4394_v56 = vadd.f32 %v4386_v35, %v6119_v32  ;;  %v3985_v17 = vadd.f32 %v3972_v42, %v3747_v41  ;;  %v3377_v11 = vadd.f32 %v6969_v2, %v3139_v15  ;;  %v7064_v57 = vld [vmem:[#allocation3_spill] sm:$0xff] }
 0x2f4   : > { %v4363_v21 = vmax.f32 %v4355_v0, 0.0  ;;  %v4111_v25 = vadd.f32 %v4098_v30, %v3985_v17  ;;  %v3503_v44 = vadd.f32 %v6977_v46, %v3377_v11 }
 0x2f6   : > { %v4375_v47 = vmul.f32 %v6986_v18, %v4363_v21  ;;  %v3749_v63 = vadd.f32 %v3739_v3, %v3503_v44 }
 0x2f8   : > { %v4387_v37 = vadd.f32 %v6994_v49, %v4375_v47  ;;  %v3987_v46 = vadd.f32 %v3977_v38, %v3749_v63 }
 0x2f9   : > { %v4342_v31 = vpop.f32.mrf.mxu3 }
 0x2fa   : > { %v4395_v19 = vadd.f32 %v4387_v37, %v6147_v16  ;;  %v4356_v39 = vadd.f32 %v4342_v31, %v4110_v55  ;;  %v4101_v16 = vpop.f32.mrf.mxu2 }
 0x2fb   : > { %v4112_v26 = vadd.f32 %v4101_v16, %v3986_v10 }
 0x2fc   : > { %v5757_v62 = vpack.c.bf16 %v4395_v19, %v4394_v56  ;;  %v4364_v8 = vmax.f32 %v4356_v39, 0.0 }
 0x2fe   : > { %5769 = vst [vmem:[%s7006_s12 + $0x8] sm:$0xff] %v5757_v62   ;;  %v4376_v32 = vmul.f32 %v6986_v18, %v4364_v8 }
 0x300   : > { %v4388_v22 = vadd.f32 %v6994_v49, %v4376_v32 }
 0x301   : > { %v4344_v34 = vpop.f32.mrf.mxu3 }
 0x302   : > { %v4357_v6 = vadd.f32 %v4344_v34, %v4111_v25  ;;  %v4396_v20 = vadd.f32 %v4388_v22, %v6184_v9  ;;  %v4103_v50 = vpop.f32.mrf.mxu2 }
 0x303   : > { %v4113_v23 = vadd.f32 %v4103_v50, %v3987_v46 }
 0x304   : > { %v4365_v14 = vmax.f32 %v4357_v6, 0.0 }
 0x306   : > { %v4377_v1 = vmul.f32 %v6986_v18, %v4365_v14 }
 0x308   : > { %v4389_v4 = vadd.f32 %v6994_v49, %v4377_v1 }
 0x309   : > { %v4347_v58 = vpop.f32.mrf.mxu3 }
 0x30a   : > { %v4397_v28 = vadd.f32 %v4389_v4, %v6232_v5  ;;  %v4358_v2 = vadd.f32 %v4347_v58, %v4112_v26 }
 0x30c   : > { %v5762_v12 = vpack.c.bf16 %v4397_v28, %v4396_v20  ;;  %v4366_v36 = vmax.f32 %v4358_v2, 0.0 }
 0x30e   : > { %5770 = vst [vmem:[%s7006_s12 + $0x10] sm:$0xff] %v5762_v12   ;;  %v4378_v60 = vmul.f32 %v6986_v18, %v4366_v36 }
 0x310   : > { %v4390_v54 = vadd.f32 %v6994_v49, %v4378_v60 }
 0x311   : > { %v4349_v29 = vpop.f32.mrf.mxu3 }
 0x312   : > { %v4359_v43 = vadd.f32 %v4349_v29, %v4113_v23  ;;  %v4398_v24 = vadd.f32 %v4390_v54, %v7064_v57 }
 0x314   : > { %v4367_v45 = vmax.f32 %v4359_v43, 0.0 }
 0x316   : > { %v4379_v9 = vmul.f32 %v6986_v18, %v4367_v45 }
 0x318   : > { %v4391_v5 = vadd.f32 %v6994_v49, %v4379_v9 }
 0x31a   : > { %v4399_v51 = vadd.f32 %v4391_v5, %v7065_v53 }
 0x31c   : > { %v5767_v33 = vpack.c.bf16 %v4399_v51, %v4398_v24 }
 0x31e   : > { %5771 = vst [vmem:[%s7006_s12 + $0x18] sm:$0xff] %v5767_v33  }
 0x31f PF: > { %s20_s13 = sadd.s32 1, %s5793_s13  }
 0x320   : > { %p17_p5 = scmp.ge.s32.totalorder %s20_s13, 4  }
 0x322   :  { %19 = sbr.rel (!%p17_p5) target bundleno = 1 (0x1), region = 108 }

// kernel: forward.4
= control target key start
LH: loop header
LB: loop body
LE: loop exit
PB: predicated region body
PF: predicated region fallthrough
CT: control target
= control target key end

     0   :  { %s6171_s13 = smov 0   ;;  %s6173_s14 = smov 0   ;;  %s7246_s0 = inlined_call_operand.vmem [shape: bf16[4,2,5,5,128], index: 0, kind: input, shape index: {}]   ;;  %s7247_s1 = inlined_call_operand.vmem [shape: bf16[9,128,128], index: 1, kind: input, shape index: {}]   ;;  %s7248_s2 = inlined_call_operand.vmem [shape: f32[1,128], index: 2, kind: input, shape index: {}]   ;;  %s7249_s3 = inlined_call_operand.vmem [shape: f32[1,128], index: 3, kind: input, shape index: {}]   ;;  %s7250_s4 = inlined_call_operand.vmem [shape: bf16[9,128,128], index: 4, kind: input, shape index: {}]   ;;  %s7251_s5 = inlined_call_operand.vmem [shape: f32[1,128], index: 5, kind: input, shape index: {}]   ;;  %s7252_s6 = inlined_call_operand.vmem [shape: f32[1,128], index: 6, kind: input, shape index: {}]   ;;  %s7253_s7 = inlined_call_operand.vmem [shape: bf16[9,128,128], index: 7, kind: input, shape index: {}]   ;;  %s7254_s8 = inlined_call_operand.vmem [shape: f32[1,128], index: 8, kind: input, shape index: {}]   ;;  %s7255_s9 = inlined_call_operand.vmem [shape: f32[1,128], index: 9, kind: input, shape index: {}]   ;;  %s7256_s10 = inlined_call_operand.vmem [shape: bf16[2,4,4,128], index: 10, kind: output, shape index: {}]  }
   0x1   :  { %s6175_s15 = smov 0  }
   0x2 LB: > { %s4530_s16 = sadd.s32 4294967295, %s6113_s15   ;;  %s6188_s17 = sadd.s32 1, %s6113_s15   ;;  %s6113_s15 = sphi %s6175_s15, %s7267_s15   ;;  %s6109_s14 = sphi %s6173_s14, %s7266_s14   ;;  %s6105_s13 = sphi %s6171_s13, %s7265_s13  }
   0x3   : > { %s24_s18 = ssub.s32 %s6113_s15, %s6188_s17  ;;  %s27_s19 = sadd.s32 1, %s6109_s14 }
   0x4   : > { %p25_p0 = scmp.eq.s32.totalorder %s24_s18, 0  ;;  %p34_p1 = scmp.ne.s32.totalorder %s6109_s14, %s6105_s13 }
   0x5   : > { %p35_p2 = scmp.eq.s32.totalorder %s6113_s15, 0  ;;  %p4533_p4 = scmp.ge.s32.totalorder %s6113_s15, 2 }
   0x6   : > { %s6197_s20 = scalar_select %p25_p0, %s6109_s14, %s27_s19  }
   0x7   : > { %p36_p3 = por %p35_p2, %p34_p1  ;;  %302 = sbr.rel (%p4533_p4) target bundleno = 29 (0x1d), region = 52 }
   0xc   : > { %305 = sbr.rel (!%p36_p3) target bundleno = 29 (0x1d), region = 56  ;;  %s307_s21 = sand.u32 (%p36_p3), 1, %s6109_s14  }
   0xd   : > { %s6058_s22 = smul.u32 (%p36_p3), 20, %s6113_s15 }
   0xe   : > { %s6057_s23 = smul.u32 (%p36_p3), 80, %s307_s21 }
   0xf   : > { %s312_s26 = scalar_lea.vmem (%p36_p3), %s7246_s0, %s6058_s22 }
  0x10   : > { %v329_v0 = vld [vmem:[%s312_s26] sm:$0xff] (%p36_p3)   ;;  %v333_v1 = vld [vmem:[%s312_s26 + $0x8] sm:$0xff] (%p36_p3)   ;;  %v337_v2 = vld [vmem:[%s312_s26 + $0x10] sm:$0xf] (%p36_p3)  ;;  %s309_s27 = scalar_lea.vmem (%p36_p3), [#allocation3], %s6057_s23 }
  0x11   : > { %330 = vst [vmem:[%s309_s27] sm:$0xff] %v329_v0   ;;  %v339_v3 = vld [vmem:[%s312_s26 + $0x28] sm:$0xff]   ;;  %v343_v4 = vld [vmem:[%s312_s26 + $0x30] sm:$0xff]   ;;  %v347_v5 = vld [vmem:[%s312_s26 + $0x38] sm:$0xf] }
  0x12   : > { %334 = vst [vmem:[%s309_s27 + $0x8] sm:$0xff] %v333_v1   ;;  %v349_v6 = vld [vmem:[%s312_s26 + $0x50] sm:$0xff]   ;;  %v353_v7 = vld [vmem:[%s312_s26 + $0x58] sm:$0xff]   ;;  %v357_v8 = vld [vmem:[%s312_s26 + $0x60] sm:$0xf] }
  0x13   : > { %338 = vst [vmem:[%s309_s27 + $0x10] sm:$0xf] %v337_v2  ;;  %v359_v9 = vld [vmem:[%s312_s26 + $0x78] sm:$0xff]   ;;  %v363_v10 = vld [vmem:[%s312_s26 + $0x80] sm:$0xff]   ;;  %v367_v11 = vld [vmem:[%s312_s26 + $0x88] sm:$0xf] }
  0x14   : > { %340 = vst [vmem:[%s309_s27 + $0x14] sm:$0xff] %v339_v3  }
  0x15   : > { %344 = vst [vmem:[%s309_s27 + $0x1c] sm:$0xff] %v343_v4  }
  0x16   : > { %348 = vst [vmem:[%s309_s27 + $0x24] sm:$0xf] %v347_v5 }
  0x17   : > { %350 = vst [vmem:[%s309_s27 + $0x28] sm:$0xff] %v349_v6  }
  0x18   : > { %354 = vst [vmem:[%s309_s27 + $0x30] sm:$0xff] %v353_v7  }
  0x19   : > { %358 = vst [vmem:[%s309_s27 + $0x38] sm:$0xf] %v357_v8 }
  0x1a   : > { %360 = vst [vmem:[%s309_s27 + $0x3c] sm:$0xff] %v359_v9  }
  0x1b   : > { %364 = vst [vmem:[%s309_s27 + $0x44] sm:$0xff] %v363_v10  }
  0x1c   : > { %368 = vst [vmem:[%s309_s27 + $0x4c] sm:$0xf] %v367_v11 }
  0x1d PF: > { %p4535_p5 = scmp.ge.s32.totalorder %s6113_s15, 1  ;;  %p431_p6 = scmp.lt.s32.totalorder %s6113_s15, 3 }
  0x1f   : > { %p432_p7 = pnand %p4535_p5, %p431_p6 }
  0x20   : > { %s438_s30 = sand.u32 (!%p432_p7), 1, %s6105_s13   ;;  %p475_p8 = scmp.lt.s32.totalorder (!%p432_p7), %s4530_s16, 1 }
  0x21   : > { %435 = sbr.rel (%p432_p7) target bundleno = 895 (0x37f), region = 97 }
  0x22   : > { %s6059_s13 = smul.u32 (!%p432_p7), 80, %s438_s30 }
  0x24   : > { %s6265_s25 = scalar_lea.vmem (!%p432_p7), [#allocation3], %s6059_s13 }
  0x26   : > { %v5856_v12 = vld [vmem:[%s7247_s1 + $0x78] sm:$0xff]  ;;  %v5855_v15 = vld [vmem:[%s7247_s1 + $0x70] sm:$0xff]  ;;  %v5854_v20 = vld [vmem:[%s7247_s1 + $0x68] sm:$0xff]  ;;  %vm711_vm0 = vsmask.f32 1280  ;;  %vm685_vm2 = vcmask 1041408  }
  0x27   : > { %v5864_v13 = vld [vmem:[%s7247_s1 + $0xb8] sm:$0xff]  ;;  %584 = vmatpush.bf16.msra.mxu0 %v5856_v12  ;;  %v5863_v16 = vld [vmem:[%s7247_s1 + $0xb0] sm:$0xff]  ;;  %v5862_v21 = vld [vmem:[%s7247_s1 + $0xa8] sm:$0xff]  ;;  %vm712_vm1 = vsmask.f32 3336  ;;  %vm689_vm3 = vcmask 1043458  }
  0x28   : > { %v5848_v14 = vld [vmem:[%s7247_s1 + $0x38] sm:$0xff]  ;;  %848 = vmatpush.bf16.msra.mxu2 %v5864_v13  ;;  %v5847_v18 = vld [vmem:[%s7247_s1 + $0x30] sm:$0xff]  ;;  %v5846_v22 = vld [vmem:[%s7247_s1 + $0x28] sm:$0xff]  ;;  %vm714_vm4 = vsmask.f32 5392  ;;  %s7269_s16 = smov (!%p475_p8, %s4530_s16), 1 }
  0x29   : > { %v5872_v17 = vld [vmem:[%s7247_s1 + $0xf8] sm:$0xff]  ;;  %659 = vmatpush.bf16.msra.mxu1 %v5848_v14  ;;  %v5871_v19 = vld [vmem:[%s7247_s1 + $0xf0] sm:$0xff]  ;;  %v5870_v23 = vld [vmem:[%s7247_s1 + $0xe8] sm:$0xff]  ;;  %vm716_vm5 = vsmask.f32 7448 }
  0x2a   : > { %947 = vmatpush.bf16.msra.mxu3 %v5872_v17  ;;  %v5853_v24 = vld [vmem:[%s7247_s1 + $0x60] sm:$0xff]  ;;  %v5852_v28 = vld [vmem:[%s7247_s1 + $0x58] sm:$0xff]  ;;  %v5851_v35 = vld [vmem:[%s7247_s1 + $0x50] sm:$0xff]  ;;  %vm1713_vm9 = vsmask.f32 256 }
  0x2b   : > { %585 = vmatpush.bf16.msra.mxu0 %v5855_v15  ;;  %v5861_v25 = vld [vmem:[%s7247_s1 + $0xa0] sm:$0xff]  ;;  %v5860_v29 = vld [vmem:[%s7247_s1 + $0x98] sm:$0xff]  ;;  %v5859_v37 = vld [vmem:[%s7247_s1 + $0x90] sm:$0xff]  ;;  %vm1714_vm10 = vsmask.f32 2312 }
  0x2c   : > { %849 = vmatpush.bf16.msra.mxu2 %v5863_v16  ;;  %v5845_v26 = vld [vmem:[%s7247_s1 + $0x20] sm:$0xff]  ;;  %v5844_v30 = vld [vmem:[%s7247_s1 + $0x18] sm:$0xff]  ;;  %v5843_v38 = vld [vmem:[%s7247_s1 + $0x10] sm:$0xff]  ;;  %vm1716_vm12 = vsmask.f32 4368 }
  0x2d   : > { %660 = vmatpush.bf16.msra.mxu1 %v5847_v18  ;;  %v5869_v27 = vld [vmem:[%s7247_s1 + $0xe0] sm:$0xff]  ;;  %v4538_v31 = vld [vmem:[%s6265_s25 + $0x14] sm:$0x3]  ;;  %v4541_v36 = vld [vmem:[%s6265_s25 + $0x20] sm:$0x3] }
  0x2e   : > { %948 = vmatpush.bf16.msra.mxu3 %v5871_v19  ;;  %v5868_v32 = vld [vmem:[%s7247_s1 + $0xd8] sm:$0xff]  ;;  %v4539_v33 = vld [vmem:[%s6265_s25 + $0x18] sm:$0x3]  ;;  %v4540_v34 = vld [vmem:[%s6265_s25 + $0x1c] sm:$0x3] }
  0x2f   : > { %586 = vmatpush.bf16.msra.mxu0 %v5854_v20  ;;  %524 = vst [vmem:[#allocation1] ss:$4 sm:$0xff] %v4538_v31  ;;  %v5867_v39 = vld [vmem:[%s7247_s1 + $0xd0] sm:$0xff]  ;;  %v673_v40 = vld [vmem:[%s6265_s25] sm:$0x7]  ;;  %v5849_v57 = vld [vmem:[%s7247_s1 + $0x40] sm:$0xff] }
  0x30   : > { %850 = vmatpush.bf16.msra.mxu2 %v5862_v21  ;;  %527 = vst [vmem:[#allocation1 + $0x1] ss:$4 sm:$0xff] %v4539_v33  ;;  %v674_v41 = vld [vmem:[%s6265_s25 + $0x4] sm:$0x7]  ;;  %v675_v42 = vld [vmem:[%s6265_s25 + $0x8] sm:$0x7]  ;;  %vm6340_vm6 = vmor %vm711_vm0, %vm712_vm1 }
  0x31   : > { %661 = vmatpush.bf16.msra.mxu1 %v5846_v22  ;;  %530 = vst [vmem:[#allocation1 + $0x2] ss:$4 sm:$0xff] %v4540_v34  ;;  %v676_v43 = vld [vmem:[%s6265_s25 + $0xc] sm:$0x7]  ;;  %v5850_v44 = vld [vmem:[%s7247_s1 + $0x48] sm:$0xff]  ;;  %v681_v45 = vrot.slane %v673_v40, 2  ;;  %vm6347_vm7 = vmor %vm6340_vm6, %vm714_vm4 }
  0x32   : > { %949 = vmatpush.bf16.msra.mxu3 %v5870_v23  ;;  %533 = vst [vmem:[#allocation1 + $0x3] ss:$4 sm:$0xff] %v4541_v36  ;;  %v682_v46 = vrot.slane %v674_v41, 2  ;;  %v683_v47 = vrot.slane %v675_v42, 2  ;;  %v5858_v48 = vld [vmem:[%s7247_s1 + $0x88] sm:$0xff]  ;;  %v684_v51 = vrot.slane %v676_v43, 2  ;;  %vm6366_vm8 = vmor %vm6347_vm7, %vm716_vm5 }
  0x33   : > { %587 = vmatpush.bf16.msra.mxu0 %v5853_v24  ;;  %v5842_v49 = vld [vmem:[%s7247_s1 + $0x8] sm:$0xff]  ;;  %v688_v53 = vsel %vm685_vm2, %v673_v40, %v681_v45  ;;  %v690_v54 = vsel %vm689_vm3, %v673_v40, %v681_v45  ;;  %v5857_v58 = vld [vmem:[%s7247_s1 + $0x80] sm:$0xff]  ;;  %v5880_v63 = vld [vmem:[%s7247_s1 + $0x138] sm:$0xff]  ;;  %vm1718_vm13 = vsmask.f32 6424 }
  0x34   : > { %851 = vmatpush.bf16.msra.mxu2 %v5861_v25  ;;  %v5866_v50 = vld [vmem:[%s7247_s1 + $0xc8] sm:$0xff]  ;;  %v695_v55 = vsel %vm685_vm2, %v674_v41, %v682_v46  ;;  %v696_v56 = vsel %vm689_vm3, %v674_v41, %v682_v46  ;;  %v692_v60 = vrot.slane %v690_v54, 2  ;;  %v702_v62 = vsel %vm689_vm3, %v675_v42, %v683_v47  ;;  %v5896_v0 = vld [vmem:[%s7247_s1 + $0x1b8] sm:$0xff]  ;;  %v5841_v5 = vld [vmem:[%s7247_s1] sm:$0xff] }
  0x35   : > { %662 = vmatpush.bf16.msra.mxu1 %v5845_v26  ;;  %v481_v52 = vld [vmem:[%s6265_s25] sm:$0x3]  ;;  %v482_v59 = vld [vmem:[%s6265_s25 + $0x4] sm:$0x3]  ;;  %v698_v61 = vrot.slane %v696_v56, 2  ;;  %v701_v1 = vsel %vm685_vm2, %v675_v42, %v683_v47  ;;  %v704_v2 = vrot.slane %v702_v62, 2  ;;  %v708_v3 = vsel %vm689_vm3, %v676_v43, %v684_v51  ;;  %vm1715_vm11 = vmor %vm1713_vm9, %vm1714_vm10 }
  0x36   : > { %950 = vmatpush.bf16.msra.mxu3 %v5869_v27  ;;  %v718_v4 = vshrl.u32 %v688_v53, 16  ;;  %v5865_v6 = vld [vmem:[%s7247_s1 + $0xc0] sm:$0xff]  ;;  %v721_v9 = vshll.u32 %v688_v53, 16  ;;  %v731_v10 = vshrl.u32 %v695_v55, 16  ;;  %v5888_v11 = vld [vmem:[%s7247_s1 + $0x178] sm:$0xff]  ;;  %v707_v14 = vsel %vm685_vm2, %v676_v43, %v684_v51  ;;  %v5895_v33 = vld [vmem:[%s7247_s1 + $0x1b0] sm:$0xff] }
  0x37   : > { %588 = vmatpush.bf16.msra.mxu0 %v5852_v28  ;;  %v483_v7 = vld [vmem:[%s6265_s25 + $0x8] sm:$0x3]  ;;  %v484_v8 = vld [vmem:[%s6265_s25 + $0xc] sm:$0x3]  ;;  %v5904_v12 = vld [vmem:[%s7247_s1 + $0x1f8] sm:$0xff]  ;;  %v710_v15 = vrot.slane %v708_v3, 2 }
  0x38   : > { %852 = vmatpush.bf16.msra.mxu2 %v5860_v29  ;;  %v720_v17 = vrot.slane %v718_v4, 6  ;;  %v734_v18 = vshll.u32 %v695_v55, 16  ;;  %v723_v19 = vrot.slane %v721_v9, 7  ;;  %v727_v20 = vshll.u32 %v692_v60, 16  ;;  %v5887_v41 = vld [vmem:[%s7247_s1 + $0x170] sm:$0xff]  ;;  %v5886_v55 = vld [vmem:[%s7247_s1 + $0x168] sm:$0xff]  ;;  %vm1717_vm14 = vmor %vm1715_vm11, %vm1716_vm12 }
  0x39   : > { %663 = vmatpush.bf16.msra.mxu1 %v5844_v30  ;;  %v534_v13 = vld.sshfl [vmem:[#allocation1] sm:$0xff pattern:$0x73625140]  ;;  %v733_v21 = vrot.slane %v731_v10, 6  ;;  %v744_v22 = vshrl.u32 %v701_v1, 16  ;;  %v740_v24 = vshll.u32 %v698_v61, 16  ;;  %vm6634_vm15 = vmor %vm1717_vm14, %vm1718_vm13 }
  0x3a   : > { %951 = vmatpush.bf16.msra.mxu3 %v5868_v32  ;;  %599 = vst [vmem:[#allocation1] ss:$4 sm:$0xff] %v481_v52  ;;  %v736_v23 = vrot.slane %v734_v18, 7  ;;  %v747_v25 = vshll.u32 %v701_v1, 16  ;;  %v753_v26 = vshll.u32 %v704_v2, 16  ;;  %v724_v28 = vor.u32 %v723_v19, %v720_v17  ;;  %v5879_v32 = vld [vmem:[%s7247_s1 + $0x130] sm:$0xff] }
  0x3b   : > { %589 = vmatpush.bf16.msra.mxu0 %v5851_v35  ;;  %602 = vst [vmem:[#allocation1 + $0x1] ss:$4 sm:$0xff] %v482_v59  ;;  %v746_v29 = vrot.slane %v744_v22, 6  ;;  %v757_v30 = vshrl.u32 %v707_v14, 16  ;;  %v760_v31 = vshll.u32 %v707_v14, 16  ;;  %v766_v36 = vshll.u32 %v710_v15, 16 }
  0x3c   : > { %853 = vmatpush.bf16.msra.mxu2 %v5859_v37  ;;  %605 = vst [vmem:[#allocation1 + $0x2] ss:$4 sm:$0xff] %v483_v7  ;;  %v737_v34 = vor.u32 %v736_v23, %v733_v21  ;;  %v749_v35 = vrot.slane %v747_v25, 7  ;;  %v725_v37 = vrot.slane %v724_v28, 2  ;;  %v5903_v42 = vld [vmem:[%s7247_s1 + $0x1f0] sm:$0xff]  ;;  %v742_v45 = vrot.slane %v740_v24, 7 }
  0x3d   : > { %664 = vmatpush.bf16.msra.mxu1 %v5843_v38  ;;  %608 = vst [vmem:[#allocation1 + $0x3] ss:$4 sm:$0xff] %v484_v8  ;;  %v729_v38 = vrot.slane %v727_v20, 7  ;;  %v762_v40 = vrot.slane %v760_v31, 7  ;;  %v755_v47 = vrot.slane %v753_v26, 7  ;;  %v768_v52 = vrot.slane %v766_v36, 7 }
  0x3e   : > { %952 = vmatpush.bf16.msra.mxu3 %v5867_v39  ;;  %v759_v39 = vrot.slane %v757_v30, 6  ;;  %v750_v46 = vor.u32 %v749_v35, %v746_v29  ;;  %v5902_v56 = vld [vmem:[%s7247_s1 + $0x1e8] sm:$0xff]  ;;  %v5877_v60 = vld [vmem:[%s7247_s1 + $0x120] sm:$0xff]  ;;  %v5876_v1 = vld [vmem:[%s7247_s1 + $0x118] sm:$0xff] }
  0x3f   : > { %590 = vmatpush.bf16.msra.mxu0 %v5850_v44  ;;  %v738_v44 = vrot.slane %v737_v34, 2  ;;  %v730_v53 = vsel %vm6366_vm8, %v725_v37, %v729_v38  ;;  %v5893_v61 = vld [vmem:[%s7247_s1 + $0x1a0] sm:$0xff]  ;;  %v5892_v2 = vld [vmem:[%s7247_s1 + $0x198] sm:$0xff]  ;;  %v5883_v18 = vld [vmem:[%s7247_s1 + $0x150] sm:$0xff] }
  0x40   : > { %854 = vmatpush.bf16.msra.mxu2 %v5858_v48  ;;  %v763_v48 = vor.u32 %v762_v40, %v759_v39  ;;  %v751_v51 = vrot.slane %v750_v46, 2  ;;  %v4774_v3 = vld [vmem:[%s6265_s25 + $0x28] sm:$0x7]  ;;  %v4775_v4 = vld [vmem:[%s6265_s25 + $0x2c] sm:$0x7]  ;;  %v5874_v23 = vld [vmem:[%s7247_s1 + $0x108] sm:$0xff] }
  0x41   : > { %665 = vmatpush.bf16.msra.mxu1 %v5842_v49  ;;  %v5878_v49 = vld [vmem:[%s7247_s1 + $0x128] sm:$0xff]  ;;  %v1070_v9 = vrot.slane %v4774_v3, 2  ;;  %v4670_v10 = vld [vmem:[%s6265_s25 + $0x28] sm:$0x3]  ;;  %v4671_v14 = vld [vmem:[%s6265_s25 + $0x2c] sm:$0x3] }
  0x42   : > { %953 = vmatpush.bf16.msra.mxu3 %v5866_v50  ;;  %v5894_v50 = vld [vmem:[%s7247_s1 + $0x1a8] sm:$0xff]  ;;  %v764_v54 = vrot.slane %v763_v48, 2  ;;  %v756_v59 = vsel %vm6366_vm8, %v751_v51, %v755_v47  ;;  %v5899_v19 = vld [vmem:[%s7247_s1 + $0x1d0] sm:$0xff]  ;;  %v5873_v35 = vld [vmem:[%s7247_s1 + $0x100] sm:$0xff] }
  0x43   : > { %591 = vmatpush.bf16.msra.mxu0 %v5849_v57  ;;  %v743_v57 = vsel %vm6366_vm8, %v738_v44, %v742_v45  ;;  %v4776_v7 = vld [vmem:[%s6265_s25 + $0x30] sm:$0x7]  ;;  %v4777_v8 = vld [vmem:[%s6265_s25 + $0x34] sm:$0x7]  ;;  %v1076_v22 = vsel %vm685_vm2, %v4774_v3, %v1070_v9  ;;  %v5889_v36 = vld [vmem:[%s7247_s1 + $0x180] sm:$0xff] }
  0x44   : > { %855 = vmatpush.bf16.msra.mxu2 %v5857_v58  ;;  %v609_v58 = vld.sshfl [vmem:[#allocation1] sm:$0xff pattern:$0x73625140]  ;;  %v769_v62 = vsel %vm6366_vm8, %v764_v54, %v768_v52  ;;  %v4672_v15 = vld [vmem:[%s6265_s25 + $0x30] sm:$0x3]  ;;  %v1072_v16 = vrot.slane %v4776_v7, 2 }
  0x45   : > { %666 = vmatpush.bf16.msra.mxu1 %v5841_v5  ;;  %788 = vst [vmem:[#allocation1] ss:$4 sm:$0xff] %v730_v53  ;;  %v5884_v5 = vld [vmem:[%s7247_s1 + $0x158] sm:$0xff]  ;;  %v1073_v20 = vrot.slane %v4777_v8, 2  ;;  %v5890_v24 = vld [vmem:[%s7247_s1 + $0x188] sm:$0xff]  ;;  %v1098_v30 = vshrl.u32 %v1076_v22, 16 }
  0x46   : > { %954 = vmatpush.bf16.msra.mxu3 %v5865_v6  ;;  %592 = vmatmul.bf16.vlgmr.msra.gmra.mxu0 %v534_v13  ;;  %791 = vst [vmem:[#allocation1 + $0x1] ss:$4 sm:$0xff] %v743_v57  ;;  %v5900_v6 = vld [vmem:[%s7247_s1 + $0x1d8] sm:$0xff]  ;;  %v1071_v13 = vrot.slane %v4775_v4, 2  ;;  %v1088_v26 = vsel %vm685_vm2, %v4776_v7, %v1072_v16  ;;  %v5882_v27 = vld [vmem:[%s7247_s1 + $0x148] sm:$0xff]  ;;  %v1101_v31 = vshll.u32 %v1076_v22, 16 }
  0x47   : > { %1046 = vmatpush.bf16.msrb.mxu0 %v5880_v63  ;;  %v5885_v63 = vld [vmem:[%s7247_s1 + $0x160] sm:$0xff]  ;;  %794 = vst [vmem:[#allocation1 + $0x2] ss:$4 sm:$0xff] %v756_v59  ;;  %v4673_v21 = vld [vmem:[%s6265_s25 + $0x34] sm:$0x3]  ;;  %v1094_v29 = vsel %vm685_vm2, %v4777_v8, %v1073_v20  ;;  %v1124_v38 = vshrl.u32 %v1088_v26, 16  ;;  %v1095_v48 = vsel %vm689_vm3, %v4777_v8, %v1073_v20 }
  0x48   : > { %1327 = vmatpush.bf16.msrb.mxu2 %v5896_v0  ;;  %667 = vmatmul.bf16.vlgmr.msra.gmra.mxu1 %v609_v58  ;;  %v5901_v0 = vld [vmem:[%s7247_s1 + $0x1e0] sm:$0xff]  ;;  %797 = vst [vmem:[#allocation1 + $0x3] ss:$4 sm:$0xff] %v769_v62  ;;  %v1082_v25 = vsel %vm685_vm2, %v4775_v4, %v1071_v13  ;;  %v5898_v28 = vld [vmem:[%s7247_s1 + $0x1c8] sm:$0xff]  ;;  %v1083_v37 = vsel %vm689_vm3, %v4775_v4, %v1071_v13  ;;  %v1127_v39 = vshll.u32 %v1088_v26, 16  ;;  %v5912_v40 = vld [vmem:[%s7247_s1 + $0x238] sm:$0xff] }
  0x49   : > { %1228 = vmatpush.bf16.msrb.mxu1 %v5888_v11  ;;  %v5875_v11 = vld [vmem:[%s7247_s1 + $0x110] sm:$0xff]  ;;  %v1114_v34 = vshll.u32 %v1082_v25, 16  ;;  %v1140_v44 = vshll.u32 %v1094_v29, 16  ;;  %v5881_v45 = vld [vmem:[%s7247_s1 + $0x140] sm:$0xff]  ;;  %v4723_v51 = vld [vmem:[%s6265_s25 + $0x40] sm:$0x3] }
  0x4a   : > { %1426 = vmatpush.bf16.msrb.mxu3 %v5904_v12  ;;  %v5891_v12 = vld [vmem:[%s7247_s1 + $0x190] sm:$0xff]  ;;  %v1085_v52 = vrot.slane %v1083_v37, 2  ;;  %v1126_v57 = vrot.slane %v1124_v38, 6  ;;  %v1129_v58 = vrot.slane %v1127_v39, 7  ;;  %v5910_v20 = vld [vmem:[%s7247_s1 + $0x228] sm:$0xff] }
  0x4b   : > { %1047 = vmatpush.bf16.msrb.mxu0 %v5879_v32  ;;  %v1077_v32 = vsel %vm689_vm3, %v4774_v3, %v1070_v9  ;;  %v4722_v46 = vld [vmem:[%s6265_s25 + $0x3c] sm:$0x3]  ;;  %v1116_v54 = vrot.slane %v1114_v34, 7  ;;  %v1142_v62 = vrot.slane %v1140_v44, 7  ;;  %v4931_v26 = vld [vmem:[%s6265_s25 + $0x8] sm:$0x7] }
  0x4c   : > { %1328 = vmatpush.bf16.msrb.mxu2 %v5895_v33  ;;  %v1111_v33 = vshrl.u32 %v1082_v25, 16  ;;  %v1079_v47 = vrot.slane %v1077_v32, 2  ;;  %v1120_v3 = vshll.u32 %v1085_v52, 16  ;;  %v5911_v4 = vld [vmem:[%s7247_s1 + $0x230] sm:$0xff]  ;;  %v5909_v25 = vld [vmem:[%s7247_s1 + $0x220] sm:$0xff] }
  0x4d   : > { %1229 = vmatpush.bf16.msrb.mxu1 %v5887_v41  ;;  %v1089_v41 = vsel %vm689_vm3, %v4776_v7, %v1072_v16  ;;  %v4826_v32 = vld [vmem:[%s6265_s25 + $0x4] sm:$0x3]  ;;  %v4827_v34 = vld [vmem:[%s6265_s25 + $0x8] sm:$0x3]  ;;  %v4828_v38 = vld [vmem:[%s6265_s25 + $0xc] sm:$0x3] }
  0x4e   : > { %1427 = vmatpush.bf16.msrb.mxu3 %v5903_v42  ;;  %v1137_v42 = vshrl.u32 %v1094_v29, 16  ;;  %v1113_v53 = vrot.slane %v1111_v33, 6  ;;  %v1122_v13 = vrot.slane %v1120_v3, 7  ;;  %v4933_v29 = vld [vmem:[%s6265_s25 + $0x10] sm:$0x7]  ;;  %v1451_v33 = vrot.slane %v4931_v26, 2 }
  0x4f   : > { %1048 = vmatpush.bf16.msrb.mxu0 %v5878_v49  ;;  %v798_v17 = vld.sshfl [vmem:[#allocation1] sm:$0xff pattern:$0x73625140]  ;;  %v1100_v49 = vrot.slane %v1098_v30, 6  ;;  %v5908_v30 = vld [vmem:[%s7247_s1 + $0x218] sm:$0xff] }
  0x50   : > { %1329 = vmatpush.bf16.msrb.mxu2 %v5894_v50  ;;  %887 = vst [vmem:[#allocation1] ss:$4 sm:$0xff] %v4670_v10  ;;  %v1103_v50 = vrot.slane %v1101_v31, 7  ;;  %v4829_v39 = vld [vmem:[%s6265_s25 + $0x10] sm:$0x3] }
  0x51   : > { %1230 = vmatpush.bf16.msrb.mxu1 %v5886_v55  ;;  %856 = vmatmul.bf16.vlgmr.msra.gmra.mxu2 %v798_v17  ;;  %890 = vst [vmem:[#allocation1 + $0x1] ss:$4 sm:$0xff] %v4671_v14  ;;  %v4724_v55 = vld [vmem:[%s6265_s25 + $0x44] sm:$0x3] }
  0x52   : > { %1428 = vmatpush.bf16.msrb.mxu3 %v5902_v56  ;;  %893 = vst [vmem:[#allocation1 + $0x2] ss:$4 sm:$0xff] %v4672_v15  ;;  %v1091_v56 = vrot.slane %v1089_v41, 2  ;;  %v1462_v41 = vsel %vm685_vm2, %v4931_v26, %v1451_v33 }
  0x53   : > { %1049 = vmatpush.bf16.msrb.mxu0 %v5877_v60  ;;  %896 = vst [vmem:[#allocation1 + $0x3] ss:$4 sm:$0xff] %v4673_v21  ;;  %v1097_v60 = vrot.slane %v1095_v48, 2 }
  0x54   : > { %1330 = vmatpush.bf16.msrb.mxu2 %v5893_v61  ;;  %v1139_v61 = vrot.slane %v1137_v42, 6  ;;  %v1133_v7 = vshll.u32 %v1091_v56, 16  ;;  %v5907_v42 = vld [vmem:[%s7247_s1 + $0x210] sm:$0xff]  ;;  %v5906_v56 = vld [vmem:[%s7247_s1 + $0x208] sm:$0xff] }
  0x55   : > { %1231 = vmatpush.bf16.msrb.mxu1 %v5885_v63  ;;  %v4725_v63 = vld [vmem:[%s6265_s25 + $0x48] sm:$0x3]  ;;  %v1146_v9 = vshll.u32 %v1097_v60, 16  ;;  %v4879_v60 = vld [vmem:[%s6265_s25 + $0x1c] sm:$0x3] }
  0x56   : > { %1429 = vmatpush.bf16.msrb.mxu3 %v5901_v0  ;;  %v1104_v0 = vor.u32 %v1103_v50, %v1100_v49  ;;  %v1143_v8 = vor.u32 %v1142_v62, %v1139_v61  ;;  %v1135_v15 = vrot.slane %v1133_v7, 7  ;;  %v1463_v49 = vsel %vm689_vm3, %v4931_v26, %v1451_v33 }
  0x57   : > { %1050 = vmatpush.bf16.msrb.mxu0 %v5876_v1  ;;  %v1107_v1 = vshll.u32 %v1079_v47, 16  ;;  %v1148_v17 = vrot.slane %v1146_v9, 7  ;;  %v1491_v50 = vshrl.u32 %v1462_v41, 16 }
  0x58   : > { %1331 = vmatpush.bf16.msrb.mxu2 %v5892_v2  ;;  %v1117_v2 = vor.u32 %v1116_v54, %v1113_v53  ;;  %v1105_v10 = vrot.slane %v1104_v0, 2  ;;  %v1144_v16 = vrot.slane %v1143_v8, 2  ;;  %v5905_v0 = vld [vmem:[%s7247_s1 + $0x200] sm:$0xff] }
  0x59   : > { %1232 = vmatpush.bf16.msrb.mxu1 %v5884_v5  ;;  %v5897_v5 = vld [vmem:[%s7247_s1 + $0x1c0] sm:$0xff] }
  0x5a   : > { %1430 = vmatpush.bf16.msrb.mxu3 %v5900_v6  ;;  %v897_v59 = vld.sshfl [vmem:[#allocation1] sm:$0xff pattern:$0x73625140]  ;;  %v1130_v6 = vor.u32 %v1129_v58, %v1126_v57 }
  0x5b   : > { %1051 = vmatpush.bf16.msrb.mxu0 %v5875_v11  ;;  %955 = vmatmul.bf16.vlgmr.msra.gmra.mxu3 %v897_v59  ;;  %986 = vst [vmem:[#allocation1] ss:$4 sm:$0xff] %v4722_v46  ;;  %v1109_v11 = vrot.slane %v1107_v1, 7  ;;  %v4878_v57 = vld [vmem:[%s6265_s25 + $0x18] sm:$0x3] }
  0x5c   : > { %1332 = vmatpush.bf16.msrb.mxu2 %v5891_v12  ;;  %989 = vst [vmem:[#allocation1 + $0x1] ss:$4 sm:$0xff] %v4723_v51  ;;  %v1118_v12 = vrot.slane %v1117_v2, 2  ;;  %v1131_v14 = vrot.slane %v1130_v6, 2  ;;  %v1494_v51 = vshll.u32 %v1462_v41, 16  ;;  %v1465_v2 = vrot.slane %v1463_v49, 2 }
  0x5d   : > { %1233 = vmatpush.bf16.msrb.mxu1 %v5883_v18  ;;  %992 = vst [vmem:[#allocation1 + $0x2] ss:$4 sm:$0xff] %v4724_v55  ;;  %v1110_v18 = vsel %vm6366_vm8, %v1105_v10, %v1109_v11  ;;  %v4880_v1 = vld [vmem:[%s6265_s25 + $0x20] sm:$0x3] }
  0x5e   : > { %1431 = vmatpush.bf16.msrb.mxu3 %v5899_v19  ;;  %995 = vst [vmem:[#allocation1 + $0x3] ss:$4 sm:$0xff] %v4725_v63  ;;  %v1123_v19 = vsel %vm6366_vm8, %v1118_v12, %v1122_v13  ;;  %v1136_v22 = vsel %vm6366_vm8, %v1131_v14, %v1135_v15  ;;  %v4881_v12 = vld [vmem:[%s6265_s25 + $0x24] sm:$0x3] }
  0x5f   : > { %1052 = vmatpush.bf16.msrb.mxu0 %v5874_v23  ;;  %v1149_v23 = vsel %vm6366_vm8, %v1144_v16, %v1148_v17  ;;  %v1500_v16 = vshll.u32 %v1465_v2, 16 }
  0x60   : > { %1333 = vmatpush.bf16.msrb.mxu2 %v5890_v24  ;;  %v4930_v24 = vld [vmem:[%s6265_s25 + $0x4] sm:$0x7] }
  0x61   : > { %1234 = vmatpush.bf16.msrb.mxu1 %v5882_v27  ;;  %v4932_v27 = vld [vmem:[%s6265_s25 + $0xc] sm:$0x7]  ;;  %v1450_v31 = vrot.slane %v4930_v24, 2  ;;  %s5840_s25 = sshll.u32 %s7269_s16, 3 }
  0x62   : > { %1432 = vmatpush.bf16.msrb.mxu3 %v5898_v28  ;;  %v6115_v28 = vmov 0   ;;  %s479_s15 = scalar_lea.vmem %s7256_s10, %s5840_s25 }
  0x63   : > { %1053 = vmatpush.bf16.msrb.mxu0 %v5873_v35  ;;  %1639 = vst [vmem:[#allocation2 + $0x4] sm:$0xf] %v6115_v28  ;;  %v1452_v35 = vrot.slane %v4932_v27, 2  ;;  %v1457_v48 = vsel %vm689_vm3, %v4930_v24, %v1450_v31 }
  0x64   : > { %1334 = vmatpush.bf16.msrb.mxu2 %v5889_v36  ;;  %1646 = vst [vmem:[#allocation2 + $0x20] sm:$0xf] %v6115_v28  ;;  %v1453_v36 = vrot.slane %v4933_v29, 2  ;;  %v1459_v61 = vrot.slane %v1457_v48, 2 }
  0x65   : > { %1235 = vmatpush.bf16.msrb.mxu1 %v5881_v45  ;;  %v996_v21 = vld.sshfl [vmem:[#allocation1] sm:$0xff pattern:$0x73625140]  ;;  %1648 = vst [vmem:[#allocation2 + $0x28] sm:$0xf] %v6115_v28  ;;  %v1468_v44 = vsel %vm685_vm2, %v4932_v27, %v1452_v35  ;;  %v1469_v52 = vsel %vm689_vm3, %v4932_v27, %v1452_v35 }
  0x66   : > { %1433 = vmatpush.bf16.msrb.mxu3 %v5897_v5  ;;  %1054 = vmatmul.bf16.vlgmr.msrb.gmra.mxu0 %v996_v21  ;;  %1168 = vst [vmem:[#allocation1] ss:$4 sm:$0xff] %v1110_v18  ;;  %v1474_v45 = vsel %vm685_vm2, %v4933_v29, %v1453_v36  ;;  %v1504_v53 = vshrl.u32 %v1468_v44, 16  ;;  %v1507_v54 = vshll.u32 %v1468_v44, 16  ;;  %v1475_v58 = vsel %vm689_vm3, %v4933_v29, %v1453_v36 }
  0x67   : > { %1608 = vmatpush.bf16.msra.mxu0 %v5912_v40  ;;  %1171 = vst [vmem:[#allocation1 + $0x1] ss:$4 sm:$0xff] %v1123_v19  ;;  %v1456_v40 = vsel %vm685_vm2, %v4930_v24, %v1450_v31  ;;  %v1517_v55 = vshrl.u32 %v1474_v45, 16  ;;  %v1520_v59 = vshll.u32 %v1474_v45, 16  ;;  %v1471_v3 = vrot.slane %v1469_v52, 2 }
  0x68   : > { %1174 = vst [vmem:[#allocation1 + $0x2] ss:$4 sm:$0xff] %v1136_v22  ;;  %v1478_v46 = vshrl.u32 %v1456_v40, 16  ;;  %v1481_v47 = vshll.u32 %v1456_v40, 16  ;;  %v1496_v5 = vrot.slane %v1494_v51, 7  ;;  %v1477_v6 = vrot.slane %v1475_v58, 2 }
  0x69   : > { %1177 = vst [vmem:[#allocation1 + $0x3] ss:$4 sm:$0xff] %v1149_v23  ;;  %v1506_v7 = vrot.slane %v1504_v53, 6  ;;  %v1509_v8 = vrot.slane %v1507_v54, 7  ;;  %v1519_v9 = vrot.slane %v1517_v55, 6  ;;  %v1522_v11 = vrot.slane %v1520_v59, 7 }
  0x6a   : > { %1638 = vst [vmem:[#allocation2] sm:$0xf] %v6115_v28  ;;  %v1480_v62 = vrot.slane %v1478_v46, 6  ;;  %v1483_v63 = vrot.slane %v1481_v47, 7  ;;  %v1487_v14 = vshll.u32 %v1459_v61, 16  ;;  %v1513_v18 = vshll.u32 %v1471_v3, 16 }
  0x6b   : > { %1609 = vmatpush.bf16.msra.mxu0 %v5911_v4  ;;  %1640 = vst [vmem:[#allocation2 + $0x8] sm:$0xf] %v6115_v28  ;;  %v1493_v4 = vrot.slane %v1491_v50, 6  ;;  %v1510_v17 = vor.u32 %v1509_v8, %v1506_v7  ;;  %v1523_v19 = vor.u32 %v1522_v11, %v1519_v9  ;;  %v1502_v24 = vrot.slane %v1500_v16, 7  ;;  %v5928_v51 = vld [vmem:[%s7250_s4 + $0x78] sm:$0xff]  ;;  %v5926_v61 = vld [vmem:[%s7250_s4 + $0x68] sm:$0xff] }
  0x6c   : > { %1641 = vst [vmem:[#allocation2 + $0xc] sm:$0xf] %v6115_v28  ;;  %v1484_v13 = vor.u32 %v1483_v63, %v1480_v62  ;;  %v1489_v22 = vrot.slane %v1487_v14, 7  ;;  %v1515_v26 = vrot.slane %v1513_v18, 7  ;;  %1862 = vmatpush.bf16.msra.mxu1 %v5928_v51  ;;  %v6085_v8 = vld [vmem:[%s7248_s2] ss:$0 sm:$0xff] }
  0x6d   : > { %1642 = vst [vmem:[#allocation2 + $0x10] sm:$0xf] %v6115_v28  ;;  %v1497_v15 = vor.u32 %v1496_v5, %v1493_v4  ;;  %v1524_v27 = vrot.slane %v1523_v19, 2  ;;  %v5920_v4 = vld [vmem:[%s7250_s4 + $0x38] sm:$0xff]  ;;  %v5923_v19 = vld [vmem:[%s7250_s4 + $0x50] sm:$0xff] }
  0x6e   : > { %1643 = vst [vmem:[#allocation2 + $0x14] sm:$0xf] %v6115_v28  ;;  %v1485_v21 = vrot.slane %v1484_v13, 2  ;;  %1937 = vmatpush.bf16.msra.mxu2 %v5920_v4  ;;  %v5924_v11 = vld [vmem:[%s7250_s4 + $0x58] sm:$0xff] }
  0x6f   : > { %1610 = vmatpush.bf16.msra.mxu0 %v5910_v20  ;;  %1644 = vst [vmem:[#allocation2 + $0x18] sm:$0xf] %v6115_v28  ;;  %v1526_v20 = vshll.u32 %v1477_v6, 16  ;;  %v1498_v23 = vrot.slane %v1497_v15, 2  ;;  %v5919_v15 = vld [vmem:[%s7250_s4 + $0x30] sm:$0xff] }
  0x70   : > { %v1178_v37 = vld.sshfl [vmem:[#allocation1] sm:$0xff pattern:$0x73625140]  ;;  %1645 = vst [vmem:[#allocation2 + $0x1c] sm:$0xf] %v6115_v28  ;;  %v1490_v29 = vsel %vm6366_vm8, %v1485_v21, %v1489_v22  ;;  %v5918_v22 = vld [vmem:[%s7250_s4 + $0x28] sm:$0xff] }
  0x71   : > { %1267 = vst [vmem:[#allocation1] ss:$4 sm:$0xff] %v4826_v32  ;;  %1236 = vmatmul.bf16.vlgmr.msrb.gmra.mxu1 %v1178_v37  ;;  %v1677_v35 = vld [vmem:[#allocation2] sm:$0x8] }
  0x72   : > { %1270 = vst [vmem:[#allocation1 + $0x1] ss:$4 sm:$0xff] %v4827_v34  ;;  %v1678_v34 = vld [vmem:[#allocation2 + $0x4] sm:$0x3]  ;;  %1938 = vmatpush.bf16.msra.mxu2 %v5919_v15 }
  0x73   : > { %1611 = vmatpush.bf16.msra.mxu0 %v5909_v25  ;;  %1273 = vst [vmem:[#allocation1 + $0x2] ss:$4 sm:$0xff] %v4828_v38  ;;  %v1511_v25 = vrot.slane %v1510_v17, 2 }
  0x74   : > { %1276 = vst [vmem:[#allocation1 + $0x3] ss:$4 sm:$0xff] %v4829_v39  ;;  %v1681_v37 = vld [vmem:[#allocation2 + $0x10] sm:$0x8] }
  0x75   : > { %1647 = vst [vmem:[#allocation2 + $0x24] sm:$0xf] %v6115_v28  ;;  %v1516_v32 = vsel %vm6366_vm8, %v1511_v25, %v1515_v26 }
  0x76   : > { %1649 = vst [vmem:[#allocation2 + $0x2c] sm:$0xf] %v6115_v28  ;;  %v1528_v28 = vrot.slane %v1526_v20, 7  ;;  %1939 = vmatpush.bf16.msra.mxu2 %v5918_v22 }
  0x77   : > { %1612 = vmatpush.bf16.msra.mxu0 %v5908_v30  ;;  %v1503_v30 = vsel %vm6366_vm8, %v1498_v23, %v1502_v24  ;;  %v5936_v23 = vld [vmem:[%s7250_s4 + $0xb8] sm:$0xff] }
  0x78   : > { %v1529_v33 = vsel %vm6366_vm8, %v1524_v27, %v1528_v28  ;;  %2117 = vmatpush.bf16.msra.mxu3 %v5936_v23  ;;  %v5922_v27 = vld [vmem:[%s7250_s4 + $0x48] sm:$0xff]  ;;  %v1683_v28 = vld [vmem:[#allocation2 + $0x18] sm:$0x8] }
  0x7b   : > { %1613 = vmatpush.bf16.msra.mxu0 %v5907_v42  ;;  %v1277_v10 = vld.sshfl [vmem:[#allocation1] sm:$0xff pattern:$0x73625140] }
  0x7c   : > { %1335 = vmatmul.bf16.vlgmr.msrb.gmra.mxu2 %v1277_v10  ;;  %1366 = vst [vmem:[#allocation1] ss:$4 sm:$0xff] %v4878_v57  ;;  %v6086_v10 = vld [vmem:[%s7249_s3] ss:$0 sm:$0xff] }
  0x7d   : > { %1369 = vst [vmem:[#allocation1 + $0x1] ss:$4 sm:$0xff] %v4879_v60 }
  0x7e   : > { %1372 = vst [vmem:[#allocation1 + $0x2] ss:$4 sm:$0xff] %v4880_v1  ;;  %v5925_v1 = vld [vmem:[%s7250_s4 + $0x60] sm:$0xff] }
  0x7f   : > { %1614 = vmatpush.bf16.msra.mxu0 %v5906_v56  ;;  %1375 = vst [vmem:[#allocation1 + $0x3] ss:$4 sm:$0xff] %v4881_v12  ;;  %v5927_v56 = vld [vmem:[%s7250_s4 + $0x70] sm:$0xff] }
  0x80   : > { %1863 = vmatpush.bf16.msra.mxu1 %v5927_v56  ;;  %v1679_v12 = vld [vmem:[#allocation2 + $0x8] sm:$0x8]  ;;  %v5914_v56 = vld [vmem:[%s7250_s4 + $0x8] sm:$0xff] }
  0x81   : > { %1694 = vst.sshfl [vmem:[#allocation1 + $0x20] sm:$0xff pattern:$0x75643120] %v1679_v12 }
  0x83   : > { %1615 = vmatpush.bf16.msra.mxu0 %v5905_v0 }
  0x84   : > { %1864 = vmatpush.bf16.msra.mxu1 %v5926_v61 }
  0x86   : > { %v1376_v31 = vld.sshfl [vmem:[#allocation1] sm:$0xff pattern:$0x73625140] }
  0x87   : > { %1434 = vmatmul.bf16.vlgmr.msrb.gmra.mxu3 %v1376_v31  ;;  %1548 = vst [vmem:[#allocation1] ss:$4 sm:$0xff] %v1490_v29  ;;  %v5917_v31 = vld [vmem:[%s7250_s4 + $0x20] sm:$0xff] }
  0x88   : > { %1551 = vst [vmem:[#allocation1 + $0x1] ss:$4 sm:$0xff] %v1503_v30  ;;  %1865 = vmatpush.bf16.msra.mxu1 %v5925_v1  ;;  %1940 = vmatpush.bf16.msra.mxu2 %v5917_v31 }
  0x89   : > { %1554 = vst [vmem:[#allocation1 + $0x2] ss:$4 sm:$0xff] %v1516_v32  ;;  %v5935_v32 = vld [vmem:[%s7250_s4 + $0xb0] sm:$0xff] }
  0x8a   : > { %1557 = vst [vmem:[#allocation1 + $0x3] ss:$4 sm:$0xff] %v1529_v33  ;;  %v6593_v33 = vld [vmem:[#allocation1 + $0x21] ss:$2 sm:$0xff]  ;;  %2118 = vmatpush.bf16.msra.mxu3 %v5935_v32 }
  0x8b   : > { %1688 = vst.sshfl [vmem:[#allocation1 + $0x10] sm:$0xff pattern:$0x75643120] %v1678_v34  ;;  %v1731_v12 = vshrl.u32 %v6593_v33, 16 }
  0x8c   : > { %1866 = vmatpush.bf16.msra.mxu1 %v5924_v11  ;;  %1708 = vst.sshfl [vmem:[#allocation1 + $0x20] sm:$0xff pattern:$0x75643120] %v1683_v28 }
  0x90   : > { %1867 = vmatpush.bf16.msra.mxu1 %v5923_v19 }
  0x91   : > { %v1558_v36 = vld.sshfl [vmem:[#allocation1] sm:$0xff pattern:$0x73625140] }
  0x92   : > { %1616 = vmatmul.bf16.vlgmr.msra.gmra.mxu0 %v1558_v36  ;;  %1686 = vst.sshfl [vmem:[#allocation1] sm:$0xff pattern:$0x75643120] %v1677_v35 }
  0x93   : > { %v1711_v19 = vld [vmem:[#allocation1 + $0x21] ss:$2 sm:$0xff] }
  0x94   : > { %1868 = vmatpush.bf16.msra.mxu1 %v5922_v27 }
  0x99   : > { %v6542_v38 = vld [vmem:[#allocation1 + $0x1] ss:$2 sm:$0xff] }
  0x9a   : > { %1702 = vst.sshfl [vmem:[#allocation1] sm:$0xff pattern:$0x75643120] %v1681_v37  ;;  %v1720_v1 = vshrl.u32 %v6542_v38, 16 }
  0x9c   : > { %v4982_v38 = vrot.slane %v1720_v1, 9 }
  0xa1   : > { %v1705_v51 = vld [vmem:[#allocation1 + $0x1] ss:$2 sm:$0xff] }
  0xc3   : > { %v593_v39 = vpop.f32.mrf.mxu0 }
  0xc5   : > { %v668_v40 = vpop.f32.mrf.mxu1 }
  0xc6   : > { %v669_v44 = vadd.f32 %v668_v40, %v593_v39  ;;  %v5921_v39 = vld [vmem:[%s7250_s4 + $0x40] sm:$0xff] }
  0xc7   : > { %1869 = vmatpush.bf16.msra.mxu1 %v5921_v39 }
  0xcb   : > { %v595_v42 = vpop.f32.mrf.mxu0 }
  0xcd   : > { %v670_v46 = vpop.f32.mrf.mxu1 }
  0xce   : > { %v671_v53 = vadd.f32 %v670_v46, %v595_v42  ;;  %v5934_v42 = vld [vmem:[%s7250_s4 + $0xa8] sm:$0xff]  ;;  %v5915_v46 = vld [vmem:[%s7250_s4 + $0x10] sm:$0xff] }
  0xcf   : > { %2119 = vmatpush.bf16.msra.mxu3 %v5934_v42 }
  0xd4   : > { %v857_v41 = vpop.f32.mrf.mxu2 }
  0xd5   : > { %v862_v47 = vadd.f32 %v857_v41, %v669_v44  ;;  %v5916_v41 = vld [vmem:[%s7250_s4 + $0x18] sm:$0xff] }
  0xd6   : > { %1941 = vmatpush.bf16.msra.mxu2 %v5916_v41 }
  0xda   : > { %1942 = vmatpush.bf16.msra.mxu2 %v5915_v46 }
  0xdc   : > { %v859_v48 = vpop.f32.mrf.mxu2 }
  0xdd   : > { %v863_v59 = vadd.f32 %v859_v48, %v671_v53  ;;  %v1692_v48 = vld [vmem:[#allocation1 + $0x10] ss:$2 sm:$0xff] }
  0xde   : > { %v956_v45 = vpop.f32.mrf.mxu3  ;;  %1943 = vmatpush.bf16.msra.mxu2 %v5914_v56  ;;  %v1724_v61 = vshrl.u32 %v1692_v48, 16 }
  0xdf   : > { %v961_v50 = vadd.f32 %v956_v45, %v862_v47  ;;  %v5933_v47 = vld [vmem:[%s7250_s4 + $0xa0] sm:$0xff] }
  0xe0   : > { %2120 = vmatpush.bf16.msra.mxu3 %v5933_v47 }
  0xe3   : > { %v1055_v49 = vpop.f32.mrf.mxu0 }
  0xe4   : > { %v1060_v54 = vadd.f32 %v1055_v49, %v961_v50 }
  0xe6   : > { %v958_v52 = vpop.f32.mrf.mxu3 }
  0xe7   : > { %v962_v63 = vadd.f32 %v958_v52, %v863_v59  ;;  %v5931_v59 = vld [vmem:[%s7250_s4 + $0x90] sm:$0xff] }
  0xeb   : > { %v1057_v58 = vpop.f32.mrf.mxu0 }
  0xec   : > { %v1061_v2 = vadd.f32 %v1057_v58, %v962_v63  ;;  %v5913_v58 = vld [vmem:[%s7250_s4] sm:$0xff] }
  0xed   : > { %1944 = vmatpush.bf16.msra.mxu2 %v5913_v58 }
  0xee   : > { %v1237_v55 = vpop.f32.mrf.mxu1 }
  0xef   : > { %v1242_v60 = vadd.f32 %v1237_v55, %v1060_v54 }
  0xf6   : > { %v1239_v5 = vpop.f32.mrf.mxu1 }
  0xf7   : > { %v1243_v13 = vadd.f32 %v1239_v5, %v1061_v2  ;;  %v1726_v5 = vrot.slane %v1724_v61, 7 }
  0xff   : > { %v1336_v57 = vpop.f32.mrf.mxu2 }
 0x100   : > { %v1341_v0 = vadd.f32 %v1336_v57, %v1242_v60  ;;  %v5932_v57 = vld [vmem:[%s7250_s4 + $0x98] sm:$0xff]  ;;  %v1780_v60 = vld [vmem:[#allocation2 + $0x4] sm:$0x3] }
 0x101   : > { %2121 = vmatpush.bf16.msra.mxu3 %v5932_v57 }
 0x105   : > { %2122 = vmatpush.bf16.msra.mxu3 %v5931_v59 }
 0x107   : > { %v1338_v9 = vpop.f32.mrf.mxu2 }
 0x108   : > { %v1342_v17 = vadd.f32 %v1338_v9, %v1243_v13 }
 0x10a   : > { %v1435_v62 = vpop.f32.mrf.mxu3 }
 0x10b   : > { %v1440_v3 = vadd.f32 %v1435_v62, %v1341_v0 }
 0x10f   : > { %v1617_v6 = vpop.f32.mrf.mxu0 }
 0x110   : > { %v1622_v7 = vadd.f32 %v1617_v6, %v1440_v3 }
 0x112   : > { %v1624_v14 = vmax.f32 %v1622_v7, 0.0  ;;  %v1437_v16 = vpop.f32.mrf.mxu3  ;;  %v1727_v7 = vshll.u32 %v1692_v48, 16 }
 0x113   : > { %v1441_v20 = vadd.f32 %v1437_v16, %v1342_v17 }
 0x114   : > { %v1630_v18 = vmul.f32 %v6085_v8, %v1624_v14  ;;  %v1729_v15 = vor.u32 %v1727_v7, %v1726_v5 }
 0x116   : > { %v6574_v21 = vadd.f32 %v6086_v10, %v1630_v18  ;;  %v1730_v33 = vsel %vm6634_vm15, %v4982_v38, %v1729_v15 }
 0x117   : > { %v1619_v24 = vpop.f32.mrf.mxu0 }
 0x118   : > { %v1650_v25 = vpack.c.bf16 %v6574_v21, %v6574_v21  ;;  %v1623_v26 = vadd.f32 %v1619_v24, %v1441_v20 }
 0x11a   : > { %v1654_v29 = vrot.slane %v1650_v25, 2  ;;  %v1625_v30 = vmax.f32 %v1623_v26, 0.0 }
 0x11c   : > { %v1658_v34 = vsel %vm685_vm2, %v1650_v25, %v1654_v29  ;;  %v1659_v35 = vsel %vm689_vm3, %v1650_v25, %v1654_v29  ;;  %v1631_v36 = vmul.f32 %v6085_v8, %v1625_v30  ;;  %v1951_v8 = vld [vmem:[#allocation2 + $0x4] sm:$0x7]  ;;  %v4983_v29 = vrot.slane %v1731_v12, 9  ;;  %v5944_v12 = vld [vmem:[%s7250_s4 + $0xf8] sm:$0xff] }
 0x11d   : > { %v1661_v37 = vrot.slane %v1659_v35, 2  ;;  %1673 = vst [vmem:[#allocation2 + $0xc] sm:$0x3] %v1658_v34  ;;  %v1959_v14 = vrot.slane %v1951_v8, 2  ;;  %v1753_v34 = vshrl.u32 %v1711_v19, 16  ;;  %2291 = vmatpush.bf16.msrb.mxu0 %v5944_v12 }
 0x11e   : > { %v6600_v40 = vadd.f32 %v6086_v10, %v1631_v36  ;;  %v1742_v10 = vshrl.u32 %v1705_v51, 16 }
 0x11f   : > { %1674 = vst [vmem:[#allocation2 + $0x14] sm:$0x3] %v1661_v37  ;;  %v1966_v25 = vsel %vm689_vm3, %v1951_v8, %v1959_v14  ;;  %v1965_v32 = vsel %vm685_vm2, %v1951_v8, %v1959_v14  ;;  %v4985_v51 = vrot.slane %v1753_v34, 9  ;;  %v5929_v8 = vld [vmem:[%s7250_s4 + $0x80] sm:$0xff] }
 0x120   : > { %v1651_v44 = vpack.c.bf16 %v6600_v40, %v6600_v40  ;;  %v4984_v22 = vrot.slane %v1742_v10, 9  ;;  %v1968_v37 = vrot.slane %v1966_v25, 2  ;;  %v1990_v46 = vshll.u32 %v1965_v32, 16 }
 0x122   : > { %v1655_v45 = vrot.slane %v1651_v44, 2  ;;  %v1996_v58 = vshll.u32 %v1968_v37, 16 }
 0x124   : > { %v1680_v49 = vld [vmem:[#allocation2 + $0xc] sm:$0x3]  ;;  %v1665_v50 = vsel %vm689_vm3, %v1651_v44, %v1655_v45  ;;  %v1664_v54 = vsel %vm685_vm2, %v1651_v44, %v1655_v45  ;;  %v1987_v45 = vshrl.u32 %v1965_v32, 16 }
 0x125   : > { %1696 = vst.sshfl [vmem:[#allocation1 + $0x30] sm:$0xff pattern:$0x75643120] %v1680_v49  ;;  %v1781_v53 = vld [vmem:[#allocation2 + $0xc] sm:$0x3]  ;;  %v1667_v55 = vrot.slane %v1665_v50, 2 }
 0x126   : > { %v1682_v52 = vld [vmem:[#allocation2 + $0x14] sm:$0x3]  ;;  %1675 = vst [vmem:[#allocation2 + $0x1c] sm:$0x3] %v1664_v54  ;;  %v1952_v9 = vld [vmem:[#allocation2 + $0xc] sm:$0x7] }
 0x127   : > { %1704 = vst.sshfl [vmem:[#allocation1 + $0x10] sm:$0xff pattern:$0x75643120] %v1682_v52  ;;  %v1782_v0 = vld [vmem:[#allocation2 + $0x14] sm:$0x3]  ;;  %v1960_v18 = vrot.slane %v1952_v9, 2 }
 0x128   : > { %1805 = vst [vmem:[#allocation1 + $0x1] ss:$4 sm:$0xff] %v1781_v53  ;;  %v1953_v17 = vld [vmem:[#allocation2 + $0x14] sm:$0x7]  ;;  %v2135_v50 = vld [vmem:[#allocation2 + $0x10] sm:$0x8] }
 0x129   : > { %1676 = vst [vmem:[#allocation2 + $0x24] sm:$0x3] %v1667_v55  ;;  %v2136_v26 = vld [vmem:[#allocation2 + $0x14] sm:$0x3]  ;;  %v1961_v31 = vrot.slane %v1953_v17, 2  ;;  %v1971_v35 = vsel %vm685_vm2, %v1952_v9, %v1960_v18  ;;  %v1972_v39 = vsel %vm689_vm3, %v1952_v9, %v1960_v18  ;;  %v5930_v54 = vld [vmem:[%s7250_s4 + $0x88] sm:$0xff] }
 0x12a   : > { %v2000_v49 = vshrl.u32 %v1971_v35, 16  ;;  %v1974_v55 = vrot.slane %v1972_v39, 2  ;;  %v1989_v61 = vrot.slane %v1987_v45, 6  ;;  %2150 = vst.sshfl [vmem:[#allocation1 + $0x20] sm:$0xff pattern:$0x75643120] %v2135_v50  ;;  %2123 = vmatpush.bf16.msra.mxu3 %v5930_v54 }
 0x12b   : > { %v1978_v48 = vsel %vm689_vm3, %v1953_v17, %v1961_v31  ;;  %v1977_v56 = vsel %vm685_vm2, %v1953_v17, %v1961_v31  ;;  %v1998_v9 = vrot.slane %v1996_v58, 7  ;;  %v2595_v45 = vld [vmem:[#allocation2 + $0x2c] sm:$0x3]  ;;  %v5960_v54 = vld [vmem:[%s7250_s4 + $0x178] sm:$0xff] }
 0x12c   : > { %v1700_v62 = vld [vmem:[#allocation1 + $0x30] ss:$2 sm:$0xff]  ;;  %v2013_v7 = vshrl.u32 %v1977_v56, 16  ;;  %v2009_v14 = vshll.u32 %v1974_v55, 16  ;;  %2571 = vmatpush.bf16.msrb.mxu2 %v5960_v54 }
 0x12d   : > { %v1684_v3 = vld [vmem:[#allocation2 + $0x1c] sm:$0x3]  ;;  %v1735_v6 = vshrl.u32 %v1700_v62, 16  ;;  %v1738_v20 = vshll.u32 %v1700_v62, 16  ;;  %v1992_v62 = vrot.slane %v1990_v46, 7  ;;  %v5940_v58 = vld [vmem:[%s7250_s4 + $0xd8] sm:$0xff] }
 0x12e   : > { %v1706_v63 = vld [vmem:[#allocation1 + $0x10] ss:$2 sm:$0xff]  ;;  %v1783_v4 = vld [vmem:[#allocation2 + $0x1c] sm:$0x3]  ;;  %v2015_v38 = vrot.slane %v2013_v7, 6  ;;  %2124 = vmatpush.bf16.msra.mxu3 %v5929_v8 }
 0x12f   : > { %1808 = vst [vmem:[#allocation1 + $0x2] ss:$4 sm:$0xff] %v1782_v0  ;;  %v1746_v2 = vshrl.u32 %v1706_v63, 16  ;;  %v1737_v13 = vrot.slane %v1735_v6, 7  ;;  %v1749_v16 = vshll.u32 %v1706_v63, 16  ;;  %v1993_v6 = vor.u32 %v1992_v62, %v1989_v61  ;;  %v5957_v8 = vld [vmem:[%s7250_s4 + $0x160] sm:$0xff] }
 0x130   : > { %1802 = vst [vmem:[#allocation1] ss:$4 sm:$0xff] %v1780_v60  ;;  %v1954_v24 = vld [vmem:[#allocation2 + $0x1c] sm:$0x7]  ;;  %v1980_v60 = vrot.slane %v1978_v48, 2  ;;  %v5942_v48 = vld [vmem:[%s7250_s4 + $0xe8] sm:$0xff] }
 0x131   : > { %1710 = vst.sshfl [vmem:[#allocation1 + $0x30] sm:$0xff pattern:$0x75643120] %v1684_v3  ;;  %v1748_v11 = vrot.slane %v1746_v2, 7  ;;  %v1740_v30 = vor.u32 %v1738_v20, %v1737_v13  ;;  %v1962_v36 = vrot.slane %v1954_v24, 2  ;;  %v2002_v2 = vrot.slane %v2000_v49, 6 }
 0x132   : > { %1811 = vst [vmem:[#allocation1 + $0x3] ss:$4 sm:$0xff] %v1783_v4  ;;  %v2140_v63 = vld [vmem:[#allocation2 + $0x24] sm:$0x3]  ;;  %v2003_v3 = vshll.u32 %v1971_v35, 16  ;;  %v1994_v13 = vrot.slane %v1993_v6, 2 }
 0x133   : > { %v1751_v23 = vor.u32 %v1749_v16, %v1748_v11  ;;  %v1741_v47 = vsel %vm6634_vm15, %v4983_v29, %v1740_v30  ;;  %v1984_v57 = vsel %vm689_vm3, %v1954_v24, %v1962_v36  ;;  %v1983_v1 = vsel %vm685_vm2, %v1954_v24, %v1962_v36  ;;  %v5943_v20 = vld [vmem:[%s7250_s4 + $0xf0] sm:$0xff]  ;;  %v6667_v29 = vld [vmem:[#allocation1 + $0x21] ss:$2 sm:$0xff]  ;;  %v5952_v49 = vld [vmem:[%s7250_s4 + $0x138] sm:$0xff] }
 0x134   : > { %v1986_v5 = vrot.slane %v1984_v57, 2  ;;  %v2005_v10 = vrot.slane %v2003_v3, 7  ;;  %v2016_v11 = vshll.u32 %v1977_v56, 16  ;;  %v2022_v15 = vshll.u32 %v1980_v60, 16  ;;  %v2591_v30 = vld [vmem:[#allocation2 + $0x1c] sm:$0x3]  ;;  %2292 = vmatpush.bf16.msrb.mxu0 %v5943_v20  ;;  %2389 = vmatpush.bf16.msrb.mxu1 %v5952_v49 }
 0x135   : > { %v1752_v42 = vsel %vm6634_vm15, %v4984_v22, %v1751_v23  ;;  %v2026_v18 = vshrl.u32 %v1983_v1, 16  ;;  %v2029_v19 = vshll.u32 %v1983_v1, 16  ;;  %v2139_v23 = vld [vmem:[#allocation2 + $0x20] sm:$0x8]  ;;  %v1999_v31 = vsel %vm6366_vm8, %v1994_v13, %v1998_v9  ;;  %v2134_v50 = vld [vmem:[#allocation2 + $0xc] sm:$0x3] }
 0x136   : > { %v2006_v16 = vor.u32 %v2005_v10, %v2002_v2  ;;  %v2018_v17 = vrot.slane %v2016_v11, 7  ;;  %v2035_v22 = vshll.u32 %v1986_v5, 16  ;;  %2164 = vst.sshfl [vmem:[#allocation1 + $0x20] sm:$0xff pattern:$0x75643120] %v2139_v23  ;;  %v2024_v35 = vrot.slane %v2022_v15, 7 }
 0x137   : > { %v5959_v56 = vld [vmem:[%s7250_s4 + $0x170] sm:$0xff]  ;;  %v2138_v60 = vld [vmem:[#allocation2 + $0x1c] sm:$0x3]  ;;  %v2137_v9 = vld [vmem:[#allocation2 + $0x18] sm:$0x8]  ;;  %v2180_v13 = vshrl.u32 %v6667_v29, 16 }
 0x138   : > { %v1712_v27 = vld [vmem:[#allocation1 + $0x30] ss:$2 sm:$0xff]  ;;  %v2007_v24 = vrot.slane %v2006_v16, 2  ;;  %v2019_v25 = vor.u32 %v2018_v17, %v2015_v38  ;;  %2293 = vmatpush.bf16.msrb.mxu0 %v5942_v48  ;;  %v2133_v57 = vld [vmem:[#allocation2 + $0x8] sm:$0x8]  ;;  %2572 = vmatpush.bf16.msrb.mxu2 %v5959_v56  ;;  %v5949_v3 = vld [vmem:[%s7250_s4 + $0x120] sm:$0xff] }
 0x139   : > { %2152 = vst.sshfl [vmem:[#allocation1 + $0x30] sm:$0xff pattern:$0x75643120] %v2136_v26  ;;  %v1812_v41 = vld.sshfl [vmem:[#allocation1] sm:$0xff pattern:$0x73625140] }
 0x13a   : > { %v1757_v44 = vshrl.u32 %v1712_v27, 16  ;;  %1870 = vmatmul.bf16.vlgmr.msra.gmra.mxu1 %v1812_v41  ;;  %1877 = vst [vmem:[#allocation1] ss:$4 sm:$0xff] %v1730_v33  ;;  %v1760_v53 = vshll.u32 %v1712_v27, 16  ;;  %v2028_v26 = vrot.slane %v2026_v18, 6  ;;  %v2031_v27 = vrot.slane %v2029_v19, 7 }
 0x13b   : > { %1880 = vst [vmem:[#allocation1 + $0x1] ss:$4 sm:$0xff] %v1741_v47  ;;  %v2011_v33 = vrot.slane %v2009_v14, 7  ;;  %v2020_v34 = vrot.slane %v2019_v25, 2  ;;  %v2590_v47 = vld [vmem:[#allocation2 + $0x18] sm:$0x8] }
 0x13c   : > { %v1759_v52 = vrot.slane %v1757_v44, 7  ;;  %1883 = vst [vmem:[#allocation1 + $0x2] ss:$4 sm:$0xff] %v1752_v42  ;;  %v2032_v36 = vor.u32 %v2031_v27, %v2028_v26  ;;  %v2037_v42 = vrot.slane %v2035_v22, 7  ;;  %v2594_v62 = vld [vmem:[#allocation2 + $0x28] sm:$0x8] }
 0x13d   : > { %v2012_v39 = vsel %vm6366_vm8, %v2007_v24, %v2011_v33  ;;  %v2025_v44 = vsel %vm6366_vm8, %v2020_v34, %v2024_v35  ;;  %v5939_v2 = vld [vmem:[%s7250_s4 + $0xd0] sm:$0xff]  ;;  %v5938_v10 = vld [vmem:[%s7250_s4 + $0xc8] sm:$0xff]  ;;  %v5948_v11 = vld [vmem:[%s7250_s4 + $0x118] sm:$0xff]  ;;  %v5115_v33 = vrot.slane %v2180_v13, 9 }
 0x13e   : > { %v1762_v59 = vor.u32 %v1760_v53, %v1759_v52  ;;  %v2033_v41 = vrot.slane %v2032_v36, 2  ;;  %v5951_v52 = vld [vmem:[%s7250_s4 + $0x130] sm:$0xff]  ;;  %v6691_v53 = vld [vmem:[#allocation1 + $0x21] ss:$2 sm:$0xff]  ;;  %v5956_v19 = vld [vmem:[%s7250_s4 + $0x158] sm:$0xff] }
 0x13f   : > { %2605 = vst.sshfl [vmem:[#allocation1 + $0x20] sm:$0xff pattern:$0x75643120] %v2590_v47  ;;  %2390 = vmatpush.bf16.msrb.mxu1 %v5951_v52  ;;  %v3084_v38 = vld [vmem:[#allocation2 + $0x8] sm:$0x8]  ;;  %v2202_v17 = vshrl.u32 %v6691_v53, 16 }
 0x140   : > { %v6653_v0 = vld [vmem:[#allocation1 + $0x30] ss:$2 sm:$0xff]  ;;  %v1763_v4 = vsel %vm6634_vm15, %v4985_v51, %v1762_v59  ;;  %v2038_v46 = vsel %vm6366_vm8, %v2033_v41, %v2037_v42  ;;  %v5941_v51 = vld [vmem:[%s7250_s4 + $0xe0] sm:$0xff]  ;;  %v5950_v59 = vld [vmem:[%s7250_s4 + $0x128] sm:$0xff] }
 0x141   : > { %2166 = vst.sshfl [vmem:[#allocation1 + $0x30] sm:$0xff pattern:$0x75643120] %v2140_v63  ;;  %2294 = vmatpush.bf16.msrb.mxu0 %v5941_v51  ;;  %v5958_v63 = vld [vmem:[%s7250_s4 + $0x168] sm:$0xff]  ;;  %v2184_v5 = vshrl.u32 %v6653_v0, 16  ;;  %v2187_v23 = vshll.u32 %v6653_v0, 16 }
 0x142   : > { %1886 = vst [vmem:[#allocation1 + $0x3] ss:$4 sm:$0xff] %v1763_v4  ;;  %2573 = vmatpush.bf16.msrb.mxu2 %v5958_v63  ;;  %v5937_v24 = vld [vmem:[%s7250_s4 + $0xc0] sm:$0xff]  ;;  %v5947_v25 = vld [vmem:[%s7250_s4 + $0x110] sm:$0xff]  ;;  %v2406_v41 = vld [vmem:[#allocation2 + $0x14] sm:$0x7] }
 0x143   : > { %2391 = vmatpush.bf16.msrb.mxu1 %v5950_v59  ;;  %v2186_v14 = vrot.slane %v2184_v5, 7  ;;  %v5955_v0 = vld [vmem:[%s7250_s4 + $0x150] sm:$0xff]  ;;  %v2408_v48 = vld [vmem:[#allocation2 + $0x24] sm:$0x7]  ;;  %v2414_v52 = vrot.slane %v2406_v41, 2  ;;  %v5945_v53 = vld [vmem:[%s7250_s4 + $0x100] sm:$0xff] }
 0x144   : > { %v2405_v35 = vld [vmem:[#allocation2 + $0xc] sm:$0x7] }
 0x145   : > { %2295 = vmatpush.bf16.msrb.mxu0 %v5940_v58  ;;  %v2189_v34 = vor.u32 %v2187_v23, %v2186_v14  ;;  %v2416_v58 = vrot.slane %v2408_v48, 2  ;;  %v2426_v13 = vsel %vm689_vm3, %v2406_v41, %v2414_v52 }
 0x146   : > { %v6717_v6 = vld [vmem:[#allocation1 + $0x21] ss:$2 sm:$0xff]  ;;  %2574 = vmatpush.bf16.msrb.mxu2 %v5957_v8  ;;  %v2307_v8 = vld [vmem:[#allocation2 + $0xc] sm:$0x3] }
 0x147   : > { %2619 = vst.sshfl [vmem:[#allocation1 + $0x20] sm:$0xff pattern:$0x75643120] %v2594_v62  ;;  %2392 = vmatpush.bf16.msrb.mxu1 %v5949_v3  ;;  %v2190_v47 = vsel %vm6634_vm15, %v5115_v33, %v2189_v34  ;;  %v2437_v63 = vsel %vm685_vm2, %v2408_v48, %v2416_v58  ;;  %v2310_v34 = vld [vmem:[#allocation2 + $0x24] sm:$0x3] }
 0x148   : > { %v6671_v32 = vld [vmem:[#allocation1 + $0x30] ss:$2 sm:$0xff] }
 0x149   : > { %2607 = vst.sshfl [vmem:[#allocation1 + $0x30] sm:$0xff pattern:$0x75643120] %v2591_v30  ;;  %v1887_v37 = vld.sshfl [vmem:[#allocation1] sm:$0xff pattern:$0x73625140]  ;;  %2296 = vmatpush.bf16.msrb.mxu0 %v5939_v2 }
 0x14a   : > { %1945 = vmatmul.bf16.vlgmr.msra.gmra.mxu2 %v1887_v37  ;;  %2057 = vst [vmem:[#allocation1] ss:$4 sm:$0xff] %v1999_v31  ;;  %v2206_v7 = vshrl.u32 %v6671_v32, 16  ;;  %v2209_v30 = vshll.u32 %v6671_v32, 16  ;;  %v5117_v37 = vrot.slane %v2202_v17, 9  ;;  %v5946_v32 = vld [vmem:[%s7250_s4 + $0x108] sm:$0xff] }
 0x14b   : > { %2060 = vst [vmem:[#allocation1 + $0x1] ss:$4 sm:$0xff] %v2012_v39  ;;  %2393 = vmatpush.bf16.msrb.mxu1 %v5948_v11  ;;  %2575 = vmatpush.bf16.msrb.mxu2 %v5956_v19  ;;  %v2483_v11 = vshll.u32 %v2437_v63, 16  ;;  %v2309_v17 = vld [vmem:[#allocation2 + $0x1c] sm:$0x3] }
 0x14c   : > { %2063 = vst [vmem:[#allocation1 + $0x2] ss:$4 sm:$0xff] %v2025_v44  ;;  %v2208_v18 = vrot.slane %v2206_v7, 7  ;;  %v2413_v44 = vrot.slane %v2405_v35, 2 }
 0x14d   : > { %2066 = vst [vmem:[#allocation1 + $0x3] ss:$4 sm:$0xff] %v2038_v46  ;;  %2297 = vmatpush.bf16.msrb.mxu0 %v5938_v10  ;;  %v2480_v10 = vshrl.u32 %v2437_v63, 16  ;;  %v2485_v33 = vrot.slane %v2483_v11, 7  ;;  %v2588_v11 = vld [vmem:[#allocation2 + $0x10] sm:$0x8] }
 0x14e   : > { %2144 = vst.sshfl [vmem:[#allocation1 + $0x10] sm:$0xff pattern:$0x75643120] %v2134_v50  ;;  %v6742_v31 = vld [vmem:[#allocation1 + $0x21] ss:$2 sm:$0xff]  ;;  %v2211_v39 = vor.u32 %v2209_v30, %v2208_v18  ;;  %v2419_v59 = vsel %vm685_vm2, %v2405_v35, %v2413_v44 }
 0x14f   : > { %3099 = vst.sshfl [vmem:[#allocation1 + $0x20] sm:$0xff pattern:$0x75643120] %v3084_v38  ;;  %2394 = vmatpush.bf16.msrb.mxu1 %v5947_v25  ;;  %2576 = vmatpush.bf16.msrb.mxu2 %v5955_v0  ;;  %v2444_v2 = vshll.u32 %v2419_v59, 16  ;;  %v2482_v30 = vrot.slane %v2480_v10, 6  ;;  %v5981_v10 = vld [vmem:[%s7250_s4 + $0x220] sm:$0xff] }
 0x150   : > { %v6696_v55 = vld [vmem:[#allocation1 + $0x30] ss:$2 sm:$0xff]  ;;  %v2212_v51 = vsel %vm6634_vm15, %v5117_v37, %v2211_v39 }
 0x151   : > { %2621 = vst.sshfl [vmem:[#allocation1 + $0x30] sm:$0xff pattern:$0x75643120] %v2595_v45  ;;  %2298 = vmatpush.bf16.msrb.mxu0 %v5937_v24  ;;  %v2407_v45 = vld [vmem:[#allocation2 + $0x1c] sm:$0x7]  ;;  %v2446_v38 = vrot.slane %v2444_v2, 7  ;;  %v2438_v24 = vsel %vm689_vm3, %v2408_v48, %v2416_v58 }
 0x152   : > { %v2415_v54 = vrot.slane %v2407_v45, 2  ;;  %v5983_v58 = vld [vmem:[%s7250_s4 + $0x230] sm:$0xff] }
 0x153   : > { %2395 = vmatpush.bf16.msrb.mxu1 %v5946_v32 }
 0x154   : > { %v2067_v61 = vld.sshfl [vmem:[#allocation1] sm:$0xff pattern:$0x73625140]  ;;  %v2431_v62 = vsel %vm685_vm2, %v2407_v45, %v2415_v54  ;;  %v2432_v19 = vsel %vm689_vm3, %v2407_v45, %v2415_v54  ;;  %v5976_v45 = vld [vmem:[%s7250_s4 + $0x1f8] sm:$0xff]  ;;  %v5975_v54 = vld [vmem:[%s7250_s4 + $0x1f0] sm:$0xff] }
 0x155   : > { %v2148_v1 = vld [vmem:[#allocation1 + $0x10] ss:$2 sm:$0xff]  ;;  %2125 = vmatmul.bf16.vlgmr.msra.gmra.mxu3 %v2067_v61  ;;  %2142 = vst.sshfl [vmem:[#allocation1] sm:$0xff pattern:$0x75643120] %v2133_v57  ;;  %v2425_v61 = vsel %vm685_vm2, %v2406_v41, %v2414_v52  ;;  %v2467_v5 = vshrl.u32 %v2431_v62, 16  ;;  %2844 = vmatpush.bf16.msra.mxu0 %v5976_v45 }
 0x156   : > { %2160 = vst.sshfl [vmem:[#allocation1 + $0x10] sm:$0xff pattern:$0x75643120] %v2138_v60  ;;  %v2173_v4 = vshrl.u32 %v2148_v1, 16  ;;  %v2176_v16 = vshll.u32 %v2148_v1, 16  ;;  %v2441_v1 = vshrl.u32 %v2419_v59, 16 }
 0x157   : > { %2396 = vmatpush.bf16.msrb.mxu1 %v5945_v53  ;;  %v2454_v3 = vshrl.u32 %v2425_v61, 16  ;;  %v2470_v7 = vshll.u32 %v2431_v62, 16  ;;  %v2469_v25 = vrot.slane %v2467_v5, 6  ;;  %v2434_v0 = vrot.slane %v2432_v19, 2  ;;  %v5982_v5 = vld [vmem:[%s7250_s4 + $0x228] sm:$0xff]  ;;  %v5971_v19 = vld [vmem:[%s7250_s4 + $0x1d0] sm:$0xff] }
 0x158   : > { %v2175_v12 = vrot.slane %v2173_v4, 7  ;;  %v2457_v4 = vshll.u32 %v2425_v61, 16  ;;  %v2443_v14 = vrot.slane %v2441_v1, 6  ;;  %v5965_v1 = vld [vmem:[%s7250_s4 + $0x1a0] sm:$0xff] }
 0x159   : > { %2845 = vmatpush.bf16.msra.mxu0 %v5975_v54 }
 0x15a   : > { %v2178_v27 = vor.u32 %v2176_v16, %v2175_v12  ;;  %v2308_v12 = vld [vmem:[#allocation2 + $0x14] sm:$0x3] }
 0x15b   : > { %v5968_v16 = vld [vmem:[%s7250_s4 + $0x1b8] sm:$0xff] }
 0x15c   : > { %v2146_v15 = vld [vmem:[#allocation1 + $0x1] ss:$2 sm:$0xff]  ;;  %2746 = vmatpush.bf16.msrb.mxu3 %v5968_v16  ;;  %v5980_v16 = vld [vmem:[%s7250_s4 + $0x218] sm:$0xff] }
 0x15d   : > { %v2162_v20 = vld [vmem:[#allocation1 + $0x10] ss:$2 sm:$0xff]  ;;  %2158 = vst.sshfl [vmem:[#allocation1] sm:$0xff pattern:$0x75643120] %v2137_v9  ;;  %v2169_v22 = vshrl.u32 %v2146_v15, 16  ;;  %v2420_v9 = vsel %vm689_vm3, %v2405_v35, %v2413_v44  ;;  %v2447_v35 = vor.u32 %v2446_v38, %v2443_v14 }
 0x15e   : > { %v2195_v29 = vshrl.u32 %v2162_v20, 16  ;;  %v2198_v50 = vshll.u32 %v2162_v20, 16  ;;  %v5954_v15 = vld [vmem:[%s7250_s4 + $0x148] sm:$0xff]  ;;  %v2456_v20 = vrot.slane %v2454_v3, 6  ;;  %v2422_v23 = vrot.slane %v2420_v9, 2  ;;  %v5967_v44 = vld [vmem:[%s7250_s4 + $0x1b0] sm:$0xff] }
 0x15f   : > { %v5114_v26 = vrot.slane %v2169_v22, 9  ;;  %v2459_v22 = vrot.slane %v2457_v4, 7  ;;  %2577 = vmatpush.bf16.msrb.mxu2 %v5954_v15  ;;  %v5974_v3 = vld [vmem:[%s7250_s4 + $0x1e8] sm:$0xff]  ;;  %v5973_v9 = vld [vmem:[%s7250_s4 + $0x1e0] sm:$0xff]  ;;  %v5972_v14 = vld [vmem:[%s7250_s4 + $0x1d8] sm:$0xff] }
 0x160   : > { %v2197_v42 = vrot.slane %v2195_v29, 7  ;;  %v2428_v29 = vrot.slane %v2426_v13, 2  ;;  %v2450_v39 = vshll.u32 %v2422_v23, 16  ;;  %2747 = vmatpush.bf16.msrb.mxu3 %v5967_v44  ;;  %2846 = vmatpush.bf16.msra.mxu0 %v5974_v3  ;;  %v2593_v13 = vld [vmem:[#allocation2 + $0x24] sm:$0x3]  ;;  %v2639_v23 = vshrl.u32 %v6696_v55, 16 }
 0x161   : > { %v2179_v36 = vsel %vm6634_vm15, %v5114_v26, %v2178_v27  ;;  %v2472_v26 = vrot.slane %v2470_v7, 7  ;;  %v5953_v27 = vld [vmem:[%s7250_s4 + $0x140] sm:$0xff]  ;;  %v2460_v37 = vor.u32 %v2459_v22, %v2456_v20  ;;  %v2589_v7 = vld [vmem:[#allocation2 + $0x14] sm:$0x3] }
 0x162   : > { %2231 = vst [vmem:[#allocation1] ss:$4 sm:$0xff] %v2179_v36  ;;  %v2200_v57 = vor.u32 %v2198_v50, %v2197_v42  ;;  %v2440_v36 = vrot.slane %v2438_v24, 2  ;;  %v2463_v41 = vshll.u32 %v2428_v29, 16  ;;  %v2486_v42 = vor.u32 %v2485_v33, %v2482_v30  ;;  %v5966_v50 = vld [vmem:[%s7250_s4 + $0x1a8] sm:$0xff]  ;;  %v5979_v24 = vld [vmem:[%s7250_s4 + $0x210] sm:$0xff] }
 0x163   : > { %v2473_v32 = vor.u32 %v2472_v26, %v2469_v25  ;;  %2578 = vmatpush.bf16.msrb.mxu2 %v5953_v27  ;;  %v2461_v48 = vrot.slane %v2460_v37, 2  ;;  %v2452_v52 = vrot.slane %v2450_v39, 7  ;;  %v2623_v38 = vld [vmem:[#allocation1 + $0x30] ss:$2 sm:$0xff]  ;;  %v2592_v25 = vld [vmem:[#allocation2 + $0x20] sm:$0x8] }
 0x164   : > { %v2161_v46 = vld [vmem:[#allocation1 + $0x1] ss:$2 sm:$0xff]  ;;  %2748 = vmatpush.bf16.msrb.mxu3 %v5966_v50  ;;  %2847 = vmatpush.bf16.msra.mxu0 %v5973_v9  ;;  %v2661_v22 = vshrl.u32 %v2623_v38, 16  ;;  %v2657_v27 = vshrl.u32 %v6742_v31, 16  ;;  %v2664_v33 = vshll.u32 %v2623_v38, 16  ;;  %v2641_v37 = vrot.slane %v2639_v23, 7 }
 0x165   : > { %v2191_v49 = vshrl.u32 %v2161_v46, 16  ;;  %2234 = vst [vmem:[#allocation1 + $0x1] ss:$4 sm:$0xff] %v2190_v47  ;;  %v2448_v46 = vrot.slane %v2447_v35, 2  ;;  %v2476_v47 = vshll.u32 %v2434_v0, 16  ;;  %v2474_v53 = vrot.slane %v2473_v32, 2 }
 0x166   : > { %2240 = vst [vmem:[#allocation1 + $0x3] ss:$4 sm:$0xff] %v2212_v51  ;;  %v5984_v51 = vld [vmem:[%s7250_s4 + $0x238] sm:$0xff]  ;;  %v5961_v26 = vld [vmem:[%s7250_s4 + $0x180] sm:$0xff]  ;;  %v2663_v30 = vrot.slane %v2661_v22, 7  ;;  %v2642_v31 = vshll.u32 %v6696_v55, 16 }
 0x167   : > { %v5116_v56 = vrot.slane %v2191_v49, 9  ;;  %v2489_v49 = vshll.u32 %v2440_v36, 16  ;;  %3026 = vmatpush.bf16.msra.mxu1 %v5984_v51  ;;  %v2478_v61 = vrot.slane %v2476_v47, 7  ;;  %v2635_v36 = vshrl.u32 %v6717_v6, 16  ;;  %v5969_v47 = vld [vmem:[%s7250_s4 + $0x1c0] sm:$0xff] }
 0x168   : > { %2749 = vmatpush.bf16.msrb.mxu3 %v5965_v1  ;;  %2848 = vmatpush.bf16.msra.mxu0 %v5972_v14  ;;  %v2644_v6 = vor.u32 %v2642_v31, %v2641_v37  ;;  %v2861_v51 = vld [vmem:[#allocation2 + $0x1c] sm:$0x7] }
 0x169   : > { %v2201_v60 = vsel %vm6634_vm15, %v5116_v56, %v2200_v57  ;;  %v2465_v56 = vrot.slane %v2463_v41, 7  ;;  %v2487_v57 = vrot.slane %v2486_v42, 2  ;;  %v2491_v63 = vrot.slane %v2489_v49, 7  ;;  %v2860_v49 = vld [vmem:[#allocation2 + $0x14] sm:$0x7]  ;;  %v5977_v9 = vld [vmem:[%s7250_s4 + $0x200] sm:$0xff] }
 0x16a   : > { %2237 = vst [vmem:[#allocation1 + $0x2] ss:$4 sm:$0xff] %v2201_v60  ;;  %v2453_v60 = vsel %vm6366_vm8, %v2448_v46, %v2452_v52  ;;  %v2479_v2 = vsel %vm6366_vm8, %v2474_v53, %v2478_v61  ;;  %v5265_v41 = vrot.slane %v2657_v27, 9  ;;  %v2666_v46 = vor.u32 %v2664_v33, %v2663_v30  ;;  %v2863_v53 = vld [vmem:[#allocation2 + $0x2c] sm:$0x7] }
 0x16b   : > { %v2466_v62 = vsel %vm6366_vm8, %v2461_v48, %v2465_v56  ;;  %v2492_v4 = vsel %vm6366_vm8, %v2487_v57, %v2491_v63  ;;  %3027 = vmatpush.bf16.msra.mxu1 %v5983_v58  ;;  %v5263_v48 = vrot.slane %v2635_v36, 9  ;;  %v2868_v54 = vrot.slane %v2860_v49, 2  ;;  %v2862_v56 = vld [vmem:[#allocation2 + $0x24] sm:$0x7] }
 0x16c   : > { %2849 = vmatpush.bf16.msra.mxu0 %v5971_v19  ;;  %v2667_v55 = vsel %vm6634_vm15, %v5265_v41, %v2666_v46  ;;  %v2870_v63 = vrot.slane %v2862_v56, 2 }
 0x16d   : > { %v2645_v58 = vsel %vm6634_vm15, %v5263_v48, %v2644_v6  ;;  %v2874_v3 = vsel %vm685_vm2, %v2860_v49, %v2868_v54 }
 0x16e   : > { %v2887_v30 = vsel %vm689_vm3, %v2862_v56, %v2870_v63 }
 0x16f   : > { %3028 = vmatpush.bf16.msra.mxu1 %v5982_v5 }
 0x171   : > { %v2241_v18 = vld.sshfl [vmem:[#allocation1] sm:$0xff pattern:$0x73625140] }
 0x172   : > { %2299 = vmatmul.bf16.vlgmr.msrb.gmra.mxu0 %v2241_v18  ;;  %2329 = vst [vmem:[#allocation1] ss:$4 sm:$0xff] %v2307_v8  ;;  %v5964_v8 = vld [vmem:[%s7250_s4 + $0x198] sm:$0xff]  ;;  %v5962_v18 = vld [vmem:[%s7250_s4 + $0x188] sm:$0xff] }
 0x173   : > { %2332 = vst [vmem:[#allocation1 + $0x1] ss:$4 sm:$0xff] %v2308_v12  ;;  %2750 = vmatpush.bf16.msrb.mxu3 %v5964_v8  ;;  %v5963_v12 = vld [vmem:[%s7250_s4 + $0x190] sm:$0xff]  ;;  %3029 = vmatpush.bf16.msra.mxu1 %v5981_v10  ;;  %v2896_v10 = vshrl.u32 %v2874_v3, 16 }
 0x174   : > { %2335 = vst [vmem:[#allocation1 + $0x2] ss:$4 sm:$0xff] %v2309_v17 }
 0x175   : > { %2338 = vst [vmem:[#allocation1 + $0x3] ss:$4 sm:$0xff] %v2310_v34  ;;  %v5970_v34 = vld [vmem:[%s7250_s4 + $0x1c8] sm:$0xff]  ;;  %v2898_v23 = vrot.slane %v2896_v10, 6 }
 0x176   : > { %2850 = vmatpush.bf16.msra.mxu0 %v5970_v34 }
 0x177   : > { %2751 = vmatpush.bf16.msrb.mxu3 %v5963_v12  ;;  %3030 = vmatpush.bf16.msra.mxu1 %v5980_v16  ;;  %v2875_v12 = vsel %vm689_vm3, %v2860_v49, %v2868_v54 }
 0x178   : > { %v2877_v22 = vrot.slane %v2875_v12, 2 }
 0x17a   : > { %2851 = vmatpush.bf16.msra.mxu0 %v5969_v47  ;;  %v2905_v47 = vshll.u32 %v2877_v22, 16 }
 0x17b   : > { %2752 = vmatpush.bf16.msrb.mxu3 %v5962_v18  ;;  %3031 = vmatpush.bf16.msra.mxu1 %v5979_v24 }
 0x17c   : > { %v2339_v59 = vld.sshfl [vmem:[#allocation1] sm:$0xff pattern:$0x73625140] }
 0x17d   : > { %2397 = vmatmul.bf16.vlgmr.msrb.gmra.mxu1 %v2339_v59  ;;  %2511 = vst [vmem:[#allocation1] ss:$4 sm:$0xff] %v2453_v60  ;;  %v2869_v59 = vrot.slane %v2861_v51, 2 }
 0x17e   : > { %2514 = vst [vmem:[#allocation1 + $0x1] ss:$4 sm:$0xff] %v2466_v62  ;;  %v2871_v62 = vrot.slane %v2863_v53, 2 }
 0x17f   : > { %2517 = vst [vmem:[#allocation1 + $0x2] ss:$4 sm:$0xff] %v2479_v2  ;;  %2753 = vmatpush.bf16.msrb.mxu3 %v5961_v26  ;;  %v2880_v5 = vsel %vm685_vm2, %v2861_v51, %v2869_v59  ;;  %v2881_v26 = vsel %vm689_vm3, %v2861_v51, %v2869_v59 }
 0x180   : > { %2520 = vst [vmem:[#allocation1 + $0x3] ss:$4 sm:$0xff] %v2492_v4  ;;  %v5978_v4 = vld [vmem:[%s7250_s4 + $0x208] sm:$0xff]  ;;  %v2892_v8 = vsel %vm685_vm2, %v2863_v53, %v2871_v62  ;;  %v2909_v14 = vshrl.u32 %v2880_v5, 16  ;;  %v2912_v38 = vshll.u32 %v2880_v5, 16  ;;  %v2893_v19 = vsel %vm689_vm3, %v2863_v53, %v2871_v62 }
 0x181   : > { %2599 = vst.sshfl [vmem:[#allocation1 + $0x10] sm:$0xff pattern:$0x75643120] %v2589_v7  ;;  %3032 = vmatpush.bf16.msra.mxu1 %v5978_v4  ;;  %v2938_v16 = vshll.u32 %v2892_v8, 16  ;;  %v2895_v34 = vrot.slane %v2893_v19, 2  ;;  %v2883_v31 = vrot.slane %v2881_v26, 2 }
 0x182   : > { %v2911_v27 = vrot.slane %v2909_v14, 6  ;;  %v2907_v53 = vrot.slane %v2905_v47, 7 }
 0x183   : > { %v2944_v46 = vshll.u32 %v2895_v34, 16  ;;  %v2918_v6 = vshll.u32 %v2883_v31, 16 }
 0x185   : > { %3033 = vmatpush.bf16.msra.mxu1 %v5977_v9 }
 0x187   : > { %v2521_v15 = vld.sshfl [vmem:[#allocation1] sm:$0xff pattern:$0x73625140] }
 0x188   : > { %v2603_v17 = vld [vmem:[#allocation1 + $0x10] ss:$2 sm:$0xff]  ;;  %2579 = vmatmul.bf16.vlgmr.msrb.gmra.mxu2 %v2521_v15  ;;  %2597 = vst.sshfl [vmem:[#allocation1] sm:$0xff pattern:$0x75643120] %v2588_v11  ;;  %v2886_v11 = vsel %vm685_vm2, %v2862_v56, %v2870_v63  ;;  %v2935_v15 = vshrl.u32 %v2892_v8, 16 }
 0x189   : > { %2615 = vst.sshfl [vmem:[#allocation1 + $0x10] sm:$0xff pattern:$0x75643120] %v2593_v13  ;;  %v2628_v20 = vshrl.u32 %v2603_v17, 16  ;;  %v2631_v35 = vshll.u32 %v2603_v17, 16  ;;  %v2899_v13 = vshll.u32 %v2874_v3, 16 }
 0x18a   : > { %v2922_v17 = vshrl.u32 %v2886_v11, 16  ;;  %v2925_v18 = vshll.u32 %v2886_v11, 16  ;;  %v2920_v56 = vrot.slane %v2918_v6, 7  ;;  %v3083_v63 = vld [vmem:[#allocation2 + $0x4] sm:$0x3] }
 0x18b   : > { %v2630_v29 = vrot.slane %v2628_v20, 7  ;;  %v2762_v20 = vld [vmem:[#allocation2 + $0x14] sm:$0x3]  ;;  %v2901_v24 = vrot.slane %v2899_v13, 7  ;;  %v3086_v3 = vld [vmem:[#allocation2 + $0x10] sm:$0x8] }
 0x18c   : > { %v2924_v36 = vrot.slane %v2922_v17, 6  ;;  %v2927_v37 = vrot.slane %v2925_v18, 7  ;;  %v5998_v6 = vld [vmem:[%s7253_s7 + $0x68] sm:$0xff] }
 0x18d   : > { %v2633_v44 = vor.u32 %v2631_v35, %v2630_v29  ;;  %v2914_v29 = vrot.slane %v2912_v38, 7  ;;  %v2940_v35 = vrot.slane %v2938_v16, 7  ;;  %v2902_v41 = vor.u32 %v2901_v24, %v2898_v23 }
 0x18e   : > { %v2928_v48 = vor.u32 %v2927_v37, %v2924_v36 }
 0x18f   : > { %v2601_v0 = vld [vmem:[#allocation1 + $0x1] ss:$2 sm:$0xff]  ;;  %v2903_v49 = vrot.slane %v2902_v41, 2  ;;  %v6088_v41 = vld [vmem:[%s7252_s6] ss:$0 sm:$0xff] }
 0x190   : > { %v2617_v39 = vld [vmem:[#allocation1 + $0x10] ss:$2 sm:$0xff]  ;;  %2613 = vst.sshfl [vmem:[#allocation1] sm:$0xff pattern:$0x75643120] %v2592_v25  ;;  %v2624_v32 = vshrl.u32 %v2601_v0, 16 }
 0x191   : > { %v2650_v45 = vshrl.u32 %v2617_v39, 16  ;;  %v2653_v61 = vshll.u32 %v2617_v39, 16  ;;  %v2763_v25 = vld [vmem:[#allocation2 + $0x1c] sm:$0x3]  ;;  %v2937_v0 = vrot.slane %v2935_v15, 6  ;;  %v2929_v54 = vrot.slane %v2928_v48, 2 }
 0x192   : > { %v5262_v42 = vrot.slane %v2624_v32, 9  ;;  %v2765_v39 = vld [vmem:[#allocation2 + $0x2c] sm:$0x3]  ;;  %v2764_v32 = vld [vmem:[#allocation2 + $0x24] sm:$0x3] }
 0x193   : > { %v2652_v52 = vrot.slane %v2650_v45, 7  ;;  %v2941_v45 = vor.u32 %v2940_v35, %v2937_v0  ;;  %v6000_v35 = vld [vmem:[%s7253_s7 + $0x78] sm:$0xff] }
 0x194   : > { %v2634_v50 = vsel %vm6634_vm15, %v5262_v42, %v2633_v44  ;;  %v2889_v42 = vrot.slane %v2887_v30, 2  ;;  %v2915_v44 = vor.u32 %v2914_v29, %v2911_v27  ;;  %3260 = vmatpush.bf16.msra.mxu2 %v6000_v35  ;;  %v5985_v35 = vld [vmem:[%s7253_s7] sm:$0xff] }
 0x195   : > { %2686 = vst [vmem:[#allocation1] ss:$4 sm:$0xff] %v2634_v50  ;;  %v2655_v2 = vor.u32 %v2653_v61, %v2652_v52  ;;  %v2942_v52 = vrot.slane %v2941_v45, 2 }
 0x196   : > { %v2931_v50 = vshll.u32 %v2889_v42, 16  ;;  %v2916_v51 = vrot.slane %v2915_v44, 2  ;;  %v5999_v44 = vld [vmem:[%s7253_s7 + $0x70] sm:$0xff] }
 0x197   : > { %v2616_v57 = vld [vmem:[#allocation1 + $0x1] ss:$2 sm:$0xff] }
 0x198   : > { %v2646_v60 = vshrl.u32 %v2616_v57, 16  ;;  %2689 = vst [vmem:[#allocation1 + $0x1] ss:$4 sm:$0xff] %v2645_v58  ;;  %v2908_v57 = vsel %vm6366_vm8, %v2903_v49, %v2907_v53  ;;  %v2933_v58 = vrot.slane %v2931_v50, 7  ;;  %3261 = vmatpush.bf16.msra.mxu2 %v5999_v44  ;;  %v6016_v44 = vld [vmem:[%s7253_s7 + $0xf8] sm:$0xff] }
 0x199   : > { %2695 = vst [vmem:[#allocation1 + $0x3] ss:$4 sm:$0xff] %v2667_v55  ;;  %v2946_v55 = vrot.slane %v2944_v46, 7  ;;  %3689 = vmatpush.bf16.msrb.mxu1 %v6016_v44 }
 0x19a   : > { %v5264_v1 = vrot.slane %v2646_v60, 9  ;;  %v2921_v60 = vsel %vm6366_vm8, %v2916_v51, %v2920_v56  ;;  %v2934_v62 = vsel %vm6366_vm8, %v2929_v54, %v2933_v58 }
 0x19b   : > { %v2947_v61 = vsel %vm6366_vm8, %v2942_v52, %v2946_v55  ;;  %v5997_v55 = vld [vmem:[%s7253_s7 + $0x60] sm:$0xff] }
 0x19c   : > { %v2656_v7 = vsel %vm6634_vm15, %v5264_v1, %v2655_v2  ;;  %v3082_v1 = vld [vmem:[#allocation2] sm:$0x8]  ;;  %3262 = vmatpush.bf16.msra.mxu2 %v5998_v6 }
 0x19d   : > { %2692 = vst [vmem:[#allocation1 + $0x2] ss:$4 sm:$0xff] %v2656_v7  ;;  %v6002_v6 = vld [vmem:[%s7253_s7 + $0x88] sm:$0xff] }
 0x1a0   : > { %3263 = vmatpush.bf16.msra.mxu2 %v5997_v55 }
 0x1a4   : > { %v2696_v33 = vld.sshfl [vmem:[#allocation1] sm:$0xff pattern:$0x73625140] }
 0x1a5   : > { %2754 = vmatmul.bf16.vlgmr.msrb.gmra.mxu3 %v2696_v33  ;;  %2784 = vst [vmem:[#allocation1] ss:$4 sm:$0xff] %v2762_v20 }
 0x1a6   : > { %2787 = vst [vmem:[#allocation1 + $0x1] ss:$4 sm:$0xff] %v2763_v25 }
 0x1a7   : > { %2790 = vst [vmem:[#allocation1 + $0x2] ss:$4 sm:$0xff] %v2764_v32 }
 0x1a8   : > { %2793 = vst [vmem:[#allocation1 + $0x3] ss:$4 sm:$0xff] %v2765_v39  ;;  %v6087_v39 = vld [vmem:[%s7251_s5] ss:$0 sm:$0xff] }
 0x1af   : > { %v2794_v59 = vld.sshfl [vmem:[#allocation1] sm:$0xff pattern:$0x73625140] }
 0x1b0   : > { %2852 = vmatmul.bf16.vlgmr.msra.gmra.mxu0 %v2794_v59  ;;  %2966 = vst [vmem:[#allocation1] ss:$4 sm:$0xff] %v2908_v57  ;;  %v5992_v57 = vld [vmem:[%s7253_s7 + $0x38] sm:$0xff] }
 0x1b1   : > { %2969 = vst [vmem:[#allocation1 + $0x1] ss:$4 sm:$0xff] %v2921_v60  ;;  %3335 = vmatpush.bf16.msra.mxu3 %v5992_v57  ;;  %v5996_v60 = vld [vmem:[%s7253_s7 + $0x58] sm:$0xff] }
 0x1b2   : > { %2972 = vst [vmem:[#allocation1 + $0x2] ss:$4 sm:$0xff] %v2934_v62  ;;  %v5991_v62 = vld [vmem:[%s7253_s7 + $0x30] sm:$0xff]  ;;  %3264 = vmatpush.bf16.msra.mxu2 %v5996_v60 }
 0x1b3   : > { %2975 = vst [vmem:[#allocation1 + $0x3] ss:$4 sm:$0xff] %v2947_v61 }
 0x1b4   : > { %3093 = vst.sshfl [vmem:[#allocation1 + $0x10] sm:$0xff pattern:$0x75643120] %v3083_v63 }
 0x1b5   : > { %3336 = vmatpush.bf16.msra.mxu3 %v5991_v62 }
 0x1b7   : > { %v1871_v5 = vpop.f32.mrf.mxu1 }
 0x1ba   : > { %v2976_v2 = vld.sshfl [vmem:[#allocation1] sm:$0xff pattern:$0x73625140] }
 0x1bb   : > { %3034 = vmatmul.bf16.vlgmr.msra.gmra.mxu1 %v2976_v2  ;;  %3091 = vst.sshfl [vmem:[#allocation1] sm:$0xff pattern:$0x75643120] %v3082_v1  ;;  %v5995_v1 = vld [vmem:[%s7253_s7 + $0x50] sm:$0xff] }
 0x1bc   : > { %3265 = vmatpush.bf16.msra.mxu2 %v5995_v1  ;;  %v6001_v1 = vld [vmem:[%s7253_s7 + $0x80] sm:$0xff] }
 0x1bf   : > { %v1873_v9 = vpop.f32.mrf.mxu1 }
 0x1c2   : > { %v6883_v4 = vld [vmem:[#allocation1 + $0x1] ss:$2 sm:$0xff] }
 0x1c3   : > { %3107 = vst.sshfl [vmem:[#allocation1] sm:$0xff pattern:$0x75643120] %v3086_v3 }
 0x1cd   : > { %v1946_v7 = vpop.f32.mrf.mxu2 }
 0x1ce   : > { %v1947_v14 = vadd.f32 %v1946_v7, %v1871_v5 }
 0x1d5   : > { %v1948_v11 = vpop.f32.mrf.mxu2 }
 0x1d6   : > { %v1949_v22 = vadd.f32 %v1948_v11, %v1873_v9  ;;  %v6919_v9 = vld [vmem:[#allocation1 + $0x1] ss:$2 sm:$0xff] }
 0x1d8   : > { %v2126_v8 = vpop.f32.mrf.mxu3 }
 0x1d9   : > { %v2131_v15 = vadd.f32 %v2126_v8, %v1947_v14  ;;  %v3097_v8 = vld [vmem:[#allocation1 + $0x10] ss:$2 sm:$0xff]  ;;  %v5994_v14 = vld [vmem:[%s7253_s7 + $0x48] sm:$0xff] }
 0x1da   : > { %3266 = vmatpush.bf16.msra.mxu2 %v5994_v14 }
 0x1e0   : > { %v2128_v12 = vpop.f32.mrf.mxu3 }
 0x1e1   : > { %v2132_v25 = vadd.f32 %v2128_v12, %v1949_v22  ;;  %v5990_v12 = vld [vmem:[%s7253_s7 + $0x28] sm:$0xff] }
 0x1e2   : > { %3337 = vmatpush.bf16.msra.mxu3 %v5990_v12  ;;  %v3178_v22 = vld [vmem:[#allocation2 + $0x4] sm:$0x3] }
 0x1ef   : > { %v2300_v10 = vpop.f32.mrf.mxu0 }
 0x1f0   : > { %v2305_v17 = vadd.f32 %v2300_v10, %v2131_v15  ;;  %v6007_v15 = vld [vmem:[%s7253_s7 + $0xb0] sm:$0xff] }
 0x1f7   : > { %v2302_v38 = vpop.f32.mrf.mxu0 }
 0x1f8   : > { %v2306_v27 = vadd.f32 %v2302_v38, %v2132_v25  ;;  %v5989_v38 = vld [vmem:[%s7253_s7 + $0x20] sm:$0xff] }
 0x1f9   : > { %3338 = vmatpush.bf16.msra.mxu3 %v5989_v38 }
 0x1fa   : > { %v2398_v13 = vpop.f32.mrf.mxu1 }
 0x1fb   : > { %v2403_v19 = vadd.f32 %v2398_v13, %v2305_v17  ;;  %v6008_v13 = vld [vmem:[%s7253_s7 + $0xb8] sm:$0xff] }
 0x1fc   : > { %3515 = vmatpush.bf16.msrb.mxu0 %v6008_v13  ;;  %v5988_v17 = vld [vmem:[%s7253_s7 + $0x18] sm:$0xff] }
 0x1fd   : > { %3339 = vmatpush.bf16.msra.mxu3 %v5988_v17 }
 0x200   : > { %3516 = vmatpush.bf16.msrb.mxu0 %v6007_v15 }
 0x202   : > { %v2400_v20 = vpop.f32.mrf.mxu1 }
 0x203   : > { %v2404_v30 = vadd.f32 %v2400_v20, %v2306_v27  ;;  %v5987_v20 = vld [vmem:[%s7253_s7 + $0x10] sm:$0xff]  ;;  %v5986_v27 = vld [vmem:[%s7253_s7 + $0x8] sm:$0xff] }
 0x204   : > { %3340 = vmatpush.bf16.msra.mxu3 %v5987_v20 }
 0x208   : > { %3341 = vmatpush.bf16.msra.mxu3 %v5986_v27 }
 0x20b   : > { %v2580_v16 = vpop.f32.mrf.mxu2 }
 0x20c   : > { %v2585_v23 = vadd.f32 %v2580_v16, %v2403_v19  ;;  %v5993_v16 = vld [vmem:[%s7253_s7 + $0x40] sm:$0xff]  ;;  %3342 = vmatpush.bf16.msra.mxu3 %v5985_v35 }
 0x20d   : > { %3267 = vmatpush.bf16.msra.mxu2 %v5993_v16 }
 0x213   : > { %v2582_v29 = vpop.f32.mrf.mxu2 }
 0x214   : > { %v2586_v36 = vadd.f32 %v2582_v29, %v2404_v30  ;;  %v3122_v29 = vshrl.u32 %v3097_v8, 16  ;;  %v6004_v30 = vld [vmem:[%s7253_s7 + $0x98] sm:$0xff] }
 0x228   : > { %v2755_v18 = vpop.f32.mrf.mxu3 }
 0x229   : > { %v2760_v26 = vadd.f32 %v2755_v18, %v2585_v23  ;;  %v6006_v18 = vld [vmem:[%s7253_s7 + $0xa8] sm:$0xff]  ;;  %v6005_v23 = vld [vmem:[%s7253_s7 + $0xa0] sm:$0xff] }
 0x22a   : > { %3517 = vmatpush.bf16.msrb.mxu0 %v6006_v18 }
 0x22d   : > { %v2853_v24 = vpop.f32.mrf.mxu0 }
 0x22e   : > { %v2858_v33 = vadd.f32 %v2853_v24, %v2760_v26  ;;  %3518 = vmatpush.bf16.msrb.mxu0 %v6005_v23 }
 0x230   : > { %v2757_v34 = vpop.f32.mrf.mxu3 }
 0x231   : > { %v2761_v32 = vadd.f32 %v2757_v34, %v2586_v36  ;;  %v3103_v36 = vld [vmem:[#allocation1 + $0x21] ss:$2 sm:$0xff] }
 0x232   : > { %3519 = vmatpush.bf16.msrb.mxu0 %v6004_v30 }
 0x235   : > { %v2855_v42 = vpop.f32.mrf.mxu0 }
 0x236   : > { %v2859_v46 = vadd.f32 %v2855_v42, %v2761_v32 }
 0x238   : > { %v3035_v0 = vpop.f32.mrf.mxu1 }
 0x239   : > { %v3040_v37 = vadd.f32 %v3035_v0, %v2858_v33  ;;  %v3118_v33 = vshrl.u32 %v6883_v4, 16  ;;  %v3088_v0 = vld [vmem:[#allocation2 + $0x18] sm:$0x8] }
 0x23a   : > { %3113 = vst.sshfl [vmem:[#allocation1 + $0x20] sm:$0xff pattern:$0x75643120] %v3088_v0 }
 0x23b   : > { %v3042_v31 = vmax.f32 %v3040_v37, 0.0  ;;  %v3124_v37 = vrot.slane %v3122_v29, 7  ;;  %v5410_v32 = vrot.slane %v3118_v33, 9 }
 0x23d   : > { %v3048_v45 = vmul.f32 %v6087_v39, %v3042_v31  ;;  %v3125_v31 = vshll.u32 %v3097_v8, 16 }
 0x23f   : > { %v3054_v47 = vadd.f32 %v6088_v41, %v3048_v45  ;;  %v3533_v45 = vld [vmem:[#allocation2 + $0x10] sm:$0x8] }
 0x240   : > { %v3037_v48 = vpop.f32.mrf.mxu1 }
 0x241   : > { %v3056_v49 = vpack.c.bf16 %v3054_v47, %v3054_v47  ;;  %v3041_v50 = vadd.f32 %v3037_v48, %v2859_v46  ;;  %v3127_v46 = vor.u32 %v3125_v31, %v3124_v37  ;;  %v3140_v47 = vshrl.u32 %v6919_v9, 16  ;;  %v3116_v57 = vld [vmem:[#allocation1 + $0x21] ss:$2 sm:$0xff] }
 0x242   : > { %3548 = vst.sshfl [vmem:[#allocation1 + $0x20] sm:$0xff pattern:$0x75643120] %v3533_v45  ;;  %v3151_v14 = vshrl.u32 %v3116_v57, 16  ;;  %v6014_v57 = vld [vmem:[%s7253_s7 + $0xe8] sm:$0xff] }
 0x243   : > { %v3060_v51 = vrot.slane %v3056_v49, 2  ;;  %v3043_v52 = vmax.f32 %v3041_v50, 0.0  ;;  %v5412_v8 = vrot.slane %v3140_v47, 9  ;;  %v3987_v47 = vld [vmem:[#allocation2 + $0x18] sm:$0x8] }
 0x244   : > { %v5413_v0 = vrot.slane %v3151_v14, 9 }
 0x245   : > { %v3064_v53 = vsel %vm685_vm2, %v3056_v49, %v3060_v51  ;;  %v3065_v54 = vsel %vm689_vm3, %v3056_v49, %v3060_v51  ;;  %v3049_v56 = vmul.f32 %v6087_v39, %v3043_v52  ;;  %v6003_v39 = vld [vmem:[%s7253_s7 + $0x90] sm:$0xff]  ;;  %v3349_v49 = vld [vmem:[#allocation2 + $0x4] sm:$0x7]  ;;  %v3128_v51 = vsel %vm6634_vm15, %v5410_v32, %v3127_v46 }
 0x246   : > { %v3067_v58 = vrot.slane %v3065_v54, 2  ;;  %3078 = vst [vmem:[#allocation2 + $0xc] sm:$0x3] %v3064_v53  ;;  %3520 = vmatpush.bf16.msrb.mxu0 %v6003_v39  ;;  %v3129_v52 = vshrl.u32 %v3103_v36, 16 }
 0x247   : > { %v3055_v59 = vadd.f32 %v6088_v41, %v3049_v56 }
 0x248   : > { %3079 = vst [vmem:[#allocation2 + $0x14] sm:$0x3] %v3067_v58  ;;  %v5411_v58 = vrot.slane %v3129_v52, 9 }
 0x249   : > { %v3057_v61 = vpack.c.bf16 %v3055_v59, %v3055_v59  ;;  %v6995_v37 = vld [vmem:[#allocation1 + $0x21] ss:$2 sm:$0xff] }
 0x24a   : > { %3521 = vmatpush.bf16.msrb.mxu0 %v6002_v6 }
 0x24b   : > { %v3061_v63 = vrot.slane %v3057_v61, 2 }
 0x24d   : > { %v3085_v2 = vld [vmem:[#allocation2 + $0xc] sm:$0x3]  ;;  %v3070_v3 = vsel %vm685_vm2, %v3057_v61, %v3061_v63  ;;  %v3071_v7 = vsel %vm689_vm3, %v3057_v61, %v3061_v63  ;;  %v3357_v61 = vrot.slane %v3349_v49, 2 }
 0x24e   : > { %3101 = vst.sshfl [vmem:[#allocation1 + $0x30] sm:$0xff pattern:$0x75643120] %v3085_v2  ;;  %v3179_v10 = vld [vmem:[#allocation2 + $0xc] sm:$0x3]  ;;  %v3073_v11 = vrot.slane %v3071_v7, 2  ;;  %3522 = vmatpush.bf16.msrb.mxu0 %v6001_v1 }
 0x24f   : > { %v3087_v5 = vld [vmem:[#allocation2 + $0x14] sm:$0x3]  ;;  %3080 = vst [vmem:[#allocation2 + $0x1c] sm:$0x3] %v3070_v3  ;;  %v6951_v24 = vld [vmem:[#allocation2 + $0xc] sm:$0x7]  ;;  %v3363_v7 = vsel %vm685_vm2, %v3349_v49, %v3357_v61 }
 0x250   : > { %3109 = vst.sshfl [vmem:[#allocation1 + $0x10] sm:$0xff pattern:$0x75643120] %v3087_v5  ;;  %v3180_v26 = vld [vmem:[#allocation2 + $0x14] sm:$0x3]  ;;  %v3358_v34 = vrot.slane %v6951_v24, 2 }
 0x251   : > { %3203 = vst [vmem:[#allocation1 + $0x1] ss:$4 sm:$0xff] %v3179_v10  ;;  %v3351_v5 = vld [vmem:[#allocation2 + $0x14] sm:$0x7]  ;;  %v3385_v38 = vshrl.u32 %v3363_v7, 16  ;;  %v3388_v15 = vshll.u32 %v3363_v7, 16 }
 0x252   : > { %3081 = vst [vmem:[#allocation2 + $0x24] sm:$0x3] %v3073_v11  ;;  %v3369_v4 = vsel %vm685_vm2, %v6951_v24, %v3358_v34  ;;  %v3359_v10 = vrot.slane %v3351_v5, 2  ;;  %v3364_v11 = vsel %vm689_vm3, %v3349_v49, %v3357_v61  ;;  %v3534_v12 = vld [vmem:[#allocation2 + $0x14] sm:$0x3]  ;;  %v3370_v27 = vsel %vm689_vm3, %v6951_v24, %v3358_v34  ;;  %v6015_v24 = vld [vmem:[%s7253_s7 + $0xf0] sm:$0xff] }
 0x253   : > { %v3398_v50 = vshrl.u32 %v3369_v4, 16  ;;  %v3401_v53 = vshll.u32 %v3369_v4, 16  ;;  %v3387_v29 = vrot.slane %v3385_v38, 6  ;;  %v3390_v30 = vrot.slane %v3388_v15, 7  ;;  %3690 = vmatpush.bf16.msrb.mxu1 %v6015_v24  ;;  %v6012_v38 = vld [vmem:[%s7253_s7 + $0xd8] sm:$0xff]  ;;  %v6022_v15 = vld [vmem:[%s7253_s7 + $0x128] sm:$0xff] }
 0x254   : > { %v3375_v20 = vsel %vm685_vm2, %v3351_v5, %v3359_v10  ;;  %v3372_v4 = vrot.slane %v3370_v27, 2  ;;  %v6021_v27 = vld [vmem:[%s7253_s7 + $0x120] sm:$0xff] }
 0x255   : > { %v3105_v42 = vld [vmem:[#allocation1 + $0x30] ss:$2 sm:$0xff]  ;;  %v3400_v16 = vrot.slane %v3398_v50, 6  ;;  %v3403_v17 = vrot.slane %v3401_v53, 7  ;;  %v3411_v33 = vshrl.u32 %v3375_v20, 16  ;;  %v3414_v39 = vshll.u32 %v3375_v20, 16 }
 0x256   : > { %v3181_v19 = vld [vmem:[#allocation2 + $0x1c] sm:$0x3]  ;;  %v3133_v55 = vshrl.u32 %v3105_v42, 16  ;;  %v3136_v60 = vshll.u32 %v3105_v42, 16  ;;  %v3376_v42 = vsel %vm689_vm3, %v3351_v5, %v3359_v10  ;;  %v3391_v34 = vor.u32 %v3390_v30, %v3387_v29  ;;  %v6023_v5 = vld [vmem:[%s7253_s7 + $0x130] sm:$0xff] }
 0x257   : > { %3209 = vst [vmem:[#allocation1 + $0x3] ss:$4 sm:$0xff] %v3181_v19  ;;  %v3111_v25 = vld [vmem:[#allocation1 + $0x10] ss:$2 sm:$0xff]  ;;  %v3089_v41 = vld [vmem:[#allocation2 + $0x1c] sm:$0x3]  ;;  %3691 = vmatpush.bf16.msrb.mxu1 %v6014_v57 }
 0x258   : > { %3200 = vst [vmem:[#allocation1] ss:$4 sm:$0xff] %v3178_v22  ;;  %v3352_v54 = vld [vmem:[#allocation2 + $0x1c] sm:$0x7]  ;;  %v3144_v56 = vshrl.u32 %v3111_v25, 16  ;;  %v3135_v59 = vrot.slane %v3133_v55, 7 }
 0x259   : > { %3206 = vst [vmem:[#allocation1 + $0x2] ss:$4 sm:$0xff] %v3180_v26  ;;  %v3147_v63 = vshll.u32 %v3111_v25, 16  ;;  %v3360_v2 = vrot.slane %v3352_v54, 2  ;;  %v3537_v25 = vld [vmem:[#allocation2 + $0x20] sm:$0x8] }
 0x25a   : > { %3115 = vst.sshfl [vmem:[#allocation1 + $0x30] sm:$0xff pattern:$0x75643120] %v3089_v41  ;;  %v3146_v62 = vrot.slane %v3144_v56, 7  ;;  %v3138_v3 = vor.u32 %v3136_v60, %v3135_v59  ;;  %v3366_v26 = vrot.slane %v3364_v11, 2  ;;  %v3413_v45 = vrot.slane %v3411_v33, 6 }
 0x25b   : > { %v3381_v22 = vsel %vm685_vm2, %v3352_v54, %v3360_v2  ;;  %3562 = vst.sshfl [vmem:[#allocation1 + $0x20] sm:$0xff pattern:$0x75643120] %v3537_v25  ;;  %v3416_v46 = vrot.slane %v3414_v39, 7  ;;  %v3382_v6 = vsel %vm689_vm3, %v3352_v54, %v3360_v2  ;;  %v3538_v49 = vld [vmem:[#allocation2 + $0x24] sm:$0x3] }
 0x25c   : > { %v3149_v9 = vor.u32 %v3147_v63, %v3146_v62  ;;  %v3139_v13 = vsel %vm6634_vm15, %v5411_v58, %v3138_v3  ;;  %v3424_v32 = vshrl.u32 %v3381_v22, 16  ;;  %v3427_v31 = vshll.u32 %v3381_v22, 16  ;;  %v6024_v54 = vld [vmem:[%s7253_s7 + $0x138] sm:$0xff]  ;;  %v6013_v3 = vld [vmem:[%s7253_s7 + $0xe0] sm:$0xff]  ;;  %v6031_v20 = vld [vmem:[%s7253_s7 + $0x170] sm:$0xff] }
 0x25d   : > { %v3394_v44 = vshll.u32 %v3366_v26, 16  ;;  %v3378_v55 = vrot.slane %v3376_v42, 2  ;;  %v3407_v53 = vshll.u32 %v3372_v4, 16  ;;  %v3384_v58 = vrot.slane %v3382_v6, 2  ;;  %3787 = vmatpush.bf16.msrb.mxu2 %v6024_v54  ;;  %3692 = vmatpush.bf16.msrb.mxu1 %v6013_v3  ;;  %v6011_v26 = vld [vmem:[%s7253_s7 + $0xd0] sm:$0xff]  ;;  %v6030_v33 = vld [vmem:[%s7253_s7 + $0x168] sm:$0xff] }
 0x25e   : > { %v3150_v19 = vsel %vm6634_vm15, %v5412_v8, %v3149_v9  ;;  %v3429_v52 = vrot.slane %v3427_v31, 7  ;;  %v3392_v59 = vrot.slane %v3391_v34, 2  ;;  %v3417_v61 = vor.u32 %v3416_v46, %v3413_v45  ;;  %v6032_v8 = vld [vmem:[%s7253_s7 + $0x178] sm:$0xff]  ;;  %v3532_v30 = vld [vmem:[#allocation2 + $0xc] sm:$0x3]  ;;  %v6009_v24 = vld [vmem:[%s7253_s7 + $0xc0] sm:$0xff] }
 0x25f   : > { %v3396_v60 = vrot.slane %v3394_v44, 7  ;;  %v3420_v1 = vshll.u32 %v3378_v55, 16  ;;  %v3409_v7 = vrot.slane %v3407_v53, 7  ;;  %v3433_v9 = vshll.u32 %v3384_v58, 16  ;;  %3969 = vmatpush.bf16.msrb.mxu3 %v6032_v8  ;;  %v3531_v4 = vld [vmem:[#allocation2 + $0x8] sm:$0x8] }
 0x260   : > { %v3210_v48 = vld.sshfl [vmem:[#allocation1] sm:$0xff pattern:$0x73625140]  ;;  %v3418_v11 = vrot.slane %v3417_v61, 2  ;;  %v6019_v34 = vld [vmem:[%s7253_s7 + $0x110] sm:$0xff]  ;;  %v6028_v6 = vld [vmem:[%s7253_s7 + $0x158] sm:$0xff] }
 0x261   : > { %3268 = vmatmul.bf16.vlgmr.msra.gmra.mxu2 %v3210_v48  ;;  %3275 = vst [vmem:[#allocation1] ss:$4 sm:$0xff] %v3128_v51  ;;  %v3117_v18 = vld [vmem:[#allocation1 + $0x30] ss:$2 sm:$0xff]  ;;  %v3404_v48 = vor.u32 %v3403_v17, %v3400_v16  ;;  %v3426_v51 = vrot.slane %v3424_v32, 6  ;;  %v3397_v10 = vsel %vm6366_vm8, %v3392_v59, %v3396_v60  ;;  %v3422_v17 = vrot.slane %v3420_v1, 7  ;;  %3693 = vmatpush.bf16.msrb.mxu1 %v6012_v38 }
 0x262   : > { %3278 = vst [vmem:[#allocation1 + $0x1] ss:$4 sm:$0xff] %v3139_v13  ;;  %v3155_v23 = vshrl.u32 %v3117_v18, 16  ;;  %v3158_v36 = vshll.u32 %v3117_v18, 16  ;;  %v7012_v63 = vld [vmem:[#allocation1 + $0x21] ss:$2 sm:$0xff]  ;;  %3788 = vmatpush.bf16.msrb.mxu2 %v6023_v5 }
 0x263   : > { %3281 = vst [vmem:[#allocation1 + $0x2] ss:$4 sm:$0xff] %v3150_v19  ;;  %v3405_v62 = vrot.slane %v3404_v48, 2  ;;  %v3430_v2 = vor.u32 %v3429_v52, %v3426_v51  ;;  %v3988_v16 = vld [vmem:[#allocation2 + $0x1c] sm:$0x3]  ;;  %v3435_v22 = vrot.slane %v3433_v9, 7  ;;  %3970 = vmatpush.bf16.msrb.mxu3 %v6031_v20 }
 0x264   : > { %3550 = vst.sshfl [vmem:[#allocation1 + $0x30] sm:$0xff pattern:$0x75643120] %v3534_v12  ;;  %v3157_v35 = vrot.slane %v3155_v23, 7  ;;  %v3991_v12 = vld [vmem:[#allocation2 + $0x28] sm:$0x8]  ;;  %v3423_v23 = vsel %vm6366_vm8, %v3418_v11, %v3422_v17 }
 0x265   : > { %4002 = vst.sshfl [vmem:[#allocation1 + $0x20] sm:$0xff pattern:$0x75643120] %v3987_v47  ;;  %v3410_v13 = vsel %vm6366_vm8, %v3405_v62, %v3409_v7  ;;  %v3431_v18 = vrot.slane %v3430_v2, 2  ;;  %3694 = vmatpush.bf16.msrb.mxu1 %v6011_v26  ;;  %v6029_v32 = vld [vmem:[%s7253_s7 + $0x160] sm:$0xff]  ;;  %v6018_v51 = vld [vmem:[%s7253_s7 + $0x108] sm:$0xff] }
 0x266   : > { %v3160_v41 = vor.u32 %v3158_v36, %v3157_v35  ;;  %3789 = vmatpush.bf16.msrb.mxu2 %v6022_v15  ;;  %v6010_v35 = vld [vmem:[%s7253_s7 + $0xc8] sm:$0xff]  ;;  %v6020_v36 = vld [vmem:[%s7253_s7 + $0x118] sm:$0xff]  ;;  %v3536_v42 = vld [vmem:[#allocation2 + $0x1c] sm:$0x3]  ;;  %v3578_v59 = vshrl.u32 %v6995_v37, 16  ;;  %v3600_v2 = vshrl.u32 %v7012_v63, 16 }
 0x267   : > { %v3436_v29 = vsel %vm6366_vm8, %v3431_v18, %v3435_v22  ;;  %3971 = vmatpush.bf16.msrb.mxu3 %v6030_v33  ;;  %v6027_v57 = vld [vmem:[%s7253_s7 + $0x150] sm:$0xff]  ;;  %v3535_v54 = vld [vmem:[#allocation2 + $0x18] sm:$0x8]  ;;  %v6040_v63 = vld [vmem:[%s7253_s7 + $0x1b8] sm:$0xff] }
 0x268   : > { %v3161_v50 = vsel %vm6634_vm15, %v5413_v0, %v3160_v41  ;;  %v3992_v0 = vld [vmem:[#allocation2 + $0x2c] sm:$0x3]  ;;  %v6017_v60 = vld [vmem:[%s7253_s7 + $0x100] sm:$0xff]  ;;  %v5545_v15 = vrot.slane %v3600_v2, 9  ;;  %4143 = vmatpush.bf16.msra.mxu0 %v6040_v63  ;;  %v3806_v22 = vld [vmem:[#allocation2 + $0x24] sm:$0x7] }
 0x269   : > { %3284 = vst [vmem:[#allocation1 + $0x3] ss:$4 sm:$0xff] %v3161_v50  ;;  %3695 = vmatpush.bf16.msrb.mxu1 %v6010_v35  ;;  %v3803_v38 = vld [vmem:[#allocation2 + $0xc] sm:$0x7]  ;;  %v6025_v17 = vld [vmem:[%s7253_s7 + $0x140] sm:$0xff] }
 0x26a   : > { %3790 = vmatpush.bf16.msrb.mxu2 %v6021_v27  ;;  %v3805_v18 = vld [vmem:[#allocation2 + $0x1c] sm:$0x7]  ;;  %v3811_v20 = vrot.slane %v3803_v38, 2  ;;  %v6039_v2 = vld [vmem:[%s7253_s7 + $0x1b0] sm:$0xff]  ;;  %v3706_v63 = vld [vmem:[#allocation2 + $0x14] sm:$0x3] }
 0x26b   : > { %v7004_v56 = vld [vmem:[#allocation1 + $0x30] ss:$2 sm:$0xff]  ;;  %3972 = vmatpush.bf16.msrb.mxu3 %v6029_v32  ;;  %v3813_v33 = vrot.slane %v3805_v18, 2  ;;  %v4160_v28 = vld [vmem:[#allocation2 + $0x1c] sm:$0x3] }
 0x26c   : > { %3564 = vst.sshfl [vmem:[#allocation1 + $0x30] sm:$0xff pattern:$0x75643120] %v3538_v49  ;;  %v4006_v25 = vld [vmem:[#allocation1 + $0x21] ss:$2 sm:$0xff]  ;;  %v3582_v52 = vshrl.u32 %v7004_v56, 16  ;;  %v3817_v32 = vsel %vm685_vm2, %v3803_v38, %v3811_v20  ;;  %4144 = vmatpush.bf16.msra.mxu0 %v6039_v2 }
 0x26d   : > { %4016 = vst.sshfl [vmem:[#allocation1 + $0x20] sm:$0xff pattern:$0x75643120] %v3991_v12  ;;  %v4032_v39 = vshrl.u32 %v4006_v25, 16  ;;  %3696 = vmatpush.bf16.msrb.mxu1 %v6009_v24  ;;  %v3585_v8 = vshll.u32 %v7004_v56, 16  ;;  %v6026_v12 = vld [vmem:[%s7253_s7 + $0x148] sm:$0xff] }
 0x26e   : > { %3791 = vmatpush.bf16.msrb.mxu2 %v6020_v36  ;;  %v3584_v1 = vrot.slane %v3582_v52, 7  ;;  %v3842_v24 = vshll.u32 %v3817_v32, 16  ;;  %v6042_v2 = vld [vmem:[%s7253_s7 + $0x1c8] sm:$0xff] }
 0x26f   : > { %v7066_v45 = vrot.slane %v4032_v39, 9  ;;  %3973 = vmatpush.bf16.msrb.mxu3 %v6028_v6 }
 0x270   : > { %v3285_v14 = vld.sshfl [vmem:[#allocation1] sm:$0xff pattern:$0x73625140] }
 0x271   : > { %3343 = vmatmul.bf16.vlgmr.msra.gmra.mxu3 %v3285_v14  ;;  %3458 = vst [vmem:[#allocation1 + $0x1] ss:$4 sm:$0xff] %v3410_v13  ;;  %v5543_v13 = vrot.slane %v3578_v59, 9  ;;  %v3587_v14 = vor.u32 %v3585_v8, %v3584_v1  ;;  %v3830_v59 = vsel %vm689_vm3, %v3805_v18, %v3813_v33 }
 0x272   : > { %3455 = vst [vmem:[#allocation1] ss:$4 sm:$0xff] %v3397_v10  ;;  %3792 = vmatpush.bf16.msrb.mxu2 %v6019_v34 }
 0x273   : > { %v7033_v19 = vld [vmem:[#allocation1 + $0x30] ss:$2 sm:$0xff]  ;;  %3461 = vst [vmem:[#allocation1 + $0x2] ss:$4 sm:$0xff] %v3423_v23  ;;  %3974 = vmatpush.bf16.msrb.mxu3 %v6027_v57  ;;  %v3588_v25 = vsel %vm6634_vm15, %v5543_v13, %v3587_v14 }
 0x274   : > { %4004 = vst.sshfl [vmem:[#allocation1 + $0x30] sm:$0xff pattern:$0x75643120] %v3988_v16  ;;  %v3604_v55 = vshrl.u32 %v7033_v19, 16  ;;  %v3607_v11 = vshll.u32 %v7033_v19, 16 }
 0x275   : > { %3464 = vst [vmem:[#allocation1 + $0x3] ss:$4 sm:$0xff] %v3436_v29 }
 0x276   : > { %3542 = vst.sshfl [vmem:[#allocation1 + $0x10] sm:$0xff pattern:$0x75643120] %v3532_v30  ;;  %3793 = vmatpush.bf16.msrb.mxu2 %v6018_v51  ;;  %v3606_v3 = vrot.slane %v3604_v55, 7  ;;  %v3804_v30 = vld [vmem:[#allocation2 + $0x14] sm:$0x7] }
 0x277   : > { %3975 = vmatpush.bf16.msrb.mxu3 %v6026_v12  ;;  %v3812_v39 = vrot.slane %v3804_v30, 2 }
 0x278   : > { %v3609_v16 = vor.u32 %v3607_v11, %v3606_v3  ;;  %v3708_v3 = vld [vmem:[#allocation2 + $0x24] sm:$0x3] }
 0x279   : > { %v3823_v34 = vsel %vm685_vm2, %v3804_v30, %v3812_v39  ;;  %v3824_v8 = vsel %vm689_vm3, %v3804_v30, %v3812_v39 }
 0x27a   : > { %3794 = vmatpush.bf16.msrb.mxu2 %v6017_v60  ;;  %v3610_v29 = vsel %vm6634_vm15, %v5545_v15, %v3609_v16  ;;  %v3852_v51 = vshrl.u32 %v3823_v34, 16  ;;  %v3855_v52 = vshll.u32 %v3823_v34, 16  ;;  %v3826_v14 = vrot.slane %v3824_v8, 2  ;;  %v6035_v34 = vld [vmem:[%s7253_s7 + $0x190] sm:$0xff] }
 0x27b   : > { %v4008_v31 = vld [vmem:[#allocation1 + $0x30] ss:$2 sm:$0xff]  ;;  %3976 = vmatpush.bf16.msrb.mxu3 %v6025_v17 }
 0x27c   : > { %4018 = vst.sshfl [vmem:[#allocation1 + $0x30] sm:$0xff pattern:$0x75643120] %v3992_v0  ;;  %v4036_v41 = vshrl.u32 %v4008_v31, 16  ;;  %v4039_v47 = vshll.u32 %v4008_v31, 16  ;;  %v3814_v0 = vrot.slane %v3806_v22, 2 }
 0x27d   : > { %v3465_v44 = vld.sshfl [vmem:[#allocation1] sm:$0xff pattern:$0x73625140]  ;;  %v3546_v48 = vld [vmem:[#allocation1 + $0x10] ss:$2 sm:$0xff] }
 0x27e   : > { %v4038_v46 = vrot.slane %v4036_v41, 7  ;;  %3523 = vmatmul.bf16.vlgmr.msrb.gmra.mxu0 %v3465_v44  ;;  %3540 = vst.sshfl [vmem:[#allocation1] sm:$0xff pattern:$0x75643120] %v3531_v4  ;;  %v3571_v50 = vshrl.u32 %v3546_v48, 16  ;;  %v3574_v62 = vshll.u32 %v3546_v48, 16  ;;  %v3829_v4 = vsel %vm685_vm2, %v3805_v18, %v3813_v33 }
 0x27f   : > { %3558 = vst.sshfl [vmem:[#allocation1 + $0x10] sm:$0xff pattern:$0x75643120] %v3536_v42  ;;  %v3835_v41 = vsel %vm685_vm2, %v3806_v22, %v3814_v0  ;;  %v3839_v42 = vshrl.u32 %v3817_v32, 16  ;;  %v3818_v44 = vsel %vm689_vm3, %v3803_v38, %v3811_v20  ;;  %v3836_v60 = vsel %vm689_vm3, %v3806_v22, %v3814_v0  ;;  %v6038_v38 = vld [vmem:[%s7253_s7 + $0x1a8] sm:$0xff] }
 0x280   : > { %v7071_v49 = vor.u32 %v4039_v47, %v4038_v46  ;;  %v3573_v58 = vrot.slane %v3571_v50, 7  ;;  %v3865_v46 = vshrl.u32 %v3829_v4, 16  ;;  %v3868_v47 = vshll.u32 %v3829_v4, 16  ;;  %v3705_v50 = vld [vmem:[#allocation2 + $0xc] sm:$0x3]  ;;  %4145 = vmatpush.bf16.msra.mxu0 %v6038_v38  ;;  %v6046_v4 = vld [vmem:[%s7253_s7 + $0x1e8] sm:$0xff] }
 0x281   : > { %v3878_v48 = vshrl.u32 %v3835_v41, 16  ;;  %v3881_v6 = vshll.u32 %v3835_v41, 16  ;;  %v3820_v55 = vrot.slane %v3818_v44, 2  ;;  %v3841_v57 = vrot.slane %v3839_v42, 6  ;;  %v6056_v41 = vld [vmem:[%s7253_s7 + $0x238] sm:$0xff]  ;;  %v6045_v44 = vld [vmem:[%s7253_s7 + $0x1e0] sm:$0xff] }
 0x282   : > { %v4042_v53 = vsel %vm6634_vm15, %v7066_v45, %v7071_v49  ;;  %v3576_v10 = vor.u32 %v3574_v62, %v3573_v58  ;;  %v3707_v58 = vld [vmem:[#allocation2 + $0x1c] sm:$0x3]  ;;  %v3870_v62 = vrot.slane %v3868_v47, 7  ;;  %v3838_v12 = vrot.slane %v3836_v60, 2  ;;  %4423 = vmatpush.bf16.msra.mxu2 %v6056_v41  ;;  %v6055_v47 = vld [vmem:[%s7253_s7 + $0x230] sm:$0xff] }
 0x283   : > { %v3848_v15 = vshll.u32 %v3820_v55, 16  ;;  %v6033_v55 = vld [vmem:[%s7253_s7 + $0x180] sm:$0xff] }
 0x284   : > { %v3887_v20 = vshll.u32 %v3838_v12, 16  ;;  %v6053_v60 = vld [vmem:[%s7253_s7 + $0x220] sm:$0xff] }
 0x285   : > { %v3544_v61 = vld [vmem:[#allocation1 + $0x1] ss:$2 sm:$0xff] }
 0x286   : > { %3556 = vst.sshfl [vmem:[#allocation1] sm:$0xff pattern:$0x75643120] %v3535_v54  ;;  %v3560_v5 = vld [vmem:[#allocation1 + $0x10] ss:$2 sm:$0xff]  ;;  %v3567_v7 = vshrl.u32 %v3544_v61, 16  ;;  %4424 = vmatpush.bf16.msra.mxu2 %v6055_v47 }
 0x287   : > { %v3593_v37 = vshrl.u32 %v3560_v5, 16  ;;  %v3596_v27 = vshll.u32 %v3560_v5, 16  ;;  %v3844_v54 = vrot.slane %v3842_v24, 7  ;;  %v3867_v61 = vrot.slane %v3865_v46, 6  ;;  %v3986_v46 = vld [vmem:[#allocation2 + $0x14] sm:$0x3] }
 0x288   : > { %v5542_v9 = vrot.slane %v3567_v7, 9  ;;  %v3880_v5 = vrot.slane %v3878_v48, 6  ;;  %v3883_v7 = vrot.slane %v3881_v6, 7  ;;  %v6034_v48 = vld [vmem:[%s7253_s7 + $0x188] sm:$0xff]  ;;  %v6044_v6 = vld [vmem:[%s7253_s7 + $0x1d8] sm:$0xff]  ;;  %v6041_v12 = vld [vmem:[%s7253_s7 + $0x1c0] sm:$0xff] }
 0x289   : > { %v3595_v19 = vrot.slane %v3593_v37, 7  ;;  %v3857_v37 = vrot.slane %v3855_v52, 7  ;;  %v3845_v11 = vor.u32 %v3844_v54, %v3841_v57  ;;  %v3871_v13 = vor.u32 %v3870_v62, %v3867_v61  ;;  %v3990_v52 = vld [vmem:[#allocation2 + $0x24] sm:$0x3]  ;;  %v6043_v54 = vld [vmem:[%s7253_s7 + $0x1d0] sm:$0xff] }
 0x28a   : > { %v3577_v56 = vsel %vm6634_vm15, %v5542_v9, %v3576_v10  ;;  %v3832_v9 = vrot.slane %v3830_v59, 2  ;;  %v3854_v10 = vrot.slane %v3852_v51, 6  ;;  %v3884_v16 = vor.u32 %v3883_v7, %v3880_v5  ;;  %v3985_v51 = vld [vmem:[#allocation2 + $0x10] sm:$0x8]  ;;  %v4019_v62 = vld [vmem:[#allocation1 + $0x21] ss:$2 sm:$0xff] }
 0x28b   : > { %3629 = vst [vmem:[#allocation1] ss:$4 sm:$0xff] %v3577_v56  ;;  %v3598_v36 = vor.u32 %v3596_v27, %v3595_v19  ;;  %v6048_v56 = vld [vmem:[%s7253_s7 + $0x1f8] sm:$0xff]  ;;  %v3846_v19 = vrot.slane %v3845_v11, 2  ;;  %v3872_v22 = vrot.slane %v3871_v13, 2  ;;  %v3850_v27 = vrot.slane %v3848_v15, 7 }
 0x28c   : > { %v3874_v17 = vshll.u32 %v3832_v9, 16  ;;  %v3858_v18 = vor.u32 %v3857_v37, %v3854_v10  ;;  %4241 = vmatpush.bf16.msra.mxu1 %v6048_v56  ;;  %v3989_v5 = vld [vmem:[#allocation2 + $0x20] sm:$0x8]  ;;  %v4054_v7 = vshrl.u32 %v4019_v62, 16 }
 0x28d   : > { %v3559_v23 = vld [vmem:[#allocation1 + $0x1] ss:$2 sm:$0xff]  ;;  %v3851_v0 = vsel %vm6366_vm8, %v3846_v19, %v3850_v27  ;;  %v4257_v27 = vld [vmem:[#allocation2 + $0x14] sm:$0x7] }
 0x28e   : > { %v3589_v26 = vshrl.u32 %v3559_v23, 16  ;;  %3632 = vst [vmem:[#allocation1 + $0x1] ss:$4 sm:$0xff] %v3588_v25  ;;  %v3861_v23 = vshll.u32 %v3826_v14, 16  ;;  %v6037_v25 = vld [vmem:[%s7253_s7 + $0x1a0] sm:$0xff]  ;;  %v3876_v30 = vrot.slane %v3874_v17, 7 }
 0x28f   : > { %3638 = vst [vmem:[#allocation1 + $0x3] ss:$4 sm:$0xff] %v3610_v29  ;;  %v3885_v29 = vrot.slane %v3884_v16, 2  ;;  %v3859_v33 = vrot.slane %v3858_v18, 2  ;;  %4146 = vmatpush.bf16.msra.mxu0 %v6037_v25  ;;  %v5693_v38 = vrot.slane %v4054_v7, 9 }
 0x290   : > { %v5544_v35 = vrot.slane %v3589_v26, 9  ;;  %v6047_v26 = vld [vmem:[%s7253_s7 + $0x1f0] sm:$0xff]  ;;  %v3877_v39 = vsel %vm6366_vm8, %v3872_v22, %v3876_v30  ;;  %v3863_v32 = vrot.slane %v3861_v23, 7  ;;  %v4258_v18 = vld [vmem:[#allocation2 + $0x1c] sm:$0x7] }
 0x291   : > { %4242 = vmatpush.bf16.msra.mxu1 %v6047_v26  ;;  %v4259_v22 = vld [vmem:[#allocation2 + $0x24] sm:$0x7]  ;;  %v4260_v26 = vld [vmem:[#allocation2 + $0x2c] sm:$0x7] }
 0x292   : > { %v3599_v31 = vsel %vm6634_vm15, %v5544_v35, %v3598_v36  ;;  %v3889_v35 = vrot.slane %v3887_v20, 7  ;;  %v3864_v24 = vsel %vm6366_vm8, %v3859_v33, %v3863_v32  ;;  %v6050_v20 = vld [vmem:[%s7253_s7 + $0x208] sm:$0xff]  ;;  %v4267_v33 = vrot.slane %v4259_v22, 2  ;;  %v4162_v7 = vld [vmem:[#allocation2 + $0x2c] sm:$0x3] }
 0x293   : > { %3635 = vst [vmem:[#allocation1 + $0x2] ss:$4 sm:$0xff] %v3599_v31  ;;  %v6036_v31 = vld [vmem:[%s7253_s7 + $0x198] sm:$0xff]  ;;  %v4265_v32 = vrot.slane %v4257_v27, 2 }
 0x294   : > { %v3890_v42 = vsel %vm6366_vm8, %v3885_v29, %v3889_v35  ;;  %4147 = vmatpush.bf16.msra.mxu0 %v6036_v31  ;;  %v4266_v29 = vrot.slane %v4258_v18, 2 }
 0x295   : > { %4243 = vmatpush.bf16.msra.mxu1 %v6046_v4  ;;  %v4271_v49 = vsel %vm685_vm2, %v4257_v27, %v4265_v32  ;;  %v4272_v62 = vsel %vm689_vm3, %v4257_v27, %v4265_v32 }
 0x296   : > { %v4277_v41 = vsel %vm685_vm2, %v4258_v18, %v4266_v29 }
 0x298   : > { %4148 = vmatpush.bf16.msra.mxu0 %v6035_v34  ;;  %v4306_v34 = vshrl.u32 %v4277_v41, 16 }
 0x299   : > { %4244 = vmatpush.bf16.msra.mxu1 %v6045_v44  ;;  %v4309_v44 = vshll.u32 %v4277_v41, 16 }
 0x29a   : > { %v3639_v1 = vld.sshfl [vmem:[#allocation1] sm:$0xff pattern:$0x73625140] }
 0x29b   : > { %3697 = vmatmul.bf16.vlgmr.msrb.gmra.mxu1 %v3639_v1  ;;  %3727 = vst [vmem:[#allocation1] ss:$4 sm:$0xff] %v3705_v50  ;;  %v6054_v50 = vld [vmem:[%s7253_s7 + $0x228] sm:$0xff] }
 0x29c   : > { %3733 = vst [vmem:[#allocation1 + $0x2] ss:$4 sm:$0xff] %v3707_v58  ;;  %4149 = vmatpush.bf16.msra.mxu0 %v6034_v48  ;;  %v4020_v58 = vld [vmem:[#allocation1 + $0x30] ss:$2 sm:$0xff]  ;;  %4425 = vmatpush.bf16.msra.mxu2 %v6054_v50  ;;  %v4293_v50 = vshrl.u32 %v4271_v49, 16 }
 0x29d   : > { %3736 = vst [vmem:[#allocation1 + $0x3] ss:$4 sm:$0xff] %v3708_v3  ;;  %4245 = vmatpush.bf16.msra.mxu1 %v6044_v6  ;;  %v4058_v1 = vshrl.u32 %v4020_v58, 16  ;;  %v6052_v3 = vld [vmem:[%s7253_s7 + $0x218] sm:$0xff]  ;;  %v4061_v10 = vshll.u32 %v4020_v58, 16  ;;  %v4308_v58 = vrot.slane %v4306_v34, 6 }
 0x29e   : > { %3730 = vst [vmem:[#allocation1 + $0x1] ss:$4 sm:$0xff] %v3706_v63  ;;  %v6051_v63 = vld [vmem:[%s7253_s7 + $0x210] sm:$0xff] }
 0x29f   : > { %v4060_v9 = vrot.slane %v4058_v1, 7 }
 0x2a0   : > { %4150 = vmatpush.bf16.msra.mxu0 %v6033_v55  ;;  %4426 = vmatpush.bf16.msra.mxu2 %v6053_v60 }
 0x2a1   : > { %4246 = vmatpush.bf16.msra.mxu1 %v6043_v54  ;;  %v4063_v17 = vor.u32 %v4061_v10, %v4060_v9  ;;  %v4161_v54 = vld [vmem:[#allocation2 + $0x24] sm:$0x3] }
 0x2a3   : > { %v4064_v25 = vsel %vm6634_vm15, %v5693_v38, %v4063_v17 }
 0x2a4   : > { %4427 = vmatpush.bf16.msra.mxu2 %v6052_v3 }
 0x2a5   : > { %v3737_v36 = vld.sshfl [vmem:[#allocation1] sm:$0xff pattern:$0x73625140]  ;;  %4247 = vmatpush.bf16.msra.mxu1 %v6042_v2 }
 0x2a6   : > { %3795 = vmatmul.bf16.vlgmr.msrb.gmra.mxu2 %v3737_v36  ;;  %3909 = vst [vmem:[#allocation1] ss:$4 sm:$0xff] %v3851_v0  ;;  %v6049_v36 = vld [vmem:[%s7253_s7 + $0x200] sm:$0xff] }
 0x2a7   : > { %3915 = vst [vmem:[#allocation1 + $0x2] ss:$4 sm:$0xff] %v3877_v39  ;;  %v4268_v39 = vrot.slane %v4260_v26, 2 }
 0x2a8   : > { %3918 = vst [vmem:[#allocation1 + $0x3] ss:$4 sm:$0xff] %v3890_v42  ;;  %4428 = vmatpush.bf16.msra.mxu2 %v6051_v63  ;;  %v4283_v42 = vsel %vm685_vm2, %v4259_v22, %v4267_v33 }
 0x2a9   : > { %3912 = vst [vmem:[#allocation1 + $0x1] ss:$4 sm:$0xff] %v3864_v24  ;;  %4248 = vmatpush.bf16.msra.mxu1 %v6041_v12  ;;  %v4289_v45 = vsel %vm685_vm2, %v4260_v26, %v4268_v39  ;;  %v4322_v47 = vshll.u32 %v4283_v42, 16  ;;  %v4274_v12 = vrot.slane %v4272_v62, 2 }
 0x2aa   : > { %3996 = vst.sshfl [vmem:[#allocation1 + $0x10] sm:$0xff pattern:$0x75643120] %v3986_v46  ;;  %v4319_v46 = vshrl.u32 %v4283_v42, 16  ;;  %v4332_v48 = vshrl.u32 %v4289_v45, 16  ;;  %v4335_v6 = vshll.u32 %v4289_v45, 16 }
 0x2ab   : > { %v4302_v17 = vshll.u32 %v4274_v12, 16 }
 0x2ac   : > { %4429 = vmatpush.bf16.msra.mxu2 %v6050_v20  ;;  %v4321_v60 = vrot.slane %v4319_v46, 6  ;;  %v4334_v3 = vrot.slane %v4332_v48, 6 }
 0x2b0   : > { %v3919_v57 = vld.sshfl [vmem:[#allocation1] sm:$0xff pattern:$0x73625140]  ;;  %4430 = vmatpush.bf16.msra.mxu2 %v6049_v36 }
 0x2b1   : > { %3977 = vmatmul.bf16.vlgmr.msrb.gmra.mxu3 %v3919_v57  ;;  %3994 = vst.sshfl [vmem:[#allocation1] sm:$0xff pattern:$0x75643120] %v3985_v51  ;;  %v4000_v59 = vld [vmem:[#allocation1 + $0x10] ss:$2 sm:$0xff]  ;;  %v4296_v51 = vshll.u32 %v4271_v49, 16  ;;  %v4284_v57 = vsel %vm689_vm3, %v4259_v22, %v4267_v33 }
 0x2b2   : > { %4012 = vst.sshfl [vmem:[#allocation1 + $0x10] sm:$0xff pattern:$0x75643120] %v3990_v52  ;;  %v4025_v61 = vshrl.u32 %v4000_v59, 16  ;;  %v4028_v11 = vshll.u32 %v4000_v59, 16  ;;  %v4290_v52 = vsel %vm689_vm3, %v4260_v26, %v4268_v39  ;;  %v4311_v59 = vrot.slane %v4309_v44, 7 }
 0x2b3   : > { %v4292_v2 = vrot.slane %v4290_v52, 2  ;;  %v4298_v9 = vrot.slane %v4296_v51, 7  ;;  %v4286_v10 = vrot.slane %v4284_v57, 2 }
 0x2b4   : > { %v4027_v8 = vrot.slane %v4025_v61, 7  ;;  %v4324_v61 = vrot.slane %v4322_v47, 7 }
 0x2b6   : > { %v4030_v15 = vor.u32 %v4028_v11, %v4027_v8  ;;  %v4295_v8 = vrot.slane %v4293_v50, 6  ;;  %v4312_v11 = vor.u32 %v4311_v59, %v4308_v58  ;;  %v4325_v63 = vor.u32 %v4324_v61, %v4321_v60  ;;  %v6089_v60 = vld [vmem:[%s7254_s8] ss:$0 sm:$0xff] }
 0x2b8   : > { %v3998_v37 = vld [vmem:[#allocation1 + $0x1] ss:$2 sm:$0xff] }
 0x2b9   : > { %4010 = vst.sshfl [vmem:[#allocation1] sm:$0xff pattern:$0x75643120] %v3989_v5  ;;  %v4014_v13 = vld [vmem:[#allocation1 + $0x10] ss:$2 sm:$0xff]  ;;  %v4021_v14 = vshrl.u32 %v3998_v37, 16 }
 0x2ba   : > { %v4047_v16 = vshrl.u32 %v4014_v13, 16  ;;  %v4050_v35 = vshll.u32 %v4014_v13, 16  ;;  %v4337_v5 = vrot.slane %v4335_v6, 7  ;;  %v4159_v37 = vld [vmem:[#allocation2 + $0x14] sm:$0x3] }
 0x2bb   : > { %v5690_v56 = vrot.slane %v4021_v14, 9  ;;  %v4341_v14 = vshll.u32 %v4292_v2, 16  ;;  %v6090_v2 = vld [vmem:[%s7255_s9] ss:$0 sm:$0xff] }
 0x2bc   : > { %v4049_v23 = vrot.slane %v4047_v16, 7  ;;  %v4338_v13 = vor.u32 %v4337_v5, %v4334_v3  ;;  %v4313_v16 = vrot.slane %v4312_v11, 2 }
 0x2bd   : > { %v4031_v19 = vsel %vm6634_vm15, %v5690_v56, %v4030_v15  ;;  %v4299_v56 = vor.u32 %v4298_v9, %v4295_v8  ;;  %v4328_v15 = vshll.u32 %v4286_v10, 16  ;;  %v4343_v20 = vrot.slane %v4341_v14, 7 }
 0x2be   : > { %4083 = vst [vmem:[#allocation1] ss:$4 sm:$0xff] %v4031_v19  ;;  %v4052_v4 = vor.u32 %v4050_v35, %v4049_v23  ;;  %v4339_v19 = vrot.slane %v4338_v13, 2 }
 0x2bf   : > { %v4300_v23 = vrot.slane %v4299_v56, 2 }
 0x2c0   : > { %v4013_v30 = vld [vmem:[#allocation1 + $0x1] ss:$2 sm:$0xff]  ;;  %v4344_v33 = vsel %vm6366_vm8, %v4339_v19, %v4343_v20 }
 0x2c1   : > { %v4043_v0 = vshrl.u32 %v4013_v30, 16  ;;  %4086 = vst [vmem:[#allocation1 + $0x1] ss:$4 sm:$0xff] %v4042_v53  ;;  %v4278_v53 = vsel %vm689_vm3, %v4258_v18, %v4266_v29  ;;  %v4326_v18 = vrot.slane %v4325_v63, 2  ;;  %v4304_v29 = vrot.slane %v4302_v17, 7 }
 0x2c2   : > { %4092 = vst [vmem:[#allocation1 + $0x3] ss:$4 sm:$0xff] %v4064_v25  ;;  %v4280_v55 = vrot.slane %v4278_v53, 2  ;;  %v4330_v25 = vrot.slane %v4328_v15, 7 }
 0x2c3   : > { %v5692_v31 = vrot.slane %v4043_v0, 9  ;;  %v4305_v0 = vsel %vm6366_vm8, %v4300_v23, %v4304_v29 }
 0x2c4   : > { %v4315_v38 = vshll.u32 %v4280_v55, 16  ;;  %v4331_v30 = vsel %vm6366_vm8, %v4326_v18, %v4330_v25 }
 0x2c5   : > { %v4053_v24 = vsel %vm6634_vm15, %v5692_v31, %v4052_v4 }
 0x2c6   : > { %4089 = vst [vmem:[#allocation1 + $0x2] ss:$4 sm:$0xff] %v4053_v24  ;;  %v4317_v22 = vrot.slane %v4315_v38, 7 }
 0x2c8   : > { %v4318_v26 = vsel %vm6366_vm8, %v4313_v16, %v4317_v22 }
 0x2cd   : > { %v4093_v1 = vld.sshfl [vmem:[#allocation1] sm:$0xff pattern:$0x73625140] }
 0x2ce   : > { %4151 = vmatmul.bf16.vlgmr.msra.gmra.mxu0 %v4093_v1  ;;  %4184 = vst [vmem:[#allocation1 + $0x1] ss:$4 sm:$0xff] %v4160_v28 }
 0x2cf   : > { %4187 = vst [vmem:[#allocation1 + $0x2] ss:$4 sm:$0xff] %v4161_v54 }
 0x2d0   : > { %4181 = vst [vmem:[#allocation1] ss:$4 sm:$0xff] %v4159_v37 }
 0x2d1   : > { %4190 = vst [vmem:[#allocation1 + $0x3] ss:$4 sm:$0xff] %v4162_v7 }
 0x2d8   : > { %v4191_v27 = vld.sshfl [vmem:[#allocation1] sm:$0xff pattern:$0x73625140] }
 0x2d9   : > { %4249 = vmatmul.bf16.vlgmr.msra.gmra.mxu1 %v4191_v27  ;;  %4366 = vst [vmem:[#allocation1 + $0x1] ss:$4 sm:$0xff] %v4318_v26 }
 0x2da   : > { %4369 = vst [vmem:[#allocation1 + $0x2] ss:$4 sm:$0xff] %v4331_v30 }
 0x2db   : > { %4363 = vst [vmem:[#allocation1] ss:$4 sm:$0xff] %v4305_v0 }
 0x2dc   : > { %4372 = vst [vmem:[#allocation1 + $0x3] ss:$4 sm:$0xff] %v4344_v33 }
 0x2e3   : > { %v4373_v35 = vld.sshfl [vmem:[#allocation1] sm:$0xff pattern:$0x73625140] }
 0x2e4   : > { %4431 = vmatmul.bf16.vlgmr.msra.gmra.mxu2 %v4373_v35  ;;  %v3269_v36 = vpop.f32.mrf.mxu2 }
 0x2ec   : > { %v3271_v32 = vpop.f32.mrf.mxu2 }
 0x2f4   : > { %v3344_v39 = vpop.f32.mrf.mxu3 }
 0x2f5   : > { %v3345_v45 = vadd.f32 %v3344_v39, %v3269_v36 }
 0x2fb   : > { %v3524_v31 = vpop.f32.mrf.mxu0 }
 0x2fc   : > { %v3346_v41 = vpop.f32.mrf.mxu3  ;;  %v3529_v53 = vadd.f32 %v3524_v31, %v3345_v45 }
 0x2fd   : > { %v3347_v47 = vadd.f32 %v3346_v41, %v3271_v32 }
 0x303   : > { %v3526_v24 = vpop.f32.mrf.mxu0 }
 0x304   : > { %v3530_v51 = vadd.f32 %v3526_v24, %v3347_v47 }
 0x318   : > { %v3698_v4 = vpop.f32.mrf.mxu1 }
 0x319   : > { %v3703_v44 = vadd.f32 %v3698_v4, %v3529_v53 }
 0x320   : > { %v3700_v49 = vpop.f32.mrf.mxu1 }
 0x321   : > { %v3704_v28 = vadd.f32 %v3700_v49, %v3530_v51 }
 0x329   : > { %v3796_v42 = vpop.f32.mrf.mxu2 }
 0x32a   : > { %v3801_v48 = vadd.f32 %v3796_v42, %v3703_v44 }
 0x331   : > { %v3798_v43 = vpop.f32.mrf.mxu2 }
 0x332   : > { %v3802_v58 = vadd.f32 %v3798_v43, %v3704_v28 }
 0x334   : > { %v3978_v34 = vpop.f32.mrf.mxu3 }
 0x335   : > { %v3983_v50 = vadd.f32 %v3978_v34, %v3801_v48 }
 0x33c   : > { %v3980_v57 = vpop.f32.mrf.mxu3 }
 0x33d   : > { %v3984_v62 = vadd.f32 %v3980_v57, %v3802_v58 }
 0x34b   : > { %v4152_v46 = vpop.f32.mrf.mxu0 }
 0x34c   : > { %v4157_v52 = vadd.f32 %v4152_v46, %v3983_v50 }
 0x353   : > { %v4154_v61 = vpop.f32.mrf.mxu0 }
 0x354   : > { %v4158_v5 = vadd.f32 %v4154_v61, %v3984_v62 }
 0x356   : > { %v4250_v6 = vpop.f32.mrf.mxu1 }
 0x357   : > { %v4255_v55 = vadd.f32 %v4250_v6, %v4157_v52 }
 0x35e   : > { %v4252_v3 = vpop.f32.mrf.mxu1 }
 0x35f   : > { %v4256_v8 = vadd.f32 %v4252_v3, %v4158_v5 }
 0x367   : > { %v4432_v54 = vpop.f32.mrf.mxu2 }
 0x368   : > { %v4437_v59 = vadd.f32 %v4432_v54, %v4255_v55 }
 0x36a   : > { %v4439_v1 = vmax.f32 %v4437_v59, 0.0 }
 0x36c   : > { %v4445_v7 = vmul.f32 %v6089_v60, %v4439_v1 }
 0x36e   : > { %v4451_v9 = vadd.f32 %v6090_v2, %v4445_v7 }
 0x36f   : > { %v4434_v10 = vpop.f32.mrf.mxu2 }
 0x370   : > { %v4453_v37 = vadd.f32 %v4451_v9, %v6574_v21  ;;  %v4438_v11 = vadd.f32 %v4434_v10, %v4256_v8 }
 0x372   : > { %v4457_v12 = vrot.slane %v4453_v37, 4  ;;  %v4461_v63 = vpack.c.bf16 %v4453_v37, %v4453_v37  ;;  %v4440_v13 = vmax.f32 %v4438_v11, 0.0 }
 0x374   : > { %v4462_v14 = vpack.c.bf16 %v4457_v12, %v4457_v12  ;;  %4465 = vst [vmem:[%s479_s15] sm:$0x3] %v4461_v63  ;;  %v4446_v38 = vmul.f32 %v6089_v60, %v4440_v13 }
 0x376   : > { %4466 = vst [vmem:[%s479_s15 + $0x2] sm:$0x3] %v4462_v14  ;;  %v4452_v56 = vadd.f32 %v6090_v2, %v4446_v38 }
 0x378   : > { %v4454_v15 = vadd.f32 %v4452_v56, %v6600_v40 }
 0x37a   : > { %v4458_v16 = vrot.slane %v4454_v15, 4  ;;  %v4463_v17 = vpack.c.bf16 %v4454_v15, %v4454_v15 }
 0x37c   : > { %v4464_v18 = vpack.c.bf16 %v4458_v16, %v4458_v16  ;;  %4467 = vst [vmem:[%s479_s15 + $0x4] sm:$0x3] %v4463_v17 }
 0x37e   : > { %4468 = vst [vmem:[%s479_s15 + $0x6] sm:$0x3] %v4464_v18 }
 0x37f PF: > { %p17_p9 = scmp.ge.s32.totalorder %s6188_s17, 4   ;;  %s7265_s13 = smov %s6109_s14 }
 0x380   : > { %s7266_s14 = smov %s6197_s20  ;;  %s7267_s15 = smov %s6188_s17 }
 0x381   :  { %19 = sbr.rel (!%p17_p9) target bundleno = 2 (0x2), region = 272 }

</bundles_post_ra>
